<compile_context>
chip_gen: v7x
topology: tpu7x:2x2x1
jax: 0.10.0
libtpu: 0.0.40
codegen_flags: <defaults>
</compile_context>

<pallas_src>
import jax
import jax.numpy as jnp
import numpy as np
from jax.experimental import pallas as pl
from jax.experimental.pallas import tpu as pltpu  # noqa: F401  (TPU backend)


# ---------------------------------------------------------------------------
# Host-side helpers
# ---------------------------------------------------------------------------
def conv_out(size, k, s):
    return (size - (k - 1) - 1) // s + 1


def im2col(x, k, s):
    """x: (B, C, H, W) -> patches (B*OH*OW, C*k*k), feature order (C, kh, kw)."""
    B, C, H, W = x.shape
    OH = (H - k) // s + 1
    OW = (W - k) // s + 1
    idx_h = (jnp.arange(OH) * s)[:, None] + jnp.arange(k)[None, :]   # (OH, k)
    idx_w = (jnp.arange(OW) * s)[:, None] + jnp.arange(k)[None, :]   # (OW, k)
    xh = x[:, :, idx_h, :]            # (B, C, OH, k, W)
    xhw = xh[:, :, :, :, idx_w]       # (B, C, OH, k, OW, k)
    p = jnp.transpose(xhw, (0, 2, 4, 1, 3, 5))      # (B, OH, OW, C, kh, kw)
    return p.reshape(B * OH * OW, C * k * k), OH, OW


def _selection_matrices(batch, h_in, w_in, h_out, w_out, k, s):
    """G[kh*k+kw, (b,oh,ow), (b, s*oh+kh, s*ow+kw)] = 1  (0 elsewhere)."""
    rin = batch * h_in * w_in
    rout = batch * h_out * w_out
    g = np.zeros((k * k, rout, rin), np.float32)
    for kh in range(k):
        for kw in range(k):
            o = kh * k + kw
            for b in range(batch):
                for oh in range(h_out):
                    for ow in range(w_out):
                        g[o,
                          b * h_out * w_out + oh * w_out + ow,
                          b * h_in * w_in + (s * oh + kh) * w_in + (s * ow + kw)] = 1.0
    return g


def _row_select(batch, n_pos):
    """E[r, b, b*n_pos + r] = 1 : picks spatial position r for every batch row."""
    e = np.zeros((n_pos, batch, batch * n_pos), np.float32)
    for r in range(n_pos):
        for b in range(batch):
            e[r, b, b * n_pos + r] = 1.0
    return e


# ---------------------------------------------------------------------------
# Fused Pallas kernel: conv1 -> conv2 -> conv3 -> fc1 -> fc2, all in VMEM.
# ---------------------------------------------------------------------------
def _dqn_fused_kernel(p1_ref, w1_ref, b1_ref,
                      g2_ref, w2_ref, b2_ref,
                      g3_ref, w3_ref, b3_ref,
                      e_ref, wf1_ref, bf1_ref,
                      wf2_ref, bf2_ref,
                      out_ref):
    f32 = jnp.float32
    bf16 = jnp.bfloat16

    # conv1: im2col patches (R1, 64) @ w1 (64, 32) -> (R1, 32)
    z1 = jnp.dot(p1_ref[...], w1_ref[...], preferred_element_type=f32)
    a1 = jnp.maximum(z1 + b1_ref[...], 0.0).astype(bf16)

    # conv2: sum over 4x4 kernel offsets of (G @ A1) @ W  -> (R2, 64)
    z2 = jnp.zeros((g2_ref.shape[1], w2_ref.shape[2]), f32)
    for o in range(g2_ref.shape[0]):
        rows = jnp.dot(g2_ref[o], a1, preferred_element_type=f32).astype(bf16)
        z2 = z2 + jnp.dot(rows, w2_ref[o], preferred_element_type=f32)
    a2 = jnp.maximum(z2 + b2_ref[...], 0.0).astype(bf16)

    # conv3: sum over 3x3 kernel offsets -> (R3, 64)
    z3 = jnp.zeros((g3_ref.shape[1], w3_ref.shape[2]), f32)
    for o in range(g3_ref.shape[0]):
        rows = jnp.dot(g3_ref[o], a2, preferred_element_type=f32).astype(bf16)
        z3 = z3 + jnp.dot(rows, w3_ref[o], preferred_element_type=f32)
    a3 = jnp.maximum(z3 + b3_ref[...], 0.0).astype(bf16)

    # fc1: flatten absorbed into per-spatial-position weight blocks -> (B, 512)
    z4 = jnp.zeros((e_ref.shape[1], wf1_ref.shape[2]), f32)
    for r in range(e_ref.shape[0]):
        rows = jnp.dot(e_ref[r], a3, preferred_element_type=f32).astype(bf16)
        z4 = z4 + jnp.dot(rows, wf1_ref[r], preferred_element_type=f32)
    a4 = jnp.maximum(z4 + bf1_ref[...], 0.0).astype(bf16)

    # fc2: (B, 512) @ (512, outputs)
    z5 = jnp.dot(a4, wf2_ref[...], preferred_element_type=f32) + bf2_ref[...]
    out_ref[...] = z5.astype(out_ref.dtype)


# ---------------------------------------------------------------------------
# Parameter preparation (done once, outside jit)
# ---------------------------------------------------------------------------
def prepare_params(p, h, w, batch):
    bf16, f32 = jnp.bfloat16, jnp.float32
    h1, w1 = conv_out(h, 8, 4), conv_out(w, 8, 4)
    h2, w2 = conv_out(h1, 4, 2), conv_out(w1, 4, 2)
    h3, w3 = conv_out(h2, 3, 1), conv_out(w2, 3, 1)
    n_pos = h3 * w3
    c3 = p["conv3_w"].shape[0]
    assert c3 * n_pos == p["fc1_w"].shape[1]

    def conv_w(wt):               # (Cout, Cin, k, k) -> (k*k, Cin, Cout)
        cout, cin, k, _ = wt.shape
        return jnp.asarray(jnp.transpose(wt, (2, 3, 1, 0)).reshape(k * k, cin, cout),
                           dtype=bf16)

    fc1 = p["fc1_w"]              # (512, c3*n_pos), torch NCHW flatten order
    wf1 = jnp.transpose(fc1.reshape(fc1.shape[0], c3, n_pos), (2, 1, 0))  # (n_pos, c3, 512)

    return {
        "w1": jnp.asarray(p["conv1_w"].reshape(p["conv1_w"].shape[0], -1).T, dtype=bf16),
        "b1": jnp.asarray(p["conv1_b"].reshape(1, -1), dtype=f32),
        "g2": jnp.asarray(_selection_matrices(batch, h1, w1, h2, w2, 4, 2), dtype=bf16),
        "w2": conv_w(p["conv2_w"]),
        "b2": jnp.asarray(p["conv2_b"].reshape(1, -1), dtype=f32),
        "g3": jnp.asarray(_selection_matrices(batch, h2, w2, h3, w3, 3, 1), dtype=bf16),
        "w3": conv_w(p["conv3_w"]),
        "b3": jnp.asarray(p["conv3_b"].reshape(1, -1), dtype=f32),
        "e": jnp.asarray(_row_select(batch, n_pos), dtype=bf16),
        "wf1": jnp.asarray(wf1, dtype=bf16),
        "bf1": jnp.asarray(p["fc1_b"].reshape(1, -1), dtype=f32),
        "wf2": jnp.asarray(p["fc2_w"].T, dtype=bf16),
        "bf2": jnp.asarray(p["fc2_b"].reshape(1, -1), dtype=f32),
    }


# ---------------------------------------------------------------------------
# Forward pass: one XLA gather (conv1 im2col) + ONE fused pallas_call.
# ---------------------------------------------------------------------------
def dqn_forward(x, prep):
    batch = x.shape[0]
    patches, _, _ = im2col(x, 8, 4)                 # (B*OH1*OW1, 64)
    patches = patches.astype(jnp.bfloat16)
    assert patches.shape[0] == prep["g2"].shape[2]  # prep was built for this batch/H/W
    n_out = prep["wf2"].shape[1]
    return pl.pallas_call(
        _dqn_fused_kernel,
        out_shape=jax.ShapeDtypeStruct((batch, n_out), jnp.float32),
    )(patches, prep["w1"], prep["b1"],
      prep["g2"], prep["w2"], prep["b2"],
      prep["g3"], prep["w3"], prep["b3"],
      prep["e"], prep["wf1"], prep["bf1"],
      prep["wf2"], prep["bf2"])


# ---------------------------------------------------------------------------
# Pure-JAX reference (validates the Pallas path against the torch semantics)
# ---------------------------------------------------------------------------
def dqn_reference(x, p):
    def conv(x, w, b, s):
        y = jax.lax.conv_general_dilated(
            x, w, window_strides=(s, s), padding="VALID",
            dimension_numbers=("NCHW", "OIHW", "NCHW"))
        return jax.nn.relu(y + b[None, :, None, None])
    x = conv(x, p["conv1_w"], p["conv1_b"], 4)
    x = conv(x, p["conv2_w"], p["conv2_b"], 2)
    x = conv(x, p["conv3_w"], p["conv3_b"], 1)
    x = x.reshape(x.shape[0], -1)
    x = jax.nn.relu(x @ p["fc1_w"].T + p["fc1_b"])
    return x @ p["fc2_w"].T + p["fc2_b"]


def init_params(key, h, w, outputs):
    convw = conv_out(conv_out(conv_out(w, 8, 4), 4, 2), 3, 1)
    convh = conv_out(conv_out(conv_out(h, 8, 4), 4, 2), 3, 1)
    lin_in = convw * convh * 64

    ks = jax.random.split(key, 10)
    scale = 0.05
    return {
        "conv1_w": scale * jax.random.normal(ks[0], (32, 1, 8, 8), jnp.float32),
        "conv1_b": scale * jax.random.normal(ks[1], (32,), jnp.float32),
        "conv2_w": scale * jax.random.normal(ks[2], (64, 32, 4, 4), jnp.float32),
        "conv2_b": scale * jax.random.normal(ks[3], (64,), jnp.float32),
        "conv3_w": scale * jax.random.normal(ks[4], (64, 64, 3, 3), jnp.float32),
        "conv3_b": scale * jax.random.normal(ks[5], (64,), jnp.float32),
        "fc1_w": scale * jax.random.normal(ks[6], (512, lin_in), jnp.float32),
        "fc1_b": scale * jax.random.normal(ks[7], (512,), jnp.float32),
        "fc2_w": scale * jax.random.normal(ks[8], (outputs, 512), jnp.float32),
        "fc2_b": scale * jax.random.normal(ks[9], (outputs,), jnp.float32),
    }


if __name__ == "__main__":
    B, H, W, OUTPUTS = 2, 64, 64, 4
    key = jax.random.PRNGKey(0)
    k_x, k_p = jax.random.split(key)
    x = jax.random.normal(k_x, (B, 1, H, W), jnp.float32)   # NCHW, 1 input channel
    params = init_params(k_p, H, W, OUTPUTS)
    prep = prepare_params(params, H, W, batch=B)            # done once, outside jit

    fwd = jax.jit(dqn_forward)
    y = fwd(x, prep)
    jax.block_until_ready(y)
    assert y.shape == (B, OUTPUTS), y.shape

    y_ref = jax.jit(dqn_reference)(x, params)
    np.testing.assert_allclose(np.asarray(y), np.asarray(y_ref), rtol=5e-2, atol=5e-2)

    print("KERNEL_OK")
</pallas_src>

<mosaic_0001>
module attributes {stable_mosaic.version = 11 : i64} {
  func.func @_dqn_fused_kernel(%arg0: memref<450x64xbf16, #tpu.memory_space<vmem>>, %arg1: memref<64x32xbf16, #tpu.memory_space<vmem>>, %arg2: memref<1x32xf32, #tpu.memory_space<vmem>>, %arg3: memref<16x72x450xbf16, #tpu.memory_space<vmem>>, %arg4: memref<16x32x64xbf16, #tpu.memory_space<vmem>>, %arg5: memref<1x64xf32, #tpu.memory_space<vmem>>, %arg6: memref<9x32x72xbf16, #tpu.memory_space<vmem>>, %arg7: memref<9x64x64xbf16, #tpu.memory_space<vmem>>, %arg8: memref<1x64xf32, #tpu.memory_space<vmem>>, %arg9: memref<16x2x32xbf16, #tpu.memory_space<vmem>>, %arg10: memref<16x64x512xbf16, #tpu.memory_space<vmem>>, %arg11: memref<1x512xf32, #tpu.memory_space<vmem>>, %arg12: memref<512x4xbf16, #tpu.memory_space<vmem>>, %arg13: memref<1x4xf32, #tpu.memory_space<vmem>>, %arg14: memref<2x4xf32, #tpu.memory_space<vmem>>) attributes {dimension_semantics = [], scalar_prefetch = 0 : i64, scratch_operands = 0 : i64, tpu.core_type = #tpu.core_type<tc>} {
    %c0 = arith.constant 0 : index
    %c0_0 = arith.constant 0 : index
    %0 = vector.load %arg0[%c0, %c0_0] : memref<450x64xbf16, #tpu.memory_space<vmem>>, vector<450x64xbf16>
    %c0_1 = arith.constant 0 : index
    %c0_2 = arith.constant 0 : index
    %1 = vector.load %arg1[%c0_1, %c0_2] : memref<64x32xbf16, #tpu.memory_space<vmem>>, vector<64x32xbf16>
    %cst = arith.constant dense<0.000000e+00> : vector<450x32xf32>
    %2 = tpu.matmul %0, %1, %cst {dimension_numbers = #tpu.dot_dimension_numbers<[1], [0], [0], [1], [0, 0, 1, 1], [], []>} : vector<450x64xbf16>, vector<64x32xbf16>, vector<450x32xf32> -> vector<450x32xf32>
    %c0_3 = arith.constant 0 : index
    %c0_4 = arith.constant 0 : index
    %3 = vector.load %arg2[%c0_3, %c0_4] : memref<1x32xf32, #tpu.memory_space<vmem>>, vector<1x32xf32>
    %4 = vector.broadcast %3 : vector<1x32xf32> to vector<450x32xf32>
    %5 = arith.addf %2, %4 : vector<450x32xf32>
    %cst_5 = arith.constant 0.000000e+00 : f32
    %6 = vector.broadcast %cst_5 : f32 to vector<450x32xf32>
    %7 = arith.maximumf %5, %6 : vector<450x32xf32>
    %8 = arith.truncf %7 : vector<450x32xf32> to vector<450x32xbf16>
    %cst_6 = arith.constant 0.000000e+00 : f32
    %9 = vector.broadcast %cst_6 : f32 to vector<72x64xf32>
    %c0_7 = arith.constant 0 : index
    %c0_8 = arith.constant 0 : index
    %c0_9 = arith.constant 0 : index
    %10 = vector.load %arg3[%c0_7, %c0_8, %c0_9] : memref<16x72x450xbf16, #tpu.memory_space<vmem>>, vector<1x72x450xbf16>
    %11 = vector.shape_cast %10 : vector<1x72x450xbf16> to vector<72x450xbf16>
    %cst_10 = arith.constant dense<0.000000e+00> : vector<72x32xf32>
    %12 = tpu.matmul %11, %8, %cst_10 {dimension_numbers = #tpu.dot_dimension_numbers<[1], [0], [0], [1], [0, 0, 1, 1], [], []>} : vector<72x450xbf16>, vector<450x32xbf16>, vector<72x32xf32> -> vector<72x32xf32>
    %13 = arith.truncf %12 : vector<72x32xf32> to vector<72x32xbf16>
    %c0_11 = arith.constant 0 : index
    %c0_12 = arith.constant 0 : index
    %c0_13 = arith.constant 0 : index
    %14 = vector.load %arg4[%c0_11, %c0_12, %c0_13] : memref<16x32x64xbf16, #tpu.memory_space<vmem>>, vector<1x32x64xbf16>
    %15 = vector.shape_cast %14 : vector<1x32x64xbf16> to vector<32x64xbf16>
    %cst_14 = arith.constant dense<0.000000e+00> : vector<72x64xf32>
    %16 = tpu.matmul %13, %15, %cst_14 {dimension_numbers = #tpu.dot_dimension_numbers<[1], [0], [0], [1], [0, 0, 1, 1], [], []>} : vector<72x32xbf16>, vector<32x64xbf16>, vector<72x64xf32> -> vector<72x64xf32>
    %17 = arith.addf %9, %16 : vector<72x64xf32>
    %c1 = arith.constant 1 : index
    %c0_15 = arith.constant 0 : index
    %c0_16 = arith.constant 0 : index
    %18 = vector.load %arg3[%c1, %c0_15, %c0_16] : memref<16x72x450xbf16, #tpu.memory_space<vmem>>, vector<1x72x450xbf16>
    %19 = vector.shape_cast %18 : vector<1x72x450xbf16> to vector<72x450xbf16>
    %cst_17 = arith.constant dense<0.000000e+00> : vector<72x32xf32>
    %20 = tpu.matmul %19, %8, %cst_17 {dimension_numbers = #tpu.dot_dimension_numbers<[1], [0], [0], [1], [0, 0, 1, 1], [], []>} : vector<72x450xbf16>, vector<450x32xbf16>, vector<72x32xf32> -> vector<72x32xf32>
    %21 = arith.truncf %20 : vector<72x32xf32> to vector<72x32xbf16>
    %c1_18 = arith.constant 1 : index
    %c0_19 = arith.constant 0 : index
    %c0_20 = arith.constant 0 : index
    %22 = vector.load %arg4[%c1_18, %c0_19, %c0_20] : memref<16x32x64xbf16, #tpu.memory_space<vmem>>, vector<1x32x64xbf16>
    %23 = vector.shape_cast %22 : vector<1x32x64xbf16> to vector<32x64xbf16>
    %cst_21 = arith.constant dense<0.000000e+00> : vector<72x64xf32>
    %24 = tpu.matmul %21, %23, %cst_21 {dimension_numbers = #tpu.dot_dimension_numbers<[1], [0], [0], [1], [0, 0, 1, 1], [], []>} : vector<72x32xbf16>, vector<32x64xbf16>, vector<72x64xf32> -> vector<72x64xf32>
    %25 = arith.addf %17, %24 : vector<72x64xf32>
    %c2 = arith.constant 2 : index
    %c0_22 = arith.constant 0 : index
    %c0_23 = arith.constant 0 : index
    %26 = vector.load %arg3[%c2, %c0_22, %c0_23] : memref<16x72x450xbf16, #tpu.memory_space<vmem>>, vector<1x72x450xbf16>
    %27 = vector.shape_cast %26 : vector<1x72x450xbf16> to vector<72x450xbf16>
    %cst_24 = arith.constant dense<0.000000e+00> : vector<72x32xf32>
    %28 = tpu.matmul %27, %8, %cst_24 {dimension_numbers = #tpu.dot_dimension_numbers<[1], [0], [0], [1], [0, 0, 1, 1], [], []>} : vector<72x450xbf16>, vector<450x32xbf16>, vector<72x32xf32> -> vector<72x32xf32>
    %29 = arith.truncf %28 : vector<72x32xf32> to vector<72x32xbf16>
    %c2_25 = arith.constant 2 : index
    %c0_26 = arith.constant 0 : index
    %c0_27 = arith.constant 0 : index
    %30 = vector.load %arg4[%c2_25, %c0_26, %c0_27] : memref<16x32x64xbf16, #tpu.memory_space<vmem>>, vector<1x32x64xbf16>
    %31 = vector.shape_cast %30 : vector<1x32x64xbf16> to vector<32x64xbf16>
    %cst_28 = arith.constant dense<0.000000e+00> : vector<72x64xf32>
    %32 = tpu.matmul %29, %31, %cst_28 {dimension_numbers = #tpu.dot_dimension_numbers<[1], [0], [0], [1], [0, 0, 1, 1], [], []>} : vector<72x32xbf16>, vector<32x64xbf16>, vector<72x64xf32> -> vector<72x64xf32>
    %33 = arith.addf %25, %32 : vector<72x64xf32>
    %c3 = arith.constant 3 : index
    %c0_29 = arith.constant 0 : index
    %c0_30 = arith.constant 0 : index
    %34 = vector.load %arg3[%c3, %c0_29, %c0_30] : memref<16x72x450xbf16, #tpu.memory_space<vmem>>, vector<1x72x450xbf16>
    %35 = vector.shape_cast %34 : vector<1x72x450xbf16> to vector<72x450xbf16>
    %cst_31 = arith.constant dense<0.000000e+00> : vector<72x32xf32>
    %36 = tpu.matmul %35, %8, %cst_31 {dimension_numbers = #tpu.dot_dimension_numbers<[1], [0], [0], [1], [0, 0, 1, 1], [], []>} : vector<72x450xbf16>, vector<450x32xbf16>, vector<72x32xf32> -> vector<72x32xf32>
    %37 = arith.truncf %36 : vector<72x32xf32> to vector<72x32xbf16>
    %c3_32 = arith.constant 3 : index
    %c0_33 = arith.constant 0 : index
    %c0_34 = arith.constant 0 : index
    %38 = vector.load %arg4[%c3_32, %c0_33, %c0_34] : memref<16x32x64xbf16, #tpu.memory_space<vmem>>, vector<1x32x64xbf16>
    %39 = vector.shape_cast %38 : vector<1x32x64xbf16> to vector<32x64xbf16>
    %cst_35 = arith.constant dense<0.000000e+00> : vector<72x64xf32>
    %40 = tpu.matmul %37, %39, %cst_35 {dimension_numbers = #tpu.dot_dimension_numbers<[1], [0], [0], [1], [0, 0, 1, 1], [], []>} : vector<72x32xbf16>, vector<32x64xbf16>, vector<72x64xf32> -> vector<72x64xf32>
    %41 = arith.addf %33, %40 : vector<72x64xf32>
    %c4 = arith.constant 4 : index
    %c0_36 = arith.constant 0 : index
    %c0_37 = arith.constant 0 : index
    %42 = vector.load %arg3[%c4, %c0_36, %c0_37] : memref<16x72x450xbf16, #tpu.memory_space<vmem>>, vector<1x72x450xbf16>
    %43 = vector.shape_cast %42 : vector<1x72x450xbf16> to vector<72x450xbf16>
    %cst_38 = arith.constant dense<0.000000e+00> : vector<72x32xf32>
    %44 = tpu.matmul %43, %8, %cst_38 {dimension_numbers = #tpu.dot_dimension_numbers<[1], [0], [0], [1], [0, 0, 1, 1], [], []>} : vector<72x450xbf16>, vector<450x32xbf16>, vector<72x32xf32> -> vector<72x32xf32>
    %45 = arith.truncf %44 : vector<72x32xf32> to vector<72x32xbf16>
    %c4_39 = arith.constant 4 : index
    %c0_40 = arith.constant 0 : index
    %c0_41 = arith.constant 0 : index
    %46 = vector.load %arg4[%c4_39, %c0_40, %c0_41] : memref<16x32x64xbf16, #tpu.memory_space<vmem>>, vector<1x32x64xbf16>
    %47 = vector.shape_cast %46 : vector<1x32x64xbf16> to vector<32x64xbf16>
    %cst_42 = arith.constant dense<0.000000e+00> : vector<72x64xf32>
    %48 = tpu.matmul %45, %47, %cst_42 {dimension_numbers = #tpu.dot_dimension_numbers<[1], [0], [0], [1], [0, 0, 1, 1], [], []>} : vector<72x32xbf16>, vector<32x64xbf16>, vector<72x64xf32> -> vector<72x64xf32>
    %49 = arith.addf %41, %48 : vector<72x64xf32>
    %c5 = arith.constant 5 : index
    %c0_43 = arith.constant 0 : index
    %c0_44 = arith.constant 0 : index
    %50 = vector.load %arg3[%c5, %c0_43, %c0_44] : memref<16x72x450xbf16, #tpu.memory_space<vmem>>, vector<1x72x450xbf16>
    %51 = vector.shape_cast %50 : vector<1x72x450xbf16> to vector<72x450xbf16>
    %cst_45 = arith.constant dense<0.000000e+00> : vector<72x32xf32>
    %52 = tpu.matmul %51, %8, %cst_45 {dimension_numbers = #tpu.dot_dimension_numbers<[1], [0], [0], [1], [0, 0, 1, 1], [], []>} : vector<72x450xbf16>, vector<450x32xbf16>, vector<72x32xf32> -> vector<72x32xf32>
    %53 = arith.truncf %52 : vector<72x32xf32> to vector<72x32xbf16>
    %c5_46 = arith.constant 5 : index
    %c0_47 = arith.constant 0 : index
    %c0_48 = arith.constant 0 : index
    %54 = vector.load %arg4[%c5_46, %c0_47, %c0_48] : memref<16x32x64xbf16, #tpu.memory_space<vmem>>, vector<1x32x64xbf16>
    %55 = vector.shape_cast %54 : vector<1x32x64xbf16> to vector<32x64xbf16>
    %cst_49 = arith.constant dense<0.000000e+00> : vector<72x64xf32>
    %56 = tpu.matmul %53, %55, %cst_49 {dimension_numbers = #tpu.dot_dimension_numbers<[1], [0], [0], [1], [0, 0, 1, 1], [], []>} : vector<72x32xbf16>, vector<32x64xbf16>, vector<72x64xf32> -> vector<72x64xf32>
    %57 = arith.addf %49, %56 : vector<72x64xf32>
    %c6 = arith.constant 6 : index
    %c0_50 = arith.constant 0 : index
    %c0_51 = arith.constant 0 : index
    %58 = vector.load %arg3[%c6, %c0_50, %c0_51] : memref<16x72x450xbf16, #tpu.memory_space<vmem>>, vector<1x72x450xbf16>
    %59 = vector.shape_cast %58 : vector<1x72x450xbf16> to vector<72x450xbf16>
    %cst_52 = arith.constant dense<0.000000e+00> : vector<72x32xf32>
    %60 = tpu.matmul %59, %8, %cst_52 {dimension_numbers = #tpu.dot_dimension_numbers<[1], [0], [0], [1], [0, 0, 1, 1], [], []>} : vector<72x450xbf16>, vector<450x32xbf16>, vector<72x32xf32> -> vector<72x32xf32>
    %61 = arith.truncf %60 : vector<72x32xf32> to vector<72x32xbf16>
    %c6_53 = arith.constant 6 : index
    %c0_54 = arith.constant 0 : index
    %c0_55 = arith.constant 0 : index
    %62 = vector.load %arg4[%c6_53, %c0_54, %c0_55] : memref<16x32x64xbf16, #tpu.memory_space<vmem>>, vector<1x32x64xbf16>
    %63 = vector.shape_cast %62 : vector<1x32x64xbf16> to vector<32x64xbf16>
    %cst_56 = arith.constant dense<0.000000e+00> : vector<72x64xf32>
    %64 = tpu.matmul %61, %63, %cst_56 {dimension_numbers = #tpu.dot_dimension_numbers<[1], [0], [0], [1], [0, 0, 1, 1], [], []>} : vector<72x32xbf16>, vector<32x64xbf16>, vector<72x64xf32> -> vector<72x64xf32>
    %65 = arith.addf %57, %64 : vector<72x64xf32>
    %c7 = arith.constant 7 : index
    %c0_57 = arith.constant 0 : index
    %c0_58 = arith.constant 0 : index
    %66 = vector.load %arg3[%c7, %c0_57, %c0_58] : memref<16x72x450xbf16, #tpu.memory_space<vmem>>, vector<1x72x450xbf16>
    %67 = vector.shape_cast %66 : vector<1x72x450xbf16> to vector<72x450xbf16>
    %cst_59 = arith.constant dense<0.000000e+00> : vector<72x32xf32>
    %68 = tpu.matmul %67, %8, %cst_59 {dimension_numbers = #tpu.dot_dimension_numbers<[1], [0], [0], [1], [0, 0, 1, 1], [], []>} : vector<72x450xbf16>, vector<450x32xbf16>, vector<72x32xf32> -> vector<72x32xf32>
    %69 = arith.truncf %68 : vector<72x32xf32> to vector<72x32xbf16>
    %c7_60 = arith.constant 7 : index
    %c0_61 = arith.constant 0 : index
    %c0_62 = arith.constant 0 : index
    %70 = vector.load %arg4[%c7_60, %c0_61, %c0_62] : memref<16x32x64xbf16, #tpu.memory_space<vmem>>, vector<1x32x64xbf16>
    %71 = vector.shape_cast %70 : vector<1x32x64xbf16> to vector<32x64xbf16>
    %cst_63 = arith.constant dense<0.000000e+00> : vector<72x64xf32>
    %72 = tpu.matmul %69, %71, %cst_63 {dimension_numbers = #tpu.dot_dimension_numbers<[1], [0], [0], [1], [0, 0, 1, 1], [], []>} : vector<72x32xbf16>, vector<32x64xbf16>, vector<72x64xf32> -> vector<72x64xf32>
    %73 = arith.addf %65, %72 : vector<72x64xf32>
    %c8 = arith.constant 8 : index
    %c0_64 = arith.constant 0 : index
    %c0_65 = arith.constant 0 : index
    %74 = vector.load %arg3[%c8, %c0_64, %c0_65] : memref<16x72x450xbf16, #tpu.memory_space<vmem>>, vector<1x72x450xbf16>
    %75 = vector.shape_cast %74 : vector<1x72x450xbf16> to vector<72x450xbf16>
    %cst_66 = arith.constant dense<0.000000e+00> : vector<72x32xf32>
    %76 = tpu.matmul %75, %8, %cst_66 {dimension_numbers = #tpu.dot_dimension_numbers<[1], [0], [0], [1], [0, 0, 1, 1], [], []>} : vector<72x450xbf16>, vector<450x32xbf16>, vector<72x32xf32> -> vector<72x32xf32>
    %77 = arith.truncf %76 : vector<72x32xf32> to vector<72x32xbf16>
    %c8_67 = arith.constant 8 : index
    %c0_68 = arith.constant 0 : index
    %c0_69 = arith.constant 0 : index
    %78 = vector.load %arg4[%c8_67, %c0_68, %c0_69] : memref<16x32x64xbf16, #tpu.memory_space<vmem>>, vector<1x32x64xbf16>
    %79 = vector.shape_cast %78 : vector<1x32x64xbf16> to vector<32x64xbf16>
    %cst_70 = arith.constant dense<0.000000e+00> : vector<72x64xf32>
    %80 = tpu.matmul %77, %79, %cst_70 {dimension_numbers = #tpu.dot_dimension_numbers<[1], [0], [0], [1], [0, 0, 1, 1], [], []>} : vector<72x32xbf16>, vector<32x64xbf16>, vector<72x64xf32> -> vector<72x64xf32>
    %81 = arith.addf %73, %80 : vector<72x64xf32>
    %c9 = arith.constant 9 : index
    %c0_71 = arith.constant 0 : index
    %c0_72 = arith.constant 0 : index
    %82 = vector.load %arg3[%c9, %c0_71, %c0_72] : memref<16x72x450xbf16, #tpu.memory_space<vmem>>, vector<1x72x450xbf16>
    %83 = vector.shape_cast %82 : vector<1x72x450xbf16> to vector<72x450xbf16>
    %cst_73 = arith.constant dense<0.000000e+00> : vector<72x32xf32>
    %84 = tpu.matmul %83, %8, %cst_73 {dimension_numbers = #tpu.dot_dimension_numbers<[1], [0], [0], [1], [0, 0, 1, 1], [], []>} : vector<72x450xbf16>, vector<450x32xbf16>, vector<72x32xf32> -> vector<72x32xf32>
    %85 = arith.truncf %84 : vector<72x32xf32> to vector<72x32xbf16>
    %c9_74 = arith.constant 9 : index
    %c0_75 = arith.constant 0 : index
    %c0_76 = arith.constant 0 : index
    %86 = vector.load %arg4[%c9_74, %c0_75, %c0_76] : memref<16x32x64xbf16, #tpu.memory_space<vmem>>, vector<1x32x64xbf16>
    %87 = vector.shape_cast %86 : vector<1x32x64xbf16> to vector<32x64xbf16>
    %cst_77 = arith.constant dense<0.000000e+00> : vector<72x64xf32>
    %88 = tpu.matmul %85, %87, %cst_77 {dimension_numbers = #tpu.dot_dimension_numbers<[1], [0], [0], [1], [0, 0, 1, 1], [], []>} : vector<72x32xbf16>, vector<32x64xbf16>, vector<72x64xf32> -> vector<72x64xf32>
    %89 = arith.addf %81, %88 : vector<72x64xf32>
    %c10 = arith.constant 10 : index
    %c0_78 = arith.constant 0 : index
    %c0_79 = arith.constant 0 : index
    %90 = vector.load %arg3[%c10, %c0_78, %c0_79] : memref<16x72x450xbf16, #tpu.memory_space<vmem>>, vector<1x72x450xbf16>
    %91 = vector.shape_cast %90 : vector<1x72x450xbf16> to vector<72x450xbf16>
    %cst_80 = arith.constant dense<0.000000e+00> : vector<72x32xf32>
    %92 = tpu.matmul %91, %8, %cst_80 {dimension_numbers = #tpu.dot_dimension_numbers<[1], [0], [0], [1], [0, 0, 1, 1], [], []>} : vector<72x450xbf16>, vector<450x32xbf16>, vector<72x32xf32> -> vector<72x32xf32>
    %93 = arith.truncf %92 : vector<72x32xf32> to vector<72x32xbf16>
    %c10_81 = arith.constant 10 : index
    %c0_82 = arith.constant 0 : index
    %c0_83 = arith.constant 0 : index
    %94 = vector.load %arg4[%c10_81, %c0_82, %c0_83] : memref<16x32x64xbf16, #tpu.memory_space<vmem>>, vector<1x32x64xbf16>
    %95 = vector.shape_cast %94 : vector<1x32x64xbf16> to vector<32x64xbf16>
    %cst_84 = arith.constant dense<0.000000e+00> : vector<72x64xf32>
    %96 = tpu.matmul %93, %95, %cst_84 {dimension_numbers = #tpu.dot_dimension_numbers<[1], [0], [0], [1], [0, 0, 1, 1], [], []>} : vector<72x32xbf16>, vector<32x64xbf16>, vector<72x64xf32> -> vector<72x64xf32>
    %97 = arith.addf %89, %96 : vector<72x64xf32>
    %c11 = arith.constant 11 : index
    %c0_85 = arith.constant 0 : index
    %c0_86 = arith.constant 0 : index
    %98 = vector.load %arg3[%c11, %c0_85, %c0_86] : memref<16x72x450xbf16, #tpu.memory_space<vmem>>, vector<1x72x450xbf16>
    %99 = vector.shape_cast %98 : vector<1x72x450xbf16> to vector<72x450xbf16>
    %cst_87 = arith.constant dense<0.000000e+00> : vector<72x32xf32>
    %100 = tpu.matmul %99, %8, %cst_87 {dimension_numbers = #tpu.dot_dimension_numbers<[1], [0], [0], [1], [0, 0, 1, 1], [], []>} : vector<72x450xbf16>, vector<450x32xbf16>, vector<72x32xf32> -> vector<72x32xf32>
    %101 = arith.truncf %100 : vector<72x32xf32> to vector<72x32xbf16>
    %c11_88 = arith.constant 11 : index
    %c0_89 = arith.constant 0 : index
    %c0_90 = arith.constant 0 : index
    %102 = vector.load %arg4[%c11_88, %c0_89, %c0_90] : memref<16x32x64xbf16, #tpu.memory_space<vmem>>, vector<1x32x64xbf16>
    %103 = vector.shape_cast %102 : vector<1x32x64xbf16> to vector<32x64xbf16>
    %cst_91 = arith.constant dense<0.000000e+00> : vector<72x64xf32>
    %104 = tpu.matmul %101, %103, %cst_91 {dimension_numbers = #tpu.dot_dimension_numbers<[1], [0], [0], [1], [0, 0, 1, 1], [], []>} : vector<72x32xbf16>, vector<32x64xbf16>, vector<72x64xf32> -> vector<72x64xf32>
    %105 = arith.addf %97, %104 : vector<72x64xf32>
    %c12 = arith.constant 12 : index
    %c0_92 = arith.constant 0 : index
    %c0_93 = arith.constant 0 : index
    %106 = vector.load %arg3[%c12, %c0_92, %c0_93] : memref<16x72x450xbf16, #tpu.memory_space<vmem>>, vector<1x72x450xbf16>
    %107 = vector.shape_cast %106 : vector<1x72x450xbf16> to vector<72x450xbf16>
    %cst_94 = arith.constant dense<0.000000e+00> : vector<72x32xf32>
    %108 = tpu.matmul %107, %8, %cst_94 {dimension_numbers = #tpu.dot_dimension_numbers<[1], [0], [0], [1], [0, 0, 1, 1], [], []>} : vector<72x450xbf16>, vector<450x32xbf16>, vector<72x32xf32> -> vector<72x32xf32>
    %109 = arith.truncf %108 : vector<72x32xf32> to vector<72x32xbf16>
    %c12_95 = arith.constant 12 : index
    %c0_96 = arith.constant 0 : index
    %c0_97 = arith.constant 0 : index
    %110 = vector.load %arg4[%c12_95, %c0_96, %c0_97] : memref<16x32x64xbf16, #tpu.memory_space<vmem>>, vector<1x32x64xbf16>
    %111 = vector.shape_cast %110 : vector<1x32x64xbf16> to vector<32x64xbf16>
    %cst_98 = arith.constant dense<0.000000e+00> : vector<72x64xf32>
    %112 = tpu.matmul %109, %111, %cst_98 {dimension_numbers = #tpu.dot_dimension_numbers<[1], [0], [0], [1], [0, 0, 1, 1], [], []>} : vector<72x32xbf16>, vector<32x64xbf16>, vector<72x64xf32> -> vector<72x64xf32>
    %113 = arith.addf %105, %112 : vector<72x64xf32>
    %c13 = arith.constant 13 : index
    %c0_99 = arith.constant 0 : index
    %c0_100 = arith.constant 0 : index
    %114 = vector.load %arg3[%c13, %c0_99, %c0_100] : memref<16x72x450xbf16, #tpu.memory_space<vmem>>, vector<1x72x450xbf16>
    %115 = vector.shape_cast %114 : vector<1x72x450xbf16> to vector<72x450xbf16>
    %cst_101 = arith.constant dense<0.000000e+00> : vector<72x32xf32>
    %116 = tpu.matmul %115, %8, %cst_101 {dimension_numbers = #tpu.dot_dimension_numbers<[1], [0], [0], [1], [0, 0, 1, 1], [], []>} : vector<72x450xbf16>, vector<450x32xbf16>, vector<72x32xf32> -> vector<72x32xf32>
    %117 = arith.truncf %116 : vector<72x32xf32> to vector<72x32xbf16>
    %c13_102 = arith.constant 13 : index
    %c0_103 = arith.constant 0 : index
    %c0_104 = arith.constant 0 : index
    %118 = vector.load %arg4[%c13_102, %c0_103, %c0_104] : memref<16x32x64xbf16, #tpu.memory_space<vmem>>, vector<1x32x64xbf16>
    %119 = vector.shape_cast %118 : vector<1x32x64xbf16> to vector<32x64xbf16>
    %cst_105 = arith.constant dense<0.000000e+00> : vector<72x64xf32>
    %120 = tpu.matmul %117, %119, %cst_105 {dimension_numbers = #tpu.dot_dimension_numbers<[1], [0], [0], [1], [0, 0, 1, 1], [], []>} : vector<72x32xbf16>, vector<32x64xbf16>, vector<72x64xf32> -> vector<72x64xf32>
    %121 = arith.addf %113, %120 : vector<72x64xf32>
    %c14 = arith.constant 14 : index
    %c0_106 = arith.constant 0 : index
    %c0_107 = arith.constant 0 : index
    %122 = vector.load %arg3[%c14, %c0_106, %c0_107] : memref<16x72x450xbf16, #tpu.memory_space<vmem>>, vector<1x72x450xbf16>
    %123 = vector.shape_cast %122 : vector<1x72x450xbf16> to vector<72x450xbf16>
    %cst_108 = arith.constant dense<0.000000e+00> : vector<72x32xf32>
    %124 = tpu.matmul %123, %8, %cst_108 {dimension_numbers = #tpu.dot_dimension_numbers<[1], [0], [0], [1], [0, 0, 1, 1], [], []>} : vector<72x450xbf16>, vector<450x32xbf16>, vector<72x32xf32> -> vector<72x32xf32>
    %125 = arith.truncf %124 : vector<72x32xf32> to vector<72x32xbf16>
    %c14_109 = arith.constant 14 : index
    %c0_110 = arith.constant 0 : index
    %c0_111 = arith.constant 0 : index
    %126 = vector.load %arg4[%c14_109, %c0_110, %c0_111] : memref<16x32x64xbf16, #tpu.memory_space<vmem>>, vector<1x32x64xbf16>
    %127 = vector.shape_cast %126 : vector<1x32x64xbf16> to vector<32x64xbf16>
    %cst_112 = arith.constant dense<0.000000e+00> : vector<72x64xf32>
    %128 = tpu.matmul %125, %127, %cst_112 {dimension_numbers = #tpu.dot_dimension_numbers<[1], [0], [0], [1], [0, 0, 1, 1], [], []>} : vector<72x32xbf16>, vector<32x64xbf16>, vector<72x64xf32> -> vector<72x64xf32>
    %129 = arith.addf %121, %128 : vector<72x64xf32>
    %c15 = arith.constant 15 : index
    %c0_113 = arith.constant 0 : index
    %c0_114 = arith.constant 0 : index
    %130 = vector.load %arg3[%c15, %c0_113, %c0_114] : memref<16x72x450xbf16, #tpu.memory_space<vmem>>, vector<1x72x450xbf16>
    %131 = vector.shape_cast %130 : vector<1x72x450xbf16> to vector<72x450xbf16>
    %cst_115 = arith.constant dense<0.000000e+00> : vector<72x32xf32>
    %132 = tpu.matmul %131, %8, %cst_115 {dimension_numbers = #tpu.dot_dimension_numbers<[1], [0], [0], [1], [0, 0, 1, 1], [], []>} : vector<72x450xbf16>, vector<450x32xbf16>, vector<72x32xf32> -> vector<72x32xf32>
    %133 = arith.truncf %132 : vector<72x32xf32> to vector<72x32xbf16>
    %c15_116 = arith.constant 15 : index
    %c0_117 = arith.constant 0 : index
    %c0_118 = arith.constant 0 : index
    %134 = vector.load %arg4[%c15_116, %c0_117, %c0_118] : memref<16x32x64xbf16, #tpu.memory_space<vmem>>, vector<1x32x64xbf16>
    %135 = vector.shape_cast %134 : vector<1x32x64xbf16> to vector<32x64xbf16>
    %cst_119 = arith.constant dense<0.000000e+00> : vector<72x64xf32>
    %136 = tpu.matmul %133, %135, %cst_119 {dimension_numbers = #tpu.dot_dimension_numbers<[1], [0], [0], [1], [0, 0, 1, 1], [], []>} : vector<72x32xbf16>, vector<32x64xbf16>, vector<72x64xf32> -> vector<72x64xf32>
    %137 = arith.addf %129, %136 : vector<72x64xf32>
    %c0_120 = arith.constant 0 : index
    %c0_121 = arith.constant 0 : index
    %138 = vector.load %arg5[%c0_120, %c0_121] : memref<1x64xf32, #tpu.memory_space<vmem>>, vector<1x64xf32>
    %139 = vector.broadcast %138 : vector<1x64xf32> to vector<72x64xf32>
    %140 = arith.addf %137, %139 : vector<72x64xf32>
    %cst_122 = arith.constant 0.000000e+00 : f32
    %141 = vector.broadcast %cst_122 : f32 to vector<72x64xf32>
    %142 = arith.maximumf %140, %141 : vector<72x64xf32>
    %143 = arith.truncf %142 : vector<72x64xf32> to vector<72x64xbf16>
    %cst_123 = arith.constant 0.000000e+00 : f32
    %144 = vector.broadcast %cst_123 : f32 to vector<32x64xf32>
    %c0_124 = arith.constant 0 : index
    %c0_125 = arith.constant 0 : index
    %c0_126 = arith.constant 0 : index
    %145 = vector.load %arg6[%c0_124, %c0_125, %c0_126] : memref<9x32x72xbf16, #tpu.memory_space<vmem>>, vector<1x32x72xbf16>
    %146 = vector.shape_cast %145 : vector<1x32x72xbf16> to vector<32x72xbf16>
    %cst_127 = arith.constant dense<0.000000e+00> : vector<32x64xf32>
    %147 = tpu.matmul %146, %143, %cst_127 {dimension_numbers = #tpu.dot_dimension_numbers<[1], [0], [0], [1], [0, 0, 1, 1], [], []>} : vector<32x72xbf16>, vector<72x64xbf16>, vector<32x64xf32> -> vector<32x64xf32>
    %148 = arith.truncf %147 : vector<32x64xf32> to vector<32x64xbf16>
    %c0_128 = arith.constant 0 : index
    %c0_129 = arith.constant 0 : index
    %c0_130 = arith.constant 0 : index
    %149 = vector.load %arg7[%c0_128, %c0_129, %c0_130] : memref<9x64x64xbf16, #tpu.memory_space<vmem>>, vector<1x64x64xbf16>
    %150 = vector.shape_cast %149 : vector<1x64x64xbf16> to vector<64x64xbf16>
    %cst_131 = arith.constant dense<0.000000e+00> : vector<32x64xf32>
    %151 = tpu.matmul %148, %150, %cst_131 {dimension_numbers = #tpu.dot_dimension_numbers<[1], [0], [0], [1], [0, 0, 1, 1], [], []>} : vector<32x64xbf16>, vector<64x64xbf16>, vector<32x64xf32> -> vector<32x64xf32>
    %152 = arith.addf %144, %151 : vector<32x64xf32>
    %c1_132 = arith.constant 1 : index
    %c0_133 = arith.constant 0 : index
    %c0_134 = arith.constant 0 : index
    %153 = vector.load %arg6[%c1_132, %c0_133, %c0_134] : memref<9x32x72xbf16, #tpu.memory_space<vmem>>, vector<1x32x72xbf16>
    %154 = vector.shape_cast %153 : vector<1x32x72xbf16> to vector<32x72xbf16>
    %cst_135 = arith.constant dense<0.000000e+00> : vector<32x64xf32>
    %155 = tpu.matmul %154, %143, %cst_135 {dimension_numbers = #tpu.dot_dimension_numbers<[1], [0], [0], [1], [0, 0, 1, 1], [], []>} : vector<32x72xbf16>, vector<72x64xbf16>, vector<32x64xf32> -> vector<32x64xf32>
    %156 = arith.truncf %155 : vector<32x64xf32> to vector<32x64xbf16>
    %c1_136 = arith.constant 1 : index
    %c0_137 = arith.constant 0 : index
    %c0_138 = arith.constant 0 : index
    %157 = vector.load %arg7[%c1_136, %c0_137, %c0_138] : memref<9x64x64xbf16, #tpu.memory_space<vmem>>, vector<1x64x64xbf16>
    %158 = vector.shape_cast %157 : vector<1x64x64xbf16> to vector<64x64xbf16>
    %cst_139 = arith.constant dense<0.000000e+00> : vector<32x64xf32>
    %159 = tpu.matmul %156, %158, %cst_139 {dimension_numbers = #tpu.dot_dimension_numbers<[1], [0], [0], [1], [0, 0, 1, 1], [], []>} : vector<32x64xbf16>, vector<64x64xbf16>, vector<32x64xf32> -> vector<32x64xf32>
    %160 = arith.addf %152, %159 : vector<32x64xf32>
    %c2_140 = arith.constant 2 : index
    %c0_141 = arith.constant 0 : index
    %c0_142 = arith.constant 0 : index
    %161 = vector.load %arg6[%c2_140, %c0_141, %c0_142] : memref<9x32x72xbf16, #tpu.memory_space<vmem>>, vector<1x32x72xbf16>
    %162 = vector.shape_cast %161 : vector<1x32x72xbf16> to vector<32x72xbf16>
    %cst_143 = arith.constant dense<0.000000e+00> : vector<32x64xf32>
    %163 = tpu.matmul %162, %143, %cst_143 {dimension_numbers = #tpu.dot_dimension_numbers<[1], [0], [0], [1], [0, 0, 1, 1], [], []>} : vector<32x72xbf16>, vector<72x64xbf16>, vector<32x64xf32> -> vector<32x64xf32>
    %164 = arith.truncf %163 : vector<32x64xf32> to vector<32x64xbf16>
    %c2_144 = arith.constant 2 : index
    %c0_145 = arith.constant 0 : index
    %c0_146 = arith.constant 0 : index
    %165 = vector.load %arg7[%c2_144, %c0_145, %c0_146] : memref<9x64x64xbf16, #tpu.memory_space<vmem>>, vector<1x64x64xbf16>
    %166 = vector.shape_cast %165 : vector<1x64x64xbf16> to vector<64x64xbf16>
    %cst_147 = arith.constant dense<0.000000e+00> : vector<32x64xf32>
    %167 = tpu.matmul %164, %166, %cst_147 {dimension_numbers = #tpu.dot_dimension_numbers<[1], [0], [0], [1], [0, 0, 1, 1], [], []>} : vector<32x64xbf16>, vector<64x64xbf16>, vector<32x64xf32> -> vector<32x64xf32>
    %168 = arith.addf %160, %167 : vector<32x64xf32>
    %c3_148 = arith.constant 3 : index
    %c0_149 = arith.constant 0 : index
    %c0_150 = arith.constant 0 : index
    %169 = vector.load %arg6[%c3_148, %c0_149, %c0_150] : memref<9x32x72xbf16, #tpu.memory_space<vmem>>, vector<1x32x72xbf16>
    %170 = vector.shape_cast %169 : vector<1x32x72xbf16> to vector<32x72xbf16>
    %cst_151 = arith.constant dense<0.000000e+00> : vector<32x64xf32>
    %171 = tpu.matmul %170, %143, %cst_151 {dimension_numbers = #tpu.dot_dimension_numbers<[1], [0], [0], [1], [0, 0, 1, 1], [], []>} : vector<32x72xbf16>, vector<72x64xbf16>, vector<32x64xf32> -> vector<32x64xf32>
    %172 = arith.truncf %171 : vector<32x64xf32> to vector<32x64xbf16>
    %c3_152 = arith.constant 3 : index
    %c0_153 = arith.constant 0 : index
    %c0_154 = arith.constant 0 : index
    %173 = vector.load %arg7[%c3_152, %c0_153, %c0_154] : memref<9x64x64xbf16, #tpu.memory_space<vmem>>, vector<1x64x64xbf16>
    %174 = vector.shape_cast %173 : vector<1x64x64xbf16> to vector<64x64xbf16>
    %cst_155 = arith.constant dense<0.000000e+00> : vector<32x64xf32>
    %175 = tpu.matmul %172, %174, %cst_155 {dimension_numbers = #tpu.dot_dimension_numbers<[1], [0], [0], [1], [0, 0, 1, 1], [], []>} : vector<32x64xbf16>, vector<64x64xbf16>, vector<32x64xf32> -> vector<32x64xf32>
    %176 = arith.addf %168, %175 : vector<32x64xf32>
    %c4_156 = arith.constant 4 : index
    %c0_157 = arith.constant 0 : index
    %c0_158 = arith.constant 0 : index
    %177 = vector.load %arg6[%c4_156, %c0_157, %c0_158] : memref<9x32x72xbf16, #tpu.memory_space<vmem>>, vector<1x32x72xbf16>
    %178 = vector.shape_cast %177 : vector<1x32x72xbf16> to vector<32x72xbf16>
    %cst_159 = arith.constant dense<0.000000e+00> : vector<32x64xf32>
    %179 = tpu.matmul %178, %143, %cst_159 {dimension_numbers = #tpu.dot_dimension_numbers<[1], [0], [0], [1], [0, 0, 1, 1], [], []>} : vector<32x72xbf16>, vector<72x64xbf16>, vector<32x64xf32> -> vector<32x64xf32>
    %180 = arith.truncf %179 : vector<32x64xf32> to vector<32x64xbf16>
    %c4_160 = arith.constant 4 : index
    %c0_161 = arith.constant 0 : index
    %c0_162 = arith.constant 0 : index
    %181 = vector.load %arg7[%c4_160, %c0_161, %c0_162] : memref<9x64x64xbf16, #tpu.memory_space<vmem>>, vector<1x64x64xbf16>
    %182 = vector.shape_cast %181 : vector<1x64x64xbf16> to vector<64x64xbf16>
    %cst_163 = arith.constant dense<0.000000e+00> : vector<32x64xf32>
    %183 = tpu.matmul %180, %182, %cst_163 {dimension_numbers = #tpu.dot_dimension_numbers<[1], [0], [0], [1], [0, 0, 1, 1], [], []>} : vector<32x64xbf16>, vector<64x64xbf16>, vector<32x64xf32> -> vector<32x64xf32>
    %184 = arith.addf %176, %183 : vector<32x64xf32>
    %c5_164 = arith.constant 5 : index
    %c0_165 = arith.constant 0 : index
    %c0_166 = arith.constant 0 : index
    %185 = vector.load %arg6[%c5_164, %c0_165, %c0_166] : memref<9x32x72xbf16, #tpu.memory_space<vmem>>, vector<1x32x72xbf16>
    %186 = vector.shape_cast %185 : vector<1x32x72xbf16> to vector<32x72xbf16>
    %cst_167 = arith.constant dense<0.000000e+00> : vector<32x64xf32>
    %187 = tpu.matmul %186, %143, %cst_167 {dimension_numbers = #tpu.dot_dimension_numbers<[1], [0], [0], [1], [0, 0, 1, 1], [], []>} : vector<32x72xbf16>, vector<72x64xbf16>, vector<32x64xf32> -> vector<32x64xf32>
    %188 = arith.truncf %187 : vector<32x64xf32> to vector<32x64xbf16>
    %c5_168 = arith.constant 5 : index
    %c0_169 = arith.constant 0 : index
    %c0_170 = arith.constant 0 : index
    %189 = vector.load %arg7[%c5_168, %c0_169, %c0_170] : memref<9x64x64xbf16, #tpu.memory_space<vmem>>, vector<1x64x64xbf16>
    %190 = vector.shape_cast %189 : vector<1x64x64xbf16> to vector<64x64xbf16>
    %cst_171 = arith.constant dense<0.000000e+00> : vector<32x64xf32>
    %191 = tpu.matmul %188, %190, %cst_171 {dimension_numbers = #tpu.dot_dimension_numbers<[1], [0], [0], [1], [0, 0, 1, 1], [], []>} : vector<32x64xbf16>, vector<64x64xbf16>, vector<32x64xf32> -> vector<32x64xf32>
    %192 = arith.addf %184, %191 : vector<32x64xf32>
    %c6_172 = arith.constant 6 : index
    %c0_173 = arith.constant 0 : index
    %c0_174 = arith.constant 0 : index
    %193 = vector.load %arg6[%c6_172, %c0_173, %c0_174] : memref<9x32x72xbf16, #tpu.memory_space<vmem>>, vector<1x32x72xbf16>
    %194 = vector.shape_cast %193 : vector<1x32x72xbf16> to vector<32x72xbf16>
    %cst_175 = arith.constant dense<0.000000e+00> : vector<32x64xf32>
    %195 = tpu.matmul %194, %143, %cst_175 {dimension_numbers = #tpu.dot_dimension_numbers<[1], [0], [0], [1], [0, 0, 1, 1], [], []>} : vector<32x72xbf16>, vector<72x64xbf16>, vector<32x64xf32> -> vector<32x64xf32>
    %196 = arith.truncf %195 : vector<32x64xf32> to vector<32x64xbf16>
    %c6_176 = arith.constant 6 : index
    %c0_177 = arith.constant 0 : index
    %c0_178 = arith.constant 0 : index
    %197 = vector.load %arg7[%c6_176, %c0_177, %c0_178] : memref<9x64x64xbf16, #tpu.memory_space<vmem>>, vector<1x64x64xbf16>
    %198 = vector.shape_cast %197 : vector<1x64x64xbf16> to vector<64x64xbf16>
    %cst_179 = arith.constant dense<0.000000e+00> : vector<32x64xf32>
    %199 = tpu.matmul %196, %198, %cst_179 {dimension_numbers = #tpu.dot_dimension_numbers<[1], [0], [0], [1], [0, 0, 1, 1], [], []>} : vector<32x64xbf16>, vector<64x64xbf16>, vector<32x64xf32> -> vector<32x64xf32>
    %200 = arith.addf %192, %199 : vector<32x64xf32>
    %c7_180 = arith.constant 7 : index
    %c0_181 = arith.constant 0 : index
    %c0_182 = arith.constant 0 : index
    %201 = vector.load %arg6[%c7_180, %c0_181, %c0_182] : memref<9x32x72xbf16, #tpu.memory_space<vmem>>, vector<1x32x72xbf16>
    %202 = vector.shape_cast %201 : vector<1x32x72xbf16> to vector<32x72xbf16>
    %cst_183 = arith.constant dense<0.000000e+00> : vector<32x64xf32>
    %203 = tpu.matmul %202, %143, %cst_183 {dimension_numbers = #tpu.dot_dimension_numbers<[1], [0], [0], [1], [0, 0, 1, 1], [], []>} : vector<32x72xbf16>, vector<72x64xbf16>, vector<32x64xf32> -> vector<32x64xf32>
    %204 = arith.truncf %203 : vector<32x64xf32> to vector<32x64xbf16>
    %c7_184 = arith.constant 7 : index
    %c0_185 = arith.constant 0 : index
    %c0_186 = arith.constant 0 : index
    %205 = vector.load %arg7[%c7_184, %c0_185, %c0_186] : memref<9x64x64xbf16, #tpu.memory_space<vmem>>, vector<1x64x64xbf16>
    %206 = vector.shape_cast %205 : vector<1x64x64xbf16> to vector<64x64xbf16>
    %cst_187 = arith.constant dense<0.000000e+00> : vector<32x64xf32>
    %207 = tpu.matmul %204, %206, %cst_187 {dimension_numbers = #tpu.dot_dimension_numbers<[1], [0], [0], [1], [0, 0, 1, 1], [], []>} : vector<32x64xbf16>, vector<64x64xbf16>, vector<32x64xf32> -> vector<32x64xf32>
    %208 = arith.addf %200, %207 : vector<32x64xf32>
    %c8_188 = arith.constant 8 : index
    %c0_189 = arith.constant 0 : index
    %c0_190 = arith.constant 0 : index
    %209 = vector.load %arg6[%c8_188, %c0_189, %c0_190] : memref<9x32x72xbf16, #tpu.memory_space<vmem>>, vector<1x32x72xbf16>
    %210 = vector.shape_cast %209 : vector<1x32x72xbf16> to vector<32x72xbf16>
    %cst_191 = arith.constant dense<0.000000e+00> : vector<32x64xf32>
    %211 = tpu.matmul %210, %143, %cst_191 {dimension_numbers = #tpu.dot_dimension_numbers<[1], [0], [0], [1], [0, 0, 1, 1], [], []>} : vector<32x72xbf16>, vector<72x64xbf16>, vector<32x64xf32> -> vector<32x64xf32>
    %212 = arith.truncf %211 : vector<32x64xf32> to vector<32x64xbf16>
    %c8_192 = arith.constant 8 : index
    %c0_193 = arith.constant 0 : index
    %c0_194 = arith.constant 0 : index
    %213 = vector.load %arg7[%c8_192, %c0_193, %c0_194] : memref<9x64x64xbf16, #tpu.memory_space<vmem>>, vector<1x64x64xbf16>
    %214 = vector.shape_cast %213 : vector<1x64x64xbf16> to vector<64x64xbf16>
    %cst_195 = arith.constant dense<0.000000e+00> : vector<32x64xf32>
    %215 = tpu.matmul %212, %214, %cst_195 {dimension_numbers = #tpu.dot_dimension_numbers<[1], [0], [0], [1], [0, 0, 1, 1], [], []>} : vector<32x64xbf16>, vector<64x64xbf16>, vector<32x64xf32> -> vector<32x64xf32>
    %216 = arith.addf %208, %215 : vector<32x64xf32>
    %c0_196 = arith.constant 0 : index
    %c0_197 = arith.constant 0 : index
    %217 = vector.load %arg8[%c0_196, %c0_197] : memref<1x64xf32, #tpu.memory_space<vmem>>, vector<1x64xf32>
    %218 = vector.broadcast %217 : vector<1x64xf32> to vector<32x64xf32>
    %219 = arith.addf %216, %218 : vector<32x64xf32>
    %cst_198 = arith.constant 0.000000e+00 : f32
    %220 = vector.broadcast %cst_198 : f32 to vector<32x64xf32>
    %221 = arith.maximumf %219, %220 : vector<32x64xf32>
    %222 = arith.truncf %221 : vector<32x64xf32> to vector<32x64xbf16>
    %cst_199 = arith.constant 0.000000e+00 : f32
    %223 = vector.broadcast %cst_199 : f32 to vector<2x512xf32>
    %c0_200 = arith.constant 0 : index
    %c0_201 = arith.constant 0 : index
    %c0_202 = arith.constant 0 : index
    %224 = vector.load %arg9[%c0_200, %c0_201, %c0_202] : memref<16x2x32xbf16, #tpu.memory_space<vmem>>, vector<1x2x32xbf16>
    %225 = vector.shape_cast %224 : vector<1x2x32xbf16> to vector<2x32xbf16>
    %cst_203 = arith.constant dense<0.000000e+00> : vector<2x64xf32>
    %226 = tpu.matmul %225, %222, %cst_203 {dimension_numbers = #tpu.dot_dimension_numbers<[1], [0], [0], [1], [0, 0, 1, 1], [], []>} : vector<2x32xbf16>, vector<32x64xbf16>, vector<2x64xf32> -> vector<2x64xf32>
    %227 = arith.truncf %226 : vector<2x64xf32> to vector<2x64xbf16>
    %c0_204 = arith.constant 0 : index
    %c0_205 = arith.constant 0 : index
    %c0_206 = arith.constant 0 : index
    %228 = vector.load %arg10[%c0_204, %c0_205, %c0_206] : memref<16x64x512xbf16, #tpu.memory_space<vmem>>, vector<1x64x512xbf16>
    %229 = vector.shape_cast %228 : vector<1x64x512xbf16> to vector<64x512xbf16>
    %cst_207 = arith.constant dense<0.000000e+00> : vector<2x512xf32>
    %230 = tpu.matmul %227, %229, %cst_207 {dimension_numbers = #tpu.dot_dimension_numbers<[1], [0], [0], [1], [0, 0, 1, 1], [], []>} : vector<2x64xbf16>, vector<64x512xbf16>, vector<2x512xf32> -> vector<2x512xf32>
    %231 = arith.addf %223, %230 : vector<2x512xf32>
    %c1_208 = arith.constant 1 : index
    %c0_209 = arith.constant 0 : index
    %c0_210 = arith.constant 0 : index
    %232 = vector.load %arg9[%c1_208, %c0_209, %c0_210] : memref<16x2x32xbf16, #tpu.memory_space<vmem>>, vector<1x2x32xbf16>
    %233 = vector.shape_cast %232 : vector<1x2x32xbf16> to vector<2x32xbf16>
    %cst_211 = arith.constant dense<0.000000e+00> : vector<2x64xf32>
    %234 = tpu.matmul %233, %222, %cst_211 {dimension_numbers = #tpu.dot_dimension_numbers<[1], [0], [0], [1], [0, 0, 1, 1], [], []>} : vector<2x32xbf16>, vector<32x64xbf16>, vector<2x64xf32> -> vector<2x64xf32>
    %235 = arith.truncf %234 : vector<2x64xf32> to vector<2x64xbf16>
    %c1_212 = arith.constant 1 : index
    %c0_213 = arith.constant 0 : index
    %c0_214 = arith.constant 0 : index
    %236 = vector.load %arg10[%c1_212, %c0_213, %c0_214] : memref<16x64x512xbf16, #tpu.memory_space<vmem>>, vector<1x64x512xbf16>
    %237 = vector.shape_cast %236 : vector<1x64x512xbf16> to vector<64x512xbf16>
    %cst_215 = arith.constant dense<0.000000e+00> : vector<2x512xf32>
    %238 = tpu.matmul %235, %237, %cst_215 {dimension_numbers = #tpu.dot_dimension_numbers<[1], [0], [0], [1], [0, 0, 1, 1], [], []>} : vector<2x64xbf16>, vector<64x512xbf16>, vector<2x512xf32> -> vector<2x512xf32>
    %239 = arith.addf %231, %238 : vector<2x512xf32>
    %c2_216 = arith.constant 2 : index
    %c0_217 = arith.constant 0 : index
    %c0_218 = arith.constant 0 : index
    %240 = vector.load %arg9[%c2_216, %c0_217, %c0_218] : memref<16x2x32xbf16, #tpu.memory_space<vmem>>, vector<1x2x32xbf16>
    %241 = vector.shape_cast %240 : vector<1x2x32xbf16> to vector<2x32xbf16>
    %cst_219 = arith.constant dense<0.000000e+00> : vector<2x64xf32>
    %242 = tpu.matmul %241, %222, %cst_219 {dimension_numbers = #tpu.dot_dimension_numbers<[1], [0], [0], [1], [0, 0, 1, 1], [], []>} : vector<2x32xbf16>, vector<32x64xbf16>, vector<2x64xf32> -> vector<2x64xf32>
    %243 = arith.truncf %242 : vector<2x64xf32> to vector<2x64xbf16>
    %c2_220 = arith.constant 2 : index
    %c0_221 = arith.constant 0 : index
    %c0_222 = arith.constant 0 : index
    %244 = vector.load %arg10[%c2_220, %c0_221, %c0_222] : memref<16x64x512xbf16, #tpu.memory_space<vmem>>, vector<1x64x512xbf16>
    %245 = vector.shape_cast %244 : vector<1x64x512xbf16> to vector<64x512xbf16>
    %cst_223 = arith.constant dense<0.000000e+00> : vector<2x512xf32>
    %246 = tpu.matmul %243, %245, %cst_223 {dimension_numbers = #tpu.dot_dimension_numbers<[1], [0], [0], [1], [0, 0, 1, 1], [], []>} : vector<2x64xbf16>, vector<64x512xbf16>, vector<2x512xf32> -> vector<2x512xf32>
    %247 = arith.addf %239, %246 : vector<2x512xf32>
    %c3_224 = arith.constant 3 : index
    %c0_225 = arith.constant 0 : index
    %c0_226 = arith.constant 0 : index
    %248 = vector.load %arg9[%c3_224, %c0_225, %c0_226] : memref<16x2x32xbf16, #tpu.memory_space<vmem>>, vector<1x2x32xbf16>
    %249 = vector.shape_cast %248 : vector<1x2x32xbf16> to vector<2x32xbf16>
    %cst_227 = arith.constant dense<0.000000e+00> : vector<2x64xf32>
    %250 = tpu.matmul %249, %222, %cst_227 {dimension_numbers = #tpu.dot_dimension_numbers<[1], [0], [0], [1], [0, 0, 1, 1], [], []>} : vector<2x32xbf16>, vector<32x64xbf16>, vector<2x64xf32> -> vector<2x64xf32>
    %251 = arith.truncf %250 : vector<2x64xf32> to vector<2x64xbf16>
    %c3_228 = arith.constant 3 : index
    %c0_229 = arith.constant 0 : index
    %c0_230 = arith.constant 0 : index
    %252 = vector.load %arg10[%c3_228, %c0_229, %c0_230] : memref<16x64x512xbf16, #tpu.memory_space<vmem>>, vector<1x64x512xbf16>
    %253 = vector.shape_cast %252 : vector<1x64x512xbf16> to vector<64x512xbf16>
    %cst_231 = arith.constant dense<0.000000e+00> : vector<2x512xf32>
    %254 = tpu.matmul %251, %253, %cst_231 {dimension_numbers = #tpu.dot_dimension_numbers<[1], [0], [0], [1], [0, 0, 1, 1], [], []>} : vector<2x64xbf16>, vector<64x512xbf16>, vector<2x512xf32> -> vector<2x512xf32>
    %255 = arith.addf %247, %254 : vector<2x512xf32>
    %c4_232 = arith.constant 4 : index
    %c0_233 = arith.constant 0 : index
    %c0_234 = arith.constant 0 : index
    %256 = vector.load %arg9[%c4_232, %c0_233, %c0_234] : memref<16x2x32xbf16, #tpu.memory_space<vmem>>, vector<1x2x32xbf16>
    %257 = vector.shape_cast %256 : vector<1x2x32xbf16> to vector<2x32xbf16>
    %cst_235 = arith.constant dense<0.000000e+00> : vector<2x64xf32>
    %258 = tpu.matmul %257, %222, %cst_235 {dimension_numbers = #tpu.dot_dimension_numbers<[1], [0], [0], [1], [0, 0, 1, 1], [], []>} : vector<2x32xbf16>, vector<32x64xbf16>, vector<2x64xf32> -> vector<2x64xf32>
    %259 = arith.truncf %258 : vector<2x64xf32> to vector<2x64xbf16>
    %c4_236 = arith.constant 4 : index
    %c0_237 = arith.constant 0 : index
    %c0_238 = arith.constant 0 : index
    %260 = vector.load %arg10[%c4_236, %c0_237, %c0_238] : memref<16x64x512xbf16, #tpu.memory_space<vmem>>, vector<1x64x512xbf16>
    %261 = vector.shape_cast %260 : vector<1x64x512xbf16> to vector<64x512xbf16>
    %cst_239 = arith.constant dense<0.000000e+00> : vector<2x512xf32>
    %262 = tpu.matmul %259, %261, %cst_239 {dimension_numbers = #tpu.dot_dimension_numbers<[1], [0], [0], [1], [0, 0, 1, 1], [], []>} : vector<2x64xbf16>, vector<64x512xbf16>, vector<2x512xf32> -> vector<2x512xf32>
    %263 = arith.addf %255, %262 : vector<2x512xf32>
    %c5_240 = arith.constant 5 : index
    %c0_241 = arith.constant 0 : index
    %c0_242 = arith.constant 0 : index
    %264 = vector.load %arg9[%c5_240, %c0_241, %c0_242] : memref<16x2x32xbf16, #tpu.memory_space<vmem>>, vector<1x2x32xbf16>
    %265 = vector.shape_cast %264 : vector<1x2x32xbf16> to vector<2x32xbf16>
    %cst_243 = arith.constant dense<0.000000e+00> : vector<2x64xf32>
    %266 = tpu.matmul %265, %222, %cst_243 {dimension_numbers = #tpu.dot_dimension_numbers<[1], [0], [0], [1], [0, 0, 1, 1], [], []>} : vector<2x32xbf16>, vector<32x64xbf16>, vector<2x64xf32> -> vector<2x64xf32>
    %267 = arith.truncf %266 : vector<2x64xf32> to vector<2x64xbf16>
    %c5_244 = arith.constant 5 : index
    %c0_245 = arith.constant 0 : index
    %c0_246 = arith.constant 0 : index
    %268 = vector.load %arg10[%c5_244, %c0_245, %c0_246] : memref<16x64x512xbf16, #tpu.memory_space<vmem>>, vector<1x64x512xbf16>
    %269 = vector.shape_cast %268 : vector<1x64x512xbf16> to vector<64x512xbf16>
    %cst_247 = arith.constant dense<0.000000e+00> : vector<2x512xf32>
    %270 = tpu.matmul %267, %269, %cst_247 {dimension_numbers = #tpu.dot_dimension_numbers<[1], [0], [0], [1], [0, 0, 1, 1], [], []>} : vector<2x64xbf16>, vector<64x512xbf16>, vector<2x512xf32> -> vector<2x512xf32>
    %271 = arith.addf %263, %270 : vector<2x512xf32>
    %c6_248 = arith.constant 6 : index
    %c0_249 = arith.constant 0 : index
    %c0_250 = arith.constant 0 : index
    %272 = vector.load %arg9[%c6_248, %c0_249, %c0_250] : memref<16x2x32xbf16, #tpu.memory_space<vmem>>, vector<1x2x32xbf16>
    %273 = vector.shape_cast %272 : vector<1x2x32xbf16> to vector<2x32xbf16>
    %cst_251 = arith.constant dense<0.000000e+00> : vector<2x64xf32>
    %274 = tpu.matmul %273, %222, %cst_251 {dimension_numbers = #tpu.dot_dimension_numbers<[1], [0], [0], [1], [0, 0, 1, 1], [], []>} : vector<2x32xbf16>, vector<32x64xbf16>, vector<2x64xf32> -> vector<2x64xf32>
    %275 = arith.truncf %274 : vector<2x64xf32> to vector<2x64xbf16>
    %c6_252 = arith.constant 6 : index
    %c0_253 = arith.constant 0 : index
    %c0_254 = arith.constant 0 : index
    %276 = vector.load %arg10[%c6_252, %c0_253, %c0_254] : memref<16x64x512xbf16, #tpu.memory_space<vmem>>, vector<1x64x512xbf16>
    %277 = vector.shape_cast %276 : vector<1x64x512xbf16> to vector<64x512xbf16>
    %cst_255 = arith.constant dense<0.000000e+00> : vector<2x512xf32>
    %278 = tpu.matmul %275, %277, %cst_255 {dimension_numbers = #tpu.dot_dimension_numbers<[1], [0], [0], [1], [0, 0, 1, 1], [], []>} : vector<2x64xbf16>, vector<64x512xbf16>, vector<2x512xf32> -> vector<2x512xf32>
    %279 = arith.addf %271, %278 : vector<2x512xf32>
    %c7_256 = arith.constant 7 : index
    %c0_257 = arith.constant 0 : index
    %c0_258 = arith.constant 0 : index
    %280 = vector.load %arg9[%c7_256, %c0_257, %c0_258] : memref<16x2x32xbf16, #tpu.memory_space<vmem>>, vector<1x2x32xbf16>
    %281 = vector.shape_cast %280 : vector<1x2x32xbf16> to vector<2x32xbf16>
    %cst_259 = arith.constant dense<0.000000e+00> : vector<2x64xf32>
    %282 = tpu.matmul %281, %222, %cst_259 {dimension_numbers = #tpu.dot_dimension_numbers<[1], [0], [0], [1], [0, 0, 1, 1], [], []>} : vector<2x32xbf16>, vector<32x64xbf16>, vector<2x64xf32> -> vector<2x64xf32>
    %283 = arith.truncf %282 : vector<2x64xf32> to vector<2x64xbf16>
    %c7_260 = arith.constant 7 : index
    %c0_261 = arith.constant 0 : index
    %c0_262 = arith.constant 0 : index
    %284 = vector.load %arg10[%c7_260, %c0_261, %c0_262] : memref<16x64x512xbf16, #tpu.memory_space<vmem>>, vector<1x64x512xbf16>
    %285 = vector.shape_cast %284 : vector<1x64x512xbf16> to vector<64x512xbf16>
    %cst_263 = arith.constant dense<0.000000e+00> : vector<2x512xf32>
    %286 = tpu.matmul %283, %285, %cst_263 {dimension_numbers = #tpu.dot_dimension_numbers<[1], [0], [0], [1], [0, 0, 1, 1], [], []>} : vector<2x64xbf16>, vector<64x512xbf16>, vector<2x512xf32> -> vector<2x512xf32>
    %287 = arith.addf %279, %286 : vector<2x512xf32>
    %c8_264 = arith.constant 8 : index
    %c0_265 = arith.constant 0 : index
    %c0_266 = arith.constant 0 : index
    %288 = vector.load %arg9[%c8_264, %c0_265, %c0_266] : memref<16x2x32xbf16, #tpu.memory_space<vmem>>, vector<1x2x32xbf16>
    %289 = vector.shape_cast %288 : vector<1x2x32xbf16> to vector<2x32xbf16>
    %cst_267 = arith.constant dense<0.000000e+00> : vector<2x64xf32>
    %290 = tpu.matmul %289, %222, %cst_267 {dimension_numbers = #tpu.dot_dimension_numbers<[1], [0], [0], [1], [0, 0, 1, 1], [], []>} : vector<2x32xbf16>, vector<32x64xbf16>, vector<2x64xf32> -> vector<2x64xf32>
    %291 = arith.truncf %290 : vector<2x64xf32> to vector<2x64xbf16>
    %c8_268 = arith.constant 8 : index
    %c0_269 = arith.constant 0 : index
    %c0_270 = arith.constant 0 : index
    %292 = vector.load %arg10[%c8_268, %c0_269, %c0_270] : memref<16x64x512xbf16, #tpu.memory_space<vmem>>, vector<1x64x512xbf16>
    %293 = vector.shape_cast %292 : vector<1x64x512xbf16> to vector<64x512xbf16>
    %cst_271 = arith.constant dense<0.000000e+00> : vector<2x512xf32>
    %294 = tpu.matmul %291, %293, %cst_271 {dimension_numbers = #tpu.dot_dimension_numbers<[1], [0], [0], [1], [0, 0, 1, 1], [], []>} : vector<2x64xbf16>, vector<64x512xbf16>, vector<2x512xf32> -> vector<2x512xf32>
    %295 = arith.addf %287, %294 : vector<2x512xf32>
    %c9_272 = arith.constant 9 : index
    %c0_273 = arith.constant 0 : index
    %c0_274 = arith.constant 0 : index
    %296 = vector.load %arg9[%c9_272, %c0_273, %c0_274] : memref<16x2x32xbf16, #tpu.memory_space<vmem>>, vector<1x2x32xbf16>
    %297 = vector.shape_cast %296 : vector<1x2x32xbf16> to vector<2x32xbf16>
    %cst_275 = arith.constant dense<0.000000e+00> : vector<2x64xf32>
    %298 = tpu.matmul %297, %222, %cst_275 {dimension_numbers = #tpu.dot_dimension_numbers<[1], [0], [0], [1], [0, 0, 1, 1], [], []>} : vector<2x32xbf16>, vector<32x64xbf16>, vector<2x64xf32> -> vector<2x64xf32>
    %299 = arith.truncf %298 : vector<2x64xf32> to vector<2x64xbf16>
    %c9_276 = arith.constant 9 : index
    %c0_277 = arith.constant 0 : index
    %c0_278 = arith.constant 0 : index
    %300 = vector.load %arg10[%c9_276, %c0_277, %c0_278] : memref<16x64x512xbf16, #tpu.memory_space<vmem>>, vector<1x64x512xbf16>
    %301 = vector.shape_cast %300 : vector<1x64x512xbf16> to vector<64x512xbf16>
    %cst_279 = arith.constant dense<0.000000e+00> : vector<2x512xf32>
    %302 = tpu.matmul %299, %301, %cst_279 {dimension_numbers = #tpu.dot_dimension_numbers<[1], [0], [0], [1], [0, 0, 1, 1], [], []>} : vector<2x64xbf16>, vector<64x512xbf16>, vector<2x512xf32> -> vector<2x512xf32>
    %303 = arith.addf %295, %302 : vector<2x512xf32>
    %c10_280 = arith.constant 10 : index
    %c0_281 = arith.constant 0 : index
    %c0_282 = arith.constant 0 : index
    %304 = vector.load %arg9[%c10_280, %c0_281, %c0_282] : memref<16x2x32xbf16, #tpu.memory_space<vmem>>, vector<1x2x32xbf16>
    %305 = vector.shape_cast %304 : vector<1x2x32xbf16> to vector<2x32xbf16>
    %cst_283 = arith.constant dense<0.000000e+00> : vector<2x64xf32>
    %306 = tpu.matmul %305, %222, %cst_283 {dimension_numbers = #tpu.dot_dimension_numbers<[1], [0], [0], [1], [0, 0, 1, 1], [], []>} : vector<2x32xbf16>, vector<32x64xbf16>, vector<2x64xf32> -> vector<2x64xf32>
    %307 = arith.truncf %306 : vector<2x64xf32> to vector<2x64xbf16>
    %c10_284 = arith.constant 10 : index
    %c0_285 = arith.constant 0 : index
    %c0_286 = arith.constant 0 : index
    %308 = vector.load %arg10[%c10_284, %c0_285, %c0_286] : memref<16x64x512xbf16, #tpu.memory_space<vmem>>, vector<1x64x512xbf16>
    %309 = vector.shape_cast %308 : vector<1x64x512xbf16> to vector<64x512xbf16>
    %cst_287 = arith.constant dense<0.000000e+00> : vector<2x512xf32>
    %310 = tpu.matmul %307, %309, %cst_287 {dimension_numbers = #tpu.dot_dimension_numbers<[1], [0], [0], [1], [0, 0, 1, 1], [], []>} : vector<2x64xbf16>, vector<64x512xbf16>, vector<2x512xf32> -> vector<2x512xf32>
    %311 = arith.addf %303, %310 : vector<2x512xf32>
    %c11_288 = arith.constant 11 : index
    %c0_289 = arith.constant 0 : index
    %c0_290 = arith.constant 0 : index
    %312 = vector.load %arg9[%c11_288, %c0_289, %c0_290] : memref<16x2x32xbf16, #tpu.memory_space<vmem>>, vector<1x2x32xbf16>
    %313 = vector.shape_cast %312 : vector<1x2x32xbf16> to vector<2x32xbf16>
    %cst_291 = arith.constant dense<0.000000e+00> : vector<2x64xf32>
    %314 = tpu.matmul %313, %222, %cst_291 {dimension_numbers = #tpu.dot_dimension_numbers<[1], [0], [0], [1], [0, 0, 1, 1], [], []>} : vector<2x32xbf16>, vector<32x64xbf16>, vector<2x64xf32> -> vector<2x64xf32>
    %315 = arith.truncf %314 : vector<2x64xf32> to vector<2x64xbf16>
    %c11_292 = arith.constant 11 : index
    %c0_293 = arith.constant 0 : index
    %c0_294 = arith.constant 0 : index
    %316 = vector.load %arg10[%c11_292, %c0_293, %c0_294] : memref<16x64x512xbf16, #tpu.memory_space<vmem>>, vector<1x64x512xbf16>
    %317 = vector.shape_cast %316 : vector<1x64x512xbf16> to vector<64x512xbf16>
    %cst_295 = arith.constant dense<0.000000e+00> : vector<2x512xf32>
    %318 = tpu.matmul %315, %317, %cst_295 {dimension_numbers = #tpu.dot_dimension_numbers<[1], [0], [0], [1], [0, 0, 1, 1], [], []>} : vector<2x64xbf16>, vector<64x512xbf16>, vector<2x512xf32> -> vector<2x512xf32>
    %319 = arith.addf %311, %318 : vector<2x512xf32>
    %c12_296 = arith.constant 12 : index
    %c0_297 = arith.constant 0 : index
    %c0_298 = arith.constant 0 : index
    %320 = vector.load %arg9[%c12_296, %c0_297, %c0_298] : memref<16x2x32xbf16, #tpu.memory_space<vmem>>, vector<1x2x32xbf16>
    %321 = vector.shape_cast %320 : vector<1x2x32xbf16> to vector<2x32xbf16>
    %cst_299 = arith.constant dense<0.000000e+00> : vector<2x64xf32>
    %322 = tpu.matmul %321, %222, %cst_299 {dimension_numbers = #tpu.dot_dimension_numbers<[1], [0], [0], [1], [0, 0, 1, 1], [], []>} : vector<2x32xbf16>, vector<32x64xbf16>, vector<2x64xf32> -> vector<2x64xf32>
    %323 = arith.truncf %322 : vector<2x64xf32> to vector<2x64xbf16>
    %c12_300 = arith.constant 12 : index
    %c0_301 = arith.constant 0 : index
    %c0_302 = arith.constant 0 : index
    %324 = vector.load %arg10[%c12_300, %c0_301, %c0_302] : memref<16x64x512xbf16, #tpu.memory_space<vmem>>, vector<1x64x512xbf16>
    %325 = vector.shape_cast %324 : vector<1x64x512xbf16> to vector<64x512xbf16>
    %cst_303 = arith.constant dense<0.000000e+00> : vector<2x512xf32>
    %326 = tpu.matmul %323, %325, %cst_303 {dimension_numbers = #tpu.dot_dimension_numbers<[1], [0], [0], [1], [0, 0, 1, 1], [], []>} : vector<2x64xbf16>, vector<64x512xbf16>, vector<2x512xf32> -> vector<2x512xf32>
    %327 = arith.addf %319, %326 : vector<2x512xf32>
    %c13_304 = arith.constant 13 : index
    %c0_305 = arith.constant 0 : index
    %c0_306 = arith.constant 0 : index
    %328 = vector.load %arg9[%c13_304, %c0_305, %c0_306] : memref<16x2x32xbf16, #tpu.memory_space<vmem>>, vector<1x2x32xbf16>
    %329 = vector.shape_cast %328 : vector<1x2x32xbf16> to vector<2x32xbf16>
    %cst_307 = arith.constant dense<0.000000e+00> : vector<2x64xf32>
    %330 = tpu.matmul %329, %222, %cst_307 {dimension_numbers = #tpu.dot_dimension_numbers<[1], [0], [0], [1], [0, 0, 1, 1], [], []>} : vector<2x32xbf16>, vector<32x64xbf16>, vector<2x64xf32> -> vector<2x64xf32>
    %331 = arith.truncf %330 : vector<2x64xf32> to vector<2x64xbf16>
    %c13_308 = arith.constant 13 : index
    %c0_309 = arith.constant 0 : index
    %c0_310 = arith.constant 0 : index
    %332 = vector.load %arg10[%c13_308, %c0_309, %c0_310] : memref<16x64x512xbf16, #tpu.memory_space<vmem>>, vector<1x64x512xbf16>
    %333 = vector.shape_cast %332 : vector<1x64x512xbf16> to vector<64x512xbf16>
    %cst_311 = arith.constant dense<0.000000e+00> : vector<2x512xf32>
    %334 = tpu.matmul %331, %333, %cst_311 {dimension_numbers = #tpu.dot_dimension_numbers<[1], [0], [0], [1], [0, 0, 1, 1], [], []>} : vector<2x64xbf16>, vector<64x512xbf16>, vector<2x512xf32> -> vector<2x512xf32>
    %335 = arith.addf %327, %334 : vector<2x512xf32>
    %c14_312 = arith.constant 14 : index
    %c0_313 = arith.constant 0 : index
    %c0_314 = arith.constant 0 : index
    %336 = vector.load %arg9[%c14_312, %c0_313, %c0_314] : memref<16x2x32xbf16, #tpu.memory_space<vmem>>, vector<1x2x32xbf16>
    %337 = vector.shape_cast %336 : vector<1x2x32xbf16> to vector<2x32xbf16>
    %cst_315 = arith.constant dense<0.000000e+00> : vector<2x64xf32>
    %338 = tpu.matmul %337, %222, %cst_315 {dimension_numbers = #tpu.dot_dimension_numbers<[1], [0], [0], [1], [0, 0, 1, 1], [], []>} : vector<2x32xbf16>, vector<32x64xbf16>, vector<2x64xf32> -> vector<2x64xf32>
    %339 = arith.truncf %338 : vector<2x64xf32> to vector<2x64xbf16>
    %c14_316 = arith.constant 14 : index
    %c0_317 = arith.constant 0 : index
    %c0_318 = arith.constant 0 : index
    %340 = vector.load %arg10[%c14_316, %c0_317, %c0_318] : memref<16x64x512xbf16, #tpu.memory_space<vmem>>, vector<1x64x512xbf16>
    %341 = vector.shape_cast %340 : vector<1x64x512xbf16> to vector<64x512xbf16>
    %cst_319 = arith.constant dense<0.000000e+00> : vector<2x512xf32>
    %342 = tpu.matmul %339, %341, %cst_319 {dimension_numbers = #tpu.dot_dimension_numbers<[1], [0], [0], [1], [0, 0, 1, 1], [], []>} : vector<2x64xbf16>, vector<64x512xbf16>, vector<2x512xf32> -> vector<2x512xf32>
    %343 = arith.addf %335, %342 : vector<2x512xf32>
    %c15_320 = arith.constant 15 : index
    %c0_321 = arith.constant 0 : index
    %c0_322 = arith.constant 0 : index
    %344 = vector.load %arg9[%c15_320, %c0_321, %c0_322] : memref<16x2x32xbf16, #tpu.memory_space<vmem>>, vector<1x2x32xbf16>
    %345 = vector.shape_cast %344 : vector<1x2x32xbf16> to vector<2x32xbf16>
    %cst_323 = arith.constant dense<0.000000e+00> : vector<2x64xf32>
    %346 = tpu.matmul %345, %222, %cst_323 {dimension_numbers = #tpu.dot_dimension_numbers<[1], [0], [0], [1], [0, 0, 1, 1], [], []>} : vector<2x32xbf16>, vector<32x64xbf16>, vector<2x64xf32> -> vector<2x64xf32>
    %347 = arith.truncf %346 : vector<2x64xf32> to vector<2x64xbf16>
    %c15_324 = arith.constant 15 : index
    %c0_325 = arith.constant 0 : index
    %c0_326 = arith.constant 0 : index
    %348 = vector.load %arg10[%c15_324, %c0_325, %c0_326] : memref<16x64x512xbf16, #tpu.memory_space<vmem>>, vector<1x64x512xbf16>
    %349 = vector.shape_cast %348 : vector<1x64x512xbf16> to vector<64x512xbf16>
    %cst_327 = arith.constant dense<0.000000e+00> : vector<2x512xf32>
    %350 = tpu.matmul %347, %349, %cst_327 {dimension_numbers = #tpu.dot_dimension_numbers<[1], [0], [0], [1], [0, 0, 1, 1], [], []>} : vector<2x64xbf16>, vector<64x512xbf16>, vector<2x512xf32> -> vector<2x512xf32>
    %351 = arith.addf %343, %350 : vector<2x512xf32>
    %c0_328 = arith.constant 0 : index
    %c0_329 = arith.constant 0 : index
    %352 = vector.load %arg11[%c0_328, %c0_329] : memref<1x512xf32, #tpu.memory_space<vmem>>, vector<1x512xf32>
    %353 = vector.broadcast %352 : vector<1x512xf32> to vector<2x512xf32>
    %354 = arith.addf %351, %353 : vector<2x512xf32>
    %cst_330 = arith.constant 0.000000e+00 : f32
    %355 = vector.broadcast %cst_330 : f32 to vector<2x512xf32>
    %356 = arith.maximumf %354, %355 : vector<2x512xf32>
    %357 = arith.truncf %356 : vector<2x512xf32> to vector<2x512xbf16>
    %c0_331 = arith.constant 0 : index
    %c0_332 = arith.constant 0 : index
    %358 = vector.load %arg12[%c0_331, %c0_332] : memref<512x4xbf16, #tpu.memory_space<vmem>>, vector<512x4xbf16>
    %cst_333 = arith.constant dense<0.000000e+00> : vector<2x4xf32>
    %359 = tpu.matmul %357, %358, %cst_333 {dimension_numbers = #tpu.dot_dimension_numbers<[1], [0], [0], [1], [0, 0, 1, 1], [], []>} : vector<2x512xbf16>, vector<512x4xbf16>, vector<2x4xf32> -> vector<2x4xf32>
    %c0_334 = arith.constant 0 : index
    %c0_335 = arith.constant 0 : index
    %360 = vector.load %arg13[%c0_334, %c0_335] : memref<1x4xf32, #tpu.memory_space<vmem>>, vector<1x4xf32>
    %361 = vector.broadcast %360 : vector<1x4xf32> to vector<2x4xf32>
    %362 = arith.addf %359, %361 : vector<2x4xf32>
    %c0_336 = arith.constant 0 : index
    %c0_337 = arith.constant 0 : index
    %363 = vector.load %arg14[%c0_336, %c0_337] : memref<2x4xf32, #tpu.memory_space<vmem>>, vector<2x4xf32>
    tpu.vector_store %arg14[%c0_336, %c0_337], %362 {strides = array<i32>} : memref<2x4xf32, #tpu.memory_space<vmem>>, vector<2x4xf32>,
    return
  }
}

</mosaic_0001>

<bundles_post_ra>
// kernel: dqn_forward.1
= control target key start
LH: loop header
LB: loop body
LE: loop exit
PB: predicated region body
PF: predicated region fallthrough
CT: control target
= control target key end

     0   :  { %v21801_v1 = vmov 0.0   ;;  %vm17183_vm0 = vmmov 0   ;;  %vm288_vm1 = vcmask 523264   ;;  %s21784_s0 = inlined_call_operand.vmem [shape: bf16[450,64], index: 0, kind: input, shape index: {}]   ;;  %s21785_s1 = inlined_call_operand.vmem [shape: bf16[64,32], index: 1, kind: input, shape index: {}]   ;;  %s21786_s2 = inlined_call_operand.vmem [shape: f32[1,32], index: 2, kind: input, shape index: {}]   ;;  %s21787_s3 = inlined_call_operand.vmem [shape: bf16[16,72,450], index: 3, kind: input, shape index: {}]   ;;  %s21788_s4 = inlined_call_operand.vmem [shape: bf16[16,32,64], index: 4, kind: input, shape index: {}]   ;;  %s21789_s5 = inlined_call_operand.vmem [shape: f32[1,64], index: 5, kind: input, shape index: {}]   ;;  %s21790_s6 = inlined_call_operand.vmem [shape: bf16[9,32,72], index: 6, kind: input, shape index: {}]   ;;  %s21791_s7 = inlined_call_operand.vmem [shape: bf16[9,64,64], index: 7, kind: input, shape index: {}]   ;;  %s21792_s8 = inlined_call_operand.vmem [shape: f32[1,64], index: 8, kind: input, shape index: {}]   ;;  %s21793_s9 = inlined_call_operand.vmem [shape: bf16[16,2,32], index: 9, kind: input, shape index: {}]   ;;  %s21794_s10 = inlined_call_operand.vmem [shape: bf16[16,64,512], index: 10, kind: input, shape index: {}]   ;;  %s21795_s11 = inlined_call_operand.vmem [shape: f32[1,512], index: 11, kind: input, shape index: {}]   ;;  %s21796_s12 = inlined_call_operand.vmem [shape: bf16[512,4], index: 12, kind: input, shape index: {}]   ;;  %s21797_s13 = inlined_call_operand.vmem [shape: f32[1,4], index: 13, kind: input, shape index: {}]   ;;  %s21798_s14 = inlined_call_operand.hbm [shape: f32[2,4], index: 14, kind: output, shape index: {}]  }
   0x1   :  { %v16175_v0 = vld [vmem:[%s21785_s1] sm:$0xff]   ;;  %15260 = vmatprep.subr.bf16.mxu0 %v21801_v1  ;;  %v16176_v2 = vld [vmem:[%s21785_s1 + $0x8] sm:$0xff]   ;;  %15268 = vmatprep.mubr.msk.bf16.mxu0 %vm17183_vm0, %v21801_v1  ;;  %v16177_v3 = vld [vmem:[%s21785_s1 + $0x10] sm:$0xff]  }
   0x2   :  { %15261 = vmatpush3.bf16.msra.mxu0 %v16175_v0  ;;  %v16178_v4 = vld [vmem:[%s21785_s1 + $0x18] sm:$0xff]   ;;  %v16179_v5 = vld [vmem:[%s21784_s0] sm:$0xff]   ;;  %v16180_v6 = vld [vmem:[%s21784_s0 + $0x8] sm:$0xff]  }
   0x3   :  { %15262 = vmatprep.subr.bf16.mxu0 %v21801_v1  ;;  %v16181_v7 = vld [vmem:[%s21784_s0 + $0x10] sm:$0xff]   ;;  %v16182_v8 = vld [vmem:[%s21784_s0 + $0x18] sm:$0xff]   ;;  %v16183_v9 = vld [vmem:[%s21784_s0 + $0x20] sm:$0xff]  }
   0x4   :  { %v16184_v10 = vld [vmem:[%s21784_s0 + $0x28] sm:$0xff]   ;;  %v16185_v11 = vld [vmem:[%s21784_s0 + $0x30] sm:$0xff]   ;;  %v16186_v12 = vld [vmem:[%s21784_s0 + $0x38] sm:$0xff]  }
   0x5   :  { %v16187_v13 = vld [vmem:[%s21784_s0 + $0x40] sm:$0xff]   ;;  %v16188_v14 = vld [vmem:[%s21784_s0 + $0x48] sm:$0xff]   ;;  %v16189_v15 = vld [vmem:[%s21784_s0 + $0x50] sm:$0xff]  }
   0x6   :  { %15263 = vmatpush3.bf16.msra.mxu0 %v16176_v2  ;;  %v16190_v16 = vld [vmem:[%s21784_s0 + $0x58] sm:$0xff]   ;;  %v16191_v17 = vld [vmem:[%s21784_s0 + $0x60] sm:$0xff]   ;;  %v16192_v18 = vld [vmem:[%s21784_s0 + $0x68] sm:$0xff]  }
   0x7   :  { %15264 = vmatprep.subr.bf16.mxu0 %v21801_v1  ;;  %v16193_v19 = vld [vmem:[%s21784_s0 + $0x70] sm:$0xff]   ;;  %v16194_v20 = vld [vmem:[%s21784_s0 + $0x78] sm:$0xff]   ;;  %v16195_v21 = vld [vmem:[%s21784_s0 + $0x80] sm:$0xff]  }
   0x8   :  { %v16196_v22 = vld [vmem:[%s21784_s0 + $0x88] sm:$0xff]   ;;  %v16197_v23 = vld [vmem:[%s21784_s0 + $0x90] sm:$0xff]   ;;  %v16198_v24 = vld [vmem:[%s21784_s0 + $0x98] sm:$0xff]  }
   0x9   :  { %v16199_v25 = vld [vmem:[%s21784_s0 + $0xa0] sm:$0xff]   ;;  %v16200_v26 = vld [vmem:[%s21784_s0 + $0xa8] sm:$0xff]   ;;  %v16201_v27 = vld [vmem:[%s21784_s0 + $0xb0] sm:$0xff]  }
   0xa   :  { %15265 = vmatpush3.bf16.msra.mxu0 %v16177_v3  ;;  %v16202_v28 = vld [vmem:[%s21784_s0 + $0xb8] sm:$0xff]   ;;  %v16203_v29 = vld [vmem:[%s21784_s0 + $0xc0] sm:$0xff]   ;;  %v16204_v30 = vld [vmem:[%s21784_s0 + $0xc8] sm:$0xff]  }
   0xb   :  { %15266 = vmatprep.subr.bf16.mxu0 %v21801_v1  ;;  %v16205_v31 = vld [vmem:[%s21784_s0 + $0xd0] sm:$0xff]   ;;  %v17442_v32 = vld [vmem:[%s21786_s2] ss:$0 sm:$0xff]  ;;  %v16206_v33 = vld [vmem:[%s21784_s0 + $0xd8] sm:$0xff]  }
   0xc   :  { %v16210_v42 = vld [vmem:[%s21787_s3 + $0x4] ss:$16 sps:$4 sm:$0xff]   ;;  %v16207_v44 = vld [vmem:[%s21784_s0 + $0xe0] ss:$0 sps:$4 sm:$0x11]  }
   0xd   :  { %885 = vmatprep.mubr.bf16.mxu1 %v16210_v42 }
   0xe   :  { %15267 = vmatpush3.bf16.msra.mxu0 %v16178_v4 }
   0xf   :  { %15408 = vmatprep.subr.bf16.mxu0 %v21801_v1 }
  0x11   :  { %15269 = vmatmul.mubr.msk.bf16.vlgmr.msra.gmra.mrb[0].mxu0 %vm288_vm1, %v16179_v5 }
  0x12   :  { %15272 = vmatprep.mubr.msk.bf16.mxu0 %vm17183_vm0, %v21801_v1 }
  0x19   :  { %15273 = vmatmul.mubr.msk.bf16.gmra.mrb[4].mxu0 %vm288_vm1, %v16180_v6 }
  0x1a   :  { %15276 = vmatprep.mubr.msk.bf16.mxu0 %vm17183_vm0, %v21801_v1 }
  0x21   :  { %15277 = vmatmul.mubr.msk.bf16.gmra.mrb[8].mxu0 %vm288_vm1, %v16181_v7 }
  0x22   :  { %15280 = vmatprep.mubr.msk.bf16.mxu0 %vm17183_vm0, %v21801_v1 }
  0x29   :  { %15281 = vmatmul.mubr.msk.bf16.gmra.mrb[12].mxu0 %vm288_vm1, %v16182_v8 }
  0x2a   :  { %15284 = vmatprep.mubr.msk.bf16.mxu0 %vm17183_vm0, %v21801_v1 }
  0x31   :  { %15285 = vmatmul.mubr.msk.bf16.gmra.mrb[16].mxu0 %vm288_vm1, %v16183_v9 }
  0x32   :  { %15288 = vmatprep.mubr.msk.bf16.mxu0 %vm17183_vm0, %v21801_v1 }
  0x39   :  { %15289 = vmatmul.mubr.msk.bf16.gmra.mrb[20].mxu0 %vm288_vm1, %v16184_v10 }
  0x3a   :  { %15292 = vmatprep.mubr.msk.bf16.mxu0 %vm17183_vm0, %v21801_v1 }
  0x41   :  { %15293 = vmatmul.mubr.msk.bf16.gmra.mrb[24].mxu0 %vm288_vm1, %v16185_v11 }
  0x42   :  { %15296 = vmatprep.mubr.msk.bf16.mxu0 %vm17183_vm0, %v21801_v1 }
  0x49   :  { %15297 = vmatmul.mubr.msk.bf16.gmra.mrb[28].mxu0 %vm288_vm1, %v16186_v12 }
  0x4a   :  { %15300 = vmatprep.mubr.msk.bf16.mxu0 %vm17183_vm0, %v21801_v1 }
  0x51   :  { %15301 = vmatmul.mubr.msk.bf16.gmra.mrb[32].mxu0 %vm288_vm1, %v16187_v13 }
  0x52   :  { %15304 = vmatprep.mubr.msk.bf16.mxu0 %vm17183_vm0, %v21801_v1 }
  0x59   :  { %15305 = vmatmul.mubr.msk.bf16.gmra.mrb[36].mxu0 %vm288_vm1, %v16188_v14 }
  0x5a   :  { %15308 = vmatprep.mubr.msk.bf16.mxu0 %vm17183_vm0, %v21801_v1 }
  0x61   :  { %15309 = vmatmul.mubr.msk.bf16.gmra.mrb[40].mxu0 %vm288_vm1, %v16189_v15 }
  0x62   :  { %15312 = vmatprep.mubr.msk.bf16.mxu0 %vm17183_vm0, %v21801_v1 }
  0x69   :  { %15313 = vmatmul.mubr.msk.bf16.gmra.mrb[44].mxu0 %vm288_vm1, %v16190_v16 }
  0x6a   :  { %15316 = vmatprep.mubr.msk.bf16.mxu0 %vm17183_vm0, %v21801_v1 }
  0x71   :  { %15317 = vmatmul.mubr.msk.bf16.gmra.mrb[48].mxu0 %vm288_vm1, %v16191_v17 }
  0x72   :  { %15320 = vmatprep.mubr.msk.bf16.mxu0 %vm17183_vm0, %v21801_v1 }
  0x79   :  { %15321 = vmatmul.mubr.msk.bf16.gmra.mrb[52].mxu0 %vm288_vm1, %v16192_v18 }
  0x7a   :  { %15324 = vmatprep.mubr.msk.bf16.mxu0 %vm17183_vm0, %v21801_v1 }
  0x81   :  { %15325 = vmatmul.mubr.msk.bf16.gmra.mrb[56].mxu0 %vm288_vm1, %v16193_v19 }
  0x82   :  { %15328 = vmatprep.mubr.msk.bf16.mxu0 %vm17183_vm0, %v21801_v1 }
  0x89   :  { %15329 = vmatmul.mubr.msk.bf16.gmra.mrb[60].mxu0 %vm288_vm1, %v16194_v20 }
  0x8a   :  { %15332 = vmatprep.mubr.msk.bf16.mxu0 %vm17183_vm0, %v21801_v1 }
  0x91   :  { %15333 = vmatmul.mubr.msk.bf16.gmra.mrb[64].mxu0 %vm288_vm1, %v16195_v21 }
  0x92   :  { %15336 = vmatprep.mubr.msk.bf16.mxu0 %vm17183_vm0, %v21801_v1 }
  0x99   :  { %15337 = vmatmul.mubr.msk.bf16.gmra.mrb[68].mxu0 %vm288_vm1, %v16196_v22 }
  0x9a   :  { %15340 = vmatprep.mubr.msk.bf16.mxu0 %vm17183_vm0, %v21801_v1 }
  0xa1   :  { %15341 = vmatmul.mubr.msk.bf16.gmra.mrb[72].mxu0 %vm288_vm1, %v16197_v23 }
  0xa2   :  { %15344 = vmatprep.mubr.msk.bf16.mxu0 %vm17183_vm0, %v21801_v1 }
  0xa9   :  { %15345 = vmatmul.mubr.msk.bf16.gmra.mrb[76].mxu0 %vm288_vm1, %v16198_v24 }
  0xaa   :  { %15348 = vmatprep.mubr.msk.bf16.mxu0 %vm17183_vm0, %v21801_v1 }
  0xb1   :  { %15349 = vmatmul.mubr.msk.bf16.gmra.mrb[80].mxu0 %vm288_vm1, %v16199_v25 }
  0xb2   :  { %15352 = vmatprep.mubr.msk.bf16.mxu0 %vm17183_vm0, %v21801_v1 }
  0xb9   :  { %15353 = vmatmul.mubr.msk.bf16.gmra.mrb[84].mxu0 %vm288_vm1, %v16200_v26 }
  0xba   :  { %15356 = vmatprep.mubr.msk.bf16.mxu0 %vm17183_vm0, %v21801_v1 }
  0xc1   :  { %15357 = vmatmul.mubr.msk.bf16.gmra.mrb[88].mxu0 %vm288_vm1, %v16201_v27 }
  0xc2   :  { %15360 = vmatprep.mubr.msk.bf16.mxu0 %vm17183_vm0, %v21801_v1 }
  0xc9   :  { %15361 = vmatmul.mubr.msk.bf16.gmra.mrb[92].mxu0 %vm288_vm1, %v16202_v28 }
  0xca   :  { %15364 = vmatprep.mubr.msk.bf16.mxu0 %vm17183_vm0, %v21801_v1 }
  0xd1   :  { %15365 = vmatmul.mubr.msk.bf16.gmra.mrb[96].mxu0 %vm288_vm1, %v16203_v29 }
  0xd2   :  { %15368 = vmatprep.mubr.msk.bf16.mxu0 %vm17183_vm0, %v21801_v1 }
  0xd9   :  { %15369 = vmatmul.mubr.msk.bf16.gmra.mrb[100].mxu0 %vm288_vm1, %v16204_v30 }
  0xda   :  { %15372 = vmatprep.mubr.msk.bf16.mxu0 %vm17183_vm0, %v21801_v1 }
  0xe1   :  { %15373 = vmatmul.mubr.msk.bf16.gmra.mrb[104].mxu0 %vm288_vm1, %v16205_v31 }
  0xe2   :  { %15376 = vmatprep.mubr.msk.bf16.mxu0 %vm17183_vm0, %v21801_v1 }
  0xe4   :  { %v410_v34 = vpop.f32.mrb[0].mxu0 }
  0xe5   :  { %v411_v35 = vadd.f32 %v17442_v32, %v410_v34  ;;  %v15270_v36 = vpop.f32.mrb[1].mxu0 }
  0xe6   :  { %v413_v37 = vpop.f32.mrb[2].mxu0 }
  0xe7   :  { %v414_v38 = vadd.f32 %v17442_v32, %v413_v37  ;;  %v15271_v39 = vpop.f32.mrb[3].mxu0  ;;  %v640_v40 = vmax.f32 %v411_v35, 0.0 }
  0xe9   :  { %v641_v41 = vmax.f32 %v414_v38, 0.0  ;;  %15377 = vmatmul.mubr.msk.bf16.gmra.mrb[108].mxu0 %vm288_vm1, %v16206_v33 }
  0xea   :  { %15380 = vmatprep.mubr.msk.bf16.mxu0 %vm17183_vm0, %v21801_v1 }
  0xeb   :  { %v17458_v43 = vpack.c.bf16 %v641_v41, %v640_v40 }
  0xec   :  { %v418_v45 = vpop.f32.mrb[4].mxu0 }
  0xed   :  { %v419_v46 = vadd.f32 %v17442_v32, %v418_v45  ;;  %v15274_v47 = vpop.f32.mrb[5].mxu0 }
  0xee   :  { %v421_v48 = vpop.f32.mrb[6].mxu0 }
  0xef   :  { %v422_v49 = vadd.f32 %v17442_v32, %v421_v48  ;;  %v15275_v50 = vpop.f32.mrb[7].mxu0  ;;  %v642_v51 = vmax.f32 %v419_v46, 0.0 }
  0xf1   :  { %v643_v52 = vmax.f32 %v422_v49, 0.0  ;;  %15381 = vmatmul.mubr.msk.bf16.gmra.mrb[112].mxu0 %vm288_vm1, %v16207_v44 }
  0xf2   :  { %15412 = vmatprep.mubr.msk.bf16.mxu0 %vm17183_vm0, %v21801_v1 }
  0xf3   :  { %v17468_v53 = vpack.c.bf16 %v643_v52, %v642_v51 }
  0xf4   :  { %v426_v54 = vpop.f32.mrb[8].mxu0 }
  0xf5   :  { %v427_v55 = vadd.f32 %v17442_v32, %v426_v54  ;;  %v15278_v56 = vpop.f32.mrb[9].mxu0 }
  0xf6   :  { %v429_v57 = vpop.f32.mrb[10].mxu0 }
  0xf7   :  { %v430_v58 = vadd.f32 %v17442_v32, %v429_v57  ;;  %v15279_v59 = vpop.f32.mrb[11].mxu0  ;;  %v644_v60 = vmax.f32 %v427_v55, 0.0 }
  0xf9   :  { %v645_v61 = vmax.f32 %v430_v58, 0.0 }
  0xfb   :  { %v17472_v62 = vpack.c.bf16 %v645_v61, %v644_v60 }
  0xfc   :  { %v434_v63 = vpop.f32.mrb[12].mxu0 }
  0xfd   :  { %v435_v0 = vadd.f32 %v17442_v32, %v434_v63  ;;  %v15282_v2 = vpop.f32.mrb[13].mxu0 }
  0xfe   :  { %v437_v3 = vpop.f32.mrb[14].mxu0 }
  0xff   :  { %v438_v4 = vadd.f32 %v17442_v32, %v437_v3  ;;  %v15283_v5 = vpop.f32.mrb[15].mxu0  ;;  %v646_v6 = vmax.f32 %v435_v0, 0.0 }
 0x101   :  { %v647_v7 = vmax.f32 %v438_v4, 0.0 }
 0x103   :  { %v17476_v8 = vpack.c.bf16 %v647_v7, %v646_v6 }
 0x104   :  { %v442_v9 = vpop.f32.mrb[16].mxu0 }
 0x105   :  { %v443_v10 = vadd.f32 %v17442_v32, %v442_v9  ;;  %v15286_v11 = vpop.f32.mrb[17].mxu0 }
 0x106   :  { %v445_v12 = vpop.f32.mrb[18].mxu0 }
 0x107   :  { %v446_v13 = vadd.f32 %v17442_v32, %v445_v12  ;;  %v15287_v14 = vpop.f32.mrb[19].mxu0  ;;  %v648_v15 = vmax.f32 %v443_v10, 0.0 }
 0x109   :  { %v649_v16 = vmax.f32 %v446_v13, 0.0 }
 0x10b   :  { %v17480_v17 = vpack.c.bf16 %v649_v16, %v648_v15 }
 0x10c   :  { %v450_v18 = vpop.f32.mrb[20].mxu0 }
 0x10d   :  { %v451_v19 = vadd.f32 %v17442_v32, %v450_v18  ;;  %v15290_v20 = vpop.f32.mrb[21].mxu0 }
 0x10e   :  { %v453_v21 = vpop.f32.mrb[22].mxu0 }
 0x10f   :  { %v454_v22 = vadd.f32 %v17442_v32, %v453_v21  ;;  %v15291_v23 = vpop.f32.mrb[23].mxu0  ;;  %v650_v24 = vmax.f32 %v451_v19, 0.0 }
 0x111   :  { %v651_v25 = vmax.f32 %v454_v22, 0.0 }
 0x113   :  { %v17484_v26 = vpack.c.bf16 %v651_v25, %v650_v24 }
 0x114   :  { %v458_v27 = vpop.f32.mrb[24].mxu0 }
 0x115   :  { %v459_v28 = vadd.f32 %v17442_v32, %v458_v27  ;;  %v15294_v29 = vpop.f32.mrb[25].mxu0 }
 0x116   :  { %v461_v30 = vpop.f32.mrb[26].mxu0 }
 0x117   :  { %v462_v31 = vadd.f32 %v17442_v32, %v461_v30  ;;  %v15295_v33 = vpop.f32.mrb[27].mxu0  ;;  %v652_v34 = vmax.f32 %v459_v28, 0.0 }
 0x119   :  { %v653_v35 = vmax.f32 %v462_v31, 0.0 }
 0x11b   :  { %v17488_v36 = vpack.c.bf16 %v653_v35, %v652_v34 }
 0x11c   :  { %v466_v37 = vpop.f32.mrb[28].mxu0 }
 0x11d   :  { %v467_v38 = vadd.f32 %v17442_v32, %v466_v37  ;;  %v15298_v39 = vpop.f32.mrb[29].mxu0 }
 0x11e   :  { %v469_v40 = vpop.f32.mrb[30].mxu0 }
 0x11f   :  { %v470_v41 = vadd.f32 %v17442_v32, %v469_v40  ;;  %v15299_v42 = vpop.f32.mrb[31].mxu0 }
 0x120   :  { %19 = vsyncpa [#allocation3], 0  ;;  %v654_v44 = vmax.f32 %v467_v38, 0.0  ;;  %vm833_vm2 = vcmask 539648   ;;  %vm849_vm3 = vcmask 1040384   ;;  %vm1295_vm4 = vcmask 261120  }
 0x121   :  { %v655_v45 = vmax.f32 %v470_v41, 0.0  ;;  %vm6916_vm5 = vcmask 588800   ;;  %vm6923_vm6 = vcmask 1043456   ;;  %s17185_s1 = smov [#allocation2]   ;;  %vm12469_vm7 = vcmask 25600  }
 0x123   :  { %v17492_v46 = vpack.c.bf16 %v655_v45, %v654_v44 }
 0x124   :  { %v474_v47 = vpop.f32.mrb[32].mxu0 }
 0x125   :  { %v475_v48 = vadd.f32 %v17442_v32, %v474_v47  ;;  %v15302_v49 = vpop.f32.mrb[33].mxu0 }
 0x126   :  { %v477_v50 = vpop.f32.mrb[34].mxu0 }
 0x127   :  { %v478_v51 = vadd.f32 %v17442_v32, %v477_v50  ;;  %v15303_v52 = vpop.f32.mrb[35].mxu0  ;;  %v656_v54 = vmax.f32 %v475_v48, 0.0 }
 0x129   :  { %v657_v55 = vmax.f32 %v478_v51, 0.0 }
 0x12b   :  { %v17496_v56 = vpack.c.bf16 %v657_v55, %v656_v54 }
 0x12c   :  { %v482_v57 = vpop.f32.mrb[36].mxu0 }
 0x12d   :  { %21805 = vst [vmem:[#allocation5_spill] sm:$0xff] %v17496_v56  ;;  %v483_v58 = vadd.f32 %v17442_v32, %v482_v57  ;;  %v15306_v59 = vpop.f32.mrb[37].mxu0  ;;  %14203 = vmatprep.subr.bf16.mxu1 %v17496_v56 }
 0x12e   :  { %v485_v60 = vpop.f32.mrb[38].mxu0  ;;  %14204 = vmatpush3.bf16.msra.mxu1 %v17458_v43 }
 0x12f   :  { %v486_v61 = vadd.f32 %v17442_v32, %v485_v60  ;;  %v15307_v63 = vpop.f32.mrb[39].mxu0  ;;  %v658_v0 = vmax.f32 %v483_v58, 0.0 }
 0x131   :  { %v659_v2 = vmax.f32 %v486_v61, 0.0 }
 0x133   :  { %v17502_v3 = vpack.c.bf16 %v659_v2, %v658_v0 }
 0x134   :  { %v490_v4 = vpop.f32.mrb[40].mxu0 }
 0x135   :  { %v491_v5 = vadd.f32 %v17442_v32, %v490_v4  ;;  %v15310_v6 = vpop.f32.mrb[41].mxu0  ;;  %14205 = vmatprep.subr.bf16.mxu1 %v17502_v3 }
 0x136   :  { %v493_v7 = vpop.f32.mrb[42].mxu0  ;;  %14206 = vmatpush3.bf16.msra.mxu1 %v17468_v53 }
 0x137   :  { %v494_v9 = vadd.f32 %v17442_v32, %v493_v7  ;;  %v15311_v10 = vpop.f32.mrb[43].mxu0  ;;  %v660_v11 = vmax.f32 %v491_v5, 0.0 }
 0x138   :  { %v16208_v10 = vld [vmem:[%s21787_s3] ss:$16 sps:$4 sm:$0xff]  }
 0x139   :  { %v661_v12 = vmax.f32 %v494_v9, 0.0 }
 0x13b   :  { %v17508_v13 = vpack.c.bf16 %v661_v12, %v660_v11  ;;  %v16211_v12 = vld [vmem:[%s21787_s3 + $0x24] ss:$16 sps:$4 sm:$0xff]  }
 0x13c   :  { %v498_v14 = vpop.f32.mrb[44].mxu0 }
 0x13d   :  { %v499_v15 = vadd.f32 %v17442_v32, %v498_v14  ;;  %v15314_v16 = vpop.f32.mrb[45].mxu0  ;;  %14207 = vmatprep.subr.bf16.mxu1 %v17508_v13 }
 0x13e   :  { %v501_v18 = vpop.f32.mrb[46].mxu0  ;;  %14208 = vmatpush3.bf16.msra.mxu1 %v17472_v62  ;;  %v21799_v16 = vmov 0  }
 0x13f   :  { %v502_v19 = vadd.f32 %v17442_v32, %v501_v18  ;;  %v15315_v20 = vpop.f32.mrb[47].mxu0  ;;  %v662_v21 = vmax.f32 %v499_v15, 0.0 }
 0x141   :  { %v663_v22 = vmax.f32 %v502_v19, 0.0 }
 0x143   :  { %v17514_v23 = vpack.c.bf16 %v663_v22, %v662_v21 }
 0x144   :  { %v506_v24 = vpop.f32.mrb[48].mxu0 }
 0x145   :  { %v507_v25 = vadd.f32 %v17442_v32, %v506_v24  ;;  %v15318_v27 = vpop.f32.mrb[49].mxu0  ;;  %14209 = vmatprep.subr.bf16.mxu1 %v17514_v23 }
 0x146   :  { %v509_v28 = vpop.f32.mrb[50].mxu0  ;;  %14210 = vmatpush3.bf16.msra.mxu1 %v17476_v8 }
 0x147   :  { %v510_v29 = vadd.f32 %v17442_v32, %v509_v28  ;;  %v15319_v30 = vpop.f32.mrb[51].mxu0  ;;  %v664_v31 = vmax.f32 %v507_v25, 0.0  ;;  %v16213_v25 = vld [vmem:[%s21787_s3 + $0x20] ss:$16 sps:$4 sm:$0xff]   ;;  %v16214_v28 = vld [vmem:[%s21787_s3 + $0x44] ss:$16 sps:$4 sm:$0xff]  }
 0x149   :  { %v665_v33 = vmax.f32 %v510_v29, 0.0 }
 0x14b   :  { %v17520_v34 = vpack.c.bf16 %v665_v33, %v664_v31 }
 0x14c   :  { %v514_v35 = vpop.f32.mrb[52].mxu0 }
 0x14d   :  { %v515_v37 = vadd.f32 %v17442_v32, %v514_v35  ;;  %v15322_v38 = vpop.f32.mrb[53].mxu0  ;;  %14211 = vmatprep.subr.bf16.mxu1 %v17520_v34 }
 0x14e   :  { %v517_v39 = vpop.f32.mrb[54].mxu0  ;;  %14212 = vmatpush3.bf16.msra.mxu1 %v17480_v17 }
 0x14f   :  { %v518_v40 = vadd.f32 %v17442_v32, %v517_v39  ;;  %v15323_v41 = vpop.f32.mrb[55].mxu0  ;;  %v666_v42 = vmax.f32 %v515_v37, 0.0 }
 0x151   :  { %v667_v44 = vmax.f32 %v518_v40, 0.0  ;;  %v16216_v40 = vld [vmem:[%s21787_s3 + $0x40] ss:$16 sps:$4 sm:$0xff]  }
 0x153   :  { %v17526_v45 = vpack.c.bf16 %v667_v44, %v666_v42  ;;  %v16217_v42 = vld [vmem:[%s21787_s3 + $0x64] ss:$16 sps:$4 sm:$0xff]  }
 0x154   :  { %v522_v47 = vpop.f32.mrb[56].mxu0 }
 0x155   :  { %v523_v48 = vadd.f32 %v17442_v32, %v522_v47  ;;  %v15326_v49 = vpop.f32.mrb[57].mxu0  ;;  %14213 = vmatprep.subr.bf16.mxu1 %v17526_v45 }
 0x156   :  { %v525_v50 = vpop.f32.mrb[58].mxu0  ;;  %14214 = vmatpush3.bf16.msra.mxu1 %v17484_v26 }
 0x157   :  { %v526_v51 = vadd.f32 %v17442_v32, %v525_v50  ;;  %v15327_v52 = vpop.f32.mrb[59].mxu0  ;;  %v668_v54 = vmax.f32 %v523_v48, 0.0 }
 0x159   :  { %v669_v55 = vmax.f32 %v526_v51, 0.0  ;;  %v742_v51 = vld [vmem:[%s21787_s3 + $0x80] sm:$0xff] }
 0x15b   :  { %v17532_v57 = vpack.c.bf16 %v669_v55, %v668_v54 }
 0x15c   :  { %v530_v58 = vpop.f32.mrb[60].mxu0 }
 0x15d   :  { %v531_v59 = vadd.f32 %v17442_v32, %v530_v58  ;;  %v15330_v60 = vpop.f32.mrb[61].mxu0  ;;  %14215 = vmatprep.subr.bf16.mxu1 %v17532_v57  ;;  %v16219_v58 = vld [vmem:[%s21787_s3 + $0x60] ss:$16 sps:$4 sm:$0xff]  }
 0x15e   :  { %v533_v61 = vpop.f32.mrb[62].mxu0  ;;  %14216 = vmatpush3.bf16.msra.mxu1 %v17488_v36  ;;  %v12565_v60 = vcombine.high %v742_v51, %v742_v51 }
 0x15f   :  { %v534_v63 = vadd.f32 %v17442_v32, %v533_v61  ;;  %v15331_v0 = vpop.f32.mrb[63].mxu0  ;;  %v670_v2 = vmax.f32 %v531_v59, 0.0 }
 0x161   :  { %v671_v4 = vmax.f32 %v534_v63, 0.0 }
 0x163   :  { %v17538_v5 = vpack.c.bf16 %v671_v4, %v670_v2 }
 0x164   :  { %v538_v6 = vpop.f32.mrb[64].mxu0 }
 0x165   :  { %v539_v7 = vadd.f32 %v17442_v32, %v538_v6  ;;  %v15334_v9 = vpop.f32.mrb[65].mxu0  ;;  %14217 = vmatprep.subr.bf16.mxu1 %v17538_v5 }
 0x166   :  { %v541_v11 = vpop.f32.mrb[66].mxu0  ;;  %14218 = vmatpush3.bf16.msra.mxu1 %v17492_v46 }
 0x167   :  { %v542_v14 = vadd.f32 %v17442_v32, %v541_v11  ;;  %v15335_v15 = vpop.f32.mrb[67].mxu0  ;;  %925 = vmatprep.subr.bf16.mxu1 %v21799_v16  ;;  %v672_v18 = vmax.f32 %v539_v7, 0.0 }
 0x169   :  { %v673_v19 = vmax.f32 %v542_v14, 0.0  ;;  %886 = vmatmul.mubr.bf16.vlgmr.msra.gmra.mrb[0].mxu1 %v16208_v10  ;;  %v12564_v10 = vcombine.low %v742_v51, %v742_v51 }
 0x16a   :  { %893 = vmatprep.mubr.bf16.mxu1 %v16211_v12  ;;  %v16224_v12 = vld [vmem:[%s21787_s3 + $0xc] ss:$16 sps:$4 sm:$0xff]  }
 0x16b   :  { %v17551_v20 = vpack.c.bf16 %v673_v19, %v672_v18 }
 0x16c   :  { %v546_v21 = vpop.f32.mrb[68].mxu0 }
 0x16d   :  { %v547_v22 = vadd.f32 %v17442_v32, %v546_v21  ;;  %v15338_v24 = vpop.f32.mrb[69].mxu0  ;;  %926 = vmatpush1.bf16.msra.mxu1 %v17551_v20 }
 0x16e   :  { %v549_v27 = vpop.f32.mrb[70].mxu0  ;;  %927 = vmatprep.subr.bf16.mxu1 %v21799_v16 }
 0x16f   :  { %v550_v29 = vadd.f32 %v17442_v32, %v549_v27  ;;  %v15339_v30 = vpop.f32.mrb[71].mxu0  ;;  %v674_v31 = vmax.f32 %v547_v22, 0.0 }
 0x171   :  { %v675_v33 = vmax.f32 %v550_v29, 0.0  ;;  %894 = vmatmul.mubr.bf16.gmra.mrb[4].mxu1 %v16213_v25 }
 0x172   :  { %901 = vmatprep.mubr.bf16.mxu1 %v16214_v28 }
 0x173   :  { %v17563_v35 = vpack.c.bf16 %v675_v33, %v674_v31 }
 0x174   :  { %v554_v37 = vpop.f32.mrb[72].mxu0 }
 0x175   :  { %v555_v38 = vadd.f32 %v17442_v32, %v554_v37  ;;  %v15342_v39 = vpop.f32.mrb[73].mxu0  ;;  %928 = vmatpush1.bf16.msra.mxu1 %v17563_v35 }
 0x176   :  { %v557_v41 = vpop.f32.mrb[74].mxu0  ;;  %929 = vmatprep.subr.bf16.mxu1 %v21799_v16 }
 0x177   :  { %v558_v44 = vadd.f32 %v17442_v32, %v557_v41  ;;  %v15343_v47 = vpop.f32.mrb[75].mxu0  ;;  %v676_v48 = vmax.f32 %v555_v38, 0.0 }
 0x179   :  { %v677_v49 = vmax.f32 %v558_v44, 0.0  ;;  %902 = vmatmul.mubr.bf16.gmra.mrb[8].mxu1 %v16216_v40 }
 0x17a   :  { %909 = vmatprep.mubr.bf16.mxu1 %v16217_v42 }
 0x17b   :  { %v17575_v50 = vpack.c.bf16 %v677_v49, %v676_v48  ;;  %v16248_v48 = vld [vmem:[%s21788_s4] sm:$0xff]  }
 0x17c   :  { %v562_v52 = vpop.f32.mrb[76].mxu0  ;;  %15409 = vmatpush3.bf16.msra.mxu0 %v16248_v48 }
 0x17d   :  { %v563_v54 = vadd.f32 %v17442_v32, %v562_v52  ;;  %v15346_v55 = vpop.f32.mrb[77].mxu0  ;;  %930 = vmatpush1.bf16.msra.mxu1 %v17575_v50  ;;  %15410 = vmatprep.subr.bf16.mxu0 %v21801_v1 }
 0x17e   :  { %v565_v59 = vpop.f32.mrb[78].mxu0  ;;  %931 = vmatprep.subr.bf16.mxu1 %v21799_v16 }
 0x17f   :  { %v566_v61 = vadd.f32 %v17442_v32, %v565_v59  ;;  %v15347_v63 = vpop.f32.mrb[79].mxu0  ;;  %v678_v0 = vmax.f32 %v563_v54, 0.0 }
 0x181   :  { %v679_v2 = vmax.f32 %v566_v61, 0.0  ;;  %910 = vmatmul.mubr.bf16.gmra.mrb[12].mxu1 %v16219_v58 }
 0x182   :  { %917 = vmatprep.mubr.bf16.mxu1 %v12565_v60 }
 0x183   :  { %v17587_v4 = vpack.c.bf16 %v679_v2, %v678_v0 }
 0x184   :  { %v570_v6 = vpop.f32.mrb[80].mxu0 }
 0x185   :  { %v571_v7 = vadd.f32 %v17442_v32, %v570_v6  ;;  %v15350_v9 = vpop.f32.mrb[81].mxu0  ;;  %932 = vmatpush1.bf16.msra.mxu1 %v17587_v4 }
 0x186   :  { %v573_v11 = vpop.f32.mrb[82].mxu0  ;;  %933 = vmatprep.subr.bf16.mxu1 %v21799_v16 }
 0x187   :  { %v574_v14 = vadd.f32 %v17442_v32, %v573_v11  ;;  %v15351_v15 = vpop.f32.mrb[83].mxu0  ;;  %v680_v18 = vmax.f32 %v571_v7, 0.0 }
 0x189   :  { %v681_v19 = vmax.f32 %v574_v14, 0.0  ;;  %918 = vmatmul.mubr.bf16.gmra.mrb[16].mxu1 %v12564_v10 }
 0x18a   :  { %12568 = vmatprep.mubr.msk.bf16.mxu1 %vm833_vm2, %v16224_v12 }
 0x18b   :  { %v17597_v21 = vpack.c.bf16 %v681_v19, %v680_v18 }
 0x18c   :  { %v578_v22 = vpop.f32.mrb[84].mxu0 }
 0x18d   :  { %v579_v24 = vadd.f32 %v17442_v32, %v578_v22  ;;  %v15354_v25 = vpop.f32.mrb[85].mxu0  ;;  %934 = vmatpush1.bf16.msra.mxu1 %v17597_v21 }
 0x18e   :  { %v581_v27 = vpop.f32.mrb[86].mxu0  ;;  %935 = vmatprep.subr.bf16.mxu1 %v21799_v16 }
 0x18f   :  { %v582_v28 = vadd.f32 %v17442_v32, %v581_v27  ;;  %v15355_v29 = vpop.f32.mrb[87].mxu0  ;;  %v682_v30 = vmax.f32 %v579_v24, 0.0 }
 0x191   :  { %v683_v31 = vmax.f32 %v582_v28, 0.0 }
 0x193   :  { %v17603_v33 = vpack.c.bf16 %v683_v31, %v682_v30 }
 0x194   :  { %v586_v37 = vpop.f32.mrb[88].mxu0 }
 0x195   :  { %v587_v38 = vadd.f32 %v17442_v32, %v586_v37  ;;  %v15358_v39 = vpop.f32.mrb[89].mxu0  ;;  %936 = vmatpush1.bf16.msra.mxu1 %v17603_v33 }
 0x196   :  { %v589_v40 = vpop.f32.mrb[90].mxu0  ;;  %937 = vmatprep.subr.bf16.mxu1 %v21799_v16 }
 0x197   :  { %v590_v41 = vadd.f32 %v17442_v32, %v589_v40  ;;  %v15359_v42 = vpop.f32.mrb[91].mxu0  ;;  %v684_v44 = vmax.f32 %v587_v38, 0.0 }
 0x199   :  { %v685_v47 = vmax.f32 %v590_v41, 0.0 }
 0x19b   :  { %v17612_v49 = vpack.c.bf16 %v685_v47, %v684_v44 }
 0x19c   :  { %v594_v51 = vpop.f32.mrb[92].mxu0 }
 0x19d   :  { %v595_v52 = vadd.f32 %v17442_v32, %v594_v51  ;;  %v15362_v54 = vpop.f32.mrb[93].mxu0  ;;  %938 = vmatpush1.bf16.msra.mxu1 %v17612_v49 }
 0x19e   :  { %v597_v55 = vpop.f32.mrb[94].mxu0  ;;  %939 = vmatprep.subr.bf16.mxu1 %v21799_v16 }
 0x19f   :  { %v598_v58 = vadd.f32 %v17442_v32, %v597_v55  ;;  %v15363_v59 = vpop.f32.mrb[95].mxu0  ;;  %v686_v60 = vmax.f32 %v595_v52, 0.0 }
 0x1a1   :  { %v687_v61 = vmax.f32 %v598_v58, 0.0 }
 0x1a3   :  { %v17619_v63 = vpack.c.bf16 %v687_v61, %v686_v60 }
 0x1a4   :  { %v602_v0 = vpop.f32.mrb[96].mxu0 }
 0x1a5   :  { %v603_v2 = vadd.f32 %v17442_v32, %v602_v0  ;;  %v15366_v6 = vpop.f32.mrb[97].mxu0  ;;  %940 = vmatpush1.bf16.msra.mxu1 %v17619_v63 }
 0x1a6   :  { %v605_v7 = vpop.f32.mrb[98].mxu0  ;;  %941 = vmatprep.subr.bf16.mxu1 %v21799_v16 }
 0x1a7   :  { %v606_v9 = vadd.f32 %v17442_v32, %v605_v7  ;;  %v15367_v10 = vpop.f32.mrb[99].mxu0  ;;  %v688_v11 = vmax.f32 %v603_v2, 0.0 }
 0x1a9   :  { %v689_v12 = vmax.f32 %v606_v9, 0.0 }
 0x1ab   :  { %v17625_v14 = vpack.c.bf16 %v689_v12, %v688_v11  ;;  %v16222_v12 = vld [vmem:[%s21787_s3 + $0x8] ss:$16 sps:$4 sm:$0xff]  }
 0x1ac   :  { %v610_v15 = vpop.f32.mrb[100].mxu0 }
 0x1ad   :  { %v611_v18 = vadd.f32 %v17442_v32, %v610_v15  ;;  %v15370_v19 = vpop.f32.mrb[101].mxu0  ;;  %942 = vmatpush1.bf16.msra.mxu1 %v17625_v14  ;;  %v16267_v15 = vld [vmem:[%s21788_s4 + $0x8] sm:$0xff]  }
 0x1ae   :  { %v613_v22 = vpop.f32.mrb[102].mxu0  ;;  %943 = vmatprep.subr.bf16.mxu1 %v21799_v16  ;;  %15411 = vmatpush3.bf16.msra.mxu0 %v16267_v15  ;;  %v16228_v19 = vld [vmem:[%s21787_s3 + $0x4c] ss:$16 sps:$4 sm:$0xff]  }
 0x1af   :  { %v614_v24 = vadd.f32 %v17442_v32, %v613_v22  ;;  %v15371_v25 = vpop.f32.mrb[103].mxu0  ;;  %v690_v27 = vmax.f32 %v611_v18, 0.0  ;;  %v16227_v18 = vld [vmem:[%s21787_s3 + $0x28] ss:$16 sps:$4 sm:$0xff]   ;;  %1677 = vmatprep.subr.bf16.mxu0 %v21799_v16 }
 0x1b0   :  { %v16230_v22 = vld [vmem:[%s21787_s3 + $0x48] ss:$16 sps:$4 sm:$0xff]  }
 0x1b1   :  { %v691_v28 = vmax.f32 %v614_v24, 0.0  ;;  %v16231_v24 = vld [vmem:[%s21787_s3 + $0x6c] ss:$16 sps:$4 sm:$0xff]  }
 0x1b2   :  { %v743_v25 = vld [vmem:[%s21787_s3 + $0x88] sm:$0xff] }
 0x1b3   :  { %v17631_v29 = vpack.c.bf16 %v691_v28, %v690_v27  ;;  %v16233_v27 = vld [vmem:[%s21787_s3 + $0x68] ss:$16 sps:$4 sm:$0xff]   ;;  %v12567_v28 = vcombine.high %v743_v25, %v743_v25 }
 0x1b4   :  { %v618_v30 = vpop.f32.mrb[104].mxu0 }
 0x1b5   :  { %v619_v31 = vadd.f32 %v17442_v32, %v618_v30  ;;  %v15374_v37 = vpop.f32.mrb[105].mxu0  ;;  %944 = vmatpush1.bf16.msra.mxu1 %v17631_v29  ;;  %v12566_v30 = vcombine.low %v743_v25, %v743_v25 }
 0x1b6   :  { %v621_v38 = vpop.f32.mrb[106].mxu0  ;;  %945 = vmatprep.subr.bf16.mxu1 %v21799_v16  ;;  %v16236_v37 = vld [vmem:[%s21787_s3 + $0x90] ss:$16 sps:$4 sm:$0xff]  }
 0x1b7   :  { %v622_v39 = vadd.f32 %v17442_v32, %v621_v38  ;;  %v15375_v40 = vpop.f32.mrb[107].mxu0  ;;  %v692_v41 = vmax.f32 %v619_v31, 0.0  ;;  %v16238_v31 = vld [vmem:[%s21787_s3 + $0x94] ss:$16 sps:$4 sm:$0xff]  }
 0x1b8   :  { %v16239_v38 = vld [vmem:[%s21787_s3 + $0xb4] ss:$16 sps:$4 sm:$0xff]  }
 0x1b9   :  { %v693_v42 = vmax.f32 %v622_v39, 0.0  ;;  %v16241_v39 = vld [vmem:[%s21787_s3 + $0xb0] ss:$16 sps:$4 sm:$0xff]   ;;  %v16242_v40 = vld [vmem:[%s21787_s3 + $0xd4] ss:$16 sps:$4 sm:$0xff]  }
 0x1bb   :  { %v17637_v44 = vpack.c.bf16 %v693_v42, %v692_v41  ;;  %v16244_v41 = vld [vmem:[%s21787_s3 + $0xd0] ss:$16 sps:$4 sm:$0xff]   ;;  %v16245_v42 = vld [vmem:[%s21787_s3 + $0xf4] ss:$16 sps:$4 sm:$0xff]  }
 0x1bc   :  { %v626_v47 = vpop.f32.mrb[108].mxu0 }
 0x1bd   :  { %v627_v48 = vadd.f32 %v17442_v32, %v626_v47  ;;  %v15378_v51 = vpop.f32.mrb[109].mxu0  ;;  %946 = vmatpush1.bf16.msra.mxu1 %v17637_v44  ;;  %v12589_v47 = vld [vmem:[%s21787_s3 + $0x110] sm:$0xff] }
 0x1be   :  { %v629_v52 = vpop.f32.mrb[110].mxu0  ;;  %947 = vmatprep.subr.bf16.mxu1 %v21799_v16  ;;  %v12608_v51 = vcombine.high %v12589_v47, %v12589_v47 }
 0x1bf   :  { %v630_v54 = vadd.f32 %v17442_v32, %v629_v52  ;;  %v15379_v55 = vpop.f32.mrb[111].mxu0  ;;  %v694_v58 = vmax.f32 %v627_v48, 0.0  ;;  %v16247_v48 = vld [vmem:[%s21787_s3 + $0xf0] ss:$16 sps:$4 sm:$0xff]   ;;  %v12607_v52 = vcombine.low %v12589_v47, %v12589_v47 }
 0x1c0   :  { %v16251_v55 = vld [vmem:[%s21787_s3 + $0x98] ss:$16 sps:$4 sm:$0xff]  }
 0x1c1   :  { %v695_v59 = vmax.f32 %v630_v54, 0.0  ;;  %v16253_v54 = vld [vmem:[%s21787_s3 + $0x9c] ss:$16 sps:$4 sm:$0xff]  }
 0x1c3   :  { %v17643_v60 = vpack.c.bf16 %v695_v59, %v694_v58  ;;  %v16254_v58 = vld [vmem:[%s21788_s4 + $0x10] sm:$0xff]   ;;  %v16256_v59 = vld [vmem:[%s21787_s3 + $0xbc] ss:$16 sps:$4 sm:$0xff]  }
 0x1c4   :  { %v634_v61 = vpop.f32.mrb[112].mxu0 }
 0x1c5   :  { %v635_v0 = vadd.f32 %v17442_v32, %v634_v61  ;;  %v15382_v2 = vpop.f32.mrb[113].mxu0  ;;  %948 = vmatpush1.bf16.msra.mxu1 %v17643_v60  ;;  %v16225_v32 = vld [vmem:[%s21787_s3 + $0x2c] ss:$16 sps:$4 sm:$0xff]  }
 0x1c6   :  { %v637_v6 = vpop.f32.mrb[114].mxu0  ;;  %949 = vmatprep.subr.bf16.mxu1 %v21799_v16  ;;  %v16255_v61 = vld [vmem:[%s21788_s4 + $0x18] sm:$0xff]  }
 0x1c7   :  { %v696_v7 = vmax.f32 %v635_v0, 0.0  ;;  %v15383_v9 = vpop.f32.mrb[115].mxu0  ;;  %v16258_v0 = vld [vmem:[%s21787_s3 + $0xb8] ss:$16 sps:$4 sm:$0xff]   ;;  %v16259_v2 = vld [vmem:[%s21787_s3 + $0xdc] ss:$16 sps:$4 sm:$0xff]  }
 0x1c8   :  { %v16261_v6 = vld [vmem:[%s21787_s3 + $0xd8] ss:$16 sps:$4 sm:$0xff]  }
 0x1c9   :  { %v725_v10 = vpack.c.bf16 %v696_v7, %v696_v7  ;;  %v16262_v7 = vld [vmem:[%s21787_s3 + $0xfc] ss:$16 sps:$4 sm:$0xff]  }
 0x1cb   :  { %v17648_v11 = vsel %vm849_vm3, %v725_v10, 0  ;;  %v12590_v10 = vld [vmem:[%s21787_s3 + $0x118] sm:$0xff] }
 0x1cc   :  { %950 = vmatpush1.bf16.msra.mxu1 %v17648_v11 }
 0x1cd   :  { %14249 = vmatprep.subr.bf16.mxu1 %v17496_v56 }
 0x1cf   :  { %958 = vmatmul.mubr.bf16.vlgmr.msra.gmra.mrb[20].mxu1 %v16222_v12 }
 0x1d0   :  { %14250 = vmatpush3.bf16.msra.mxu1 %v17458_v43  ;;  %12569 = vmatprep.mubr.msk.bf16.mxu1 %vm833_vm2, %v16225_v32 }
 0x1d1   :  { %14251 = vmatprep.subr.bf16.mxu1 %v17502_v3 }
 0x1d4   :  { %14252 = vmatpush3.bf16.msra.mxu1 %v17468_v53 }
 0x1d5   :  { %14253 = vmatprep.subr.bf16.mxu1 %v17508_v13 }
 0x1d7   :  { %966 = vmatmul.mubr.bf16.gmra.mrb[24].mxu1 %v16227_v18  ;;  %v16264_v18 = vld [vmem:[%s21787_s3 + $0xf8] ss:$16 sps:$4 sm:$0xff]  }
 0x1d8   :  { %14254 = vmatpush3.bf16.msra.mxu1 %v17472_v62  ;;  %12570 = vmatprep.mubr.msk.bf16.mxu1 %vm833_vm2, %v16228_v19 }
 0x1d9   :  { %14255 = vmatprep.subr.bf16.mxu1 %v17514_v23 }
 0x1dc   :  { %14256 = vmatpush3.bf16.msra.mxu1 %v17476_v8 }
 0x1dd   :  { %14257 = vmatprep.subr.bf16.mxu1 %v17520_v34 }
 0x1df   :  { %974 = vmatmul.mubr.bf16.gmra.mrb[28].mxu1 %v16230_v22  ;;  %v12610_v22 = vcombine.high %v12590_v10, %v12590_v10 }
 0x1e0   :  { %14258 = vmatpush3.bf16.msra.mxu1 %v17480_v17  ;;  %12571 = vmatprep.mubr.msk.bf16.mxu1 %vm833_vm2, %v16231_v24 }
 0x1e1   :  { %14259 = vmatprep.subr.bf16.mxu1 %v17526_v45 }
 0x1e4   :  { %14260 = vmatpush3.bf16.msra.mxu1 %v17484_v26 }
 0x1e5   :  { %14261 = vmatprep.subr.bf16.mxu1 %v17532_v57 }
 0x1e7   :  { %982 = vmatmul.mubr.bf16.gmra.mrb[32].mxu1 %v16233_v27 }
 0x1e8   :  { %14262 = vmatpush3.bf16.msra.mxu1 %v17488_v36  ;;  %12572 = vmatprep.mubr.msk.bf16.mxu1 %vm833_vm2, %v12567_v28 }
 0x1e9   :  { %14263 = vmatprep.subr.bf16.mxu1 %v17538_v5 }
 0x1ec   :  { %14264 = vmatpush3.bf16.msra.mxu1 %v17492_v46 }
 0x1ed   :  { %1201 = vmatprep.subr.bf16.mxu1 %v21799_v16 }
 0x1ef   :  { %990 = vmatmul.mubr.bf16.gmra.mrb[36].mxu1 %v12566_v30 }
 0x1f0   :  { %1161 = vmatprep.mubr.bf16.mxu1 %v16238_v31  ;;  %v12609_v31 = vcombine.low %v12590_v10, %v12590_v10 }
 0x1f7   :  { %1162 = vmatmul.mubr.bf16.vlgmr.msra.gmra.mrb[40].mxu1 %v16236_v37 }
 0x1f8   :  { %1202 = vmatpush1.bf16.msra.mxu1 %v17551_v20  ;;  %1169 = vmatprep.mubr.bf16.mxu1 %v16239_v38 }
 0x1f9   :  { %1203 = vmatprep.subr.bf16.mxu1 %v21799_v16 }
 0x1fc   :  { %1204 = vmatpush1.bf16.msra.mxu1 %v17563_v35 }
 0x1fd   :  { %1205 = vmatprep.subr.bf16.mxu1 %v21799_v16 }
 0x1ff   :  { %1170 = vmatmul.mubr.bf16.gmra.mrb[44].mxu1 %v16241_v39 }
 0x200   :  { %1206 = vmatpush1.bf16.msra.mxu1 %v17575_v50  ;;  %1177 = vmatprep.mubr.bf16.mxu1 %v16242_v40 }
 0x201   :  { %1207 = vmatprep.subr.bf16.mxu1 %v21799_v16 }
 0x204   :  { %1208 = vmatpush1.bf16.msra.mxu1 %v17587_v4 }
 0x205   :  { %1209 = vmatprep.subr.bf16.mxu1 %v21799_v16 }
 0x207   :  { %1178 = vmatmul.mubr.bf16.gmra.mrb[48].mxu1 %v16244_v41 }
 0x208   :  { %1210 = vmatpush1.bf16.msra.mxu1 %v17597_v21  ;;  %1185 = vmatprep.mubr.bf16.mxu1 %v16245_v42 }
 0x209   :  { %1211 = vmatprep.subr.bf16.mxu1 %v21799_v16 }
 0x20c   :  { %1212 = vmatpush1.bf16.msra.mxu1 %v17603_v33 }
 0x20d   :  { %1213 = vmatprep.subr.bf16.mxu1 %v21799_v16 }
 0x20f   :  { %1186 = vmatmul.mubr.bf16.gmra.mrb[52].mxu1 %v16247_v48 }
 0x210   :  { %1214 = vmatpush1.bf16.msra.mxu1 %v17612_v49  ;;  %1193 = vmatprep.mubr.bf16.mxu1 %v12608_v51 }
 0x211   :  { %1215 = vmatprep.subr.bf16.mxu1 %v21799_v16 }
 0x214   :  { %1216 = vmatpush1.bf16.msra.mxu1 %v17619_v63 }
 0x215   :  { %1217 = vmatprep.subr.bf16.mxu1 %v21799_v16 }
 0x217   :  { %1194 = vmatmul.mubr.bf16.gmra.mrb[56].mxu1 %v12607_v52 }
 0x218   :  { %1218 = vmatpush1.bf16.msra.mxu1 %v17625_v14  ;;  %12611 = vmatprep.mubr.msk.bf16.mxu1 %vm833_vm2, %v16253_v54 }
 0x219   :  { %1219 = vmatprep.subr.bf16.mxu1 %v21799_v16 }
 0x21c   :  { %1220 = vmatpush1.bf16.msra.mxu1 %v17631_v29 }
 0x21d   :  { %1221 = vmatprep.subr.bf16.mxu1 %v21799_v16 }
 0x220   :  { %1222 = vmatpush1.bf16.msra.mxu1 %v17637_v44 }
 0x221   :  { %1223 = vmatprep.subr.bf16.mxu1 %v21799_v16 }
 0x224   :  { %1224 = vmatpush1.bf16.msra.mxu1 %v17643_v60 }
 0x225   :  { %1225 = vmatprep.subr.bf16.mxu1 %v21799_v16 }
 0x228   :  { %1226 = vmatpush1.bf16.msra.mxu1 %v17648_v11 }
 0x229   :  { %15384 = vmatprep.subr.bf16.mxu1 %v21801_v1 }
 0x22b   :  { %1234 = vmatmul.mubr.bf16.vlgmr.msra.gmra.mrb[60].mxu1 %v16251_v55 }
 0x22c   :  { %15385 = vmatpush3.bf16.msra.mxu1 %v16254_v58  ;;  %12612 = vmatprep.mubr.msk.bf16.mxu1 %vm833_vm2, %v16256_v59 }
 0x22d   :  { %15386 = vmatprep.subr.bf16.mxu1 %v21801_v1 }
 0x230   :  { %15387 = vmatpush3.bf16.msra.mxu1 %v16255_v61 }
 0x231   :  { %14309 = vmatprep.subr.bf16.mxu1 %v17496_v56 }
 0x233   :  { %1242 = vmatmul.mubr.bf16.gmra.mrb[64].mxu1 %v16258_v0 }
 0x234   :  { %12613 = vmatprep.mubr.msk.bf16.mxu1 %vm833_vm2, %v16259_v2 }
 0x23b   :  { %1250 = vmatmul.mubr.bf16.gmra.mrb[68].mxu1 %v16261_v6 }
 0x23c   :  { %12614 = vmatprep.mubr.msk.bf16.mxu1 %vm833_vm2, %v16262_v7  ;;  %v14219_v9 = vpop.f32.mrb[0].mxu1 }
 0x23d   :  { %v14220_v12 = vpop.f32.mrb[1].mxu1 }
 0x23e   :  { %v14221_v32 = vadd.f32 %v14220_v12, %v14219_v9  ;;  %v14222_v15 = vpop.f32.mrb[2].mxu1 }
 0x23f   :  { %v14223_v19 = vpop.f32.mrb[3].mxu1 }
 0x240   :  { %v14224_v24 = vadd.f32 %v14223_v19, %v14222_v15 }
 0x243   :  { %1258 = vmatmul.mubr.bf16.gmra.mrb[72].mxu1 %v16264_v18 }
 0x244   :  { %12615 = vmatprep.mubr.msk.bf16.mxu1 %vm833_vm2, %v12610_v22  ;;  %v14225_v25 = vpop.f32.mrb[4].mxu1 }
 0x245   :  { %v14226_v27 = vpop.f32.mrb[5].mxu1 }
 0x246   :  { %v14227_v28 = vadd.f32 %v14226_v27, %v14225_v25  ;;  %v14228_v30 = vpop.f32.mrb[6].mxu1 }
 0x247   :  { %v14229_v37 = vpop.f32.mrb[7].mxu1 }
 0x248   :  { %v14230_v38 = vadd.f32 %v14229_v37, %v14228_v30 }
 0x24b   :  { %1266 = vmatmul.mubr.bf16.gmra.mrb[76].mxu1 %v12609_v31 }
 0x24c   :  { %v14231_v39 = vpop.f32.mrb[8].mxu1  ;;  %15388 = vmatprep.mubr.msk.bf16.mxu1 %vm17183_vm0, %v21801_v1 }
 0x24d   :  { %v14232_v40 = vpop.f32.mrb[9].mxu1 }
 0x24e   :  { %v14233_v41 = vadd.f32 %v14232_v40, %v14231_v39  ;;  %v14234_v42 = vpop.f32.mrb[10].mxu1 }
 0x24f   :  { %v14235_v47 = vpop.f32.mrb[11].mxu1 }
 0x250   :  { %v14236_v48 = vadd.f32 %v14235_v47, %v14234_v42 }
 0x254   :  { %v14237_v51 = vpop.f32.mrb[12].mxu1 }
 0x255   :  { %v14238_v52 = vpop.f32.mrb[13].mxu1 }
 0x256   :  { %v14239_v54 = vadd.f32 %v14238_v52, %v14237_v51  ;;  %v14240_v55 = vpop.f32.mrb[14].mxu1 }
 0x257   :  { %v14241_v58 = vpop.f32.mrb[15].mxu1 }
 0x258   :  { %v14242_v59 = vadd.f32 %v14241_v58, %v14240_v55 }
 0x25c   :  { %v14243_v61 = vpop.f32.mrb[16].mxu1 }
 0x25d   :  { %v14244_v0 = vpop.f32.mrb[17].mxu1 }
 0x25e   :  { %v14245_v2 = vadd.f32 %v14244_v0, %v14243_v61  ;;  %v14246_v6 = vpop.f32.mrb[18].mxu1 }
 0x25f   :  { %v14247_v7 = vpop.f32.mrb[19].mxu1 }
 0x2a2   :  { %v959_v9 = vpop.f32.mrb[20].mxu1 }
 0x2a3   :  { %v960_v10 = vadd.f32 %v14221_v32, %v959_v9  ;;  %v961_v12 = vpop.f32.mrb[21].mxu1 }
 0x2a4   :  { %v962_v15 = vpop.f32.mrb[22].mxu1 }
 0x2a5   :  { %v963_v18 = vadd.f32 %v14224_v24, %v962_v15  ;;  %v964_v19 = vpop.f32.mrb[23].mxu1 }
 0x2a7   :  { %v997_v22 = vpack.c.bf16 %v963_v18, %v960_v10  ;;  %v16270_v10 = vld [vmem:[%s21787_s3 + $0x12c] ss:$16 sps:$4 sm:$0xff]  }
 0x2a9   :  { %15413 = vmatmul.mubr.msk.bf16.vlgmr.msra.gmra.mrb[116].mxu0 %vm1295_vm4, %v997_v22 }
 0x2aa   :  { %1678 = vmatpush1.bf16.msra.mxu0 %v17551_v20  ;;  %v967_v25 = vpop.f32.mrb[24].mxu1  ;;  %15416 = vmatprep.mubr.msk.bf16.mxu0 %vm17183_vm0, %v21801_v1 }
 0x2ab   :  { %v968_v27 = vadd.f32 %v14227_v28, %v967_v25  ;;  %v969_v30 = vpop.f32.mrb[25].mxu1  ;;  %1679 = vmatprep.subr.bf16.mxu0 %v21799_v16 }
 0x2ac   :  { %v970_v31 = vpop.f32.mrb[26].mxu1 }
 0x2ad   :  { %v971_v32 = vadd.f32 %v14230_v38, %v970_v31  ;;  %v972_v37 = vpop.f32.mrb[27].mxu1 }
 0x2ae   :  { %1680 = vmatpush1.bf16.msra.mxu0 %v17563_v35 }
 0x2af   :  { %v998_v24 = vpack.c.bf16 %v971_v32, %v968_v27  ;;  %1681 = vmatprep.subr.bf16.mxu0 %v21799_v16 }
 0x2b1   :  { %15417 = vmatmul.mubr.msk.bf16.gmra.mrb[120].mxu0 %vm1295_vm4, %v998_v24 }
 0x2b2   :  { %1682 = vmatpush1.bf16.msra.mxu0 %v17575_v50  ;;  %v975_v39 = vpop.f32.mrb[28].mxu1  ;;  %15420 = vmatprep.mubr.msk.bf16.mxu0 %vm17183_vm0, %v21801_v1 }
 0x2b3   :  { %v976_v28 = vadd.f32 %v14233_v41, %v975_v39  ;;  %v977_v40 = vpop.f32.mrb[29].mxu1  ;;  %1683 = vmatprep.subr.bf16.mxu0 %v21799_v16  ;;  %v16268_v39 = vld [vmem:[%s21787_s3 + $0x128] ss:$16 sps:$4 sm:$0xff]  }
 0x2b4   :  { %v978_v42 = vpop.f32.mrb[30].mxu1  ;;  %v16271_v40 = vld [vmem:[%s21787_s3 + $0x14c] ss:$16 sps:$4 sm:$0xff]  }
 0x2b5   :  { %v979_v38 = vadd.f32 %v14236_v48, %v978_v42  ;;  %v980_v47 = vpop.f32.mrb[31].mxu1 }
 0x2b6   :  { %1684 = vmatpush1.bf16.msra.mxu0 %v17587_v4 }
 0x2b7   :  { %v999_v51 = vpack.c.bf16 %v979_v38, %v976_v28  ;;  %1685 = vmatprep.subr.bf16.mxu0 %v21799_v16 }
 0x2b9   :  { %15421 = vmatmul.mubr.msk.bf16.gmra.mrb[124].mxu0 %vm1295_vm4, %v999_v51 }
 0x2ba   :  { %1686 = vmatpush1.bf16.msra.mxu0 %v17597_v21  ;;  %v983_v52 = vpop.f32.mrb[32].mxu1  ;;  %15424 = vmatprep.mubr.msk.bf16.mxu0 %vm17183_vm0, %v21801_v1 }
 0x2bb   :  { %v984_v41 = vadd.f32 %v14239_v54, %v983_v52  ;;  %v985_v55 = vpop.f32.mrb[33].mxu1  ;;  %1687 = vmatprep.subr.bf16.mxu0 %v21799_v16 }
 0x2bc   :  { %v986_v58 = vpop.f32.mrb[34].mxu1 }
 0x2bd   :  { %v987_v48 = vadd.f32 %v14242_v59, %v986_v58  ;;  %v988_v61 = vpop.f32.mrb[35].mxu1  ;;  %v16274_v58 = vld [vmem:[%s21787_s3 + $0x16c] ss:$16 sps:$4 sm:$0xff]  }
 0x2be   :  { %1688 = vmatpush1.bf16.msra.mxu0 %v17603_v33 }
 0x2bf   :  { %v1000_v0 = vpack.c.bf16 %v987_v48, %v984_v41  ;;  %1689 = vmatprep.subr.bf16.mxu0 %v21799_v16  ;;  %v16273_v41 = vld [vmem:[%s21787_s3 + $0x148] ss:$16 sps:$4 sm:$0xff]  }
 0x2c1   :  { %15425 = vmatmul.mubr.msk.bf16.gmra.mrb[128].mxu0 %vm1295_vm4, %v1000_v0 }
 0x2c2   :  { %1690 = vmatpush1.bf16.msra.mxu0 %v17612_v49  ;;  %v991_v6 = vpop.f32.mrb[36].mxu1  ;;  %15428 = vmatprep.mubr.msk.bf16.mxu0 %vm17183_vm0, %v21801_v1 }
 0x2c3   :  { %v992_v54 = vadd.f32 %v14245_v2, %v991_v6  ;;  %v993_v7 = vpop.f32.mrb[37].mxu1  ;;  %1691 = vmatprep.subr.bf16.mxu0 %v21799_v16 }
 0x2c4   :  { %v994_v9 = vpop.f32.mrb[38].mxu1  ;;  %v16276_v7 = vld [vmem:[%s21787_s3 + $0x168] ss:$16 sps:$4 sm:$0xff]  }
 0x2c5   :  { %v995_v59 = vpop.f32.mrb[39].mxu1  ;;  %v1001_v12 = vpack.c.bf16 %v992_v54, %v992_v54 }
 0x2c6   :  { %1692 = vmatpush1.bf16.msra.mxu0 %v17619_v63  ;;  %v16277_v59 = vld [vmem:[%s21787_s3 + $0x18c] ss:$16 sps:$4 sm:$0xff]  }
 0x2c7   :  { %1693 = vmatprep.subr.bf16.mxu0 %v21799_v16 }
 0x2c9   :  { %15429 = vmatmul.mubr.msk.bf16.gmra.mrb[132].mxu0 %vm1295_vm4, %v1001_v12 }
 0x2ca   :  { %1694 = vmatpush1.bf16.msra.mxu0 %v17625_v14  ;;  %v14265_v15 = vpop.f32.mrb[40].mxu1  ;;  %12672 = vmatprep.mubr.msk.bf16.mxu0 %vm833_vm2, %v16270_v10 }
 0x2cb   :  { %v14266_v2 = vpop.f32.mrb[41].mxu1  ;;  %1695 = vmatprep.subr.bf16.mxu0 %v21799_v16 }
 0x2cc   :  { %v17830_v18 = vadd.f32 %v14266_v2, %v14265_v15  ;;  %v14268_v19 = vpop.f32.mrb[42].mxu1 }
 0x2cd   :  { %v14269_v22 = vpop.f32.mrb[43].mxu1 }
 0x2ce   :  { %v17832_v25 = vadd.f32 %v14269_v22, %v14268_v19  ;;  %1696 = vmatpush1.bf16.msra.mxu0 %v17631_v29  ;;  %v12651_v19 = vld [vmem:[%s21787_s3 + $0x1a8] sm:$0xff] }
 0x2cf   :  { %1697 = vmatprep.subr.bf16.mxu0 %v21799_v16  ;;  %v16279_v22 = vld [vmem:[%s21787_s3 + $0x188] ss:$16 sps:$4 sm:$0xff]  }
 0x2d2   :  { %1698 = vmatpush1.bf16.msra.mxu0 %v17637_v44  ;;  %v14271_v27 = vpop.f32.mrb[44].mxu1 }
 0x2d3   :  { %1699 = vmatprep.subr.bf16.mxu0 %v21799_v16  ;;  %v14272_v30 = vpop.f32.mrb[45].mxu1 }
 0x2d4   :  { %v17838_v31 = vadd.f32 %v14272_v30, %v14271_v27  ;;  %v14274_v32 = vpop.f32.mrb[46].mxu1  ;;  %v12671_v27 = vcombine.high %v12651_v19, %v12651_v19  ;;  %v12670_v30 = vcombine.low %v12651_v19, %v12651_v19 }
 0x2d5   :  { %v14275_v37 = vpop.f32.mrb[47].mxu1 }
 0x2d6   :  { %1700 = vmatpush1.bf16.msra.mxu0 %v17643_v60  ;;  %v17841_v24 = vadd.f32 %v14275_v37, %v14274_v32  ;;  %v16284_v32 = vld [vmem:[%s21787_s3 + $0x1bc] ss:$16 sps:$4 sm:$0xff]  }
 0x2d7   :  { %1701 = vmatprep.subr.bf16.mxu0 %v21799_v16 }
 0x2da   :  { %1702 = vmatpush1.bf16.msra.mxu0 %v17648_v11  ;;  %v14277_v28 = vpop.f32.mrb[48].mxu1 }
 0x2db   :  { %2062 = vmatprep.subr.bf16.mxu0 %v21799_v16  ;;  %v14278_v42 = vpop.f32.mrb[49].mxu1 }
 0x2dc   :  { %v17852_v38 = vadd.f32 %v14278_v42, %v14277_v28  ;;  %v14280_v47 = vpop.f32.mrb[50].mxu1 }
 0x2dd   :  { %1710 = vmatmul.mubr.bf16.vlgmr.msra.gmra.mrb[136].mxu0 %v16268_v39  ;;  %v14281_v51 = vpop.f32.mrb[51].mxu1 }
 0x2de   :  { %2063 = vmatpush1.bf16.msra.mxu0 %v17551_v20  ;;  %v17855_v52 = vadd.f32 %v14281_v51, %v14280_v47  ;;  %12673 = vmatprep.mubr.msk.bf16.mxu0 %vm833_vm2, %v16271_v40 }
 0x2df   :  { %2064 = vmatprep.subr.bf16.mxu0 %v21799_v16 }
 0x2e2   :  { %2065 = vmatpush1.bf16.msra.mxu0 %v17563_v35  ;;  %v14283_v55 = vpop.f32.mrb[52].mxu1 }
 0x2e3   :  { %2066 = vmatprep.subr.bf16.mxu0 %v21799_v16  ;;  %v14284_v48 = vpop.f32.mrb[53].mxu1 }
 0x2e4   :  { %v17867_v61 = vadd.f32 %v14284_v48, %v14283_v55  ;;  %v14286_v0 = vpop.f32.mrb[54].mxu1 }
 0x2e5   :  { %v14287_v6 = vpop.f32.mrb[55].mxu1  ;;  %1718 = vmatmul.mubr.bf16.gmra.mrb[140].mxu0 %v16273_v41 }
 0x2e6   :  { %2067 = vmatpush1.bf16.msra.mxu0 %v17575_v50  ;;  %v17870_v54 = vadd.f32 %v14287_v6, %v14286_v0  ;;  %12674 = vmatprep.mubr.msk.bf16.mxu0 %vm833_vm2, %v16274_v58 }
 0x2e7   :  { %2068 = vmatprep.subr.bf16.mxu0 %v21799_v16 }
 0x2ea   :  { %2069 = vmatpush1.bf16.msra.mxu0 %v17587_v4  ;;  %v14289_v9 = vpop.f32.mrb[56].mxu1 }
 0x2eb   :  { %2070 = vmatprep.subr.bf16.mxu0 %v21799_v16  ;;  %v14290_v10 = vpop.f32.mrb[57].mxu1 }
 0x2ec   :  { %v17882_v12 = vadd.f32 %v14290_v10, %v14289_v9  ;;  %v14292_v15 = vpop.f32.mrb[58].mxu1 }
 0x2ed   :  { %v14293_v2 = vpop.f32.mrb[59].mxu1  ;;  %1726 = vmatmul.mubr.bf16.gmra.mrb[144].mxu0 %v16276_v7 }
 0x2ee   :  { %2071 = vmatpush1.bf16.msra.mxu0 %v17597_v21  ;;  %12675 = vmatprep.mubr.msk.bf16.mxu0 %vm833_vm2, %v16277_v59 }
 0x2ef   :  { %2072 = vmatprep.subr.bf16.mxu0 %v21799_v16 }
 0x2f2   :  { %2073 = vmatpush1.bf16.msra.mxu0 %v17603_v33 }
 0x2f3   :  { %2074 = vmatprep.subr.bf16.mxu0 %v21799_v16 }
 0x2f5   :  { %1734 = vmatmul.mubr.bf16.gmra.mrb[148].mxu0 %v16279_v22 }
 0x2f6   :  { %2075 = vmatpush1.bf16.msra.mxu0 %v17612_v49  ;;  %12676 = vmatprep.mubr.msk.bf16.mxu0 %vm833_vm2, %v12671_v27 }
 0x2f7   :  { %2076 = vmatprep.subr.bf16.mxu0 %v21799_v16 }
 0x2fa   :  { %2077 = vmatpush1.bf16.msra.mxu0 %v17619_v63 }
 0x2fb   :  { %2078 = vmatprep.subr.bf16.mxu0 %v21799_v16 }
 0x2fd   :  { %1742 = vmatmul.mubr.bf16.gmra.mrb[152].mxu0 %v12670_v30 }
 0x2fe   :  { %v1235_v37 = vpop.f32.mrb[60].mxu1  ;;  %2079 = vmatpush1.bf16.msra.mxu0 %v17625_v14  ;;  %12726 = vmatprep.mubr.msk.bf16.mxu0 %vm833_vm2, %v16284_v32 }
 0x2ff   :  { %v1236_v39 = vadd.f32 %v17830_v18, %v1235_v37  ;;  %v1237_v28 = vpop.f32.mrb[61].mxu1  ;;  %2080 = vmatprep.subr.bf16.mxu0 %v21799_v16 }
 0x300   :  { %v1238_v40 = vpop.f32.mrb[62].mxu1  ;;  %v16287_v28 = vld [vmem:[%s21787_s3 + $0x124] ss:$16 sps:$4 sm:$0xff]  }
 0x301   :  { %v1239_v42 = vadd.f32 %v17832_v25, %v1238_v40  ;;  %v1240_v47 = vpop.f32.mrb[63].mxu1 }
 0x302   :  { %2081 = vmatpush1.bf16.msra.mxu0 %v17631_v29  ;;  %v16290_v47 = vld [vmem:[%s21787_s3 + $0x144] ss:$16 sps:$4 sm:$0xff]  }
 0x303   :  { %v1273_v51 = vpack.c.bf16 %v1239_v42, %v1236_v39  ;;  %2082 = vmatprep.subr.bf16.mxu0 %v21799_v16  ;;  %v16288_v42 = vld [vmem:[%s21788_s4 + $0x20] sm:$0xff]  }
 0x305   :  { %15389 = vmatmul.mubr.msk.bf16.vlgmr.msra.gmra.mrb[80].mxu1 %vm1295_vm4, %v1273_v51  ;;  %v16289_v51 = vld [vmem:[%s21788_s4 + $0x28] sm:$0xff]  }
 0x306   :  { %14310 = vmatpush3.bf16.msra.mxu1 %v17458_v43  ;;  %v1243_v41 = vpop.f32.mrb[64].mxu1  ;;  %2083 = vmatpush1.bf16.msra.mxu0 %v17637_v44 }
 0x307   :  { %v1244_v18 = vadd.f32 %v17838_v31, %v1243_v41  ;;  %14311 = vmatprep.subr.bf16.mxu1 %v17502_v3  ;;  %v1245_v55 = vpop.f32.mrb[65].mxu1  ;;  %2084 = vmatprep.subr.bf16.mxu0 %v21799_v16  ;;  %v16282_v31 = vld [vmem:[%s21787_s3 + $0x1b8] ss:$16 sps:$4 sm:$0xff]   ;;  %v16292_v41 = vld [vmem:[%s21787_s3 + $0x140] ss:$16 sps:$4 sm:$0xff]  }
 0x308   :  { %v1246_v25 = vpop.f32.mrb[66].mxu1  ;;  %15392 = vmatprep.mubr.msk.bf16.mxu1 %vm17183_vm0, %v21801_v1  ;;  %v16295_v55 = vld [vmem:[%s21787_s3 + $0x160] ss:$16 sps:$4 sm:$0xff]  }
 0x309   :  { %v1247_v58 = vadd.f32 %v17841_v24, %v1246_v25  ;;  %v1248_v48 = vpop.f32.mrb[67].mxu1  ;;  %v16296_v25 = vld [vmem:[%s21787_s3 + $0x184] ss:$16 sps:$4 sm:$0xff]  }
 0x30a   :  { %14312 = vmatpush3.bf16.msra.mxu1 %v17468_v53  ;;  %2085 = vmatpush1.bf16.msra.mxu0 %v17643_v60  ;;  %v16298_v48 = vld [vmem:[%s21787_s3 + $0x180] ss:$16 sps:$4 sm:$0xff]  }
 0x30b   :  { %v1274_v0 = vpack.c.bf16 %v1247_v58, %v1244_v18  ;;  %14313 = vmatprep.subr.bf16.mxu1 %v17508_v13  ;;  %2086 = vmatprep.subr.bf16.mxu0 %v21799_v16  ;;  %v16293_v18 = vld [vmem:[%s21787_s3 + $0x164] ss:$16 sps:$4 sm:$0xff]  }
 0x30c   :  { %v12650_v58 = vld [vmem:[%s21787_s3 + $0x1a0] sm:$0xff] }
 0x30d   :  { %15393 = vmatmul.mubr.msk.bf16.gmra.mrb[84].mxu1 %vm1295_vm4, %v1274_v0  ;;  %v12669_v0 = vcombine.high %v12650_v58, %v12650_v58 }
 0x30e   :  { %14314 = vmatpush3.bf16.msra.mxu1 %v17472_v62  ;;  %v1251_v6 = vpop.f32.mrb[68].mxu1  ;;  %2087 = vmatpush1.bf16.msra.mxu0 %v17648_v11 }
 0x30f   :  { %v1252_v24 = vadd.f32 %v17852_v38, %v1251_v6  ;;  %14315 = vmatprep.subr.bf16.mxu1 %v17514_v23  ;;  %v1253_v7 = vpop.f32.mrb[69].mxu1  ;;  %14415 = vmatprep.subr.bf16.mxu0 %v17496_v56 }
 0x310   :  { %v1254_v9 = vpop.f32.mrb[70].mxu1  ;;  %15396 = vmatprep.mubr.msk.bf16.mxu1 %vm17183_vm0, %v21801_v1 }
 0x311   :  { %v1255_v59 = vadd.f32 %v17855_v52, %v1254_v9  ;;  %v1256_v10 = vpop.f32.mrb[71].mxu1  ;;  %2095 = vmatmul.mubr.bf16.vlgmr.msra.gmra.mrb[156].mxu0 %v16282_v31  ;;  %v12668_v31 = vcombine.low %v12650_v58, %v12650_v58 }
 0x312   :  { %14316 = vmatpush3.bf16.msra.mxu1 %v17476_v8  ;;  %14416 = vmatpush3.bf16.msra.mxu0 %v17458_v43 }
 0x313   :  { %v1275_v15 = vpack.c.bf16 %v1255_v59, %v1252_v24  ;;  %14317 = vmatprep.subr.bf16.mxu1 %v17520_v34  ;;  %14417 = vmatprep.subr.bf16.mxu0 %v17502_v3 }
 0x315   :  { %15397 = vmatmul.mubr.msk.bf16.gmra.mrb[88].mxu1 %vm1295_vm4, %v1275_v15 }
 0x316   :  { %14318 = vmatpush3.bf16.msra.mxu1 %v17480_v17  ;;  %v1259_v38 = vpop.f32.mrb[72].mxu1  ;;  %14418 = vmatpush3.bf16.msra.mxu0 %v17468_v53 }
 0x317   :  { %v1260_v52 = vadd.f32 %v17867_v61, %v1259_v38  ;;  %14319 = vmatprep.subr.bf16.mxu1 %v17526_v45  ;;  %v1261_v2 = vpop.f32.mrb[73].mxu1  ;;  %14419 = vmatprep.subr.bf16.mxu0 %v17508_v13 }
 0x318   :  { %v1262_v19 = vpop.f32.mrb[74].mxu1  ;;  %15400 = vmatprep.mubr.msk.bf16.mxu1 %vm17183_vm0, %v21801_v1 }
 0x319   :  { %v1263_v22 = vadd.f32 %v17870_v54, %v1262_v19  ;;  %v1264_v27 = vpop.f32.mrb[75].mxu1 }
 0x31a   :  { %14320 = vmatpush3.bf16.msra.mxu1 %v17484_v26  ;;  %14420 = vmatpush3.bf16.msra.mxu0 %v17472_v62 }
 0x31b   :  { %v1276_v30 = vpack.c.bf16 %v1263_v22, %v1260_v52  ;;  %14321 = vmatprep.subr.bf16.mxu1 %v17532_v57  ;;  %14421 = vmatprep.subr.bf16.mxu0 %v17514_v23 }
 0x31d   :  { %15401 = vmatmul.mubr.msk.bf16.gmra.mrb[92].mxu1 %vm1295_vm4, %v1276_v30 }
 0x31e   :  { %14322 = vmatpush3.bf16.msra.mxu1 %v17488_v36  ;;  %v1267_v61 = vpop.f32.mrb[76].mxu1  ;;  %14422 = vmatpush3.bf16.msra.mxu0 %v17476_v8 }
 0x31f   :  { %v1268_v32 = vadd.f32 %v17882_v12, %v1267_v61  ;;  %14323 = vmatprep.subr.bf16.mxu1 %v17538_v5  ;;  %v1269_v54 = vpop.f32.mrb[77].mxu1  ;;  %14423 = vmatprep.subr.bf16.mxu0 %v17520_v34  ;;  %v16285_v12 = vld [vmem:[%s21787_s3 + $0x120] ss:$16 sps:$4 sm:$0xff]  }
 0x320   :  { %v1270_v37 = vpop.f32.mrb[78].mxu1  ;;  %15404 = vmatprep.mubr.msk.bf16.mxu1 %vm17183_vm0, %v21801_v1 }
 0x321   :  { %v1271_v39 = vpop.f32.mrb[79].mxu1  ;;  %v1277_v40 = vpack.c.bf16 %v1268_v32, %v1268_v32 }
 0x322   :  { %14324 = vmatpush3.bf16.msra.mxu1 %v17492_v46  ;;  %14424 = vmatpush3.bf16.msra.mxu0 %v17480_v17 }
 0x323   :  { %14425 = vmatprep.subr.bf16.mxu0 %v17526_v45  ;;  %15432 = vmatprep.subr.bf16.mxu1 %v21801_v1 }
 0x325   :  { %15405 = vmatmul.mubr.msk.bf16.gmra.mrb[96].mxu1 %vm1295_vm4, %v1277_v40 }
 0x326   :  { %14426 = vmatpush3.bf16.msra.mxu0 %v17484_v26  ;;  %1637 = vmatprep.mubr.bf16.mxu1 %v16287_v28 }
 0x327   :  { %14427 = vmatprep.subr.bf16.mxu0 %v17532_v57 }
 0x32a   :  { %14428 = vmatpush3.bf16.msra.mxu0 %v17488_v36 }
 0x32b   :  { %14429 = vmatprep.subr.bf16.mxu0 %v17538_v5 }
 0x32d   :  { %1638 = vmatmul.mubr.bf16.vlgmr.msra.gmra.mrb[100].mxu1 %v16285_v12 }
 0x32e   :  { %15433 = vmatpush3.bf16.msra.mxu1 %v16288_v42  ;;  %14430 = vmatpush3.bf16.msra.mxu0 %v17492_v46 }
 0x32f   :  { %15434 = vmatprep.subr.bf16.mxu1 %v21801_v1  ;;  %1645 = vmatprep.mubr.bf16.mxu1 %v16290_v47 }
 0x330   :  { %15480 = vmatprep.subr.bf16.mxu0 %v21801_v1 }
 0x332   :  { %15435 = vmatpush3.bf16.msra.mxu1 %v16289_v51 }
 0x333   :  { %14362 = vmatprep.subr.bf16.mxu1 %v17496_v56 }
 0x335   :  { %1646 = vmatmul.mubr.bf16.gmra.mrb[104].mxu1 %v16292_v41 }
 0x336   :  { %1653 = vmatprep.mubr.bf16.mxu1 %v16293_v18 }
 0x33d   :  { %1654 = vmatmul.mubr.bf16.gmra.mrb[108].mxu1 %v16295_v55  ;;  %v16307_v55 = vld [vmem:[%s21787_s3 + $0x1dc] ss:$16 sps:$4 sm:$0xff]  }
 0x33e   :  { %1661 = vmatprep.mubr.bf16.mxu1 %v16296_v25  ;;  %v16309_v25 = vld [vmem:[%s21787_s3 + $0x1d8] ss:$16 sps:$4 sm:$0xff]   ;;  %12727 = vmatprep.mubr.msk.bf16.mxu0 %vm833_vm2, %v16307_v55 }
 0x33f   :  { %2103 = vmatmul.mubr.bf16.gmra.mrb[160].mxu0 %v16309_v25 }
 0x345   :  { %1662 = vmatmul.mubr.bf16.gmra.mrb[112].mxu1 %v16298_v48 }
 0x346   :  { %1669 = vmatprep.mubr.bf16.mxu1 %v12669_v0 }
 0x34d   :  { %1670 = vmatmul.mubr.bf16.gmra.mrb[116].mxu1 %v12668_v31 }
 0x34e   :  { %15436 = vmatprep.mubr.msk.bf16.mxu1 %vm17183_vm0, %v21801_v1 }
 0x37c   :  { %v1444_v6 = vpop.f32.mrb[116].mxu0 }
 0x37d   :  { %v15414_v24 = vpop.f32.mrb[117].mxu0 }
 0x37e   :  { %v1447_v7 = vpop.f32.mrb[118].mxu0  ;;  %v16313_v24 = vld [vmem:[%s21787_s3 + $0x1fc] ss:$16 sps:$4 sm:$0xff]  }
 0x37f   :  { %v15415_v9 = vpop.f32.mrb[119].mxu0  ;;  %12728 = vmatprep.mubr.msk.bf16.mxu0 %vm833_vm2, %v16313_v24 }
 0x380   :  { %v16315_v9 = vld [vmem:[%s21787_s3 + $0x1f8] ss:$16 sps:$4 sm:$0xff]  }
 0x381   :  { %2111 = vmatmul.mubr.bf16.gmra.mrb[164].mxu0 %v16315_v9 }
 0x384   :  { %v1452_v59 = vpop.f32.mrb[120].mxu0 }
 0x385   :  { %v15418_v10 = vpop.f32.mrb[121].mxu0 }
 0x386   :  { %v1455_v15 = vpop.f32.mrb[122].mxu0 }
 0x387   :  { %v15419_v38 = vpop.f32.mrb[123].mxu0 }
 0x38c   :  { %v1460_v52 = vpop.f32.mrb[124].mxu0 }
 0x38d   :  { %v15422_v2 = vpop.f32.mrb[125].mxu0 }
 0x38e   :  { %v18008_v19 = vpop.f32.mrb[126].mxu0 }
 0x38f   :  { %v15423_v22 = vpop.f32.mrb[127].mxu0 }
 0x394   :  { %v18010_v27 = vpop.f32.mrb[128].mxu0 }
 0x395   :  { %v15426_v30 = vpop.f32.mrb[129].mxu0 }
 0x396   :  { %v18012_v61 = vpop.f32.mrb[130].mxu0  ;;  %v16319_v30 = vld [vmem:[%s21787_s3 + $0x21c] ss:$16 sps:$4 sm:$0xff]  }
 0x397   :  { %v15427_v32 = vpop.f32.mrb[131].mxu0  ;;  %12729 = vmatprep.mubr.msk.bf16.mxu0 %vm833_vm2, %v16319_v30 }
 0x398   :  { %v16321_v32 = vld [vmem:[%s21787_s3 + $0x218] ss:$16 sps:$4 sm:$0xff]  }
 0x399   :  { %2119 = vmatmul.mubr.bf16.gmra.mrb[168].mxu0 %v16321_v32 }
 0x39c   :  { %v18014_v54 = vpop.f32.mrb[132].mxu0 }
 0x39d   :  { %v15430_v37 = vpop.f32.mrb[133].mxu0 }
 0x39e   :  { %v1479_v39 = vpop.f32.mrb[134].mxu0 }
 0x39f   :  { %v15431_v28 = vpop.f32.mrb[135].mxu0 }
 0x3b0   :  { %v18016_v40 = vpop.f32.mrb[136].mxu0 }
 0x3b1   :  { %v1713_v12 = vpop.f32.mrb[137].mxu0 }
 0x3b2   :  { %v18018_v42 = vpop.f32.mrb[138].mxu0 }
 0x3b3   :  { %v1716_v47 = vpop.f32.mrb[139].mxu0 }
 0x3b4   :  { %v12705_v47 = vld [vmem:[%s21787_s3 + $0x238] sm:$0xff] }
 0x3b5   :  { %v12725_v55 = vcombine.high %v12705_v47, %v12705_v47  ;;  %v12724_v25 = vcombine.low %v12705_v47, %v12705_v47 }
 0x3b7   :  { %12730 = vmatprep.mubr.msk.bf16.mxu0 %vm833_vm2, %v12725_v55 }
 0x3b8   :  { %v18020_v51 = vpop.f32.mrb[140].mxu0  ;;  %2127 = vmatmul.mubr.bf16.gmra.mrb[172].mxu0 %v12724_v25 }
 0x3b9   :  { %v1721_v41 = vpop.f32.mrb[141].mxu0 }
 0x3ba   :  { %v18022_v18 = vpop.f32.mrb[142].mxu0 }
 0x3bb   :  { %v1724_v58 = vpop.f32.mrb[143].mxu0 }
 0x3c0   :  { %v18031_v48 = vpop.f32.mrb[144].mxu0 }
 0x3c1   :  { %v1729_v0 = vpop.f32.mrb[145].mxu0 }
 0x3c2   :  { %v18033_v31 = vpop.f32.mrb[146].mxu0 }
 0x3c3   :  { %v1732_v10 = vpop.f32.mrb[147].mxu0 }
 0x3c8   :  { %v18042_v38 = vpop.f32.mrb[148].mxu0 }
 0x3c9   :  { %v1737_v2 = vpop.f32.mrb[149].mxu0 }
 0x3ca   :  { %v18044_v22 = vpop.f32.mrb[150].mxu0 }
 0x3cb   :  { %v1740_v37 = vpop.f32.mrb[151].mxu0 }
 0x3d0   :  { %v18053_v39 = vpop.f32.mrb[152].mxu0 }
 0x3d1   :  { %v1745_v28 = vpop.f32.mrb[153].mxu0 }
 0x3d2   :  { %v1746_v12 = vpop.f32.mrb[154].mxu0 }
 0x3d3   :  { %v1747_v41 = vpop.f32.mrb[155].mxu0 }
 0x3d8   :  { %v1345_v58 = vpop.f32.mrb[80].mxu1 }
 0x3d9   :  { %v18059_v0 = vadd.f32 %v1444_v6, %v1345_v58  ;;  %v15390_v24 = vpop.f32.mrb[81].mxu1 }
 0x3da   :  { %v1348_v9 = vpop.f32.mrb[82].mxu1 }
 0x3db   :  { %v18061_v10 = vadd.f32 %v1447_v7, %v1348_v9  ;;  %v15391_v2 = vpop.f32.mrb[83].mxu1 }
 0x3e0   :  { %v1353_v30 = vpop.f32.mrb[84].mxu1 }
 0x3e1   :  { %v18063_v32 = vadd.f32 %v1452_v59, %v1353_v30  ;;  %v15394_v37 = vpop.f32.mrb[85].mxu1 }
 0x3e2   :  { %v1356_v28 = vpop.f32.mrb[86].mxu1 }
 0x3e3   :  { %v18065_v12 = vadd.f32 %v1455_v15, %v1356_v28  ;;  %v15395_v41 = vpop.f32.mrb[87].mxu1 }
 0x3e8   :  { %v1361_v47 = vpop.f32.mrb[88].mxu1 }
 0x3e9   :  { %v18067_v16 = vadd.f32 %v1460_v52, %v1361_v47  ;;  %v15398_v55 = vpop.f32.mrb[89].mxu1 }
 0x3ea   :  { %v1364_v25 = vpop.f32.mrb[90].mxu1 }
 0x3eb   :  { %v18070_v6 = vadd.f32 %v18008_v19, %v1364_v25  ;;  %v15399_v58 = vpop.f32.mrb[91].mxu1 }
 0x3f0   :  { %v1369_v7 = vpop.f32.mrb[92].mxu1 }
 0x3f1   :  { %v18073_v24 = vadd.f32 %v18010_v27, %v1369_v7  ;;  %v15402_v59 = vpop.f32.mrb[93].mxu1 }
 0x3f2   :  { %v1372_v9 = vpop.f32.mrb[94].mxu1 }
 0x3f3   :  { %v18076_v2 = vadd.f32 %v18012_v61, %v1372_v9  ;;  %v15403_v15 = vpop.f32.mrb[95].mxu1 }
 0x3f8   :  { %v1377_v30 = vpop.f32.mrb[96].mxu1 }
 0x3f9   :  { %v18079_v52 = vadd.f32 %v18014_v54, %v1377_v30  ;;  %v15406_v37 = vpop.f32.mrb[97].mxu1  ;;  %v21806_v30 = vmov 0.0  }
 0x3fa   :  { %v1380_v28 = vpop.f32.mrb[98].mxu1 }
 0x3fb   :  { %v15407_v41 = vpop.f32.mrb[99].mxu1 }
 0x400   :  { %v14325_v19 = vpop.f32.mrb[100].mxu1 }
 0x401   :  { %v14326_v47 = vpop.f32.mrb[101].mxu1 }
 0x402   :  { %v14327_v55 = vadd.f32 %v14326_v47, %v14325_v19  ;;  %v14328_v25 = vpop.f32.mrb[102].mxu1 }
 0x403   :  { %v14329_v58 = vpop.f32.mrb[103].mxu1 }
 0x404   :  { %v1712_v27 = vadd.f32 %v14327_v55, %v18016_v40  ;;  %v14330_v7 = vadd.f32 %v14329_v58, %v14328_v25 }
 0x406   :  { %v1715_v59 = vadd.f32 %v14330_v7, %v18018_v42 }
 0x408   :  { %v1749_v61 = vpack.c.bf16 %v1715_v59, %v1712_v27  ;;  %v14331_v9 = vpop.f32.mrb[104].mxu1 }
 0x409   :  { %v14332_v15 = vpop.f32.mrb[105].mxu1 }
 0x40a   :  { %v14333_v1 = vadd.f32 %v14332_v15, %v14331_v9  ;;  %v14334_v56 = vpop.f32.mrb[106].mxu1  ;;  %15437 = vmatmul.mubr.msk.bf16.vlgmr.msra.gmra.mrb[120].mxu1 %vm1295_vm4, %v1749_v61 }
 0x40b   :  { %14363 = vmatpush3.bf16.msra.mxu1 %v17458_v43  ;;  %v14335_v54 = vpop.f32.mrb[107].mxu1  ;;  %15440 = vmatprep.mubr.msk.bf16.mxu1 %vm17183_vm0, %v21806_v30 }
 0x40c   :  { %v1720_v37 = vadd.f32 %v14333_v1, %v18020_v51  ;;  %v14336_v28 = vadd.f32 %v14335_v54, %v14334_v56  ;;  %14364 = vmatprep.subr.bf16.mxu1 %v17502_v3 }
 0x40e   :  { %v1723_v40 = vadd.f32 %v14336_v28, %v18022_v18 }
 0x40f   :  { %14365 = vmatpush3.bf16.msra.mxu1 %v17468_v53 }
 0x410   :  { %14366 = vmatprep.subr.bf16.mxu1 %v17508_v13  ;;  %v14337_v42 = vpop.f32.mrb[108].mxu1  ;;  %v1750_v41 = vpack.c.bf16 %v1723_v40, %v1720_v37 }
 0x411   :  { %v14338_v19 = vpop.f32.mrb[109].mxu1 }
 0x412   :  { %v14339_v47 = vadd.f32 %v14338_v19, %v14337_v42  ;;  %v14340_v55 = vpop.f32.mrb[110].mxu1  ;;  %15441 = vmatmul.mubr.msk.bf16.gmra.mrb[124].mxu1 %vm1295_vm4, %v1750_v41  ;;  %v16303_v41 = vld [vmem:[%s21787_s3 + $0x1b4] ss:$16 sps:$4 sm:$0xff]   ;;  %v16301_v19 = vld [vmem:[%s21787_s3 + $0x1b0] ss:$16 sps:$4 sm:$0xff]  }
 0x413   :  { %14367 = vmatpush3.bf16.msra.mxu1 %v17472_v62  ;;  %v14341_v25 = vpop.f32.mrb[111].mxu1  ;;  %15444 = vmatprep.mubr.msk.bf16.mxu1 %vm17183_vm0, %v21806_v30 }
 0x414   :  { %v1728_v1 = vadd.f32 %v14339_v47, %v18031_v48  ;;  %v14342_v56 = vadd.f32 %v14341_v25, %v14340_v55  ;;  %14368 = vmatprep.subr.bf16.mxu1 %v17514_v23  ;;  %v16306_v47 = vld [vmem:[%s21787_s3 + $0x1d0] ss:$16 sps:$4 sm:$0xff]   ;;  %v16310_v55 = vld [vmem:[%s21787_s3 + $0x1f4] ss:$16 sps:$4 sm:$0xff]  }
 0x415   :  { %v16312_v25 = vld [vmem:[%s21787_s3 + $0x1f0] ss:$16 sps:$4 sm:$0xff]  }
 0x416   :  { %v1731_v51 = vadd.f32 %v14342_v56, %v18033_v31  ;;  %v12704_v56 = vld [vmem:[%s21787_s3 + $0x230] sm:$0xff] }
 0x417   :  { %14369 = vmatpush3.bf16.msra.mxu1 %v17476_v8 }
 0x418   :  { %14370 = vmatprep.subr.bf16.mxu1 %v17520_v34  ;;  %v14343_v18 = vpop.f32.mrb[112].mxu1  ;;  %v1751_v58 = vpack.c.bf16 %v1731_v51, %v1728_v1  ;;  %v16316_v1 = vld [vmem:[%s21787_s3 + $0x214] ss:$16 sps:$4 sm:$0xff]   ;;  %v16318_v51 = vld [vmem:[%s21787_s3 + $0x210] ss:$16 sps:$4 sm:$0xff]  }
 0x419   :  { %v14344_v27 = vpop.f32.mrb[113].mxu1 }
 0x41a   :  { %v14345_v7 = vadd.f32 %v14344_v27, %v14343_v18  ;;  %v14346_v59 = vpop.f32.mrb[114].mxu1  ;;  %15445 = vmatmul.mubr.msk.bf16.gmra.mrb[128].mxu1 %vm1295_vm4, %v1751_v58  ;;  %v12723_v18 = vcombine.high %v12704_v56, %v12704_v56  ;;  %v12722_v58 = vcombine.low %v12704_v56, %v12704_v56  ;;  %v16326_v27 = vld [vmem:[%s21788_s4 + $0x30] sm:$0xff]  }
 0x41b   :  { %14371 = vmatpush3.bf16.msra.mxu1 %v17480_v17  ;;  %v14347_v61 = vpop.f32.mrb[115].mxu1  ;;  %15448 = vmatprep.mubr.msk.bf16.mxu1 %vm17183_vm0, %v21806_v30 }
 0x41c   :  { %v1736_v48 = vadd.f32 %v14345_v7, %v18042_v38  ;;  %v14348_v31 = vadd.f32 %v14347_v61, %v14346_v59  ;;  %14372 = vmatprep.subr.bf16.mxu1 %v17526_v45  ;;  %v16327_v7 = vld [vmem:[%s21788_s4 + $0x38] sm:$0xff]   ;;  %v21807_v59 = vmov 0   ;;  %v18156_v61 = vpop.f32.mrb[156].mxu0 }
 0x41e   :  { %v1739_v9 = vadd.f32 %v14348_v31, %v18044_v22 }
 0x41f   :  { %14373 = vmatpush3.bf16.msra.mxu1 %v17484_v26 }
 0x420   :  { %14374 = vmatprep.subr.bf16.mxu1 %v17532_v57  ;;  %v14349_v15 = vpop.f32.mrb[116].mxu1  ;;  %v1752_v54 = vpack.c.bf16 %v1739_v9, %v1736_v48  ;;  %v2098_v48 = vpop.f32.mrb[157].mxu0 }
 0x421   :  { %v14350_v37 = vpop.f32.mrb[117].mxu1  ;;  %v18158_v31 = vpop.f32.mrb[158].mxu0  ;;  %v16342_v48 = vld [vmem:[%s21787_s3 + $0x280] ss:$16 sps:$4 sm:$0xff]  }
 0x422   :  { %v14351_v28 = vadd.f32 %v14350_v37, %v14349_v15  ;;  %v14352_v40 = vpop.f32.mrb[118].mxu1  ;;  %15449 = vmatmul.mubr.msk.bf16.gmra.mrb[132].mxu1 %vm1295_vm4, %v1752_v54  ;;  %v2101_v9 = vpop.f32.mrb[159].mxu0 }
 0x423   :  { %14375 = vmatpush3.bf16.msra.mxu1 %v17488_v36  ;;  %v14353_v42 = vpop.f32.mrb[119].mxu1  ;;  %15452 = vmatprep.mubr.msk.bf16.mxu1 %vm17183_vm0, %v21806_v30  ;;  %v18160_v15 = vpop.f32.mrb[160].mxu0  ;;  %v16346_v9 = vld [vmem:[%s21787_s3 + $0x2a4] ss:$16 sps:$4 sm:$0xff]  }
 0x424   :  { %v1744_v38 = vadd.f32 %v14351_v28, %v18053_v39  ;;  %14376 = vmatprep.subr.bf16.mxu1 %v17538_v5  ;;  %v16304_v39 = vld [vmem:[%s21787_s3 + $0x1d4] ss:$16 sps:$4 sm:$0xff]   ;;  %v2106_v54 = vpop.f32.mrb[161].mxu0 }
 0x425   :  { %v18162_v37 = vpop.f32.mrb[162].mxu0  ;;  %v16348_v54 = vld [vmem:[%s21787_s3 + $0x2a0] ss:$16 sps:$4 sm:$0xff]  }
 0x426   :  { %v1753_v22 = vpack.c.bf16 %v1744_v38, %v1744_v38  ;;  %v2109_v28 = vpop.f32.mrb[163].mxu0 }
 0x427   :  { %14377 = vmatpush3.bf16.msra.mxu1 %v17492_v46 }
 0x428   :  { %15456 = vmatprep.subr.bf16.mxu1 %v21806_v30 }
 0x42a   :  { %15453 = vmatmul.mubr.msk.bf16.gmra.mrb[136].mxu1 %vm1295_vm4, %v1753_v22 }
 0x42b   :  { %2022 = vmatprep.mubr.bf16.mxu1 %v16303_v41 }
 0x432   :  { %2023 = vmatmul.mubr.bf16.vlgmr.msra.gmra.mrb[140].mxu1 %v16301_v19 }
 0x433   :  { %2030 = vmatprep.mubr.bf16.mxu1 %v16304_v39  ;;  %15457 = vmatpush3.bf16.msra.mxu1 %v16326_v27  ;;  %v16336_v27 = vld [vmem:[%s21787_s3 + $0x260] ss:$16 sps:$4 sm:$0xff]  }
 0x434   :  { %15458 = vmatprep.subr.bf16.mxu1 %v21806_v30 }
 0x437   :  { %15459 = vmatpush3.bf16.msra.mxu1 %v16327_v7  ;;  %v16340_v7 = vld [vmem:[%s21787_s3 + $0x284] ss:$16 sps:$4 sm:$0xff]  }
 0x438   :  { %2447 = vmatprep.subr.bf16.mxu1 %v21807_v59 }
 0x43a   :  { %2031 = vmatmul.mubr.bf16.gmra.mrb[144].mxu1 %v16306_v47 }
 0x43b   :  { %2038 = vmatprep.mubr.bf16.mxu1 %v16310_v55 }
 0x442   :  { %2039 = vmatmul.mubr.bf16.gmra.mrb[148].mxu1 %v16312_v25 }
 0x443   :  { %2046 = vmatprep.mubr.bf16.mxu1 %v16316_v1 }
 0x44a   :  { %2047 = vmatmul.mubr.bf16.gmra.mrb[152].mxu1 %v16318_v51  ;;  %v16328_v51 = vld [vmem:[%s21787_s3 + $0x240] ss:$16 sps:$4 sm:$0xff]  }
 0x44b   :  { %2054 = vmatprep.mubr.bf16.mxu1 %v12723_v18  ;;  %v16330_v18 = vld [vmem:[%s21787_s3 + $0x244] ss:$16 sps:$4 sm:$0xff]  }
 0x44c   :  { %2407 = vmatprep.mubr.bf16.mxu0 %v16330_v18 }
 0x44d   :  { %2408 = vmatmul.mubr.bf16.vlgmr.msra.gmra.mrb[176].mxu0 %v16328_v51 }
 0x452   :  { %2055 = vmatmul.mubr.bf16.gmra.mrb[156].mxu1 %v12722_v58  ;;  %v16334_v58 = vld [vmem:[%s21787_s3 + $0x264] ss:$16 sps:$4 sm:$0xff]  }
 0x453   :  { %15460 = vmatprep.mubr.msk.bf16.mxu1 %vm17183_vm0, %v21806_v30  ;;  %2415 = vmatprep.mubr.bf16.mxu0 %v16334_v58 }
 0x454   :  { %v18164_v40 = vpop.f32.mrb[164].mxu0 }
 0x455   :  { %v2114_v42 = vpop.f32.mrb[165].mxu0  ;;  %2416 = vmatmul.mubr.bf16.gmra.mrb[180].mxu0 %v16336_v27 }
 0x456   :  { %v18166_v38 = vpop.f32.mrb[166].mxu0  ;;  %2423 = vmatprep.mubr.bf16.mxu0 %v16340_v7 }
 0x457   :  { %v2117_v22 = vpop.f32.mrb[167].mxu0 }
 0x45d   :  { %2424 = vmatmul.mubr.bf16.gmra.mrb[184].mxu0 %v16342_v48 }
 0x45e   :  { %2431 = vmatprep.mubr.bf16.mxu0 %v16346_v9 }
 0x465   :  { %2432 = vmatmul.mubr.bf16.gmra.mrb[188].mxu0 %v16348_v54 }
 0x46c   :  { %v18168_v41 = vpop.f32.mrb[168].mxu0 }
 0x46d   :  { %v2122_v19 = vpop.f32.mrb[169].mxu0 }
 0x46e   :  { %v18170_v39 = vpop.f32.mrb[170].mxu0  ;;  %v12758_v19 = vld [vmem:[%s21787_s3 + $0x2c0] sm:$0xff] }
 0x46f   :  { %v2125_v47 = vpop.f32.mrb[171].mxu0  ;;  %v12776_v51 = vcombine.low %v12758_v19, %v12758_v19 }
 0x48b   :  { %v18172_v55 = vpop.f32.mrb[172].mxu0 }
 0x48c   :  { %v2130_v25 = vpop.f32.mrb[173].mxu0 }
 0x48d   :  { %v2131_v1 = vpop.f32.mrb[174].mxu0  ;;  %v12777_v25 = vcombine.high %v12758_v19, %v12758_v19 }
 0x48e   :  { %v2132_v56 = vpop.f32.mrb[175].mxu0 }
 0x48f   :  { %2439 = vmatprep.mubr.bf16.mxu0 %v12777_v25 }
 0x490   :  { %2440 = vmatmul.mubr.bf16.gmra.mrb[192].mxu0 %v12776_v51 }
 0x491   :  { %15484 = vmatprep.mubr.msk.bf16.mxu0 %vm17183_vm0, %v21806_v30 }
 0x4dd   :  { %v1820_v28 = vpop.f32.mrb[120].mxu1 }
 0x4de   :  { %v18199_v42 = vadd.f32 %v1820_v28, %v18059_v0  ;;  %v15438_v22 = vpop.f32.mrb[121].mxu1 }
 0x4df   :  { %v1823_v47 = vpop.f32.mrb[122].mxu1 }
 0x4e0   :  { %v18205_v1 = vadd.f32 %v1823_v47, %v18061_v10  ;;  %v15439_v56 = vpop.f32.mrb[123].mxu1 }
 0x4e5   :  { %v1828_v18 = vpop.f32.mrb[124].mxu1 }
 0x4e6   :  { %v18210_v0 = vadd.f32 %v1828_v18, %v18063_v32  ;;  %v15442_v58 = vpop.f32.mrb[125].mxu1 }
 0x4e7   :  { %v1831_v27 = vpop.f32.mrb[126].mxu1 }
 0x4e8   :  { %v18213_v7 = vadd.f32 %v1831_v27, %v18065_v12  ;;  %v15443_v48 = vpop.f32.mrb[127].mxu1 }
 0x4ed   :  { %v1836_v9 = vpop.f32.mrb[128].mxu1 }
 0x4ee   :  { %v18216_v10 = vadd.f32 %v1836_v9, %v18067_v16  ;;  %v15446_v54 = vpop.f32.mrb[129].mxu1 }
 0x4ef   :  { %v1839_v28 = vpop.f32.mrb[130].mxu1 }
 0x4f0   :  { %v18219_v22 = vadd.f32 %v1839_v28, %v18070_v6  ;;  %v15447_v19 = vpop.f32.mrb[131].mxu1 }
 0x4f5   :  { %v1844_v47 = vpop.f32.mrb[132].mxu1 }
 0x4f6   :  { %v18222_v32 = vadd.f32 %v1844_v47, %v18073_v24  ;;  %v15450_v25 = vpop.f32.mrb[133].mxu1 }
 0x4f7   :  { %v1847_v56 = vpop.f32.mrb[134].mxu1 }
 0x4f8   :  { %21808 = vst [vmem:[#allocation6_spill] sm:$0xff] %v18222_v32  ;;  %v18225_v12 = vadd.f32 %v1847_v56, %v18076_v2  ;;  %v15451_v51 = vpop.f32.mrb[135].mxu1 }
 0x4fa   :  { %21809 = vst [vmem:[#allocation7_spill] sm:$0xff] %v18225_v12 }
 0x4fd   :  { %v1852_v18 = vpop.f32.mrb[136].mxu1 }
 0x4fe   :  { %v18228_v16 = vadd.f32 %v1852_v18, %v18079_v52  ;;  %v15454_v58 = vpop.f32.mrb[137].mxu1 }
 0x4ff   :  { %v1855_v27 = vpop.f32.mrb[138].mxu1 }
 0x500   :  { %v15455_v48 = vpop.f32.mrb[139].mxu1 }
 0x505   :  { %v14378_v6 = vpop.f32.mrb[140].mxu1 }
 0x506   :  { %v14379_v9 = vpop.f32.mrb[141].mxu1 }
 0x507   :  { %v14380_v54 = vadd.f32 %v14379_v9, %v14378_v6  ;;  %v14381_v28 = vpop.f32.mrb[142].mxu1 }
 0x508   :  { %v14382_v19 = vpop.f32.mrb[143].mxu1 }
 0x509   :  { %v2097_v24 = vadd.f32 %v14380_v54, %v18156_v61  ;;  %v14383_v47 = vadd.f32 %v14382_v19, %v14381_v28 }
 0x50b   :  { %v2100_v25 = vadd.f32 %v14383_v47, %v18158_v31 }
 0x50d   :  { %v2134_v2 = vpack.c.bf16 %v2100_v25, %v2097_v24  ;;  %v14384_v56 = vpop.f32.mrb[144].mxu1 }
 0x50e   :  { %v14385_v51 = vpop.f32.mrb[145].mxu1 }
 0x50f   :  { %v14386_v12 = vadd.f32 %v14385_v51, %v14384_v56  ;;  %v14387_v32 = vpop.f32.mrb[146].mxu1  ;;  %15461 = vmatmul.mubr.msk.bf16.vlgmr.msra.gmra.mrb[160].mxu1 %vm1295_vm4, %v2134_v2 }
 0x510   :  { %2448 = vmatpush1.bf16.msra.mxu1 %v17551_v20  ;;  %v14388_v52 = vpop.f32.mrb[147].mxu1  ;;  %15464 = vmatprep.mubr.msk.bf16.mxu1 %vm17183_vm0, %v21806_v30 }
 0x511   :  { %v14389_v18 = vadd.f32 %v14388_v52, %v14387_v32  ;;  %v2105_v58 = vadd.f32 %v14386_v12, %v18160_v15  ;;  %2449 = vmatprep.subr.bf16.mxu1 %v21807_v59 }
 0x513   :  { %v2108_v61 = vadd.f32 %v14389_v18, %v18162_v37 }
 0x514   :  { %2450 = vmatpush1.bf16.msra.mxu1 %v17563_v35 }
 0x515   :  { %v2135_v31 = vpack.c.bf16 %v2108_v61, %v2105_v58  ;;  %v14390_v27 = vpop.f32.mrb[148].mxu1  ;;  %2451 = vmatprep.subr.bf16.mxu1 %v21807_v59 }
 0x516   :  { %v14391_v48 = vpop.f32.mrb[149].mxu1 }
 0x517   :  { %v14392_v6 = vadd.f32 %v14391_v48, %v14390_v27  ;;  %v14393_v9 = vpop.f32.mrb[150].mxu1  ;;  %15465 = vmatmul.mubr.msk.bf16.gmra.mrb[164].mxu1 %vm1295_vm4, %v2135_v31  ;;  %v16333_v31 = vld [vmem:[%s21787_s3 + $0x24c] ss:$16 sps:$4 sm:$0xff]   ;;  %v21810_v48 = vld [vmem:[#allocation5_spill] sm:$0xff] }
 0x518   :  { %2452 = vmatpush1.bf16.msra.mxu1 %v17575_v50  ;;  %v14394_v32 = vpop.f32.mrb[151].mxu1  ;;  %15468 = vmatprep.mubr.msk.bf16.mxu1 %vm17183_vm0, %v21806_v30  ;;  %v16337_v27 = vld [vmem:[%s21787_s3 + $0x26c] ss:$16 sps:$4 sm:$0xff]  }
 0x519   :  { %v14395_v15 = vadd.f32 %v14394_v32, %v14393_v9  ;;  %v2113_v37 = vadd.f32 %v14392_v6, %v18164_v40  ;;  %2453 = vmatprep.subr.bf16.mxu1 %v21807_v59  ;;  %v16339_v6 = vld [vmem:[%s21787_s3 + $0x268] ss:$16 sps:$4 sm:$0xff]   ;;  %v16343_v9 = vld [vmem:[%s21787_s3 + $0x28c] ss:$16 sps:$4 sm:$0xff]  }
 0x51a   :  { %v16345_v32 = vld [vmem:[%s21787_s3 + $0x288] ss:$16 sps:$4 sm:$0xff]  }
 0x51b   :  { %v2116_v12 = vadd.f32 %v14395_v15, %v18166_v38  ;;  %v16349_v15 = vld [vmem:[%s21787_s3 + $0x2ac] ss:$16 sps:$4 sm:$0xff]  }
 0x51c   :  { %2454 = vmatpush1.bf16.msra.mxu1 %v17587_v4 }
 0x51d   :  { %v2136_v54 = vpack.c.bf16 %v2116_v12, %v2113_v37  ;;  %v14396_v28 = vpop.f32.mrb[152].mxu1  ;;  %2455 = vmatprep.subr.bf16.mxu1 %v21807_v59  ;;  %v12759_v37 = vld [vmem:[%s21787_s3 + $0x2c8] sm:$0xff] }
 0x51e   :  { %v14397_v19 = vpop.f32.mrb[153].mxu1  ;;  %v16351_v12 = vld [vmem:[%s21787_s3 + $0x2a8] ss:$16 sps:$4 sm:$0xff]  }
 0x51f   :  { %v14398_v24 = vadd.f32 %v14397_v19, %v14396_v28  ;;  %v14399_v47 = vpop.f32.mrb[154].mxu1  ;;  %15469 = vmatmul.mubr.msk.bf16.gmra.mrb[168].mxu1 %vm1295_vm4, %v2136_v54  ;;  %v12779_v54 = vcombine.high %v12759_v37, %v12759_v37  ;;  %v12778_v28 = vcombine.low %v12759_v37, %v12759_v37  ;;  %v16356_v19 = vld [vmem:[%s21788_s4 + $0x40] sm:$0xff]  }
 0x520   :  { %2456 = vmatpush1.bf16.msra.mxu1 %v17597_v21  ;;  %v14400_v25 = vpop.f32.mrb[155].mxu1  ;;  %15472 = vmatprep.mubr.msk.bf16.mxu1 %vm17183_vm0, %v21806_v30 }
 0x521   :  { %v14401_v40 = vadd.f32 %v14400_v25, %v14399_v47  ;;  %v2121_v38 = vadd.f32 %v14398_v24, %v18168_v41  ;;  %2457 = vmatprep.subr.bf16.mxu1 %v21807_v59  ;;  %15481 = vmatpush3.bf16.msra.mxu0 %v16356_v19  ;;  %v16357_v24 = vld [vmem:[%s21788_s4 + $0x48] sm:$0xff]   ;;  %v14431_v47 = vpop.f32.mrb[176].mxu0 }
 0x522   :  { %15482 = vmatprep.subr.bf16.mxu0 %v21806_v30  ;;  %v14432_v25 = vpop.f32.mrb[177].mxu0 }
 0x523   :  { %v2124_v2 = vadd.f32 %v14401_v40, %v18170_v39  ;;  %v18334_v40 = vadd.f32 %v14432_v25, %v14431_v47 }
 0x524   :  { %2458 = vmatpush1.bf16.msra.mxu1 %v17603_v33 }
 0x525   :  { %v2137_v56 = vpack.c.bf16 %v2124_v2, %v2121_v38  ;;  %2459 = vmatprep.subr.bf16.mxu1 %v21807_v59  ;;  %v14402_v51 = vpop.f32.mrb[156].mxu1  ;;  %15483 = vmatpush3.bf16.msra.mxu0 %v16357_v24  ;;  %v14434_v38 = vpop.f32.mrb[178].mxu0 }
 0x526   :  { %v14403_v52 = vpop.f32.mrb[157].mxu1  ;;  %2832 = vmatprep.subr.bf16.mxu0 %v21807_v59  ;;  %v14435_v2 = vpop.f32.mrb[179].mxu0 }
 0x527   :  { %15473 = vmatmul.mubr.msk.bf16.gmra.mrb[172].mxu1 %vm1295_vm4, %v2137_v56  ;;  %v14404_v18 = vadd.f32 %v14403_v52, %v14402_v51  ;;  %v14405_v58 = vpop.f32.mrb[158].mxu1  ;;  %v18336_v56 = vadd.f32 %v14435_v2, %v14434_v38  ;;  %v16358_v2 = vld [vmem:[%s21787_s3 + $0x2d0] ss:$16 sps:$4 sm:$0xff]  }
 0x528   :  { %2460 = vmatpush1.bf16.msra.mxu1 %v17612_v49  ;;  %15476 = vmatprep.mubr.msk.bf16.mxu1 %vm17183_vm0, %v21806_v30  ;;  %v14406_v41 = vpop.f32.mrb[159].mxu1  ;;  %v14437_v51 = vpop.f32.mrb[180].mxu0 }
 0x529   :  { %v2129_v61 = vadd.f32 %v14404_v18, %v18172_v55  ;;  %2461 = vmatprep.subr.bf16.mxu1 %v21807_v59  ;;  %v16331_v55 = vld [vmem:[%s21787_s3 + $0x248] ss:$16 sps:$4 sm:$0xff]   ;;  %v14438_v52 = vpop.f32.mrb[181].mxu0 }
 0x52a   :  { %v18338_v18 = vadd.f32 %v14438_v52, %v14437_v51  ;;  %v14440_v58 = vpop.f32.mrb[182].mxu0  ;;  %v16360_v51 = vld [vmem:[%s21787_s3 + $0x2d4] ss:$16 sps:$4 sm:$0xff]  }
 0x52b   :  { %v2138_v39 = vpack.c.bf16 %v2129_v61, %v2129_v61  ;;  %v14441_v41 = vpop.f32.mrb[183].mxu0  ;;  %v16364_v52 = vld [vmem:[%s21787_s3 + $0x2f4] ss:$16 sps:$4 sm:$0xff]  }
 0x52c   :  { %2462 = vmatpush1.bf16.msra.mxu1 %v17619_v63  ;;  %v18340_v61 = vadd.f32 %v14441_v41, %v14440_v58  ;;  %v16366_v58 = vld [vmem:[%s21787_s3 + $0x2f0] ss:$16 sps:$4 sm:$0xff]   ;;  %v16370_v41 = vld [vmem:[%s21787_s3 + $0x314] ss:$16 sps:$4 sm:$0xff]  }
 0x52d   :  { %2463 = vmatprep.subr.bf16.mxu1 %v21807_v59 }
 0x52f   :  { %15477 = vmatmul.mubr.msk.bf16.gmra.mrb[176].mxu1 %vm1295_vm4, %v2138_v39 }
 0x530   :  { %2464 = vmatpush1.bf16.msra.mxu1 %v17625_v14  ;;  %12780 = vmatprep.mubr.msk.bf16.mxu1 %vm833_vm2, %v16333_v31  ;;  %v14443_v39 = vpop.f32.mrb[184].mxu0 }
 0x531   :  { %2465 = vmatprep.subr.bf16.mxu1 %v21807_v59  ;;  %v14444_v31 = vpop.f32.mrb[185].mxu0 }
 0x534   :  { %2466 = vmatpush1.bf16.msra.mxu1 %v17631_v29 }
 0x535   :  { %2467 = vmatprep.subr.bf16.mxu1 %v21807_v59 }
 0x538   :  { %2468 = vmatpush1.bf16.msra.mxu1 %v17637_v44 }
 0x539   :  { %2469 = vmatprep.subr.bf16.mxu1 %v21807_v59 }
 0x53c   :  { %2470 = vmatpush1.bf16.msra.mxu1 %v17643_v60 }
 0x53d   :  { %2471 = vmatprep.subr.bf16.mxu1 %v21807_v59 }
 0x540   :  { %2472 = vmatpush1.bf16.msra.mxu1 %v17648_v11 }
 0x541   :  { %14468 = vmatprep.subr.bf16.mxu1 %v21810_v48 }
 0x543   :  { %2480 = vmatmul.mubr.bf16.vlgmr.msra.gmra.mrb[180].mxu1 %v16331_v55  ;;  %v18342_v55 = vadd.f32 %v14444_v31, %v14443_v39  ;;  %v16372_v39 = vld [vmem:[%s21787_s3 + $0x310] ss:$16 sps:$4 sm:$0xff]  }
 0x544   :  { %14469 = vmatpush3.bf16.msra.mxu1 %v17458_v43  ;;  %12781 = vmatprep.mubr.msk.bf16.mxu1 %vm833_vm2, %v16337_v27  ;;  %v14446_v27 = vpop.f32.mrb[186].mxu0 }
 0x545   :  { %14470 = vmatprep.subr.bf16.mxu1 %v17502_v3 }
 0x548   :  { %14471 = vmatpush3.bf16.msra.mxu1 %v17468_v53 }
 0x549   :  { %14472 = vmatprep.subr.bf16.mxu1 %v17508_v13 }
 0x54b   :  { %2488 = vmatmul.mubr.bf16.gmra.mrb[184].mxu1 %v16339_v6  ;;  %v14447_v6 = vpop.f32.mrb[187].mxu0 }
 0x54c   :  { %14473 = vmatpush3.bf16.msra.mxu1 %v17472_v62  ;;  %12782 = vmatprep.mubr.msk.bf16.mxu1 %vm833_vm2, %v16343_v9  ;;  %v18344_v9 = vadd.f32 %v14447_v6, %v14446_v27 }
 0x54d   :  { %14474 = vmatprep.subr.bf16.mxu1 %v17514_v23 }
 0x550   :  { %14475 = vmatpush3.bf16.msra.mxu1 %v17476_v8 }
 0x551   :  { %14476 = vmatprep.subr.bf16.mxu1 %v17520_v34 }
 0x553   :  { %2496 = vmatmul.mubr.bf16.gmra.mrb[188].mxu1 %v16345_v32  ;;  %v14449_v32 = vpop.f32.mrb[188].mxu0 }
 0x554   :  { %14477 = vmatpush3.bf16.msra.mxu1 %v17480_v17  ;;  %12783 = vmatprep.mubr.msk.bf16.mxu1 %vm833_vm2, %v16349_v15  ;;  %v14450_v15 = vpop.f32.mrb[189].mxu0 }
 0x555   :  { %14478 = vmatprep.subr.bf16.mxu1 %v17526_v45  ;;  %v18346_v37 = vadd.f32 %v14450_v15, %v14449_v32  ;;  %v16376_v32 = vld [vmem:[%s21787_s3 + $0x334] ss:$16 sps:$4 sm:$0xff]   ;;  %v16378_v15 = vld [vmem:[%s21787_s3 + $0x330] ss:$16 sps:$4 sm:$0xff]  }
 0x558   :  { %14479 = vmatpush3.bf16.msra.mxu1 %v17484_v26 }
 0x559   :  { %14480 = vmatprep.subr.bf16.mxu1 %v17532_v57 }
 0x55b   :  { %2504 = vmatmul.mubr.bf16.gmra.mrb[192].mxu1 %v16351_v12  ;;  %v14452_v12 = vpop.f32.mrb[190].mxu0 }
 0x55c   :  { %14481 = vmatpush3.bf16.msra.mxu1 %v17488_v36  ;;  %12784 = vmatprep.mubr.msk.bf16.mxu1 %vm833_vm2, %v12779_v54  ;;  %v14453_v54 = vpop.f32.mrb[191].mxu0 }
 0x55d   :  { %14482 = vmatprep.subr.bf16.mxu1 %v17538_v5 }
 0x560   :  { %14483 = vmatpush3.bf16.msra.mxu1 %v17492_v46 }
 0x561   :  { %15504 = vmatprep.subr.bf16.mxu1 %v21806_v30 }
 0x563   :  { %2512 = vmatmul.mubr.bf16.gmra.mrb[196].mxu1 %v12778_v28  ;;  %v18348_v28 = vadd.f32 %v14453_v54, %v14452_v12  ;;  %v14455_v19 = vpop.f32.mrb[192].mxu0 }
 0x564   :  { %v14456_v24 = vpop.f32.mrb[193].mxu0  ;;  %2792 = vmatprep.mubr.bf16.mxu1 %v16360_v51 }
 0x565   :  { %v18350_v47 = vadd.f32 %v14456_v24, %v14455_v19  ;;  %v14458_v25 = vpop.f32.mrb[194].mxu0 }
 0x566   :  { %v14459_v38 = vpop.f32.mrb[195].mxu0 }
 0x56b   :  { %2793 = vmatmul.mubr.bf16.vlgmr.msra.gmra.mrb[200].mxu1 %v16358_v2  ;;  %v12812_v2 = vld [vmem:[%s21787_s3 + $0x350] sm:$0xff] }
 0x56c   :  { %2800 = vmatprep.mubr.bf16.mxu1 %v16364_v52 }
 0x573   :  { %2801 = vmatmul.mubr.bf16.gmra.mrb[204].mxu1 %v16366_v58  ;;  %v12831_v58 = vcombine.high %v12812_v2, %v12812_v2 }
 0x574   :  { %2808 = vmatprep.mubr.bf16.mxu1 %v16370_v41 }
 0x57b   :  { %2809 = vmatmul.mubr.bf16.gmra.mrb[208].mxu1 %v16372_v39 }
 0x57c   :  { %2816 = vmatprep.mubr.bf16.mxu1 %v16376_v32 }
 0x583   :  { %2817 = vmatmul.mubr.bf16.gmra.mrb[212].mxu1 %v16378_v15  ;;  %v21811_v15 = vld [vmem:[#allocation6_spill] sm:$0xff] }
 0x584   :  { %2824 = vmatprep.mubr.bf16.mxu1 %v12831_v58 }
 0x5e2   :  { %v2205_v31 = vpop.f32.mrb[160].mxu1 }
 0x5e3   :  { %v18371_v27 = vadd.f32 %v2205_v31, %v18199_v42  ;;  %v15462_v6 = vpop.f32.mrb[161].mxu1 }
 0x5e4   :  { %v2208_v12 = vpop.f32.mrb[162].mxu1 }
 0x5e5   :  { %v18380_v54 = vadd.f32 %v2208_v12, %v18205_v1  ;;  %v15463_v19 = vpop.f32.mrb[163].mxu1  ;;  %v12830_v1 = vcombine.low %v12812_v2, %v12812_v2 }
 0x5e7   :  { %2825 = vmatmul.mubr.bf16.gmra.mrb[216].mxu1 %v12830_v1 }
 0x5e8   :  { %15508 = vmatprep.mubr.msk.bf16.mxu1 %vm17183_vm0, %v21806_v30 }
 0x5ea   :  { %v2213_v24 = vpop.f32.mrb[164].mxu1 }
 0x5eb   :  { %v18383_v42 = vadd.f32 %v2213_v24, %v18210_v0  ;;  %v15466_v25 = vpop.f32.mrb[165].mxu1 }
 0x5ec   :  { %v2216_v38 = vpop.f32.mrb[166].mxu1  ;;  %v21812_v25 = vld [vmem:[#allocation7_spill] sm:$0xff] }
 0x5ed   :  { %v18389_v51 = vadd.f32 %v2216_v38, %v18213_v7  ;;  %v15467_v52 = vpop.f32.mrb[167].mxu1 }
 0x5f2   :  { %v2221_v41 = vpop.f32.mrb[168].mxu1 }
 0x5f3   :  { %v18394_v0 = vadd.f32 %v2221_v41, %v18216_v10  ;;  %v15470_v39 = vpop.f32.mrb[169].mxu1 }
 0x5f4   :  { %v2224_v31 = vpop.f32.mrb[170].mxu1 }
 0x5f5   :  { %v18397_v6 = vadd.f32 %v2224_v31, %v18219_v22  ;;  %v15471_v32 = vpop.f32.mrb[171].mxu1 }
 0x5fa   :  { %v2229_v7 = vpop.f32.mrb[172].mxu1 }
 0x5fb   :  { %v18400_v12 = vadd.f32 %v2229_v7, %v21811_v15  ;;  %v15474_v19 = vpop.f32.mrb[173].mxu1 }
 0x5fc   :  { %v2232_v24 = vpop.f32.mrb[174].mxu1 }
 0x5fd   :  { %v18403_v38 = vadd.f32 %v2232_v24, %v21812_v25  ;;  %v15475_v2 = vpop.f32.mrb[175].mxu1 }
 0x602   :  { %v2237_v52 = vpop.f32.mrb[176].mxu1 }
 0x603   :  { %v18406_v10 = vadd.f32 %v2237_v52, %v18228_v16  ;;  %v15478_v58 = vpop.f32.mrb[177].mxu1 }
 0x604   :  { %v2240_v1 = vpop.f32.mrb[178].mxu1 }
 0x605   :  { %v15479_v41 = vpop.f32.mrb[179].mxu1 }
 0x616   :  { %v2481_v22 = vpop.f32.mrb[180].mxu1 }
 0x617   :  { %v2482_v39 = vadd.f32 %v18334_v40, %v2481_v22  ;;  %v2483_v31 = vpop.f32.mrb[181].mxu1 }
 0x618   :  { %v2484_v32 = vpop.f32.mrb[182].mxu1 }
 0x619   :  { %v2485_v7 = vadd.f32 %v18336_v56, %v2484_v32  ;;  %v2486_v15 = vpop.f32.mrb[183].mxu1 }
 0x61b   :  { %v2519_v19 = vpack.c.bf16 %v2485_v7, %v2482_v39 }
 0x61d   :  { %15485 = vmatmul.mubr.msk.bf16.vlgmr.msra.gmra.mrb[196].mxu0 %vm1295_vm4, %v2519_v19 }
 0x61e   :  { %2833 = vmatpush1.bf16.msra.mxu0 %v17551_v20  ;;  %v2489_v24 = vpop.f32.mrb[184].mxu1  ;;  %15488 = vmatprep.mubr.msk.bf16.mxu0 %vm17183_vm0, %v21806_v30 }
 0x61f   :  { %v2490_v16 = vadd.f32 %v18338_v18, %v2489_v24  ;;  %v2491_v25 = vpop.f32.mrb[185].mxu1  ;;  %2834 = vmatprep.subr.bf16.mxu0 %v21807_v59 }
 0x620   :  { %v2492_v40 = vpop.f32.mrb[186].mxu1 }
 0x621   :  { %v2493_v2 = vadd.f32 %v18340_v61, %v2492_v40  ;;  %v2494_v52 = vpop.f32.mrb[187].mxu1 }
 0x622   :  { %2835 = vmatpush1.bf16.msra.mxu0 %v17563_v35  ;;  %v16367_v52 = vld [vmem:[%s21787_s3 + $0x2fc] ss:$16 sps:$4 sm:$0xff]  }
 0x623   :  { %v2520_v56 = vpack.c.bf16 %v2493_v2, %v2490_v16  ;;  %2836 = vmatprep.subr.bf16.mxu0 %v21807_v59  ;;  %v16363_v2 = vld [vmem:[%s21787_s3 + $0x2dc] ss:$16 sps:$4 sm:$0xff]  }
 0x625   :  { %15489 = vmatmul.mubr.msk.bf16.gmra.mrb[200].mxu0 %vm1295_vm4, %v2520_v56  ;;  %v16369_v56 = vld [vmem:[%s21787_s3 + $0x2f8] ss:$16 sps:$4 sm:$0xff]  }
 0x626   :  { %2837 = vmatpush1.bf16.msra.mxu0 %v17575_v50  ;;  %v2497_v58 = vpop.f32.mrb[188].mxu1  ;;  %15492 = vmatprep.mubr.msk.bf16.mxu0 %vm17183_vm0, %v21806_v30 }
 0x627   :  { %v2498_v18 = vadd.f32 %v18342_v55, %v2497_v58  ;;  %v2499_v1 = vpop.f32.mrb[189].mxu1  ;;  %2838 = vmatprep.subr.bf16.mxu0 %v21807_v59  ;;  %v16373_v58 = vld [vmem:[%s21787_s3 + $0x31c] ss:$16 sps:$4 sm:$0xff]  }
 0x628   :  { %v2500_v61 = vpop.f32.mrb[190].mxu1  ;;  %v16379_v1 = vld [vmem:[%s21787_s3 + $0x33c] ss:$16 sps:$4 sm:$0xff]  }
 0x629   :  { %v2501_v41 = vadd.f32 %v18344_v9, %v2500_v61  ;;  %v2502_v22 = vpop.f32.mrb[191].mxu1  ;;  %v12813_v61 = vld [vmem:[%s21787_s3 + $0x358] sm:$0xff] }
 0x62a   :  { %2839 = vmatpush1.bf16.msra.mxu0 %v17587_v4  ;;  %v12833_v22 = vcombine.high %v12813_v61, %v12813_v61 }
 0x62b   :  { %v2521_v39 = vpack.c.bf16 %v2501_v41, %v2498_v18  ;;  %2840 = vmatprep.subr.bf16.mxu0 %v21807_v59  ;;  %v16375_v18 = vld [vmem:[%s21787_s3 + $0x318] ss:$16 sps:$4 sm:$0xff]  }
 0x62c   :  { %v16381_v41 = vld [vmem:[%s21787_s3 + $0x338] ss:$16 sps:$4 sm:$0xff]  }
 0x62d   :  { %15493 = vmatmul.mubr.msk.bf16.gmra.mrb[204].mxu0 %vm1295_vm4, %v2521_v39  ;;  %v12832_v39 = vcombine.low %v12813_v61, %v12813_v61 }
 0x62e   :  { %2841 = vmatpush1.bf16.msra.mxu0 %v17597_v21  ;;  %v2505_v31 = vpop.f32.mrb[192].mxu1  ;;  %15496 = vmatprep.mubr.msk.bf16.mxu0 %vm17183_vm0, %v21806_v30 }
 0x62f   :  { %v2506_v55 = vadd.f32 %v18346_v37, %v2505_v31  ;;  %v2507_v32 = vpop.f32.mrb[193].mxu1  ;;  %2842 = vmatprep.subr.bf16.mxu0 %v21807_v59  ;;  %v16386_v31 = vld [vmem:[%s21788_s4 + $0x50] sm:$0xff]  }
 0x630   :  { %v2508_v9 = vpop.f32.mrb[194].mxu1  ;;  %15505 = vmatpush3.bf16.msra.mxu1 %v16386_v31 }
 0x631   :  { %v2509_v7 = vadd.f32 %v18348_v28, %v2508_v9  ;;  %v2510_v15 = vpop.f32.mrb[195].mxu1  ;;  %15506 = vmatprep.subr.bf16.mxu1 %v21806_v30 }
 0x632   :  { %2843 = vmatpush1.bf16.msra.mxu0 %v17603_v33 }
 0x633   :  { %v2522_v19 = vpack.c.bf16 %v2509_v7, %v2506_v55  ;;  %2844 = vmatprep.subr.bf16.mxu0 %v21807_v59  ;;  %v16387_v55 = vld [vmem:[%s21788_s4 + $0x58] sm:$0xff]  }
 0x634   :  { %15507 = vmatpush3.bf16.msra.mxu1 %v16387_v55 }
 0x635   :  { %15497 = vmatmul.mubr.msk.bf16.gmra.mrb[208].mxu0 %vm1295_vm4, %v2522_v19  ;;  %3217 = vmatprep.subr.bf16.mxu1 %v21807_v59 }
 0x636   :  { %2845 = vmatpush1.bf16.msra.mxu0 %v17612_v49  ;;  %v2513_v24 = vpop.f32.mrb[196].mxu1  ;;  %15500 = vmatprep.mubr.msk.bf16.mxu0 %vm17183_vm0, %v21806_v30 }
 0x637   :  { %v2514_v37 = vadd.f32 %v18350_v47, %v2513_v24  ;;  %2846 = vmatprep.subr.bf16.mxu0 %v21807_v59  ;;  %v2515_v16 = vpop.f32.mrb[197].mxu1  ;;  %v16361_v47 = vld [vmem:[%s21787_s3 + $0x2d8] ss:$16 sps:$4 sm:$0xff]  }
 0x638   :  { %v2516_v28 = vpop.f32.mrb[198].mxu1 }
 0x639   :  { %v2523_v25 = vpack.c.bf16 %v2514_v37, %v2514_v37  ;;  %v2517_v40 = vpop.f32.mrb[199].mxu1 }
 0x63a   :  { %2847 = vmatpush1.bf16.msra.mxu0 %v17619_v63 }
 0x63b   :  { %2848 = vmatprep.subr.bf16.mxu0 %v21807_v59 }
 0x63d   :  { %15501 = vmatmul.mubr.msk.bf16.gmra.mrb[212].mxu0 %vm1295_vm4, %v2523_v25 }
 0x63e   :  { %2849 = vmatpush1.bf16.msra.mxu0 %v17625_v14  ;;  %12834 = vmatprep.mubr.msk.bf16.mxu0 %vm833_vm2, %v16363_v2  ;;  %v14484_v32 = vpop.f32.mrb[200].mxu1 }
 0x63f   :  { %2850 = vmatprep.subr.bf16.mxu0 %v21807_v59  ;;  %v14485_v9 = vpop.f32.mrb[201].mxu1 }
 0x640   :  { %v18512_v7 = vadd.f32 %v14485_v9, %v14484_v32  ;;  %v14487_v15 = vpop.f32.mrb[202].mxu1 }
 0x641   :  { %v14488_v19 = vpop.f32.mrb[203].mxu1 }
 0x642   :  { %2851 = vmatpush1.bf16.msra.mxu0 %v17631_v29  ;;  %v18514_v24 = vadd.f32 %v14488_v19, %v14487_v15 }
 0x643   :  { %2852 = vmatprep.subr.bf16.mxu0 %v21807_v59 }
 0x646   :  { %2853 = vmatpush1.bf16.msra.mxu0 %v17637_v44  ;;  %v14490_v37 = vpop.f32.mrb[204].mxu1 }
 0x647   :  { %2854 = vmatprep.subr.bf16.mxu0 %v21807_v59  ;;  %v14491_v16 = vpop.f32.mrb[205].mxu1 }
 0x648   :  { %v18516_v28 = vadd.f32 %v14491_v16, %v14490_v37  ;;  %v14493_v25 = vpop.f32.mrb[206].mxu1  ;;  %v16388_v16 = vld [vmem:[%s21787_s3 + $0x360] ss:$16 sps:$4 sm:$0xff]  }
 0x649   :  { %v14494_v40 = vpop.f32.mrb[207].mxu1 }
 0x64a   :  { %2855 = vmatpush1.bf16.msra.mxu0 %v17643_v60  ;;  %v18518_v2 = vadd.f32 %v14494_v40, %v14493_v25  ;;  %v16390_v25 = vld [vmem:[%s21787_s3 + $0x364] ss:$16 sps:$4 sm:$0xff]  }
 0x64b   :  { %2856 = vmatprep.subr.bf16.mxu0 %v21807_v59  ;;  %v16394_v40 = vld [vmem:[%s21787_s3 + $0x384] ss:$16 sps:$4 sm:$0xff]  }
 0x64e   :  { %2857 = vmatpush1.bf16.msra.mxu0 %v17648_v11 }
 0x64f   :  { %14521 = vmatprep.subr.bf16.mxu0 %v21810_v48 }
 0x651   :  { %2865 = vmatmul.mubr.bf16.vlgmr.msra.gmra.mrb[216].mxu0 %v16361_v47  ;;  %v14496_v47 = vpop.f32.mrb[208].mxu1 }
 0x652   :  { %14522 = vmatpush3.bf16.msra.mxu0 %v17458_v43  ;;  %12835 = vmatprep.mubr.msk.bf16.mxu0 %vm833_vm2, %v16367_v52  ;;  %v14497_v52 = vpop.f32.mrb[209].mxu1 }
 0x653   :  { %14523 = vmatprep.subr.bf16.mxu0 %v17502_v3 }
 0x656   :  { %14524 = vmatpush3.bf16.msra.mxu0 %v17468_v53 }
 0x657   :  { %14525 = vmatprep.subr.bf16.mxu0 %v17508_v13 }
 0x659   :  { %2873 = vmatmul.mubr.bf16.gmra.mrb[220].mxu0 %v16369_v56  ;;  %v18520_v56 = vadd.f32 %v14497_v52, %v14496_v47  ;;  %v16396_v47 = vld [vmem:[%s21787_s3 + $0x380] ss:$16 sps:$4 sm:$0xff]   ;;  %v16400_v52 = vld [vmem:[%s21787_s3 + $0x3a4] ss:$16 sps:$4 sm:$0xff]  }
 0x65a   :  { %14526 = vmatpush3.bf16.msra.mxu0 %v17472_v62  ;;  %12836 = vmatprep.mubr.msk.bf16.mxu0 %vm833_vm2, %v16373_v58  ;;  %v14499_v58 = vpop.f32.mrb[210].mxu1 }
 0x65b   :  { %14527 = vmatprep.subr.bf16.mxu0 %v17514_v23 }
 0x65e   :  { %14528 = vmatpush3.bf16.msra.mxu0 %v17476_v8 }
 0x65f   :  { %14529 = vmatprep.subr.bf16.mxu0 %v17520_v34 }
 0x661   :  { %2881 = vmatmul.mubr.bf16.gmra.mrb[224].mxu0 %v16375_v18  ;;  %v14500_v18 = vpop.f32.mrb[211].mxu1 }
 0x662   :  { %14530 = vmatpush3.bf16.msra.mxu0 %v17480_v17  ;;  %12837 = vmatprep.mubr.msk.bf16.mxu0 %vm833_vm2, %v16379_v1  ;;  %v18522_v1 = vadd.f32 %v14500_v18, %v14499_v58  ;;  %v14502_v61 = vpop.f32.mrb[212].mxu1  ;;  %v16402_v58 = vld [vmem:[%s21787_s3 + $0x3a0] ss:$16 sps:$4 sm:$0xff]  }
 0x663   :  { %14531 = vmatprep.subr.bf16.mxu0 %v17526_v45 }
 0x666   :  { %14532 = vmatpush3.bf16.msra.mxu0 %v17484_v26 }
 0x667   :  { %14533 = vmatprep.subr.bf16.mxu0 %v17532_v57 }
 0x669   :  { %2889 = vmatmul.mubr.bf16.gmra.mrb[228].mxu0 %v16381_v41  ;;  %v14503_v41 = vpop.f32.mrb[213].mxu1 }
 0x66a   :  { %14534 = vmatpush3.bf16.msra.mxu0 %v17488_v36  ;;  %12838 = vmatprep.mubr.msk.bf16.mxu0 %vm833_vm2, %v12833_v22  ;;  %v18524_v22 = vadd.f32 %v14503_v41, %v14502_v61 }
 0x66b   :  { %14535 = vmatprep.subr.bf16.mxu0 %v17538_v5 }
 0x66e   :  { %14536 = vmatpush3.bf16.msra.mxu0 %v17492_v46 }
 0x66f   :  { %15528 = vmatprep.subr.bf16.mxu0 %v21806_v30 }
 0x671   :  { %2897 = vmatmul.mubr.bf16.gmra.mrb[232].mxu0 %v12832_v39  ;;  %v14505_v39 = vpop.f32.mrb[214].mxu1 }
 0x672   :  { %v14506_v31 = vpop.f32.mrb[215].mxu1  ;;  %3177 = vmatprep.mubr.bf16.mxu0 %v16390_v25 }
 0x673   :  { %v18526_v55 = vadd.f32 %v14506_v31, %v14505_v39  ;;  %v16406_v39 = vld [vmem:[%s21787_s3 + $0x3c4] ss:$16 sps:$4 sm:$0xff]   ;;  %v16408_v31 = vld [vmem:[%s21787_s3 + $0x3c0] ss:$16 sps:$4 sm:$0xff]  }
 0x679   :  { %3178 = vmatmul.mubr.bf16.vlgmr.msra.gmra.mrb[236].mxu0 %v16388_v16 }
 0x67a   :  { %3185 = vmatprep.mubr.bf16.mxu0 %v16394_v40  ;;  %v12866_v40 = vld [vmem:[%s21787_s3 + $0x3e0] sm:$0xff] }
 0x681   :  { %3186 = vmatmul.mubr.bf16.gmra.mrb[240].mxu0 %v16396_v47 }
 0x682   :  { %3193 = vmatprep.mubr.bf16.mxu0 %v16400_v52 }
 0x689   :  { %3194 = vmatmul.mubr.bf16.gmra.mrb[244].mxu0 %v16402_v58  ;;  %v12885_v58 = vcombine.high %v12866_v40, %v12866_v40 }
 0x68a   :  { %3201 = vmatprep.mubr.bf16.mxu0 %v16406_v39 }
 0x691   :  { %3202 = vmatmul.mubr.bf16.gmra.mrb[248].mxu0 %v16408_v31 }
 0x692   :  { %3209 = vmatprep.mubr.bf16.mxu0 %v12885_v58 }
 0x6ba   :  { %v14508_v32 = vpop.f32.mrb[216].mxu1 }
 0x6bb   :  { %v14509_v9 = vpop.f32.mrb[217].mxu1 }
 0x6bc   :  { %v18528_v15 = vadd.f32 %v14509_v9, %v14508_v32  ;;  %v14511_v19 = vpop.f32.mrb[218].mxu1 }
 0x6bd   :  { %v14512_v37 = vpop.f32.mrb[219].mxu1 }
 0x6f0   :  { %v2590_v18 = vpop.f32.mrb[196].mxu0 }
 0x6f1   :  { %v18549_v61 = vadd.f32 %v2590_v18, %v18371_v27  ;;  %v15486_v41 = vpop.f32.mrb[197].mxu0 }
 0x6f2   :  { %v2593_v32 = vpop.f32.mrb[198].mxu0 }
 0x6f3   :  { %v18558_v9 = vadd.f32 %v2593_v32, %v18380_v54  ;;  %v15487_v19 = vpop.f32.mrb[199].mxu0  ;;  %v12884_v54 = vcombine.low %v12866_v40, %v12866_v40 }
 0x6f5   :  { %3210 = vmatmul.mubr.bf16.gmra.mrb[252].mxu0 %v12884_v54 }
 0x6f6   :  { %15532 = vmatprep.mubr.msk.bf16.mxu0 %vm17183_vm0, %v21806_v30 }
 0x6f8   :  { %v2598_v37 = vpop.f32.mrb[200].mxu0 }
 0x6f9   :  { %v18561_v27 = vadd.f32 %v2598_v37, %v18383_v42  ;;  %v15490_v16 = vpop.f32.mrb[201].mxu0 }
 0x6fa   :  { %v2601_v25 = vpop.f32.mrb[202].mxu0 }
 0x6fb   :  { %v18567_v47 = vadd.f32 %v2601_v25, %v18389_v51  ;;  %v15491_v52 = vpop.f32.mrb[203].mxu0 }
 0x700   :  { %v2606_v18 = vpop.f32.mrb[204].mxu0 }
 0x701   :  { %v18572_v42 = vadd.f32 %v2606_v18, %v18394_v0  ;;  %v15494_v41 = vpop.f32.mrb[205].mxu0 }
 0x702   :  { %v2609_v39 = vpop.f32.mrb[206].mxu0 }
 0x703   :  { %v18575_v31 = vadd.f32 %v2609_v39, %v18397_v6  ;;  %v15495_v32 = vpop.f32.mrb[207].mxu0 }
 0x708   :  { %v2614_v51 = vpop.f32.mrb[208].mxu0 }
 0x709   :  { %v18578_v19 = vadd.f32 %v2614_v51, %v18400_v12  ;;  %v15498_v37 = vpop.f32.mrb[209].mxu0 }
 0x70a   :  { %v2617_v16 = vpop.f32.mrb[210].mxu0 }
 0x70b   :  { %v18581_v25 = vadd.f32 %v2617_v16, %v18403_v38  ;;  %v15499_v40 = vpop.f32.mrb[211].mxu0 }
 0x710   :  { %v2622_v52 = vpop.f32.mrb[212].mxu0 }
 0x711   :  { %v18584_v0 = vadd.f32 %v2622_v52, %v18406_v10  ;;  %v15502_v58 = vpop.f32.mrb[213].mxu0 }
 0x712   :  { %v2625_v54 = vpop.f32.mrb[214].mxu0 }
 0x713   :  { %v15503_v18 = vpop.f32.mrb[215].mxu0 }
 0x724   :  { %v2866_v6 = vpop.f32.mrb[216].mxu0 }
 0x725   :  { %v2867_v41 = vadd.f32 %v18512_v7, %v2866_v6  ;;  %v2868_v39 = vpop.f32.mrb[217].mxu0 }
 0x726   :  { %v2869_v32 = vpop.f32.mrb[218].mxu0 }
 0x727   :  { %v2870_v12 = vadd.f32 %v18514_v24, %v2869_v32  ;;  %v2871_v51 = vpop.f32.mrb[219].mxu0 }
 0x729   :  { %v2904_v37 = vpack.c.bf16 %v2870_v12, %v2867_v41 }
 0x72b   :  { %15509 = vmatmul.mubr.msk.bf16.vlgmr.msra.gmra.mrb[220].mxu1 %vm1295_vm4, %v2904_v37 }
 0x72c   :  { %3218 = vmatpush1.bf16.msra.mxu1 %v17551_v20  ;;  %v2874_v38 = vpop.f32.mrb[220].mxu0  ;;  %15512 = vmatprep.mubr.msk.bf16.mxu1 %vm17183_vm0, %v21806_v30 }
 0x72d   :  { %v2875_v10 = vadd.f32 %v18516_v28, %v2874_v38  ;;  %v2876_v16 = vpop.f32.mrb[221].mxu0  ;;  %3219 = vmatprep.subr.bf16.mxu1 %v21807_v59 }
 0x72e   :  { %v2877_v7 = vpop.f32.mrb[222].mxu0 }
 0x72f   :  { %v2878_v40 = vadd.f32 %v18518_v2, %v2877_v7  ;;  %v2879_v52 = vpop.f32.mrb[223].mxu0 }
 0x730   :  { %3220 = vmatpush1.bf16.msra.mxu1 %v17563_v35  ;;  %v16397_v52 = vld [vmem:[%s21787_s3 + $0x38c] ss:$16 sps:$4 sm:$0xff]  }
 0x731   :  { %v2905_v24 = vpack.c.bf16 %v2878_v40, %v2875_v10  ;;  %3221 = vmatprep.subr.bf16.mxu1 %v21807_v59  ;;  %v16393_v40 = vld [vmem:[%s21787_s3 + $0x36c] ss:$16 sps:$4 sm:$0xff]  }
 0x733   :  { %15513 = vmatmul.mubr.msk.bf16.gmra.mrb[224].mxu1 %vm1295_vm4, %v2905_v24  ;;  %v16399_v24 = vld [vmem:[%s21787_s3 + $0x388] ss:$16 sps:$4 sm:$0xff]  }
 0x734   :  { %3222 = vmatpush1.bf16.msra.mxu1 %v17575_v50  ;;  %v2882_v58 = vpop.f32.mrb[224].mxu0  ;;  %15516 = vmatprep.mubr.msk.bf16.mxu1 %vm17183_vm0, %v21806_v30 }
 0x735   :  { %v2883_v28 = vadd.f32 %v18520_v56, %v2882_v58  ;;  %v2884_v54 = vpop.f32.mrb[225].mxu0  ;;  %3223 = vmatprep.subr.bf16.mxu1 %v21807_v59  ;;  %v16403_v58 = vld [vmem:[%s21787_s3 + $0x3ac] ss:$16 sps:$4 sm:$0xff]  }
 0x736   :  { %v2885_v2 = vpop.f32.mrb[226].mxu0  ;;  %v16409_v54 = vld [vmem:[%s21787_s3 + $0x3cc] ss:$16 sps:$4 sm:$0xff]  }
 0x737   :  { %v2886_v18 = vadd.f32 %v18522_v1, %v2885_v2  ;;  %v2887_v6 = vpop.f32.mrb[227].mxu0  ;;  %v12867_v2 = vld [vmem:[%s21787_s3 + $0x3e8] sm:$0xff] }
 0x738   :  { %3224 = vmatpush1.bf16.msra.mxu1 %v17587_v4  ;;  %v12887_v6 = vcombine.high %v12867_v2, %v12867_v2 }
 0x739   :  { %v2906_v41 = vpack.c.bf16 %v2886_v18, %v2883_v28  ;;  %3225 = vmatprep.subr.bf16.mxu1 %v21807_v59  ;;  %v16405_v28 = vld [vmem:[%s21787_s3 + $0x3a8] ss:$16 sps:$4 sm:$0xff]  }
 0x73a   :  { %v16411_v18 = vld [vmem:[%s21787_s3 + $0x3c8] ss:$16 sps:$4 sm:$0xff]  }
 0x73b   :  { %15517 = vmatmul.mubr.msk.bf16.gmra.mrb[228].mxu1 %vm1295_vm4, %v2906_v41  ;;  %v12886_v41 = vcombine.low %v12867_v2, %v12867_v2 }
 0x73c   :  { %3226 = vmatpush1.bf16.msra.mxu1 %v17597_v21  ;;  %v2890_v39 = vpop.f32.mrb[228].mxu0  ;;  %15520 = vmatprep.mubr.msk.bf16.mxu1 %vm17183_vm0, %v21806_v30 }
 0x73d   :  { %v2891_v56 = vadd.f32 %v18524_v22, %v2890_v39  ;;  %v2892_v32 = vpop.f32.mrb[229].mxu0  ;;  %3227 = vmatprep.subr.bf16.mxu1 %v21807_v59  ;;  %v16416_v39 = vld [vmem:[%s21788_s4 + $0x60] sm:$0xff]  }
 0x73e   :  { %v2893_v1 = vpop.f32.mrb[230].mxu0  ;;  %15529 = vmatpush3.bf16.msra.mxu0 %v16416_v39 }
 0x73f   :  { %v2894_v12 = vadd.f32 %v18526_v55, %v2893_v1  ;;  %v2895_v51 = vpop.f32.mrb[231].mxu0  ;;  %15530 = vmatprep.subr.bf16.mxu0 %v21806_v30 }
 0x740   :  { %3228 = vmatpush1.bf16.msra.mxu1 %v17603_v33 }
 0x741   :  { %v2907_v37 = vpack.c.bf16 %v2894_v12, %v2891_v56  ;;  %3229 = vmatprep.subr.bf16.mxu1 %v21807_v59  ;;  %v16417_v56 = vld [vmem:[%s21788_s4 + $0x68] sm:$0xff]  }
 0x742   :  { %15531 = vmatpush3.bf16.msra.mxu0 %v16417_v56 }
 0x743   :  { %15521 = vmatmul.mubr.msk.bf16.gmra.mrb[232].mxu1 %vm1295_vm4, %v2907_v37  ;;  %3602 = vmatprep.subr.bf16.mxu0 %v21807_v59 }
 0x744   :  { %3230 = vmatpush1.bf16.msra.mxu1 %v17612_v49  ;;  %v2898_v38 = vpop.f32.mrb[232].mxu0  ;;  %15524 = vmatprep.mubr.msk.bf16.mxu1 %vm17183_vm0, %v21806_v30 }
 0x745   :  { %v2899_v22 = vadd.f32 %v18528_v15, %v2898_v38  ;;  %3231 = vmatprep.subr.bf16.mxu1 %v21807_v59  ;;  %v2900_v10 = vpop.f32.mrb[233].mxu0  ;;  %v16391_v15 = vld [vmem:[%s21787_s3 + $0x368] ss:$16 sps:$4 sm:$0xff]  }
 0x746   :  { %v2901_v55 = vpop.f32.mrb[234].mxu0 }
 0x747   :  { %v2908_v16 = vpack.c.bf16 %v2899_v22, %v2899_v22  ;;  %v2902_v7 = vpop.f32.mrb[235].mxu0 }
 0x748   :  { %3232 = vmatpush1.bf16.msra.mxu1 %v17619_v63 }
 0x749   :  { %3233 = vmatprep.subr.bf16.mxu1 %v21807_v59 }
 0x74b   :  { %15525 = vmatmul.mubr.msk.bf16.gmra.mrb[236].mxu1 %vm1295_vm4, %v2908_v16 }
 0x74c   :  { %3234 = vmatpush1.bf16.msra.mxu1 %v17625_v14  ;;  %12888 = vmatprep.mubr.msk.bf16.mxu1 %vm833_vm2, %v16393_v40  ;;  %v14537_v32 = vpop.f32.mrb[236].mxu0 }
 0x74d   :  { %3235 = vmatprep.subr.bf16.mxu1 %v21807_v59  ;;  %v14538_v1 = vpop.f32.mrb[237].mxu0 }
 0x74e   :  { %v18690_v12 = vadd.f32 %v14538_v1, %v14537_v32  ;;  %v14540_v51 = vpop.f32.mrb[238].mxu0 }
 0x74f   :  { %v14541_v37 = vpop.f32.mrb[239].mxu0 }
 0x750   :  { %3236 = vmatpush1.bf16.msra.mxu1 %v17631_v29  ;;  %v18692_v38 = vadd.f32 %v14541_v37, %v14540_v51 }
 0x751   :  { %3237 = vmatprep.subr.bf16.mxu1 %v21807_v59 }
 0x754   :  { %3238 = vmatpush1.bf16.msra.mxu1 %v17637_v44  ;;  %v14543_v22 = vpop.f32.mrb[240].mxu0 }
 0x755   :  { %3239 = vmatprep.subr.bf16.mxu1 %v21807_v59  ;;  %v14544_v10 = vpop.f32.mrb[241].mxu0 }
 0x756   :  { %v18694_v55 = vadd.f32 %v14544_v10, %v14543_v22  ;;  %v14546_v16 = vpop.f32.mrb[242].mxu0  ;;  %v16418_v10 = vld [vmem:[%s21787_s3 + $0x3f0] ss:$16 sps:$4 sm:$0xff]  }
 0x757   :  { %v14547_v7 = vpop.f32.mrb[243].mxu0 }
 0x758   :  { %3240 = vmatpush1.bf16.msra.mxu1 %v17643_v60  ;;  %v18696_v40 = vadd.f32 %v14547_v7, %v14546_v16  ;;  %v16420_v16 = vld [vmem:[%s21787_s3 + $0x3f4] ss:$16 sps:$4 sm:$0xff]   ;;  %v16424_v7 = vld [vmem:[%s21787_s3 + $0x410] ss:$16 sps:$4 sm:$0xff]  }
 0x759   :  { %3241 = vmatprep.subr.bf16.mxu1 %v21807_v59 }
 0x75c   :  { %3242 = vmatpush1.bf16.msra.mxu1 %v17648_v11 }
 0x75d   :  { %14574 = vmatprep.subr.bf16.mxu1 %v21810_v48 }
 0x75f   :  { %3250 = vmatmul.mubr.bf16.vlgmr.msra.gmra.mrb[240].mxu1 %v16391_v15  ;;  %v14549_v15 = vpop.f32.mrb[244].mxu0 }
 0x760   :  { %14575 = vmatpush3.bf16.msra.mxu1 %v17458_v43  ;;  %12889 = vmatprep.mubr.msk.bf16.mxu1 %vm833_vm2, %v16397_v52  ;;  %v14550_v52 = vpop.f32.mrb[245].mxu0 }
 0x761   :  { %14576 = vmatprep.subr.bf16.mxu1 %v17502_v3 }
 0x764   :  { %14577 = vmatpush3.bf16.msra.mxu1 %v17468_v53 }
 0x765   :  { %14578 = vmatprep.subr.bf16.mxu1 %v17508_v13 }
 0x767   :  { %3258 = vmatmul.mubr.bf16.gmra.mrb[244].mxu1 %v16399_v24  ;;  %v18698_v24 = vadd.f32 %v14550_v52, %v14549_v15  ;;  %v16426_v15 = vld [vmem:[%s21787_s3 + $0x414] ss:$16 sps:$4 sm:$0xff]   ;;  %v16430_v52 = vld [vmem:[%s21787_s3 + $0x430] ss:$16 sps:$4 sm:$0xff]  }
 0x768   :  { %14579 = vmatpush3.bf16.msra.mxu1 %v17472_v62  ;;  %12890 = vmatprep.mubr.msk.bf16.mxu1 %vm833_vm2, %v16403_v58  ;;  %v14552_v58 = vpop.f32.mrb[246].mxu0 }
 0x769   :  { %14580 = vmatprep.subr.bf16.mxu1 %v17514_v23 }
 0x76c   :  { %14581 = vmatpush3.bf16.msra.mxu1 %v17476_v8 }
 0x76d   :  { %14582 = vmatprep.subr.bf16.mxu1 %v17520_v34 }
 0x76f   :  { %3266 = vmatmul.mubr.bf16.gmra.mrb[248].mxu1 %v16405_v28  ;;  %v14553_v28 = vpop.f32.mrb[247].mxu0 }
 0x770   :  { %14583 = vmatpush3.bf16.msra.mxu1 %v17480_v17  ;;  %12891 = vmatprep.mubr.msk.bf16.mxu1 %vm833_vm2, %v16409_v54  ;;  %v18700_v54 = vadd.f32 %v14553_v28, %v14552_v58  ;;  %v14555_v2 = vpop.f32.mrb[248].mxu0  ;;  %v16432_v58 = vld [vmem:[%s21787_s3 + $0x434] ss:$16 sps:$4 sm:$0xff]  }
 0x771   :  { %14584 = vmatprep.subr.bf16.mxu1 %v17526_v45 }
 0x774   :  { %14585 = vmatpush3.bf16.msra.mxu1 %v17484_v26 }
 0x775   :  { %14586 = vmatprep.subr.bf16.mxu1 %v17532_v57 }
 0x777   :  { %3274 = vmatmul.mubr.bf16.gmra.mrb[252].mxu1 %v16411_v18  ;;  %v14556_v18 = vpop.f32.mrb[249].mxu0 }
 0x778   :  { %14587 = vmatpush3.bf16.msra.mxu1 %v17488_v36  ;;  %12892 = vmatprep.mubr.msk.bf16.mxu1 %vm833_vm2, %v12887_v6  ;;  %v18702_v6 = vadd.f32 %v14556_v18, %v14555_v2 }
 0x779   :  { %14588 = vmatprep.subr.bf16.mxu1 %v17538_v5 }
 0x77c   :  { %14589 = vmatpush3.bf16.msra.mxu1 %v17492_v46 }
 0x77d   :  { %15552 = vmatprep.subr.bf16.mxu1 %v21806_v30 }
 0x77f   :  { %3282 = vmatmul.mubr.bf16.gmra.mrb[0].mxu1 %v12886_v41  ;;  %v14558_v41 = vpop.f32.mrb[250].mxu0 }
 0x780   :  { %v14559_v39 = vpop.f32.mrb[251].mxu0  ;;  %3562 = vmatprep.mubr.bf16.mxu1 %v16420_v16 }
 0x781   :  { %v18704_v56 = vadd.f32 %v14559_v39, %v14558_v41  ;;  %v16436_v41 = vld [vmem:[%s21787_s3 + $0x450] ss:$16 sps:$4 sm:$0xff]   ;;  %v16438_v39 = vld [vmem:[%s21787_s3 + $0x454] ss:$16 sps:$4 sm:$0xff]  }
 0x787   :  { %3563 = vmatmul.mubr.bf16.vlgmr.msra.gmra.mrb[4].mxu1 %v16418_v10 }
 0x788   :  { %3570 = vmatprep.mubr.bf16.mxu1 %v16426_v15 }
 0x78f   :  { %3571 = vmatmul.mubr.bf16.gmra.mrb[8].mxu1 %v16424_v7  ;;  %v12920_v7 = vld [vmem:[%s21787_s3 + $0x470] sm:$0xff] }
 0x790   :  { %3578 = vmatprep.mubr.bf16.mxu1 %v16432_v58  ;;  %v12939_v58 = vcombine.high %v12920_v7, %v12920_v7 }
 0x797   :  { %3579 = vmatmul.mubr.bf16.gmra.mrb[12].mxu1 %v16430_v52 }
 0x798   :  { %3586 = vmatprep.mubr.bf16.mxu1 %v16438_v39 }
 0x79f   :  { %3587 = vmatmul.mubr.bf16.gmra.mrb[16].mxu1 %v16436_v41 }
 0x7a0   :  { %3594 = vmatprep.mubr.bf16.mxu1 %v12939_v58 }
 0x7c8   :  { %v14561_v32 = vpop.f32.mrb[252].mxu0 }
 0x7c9   :  { %v14562_v1 = vpop.f32.mrb[253].mxu0 }
 0x7ca   :  { %v18706_v51 = vadd.f32 %v14562_v1, %v14561_v32  ;;  %v14564_v37 = vpop.f32.mrb[254].mxu0 }
 0x7cb   :  { %v14565_v22 = vpop.f32.mrb[255].mxu0 }
 0x7fe   :  { %v2975_v28 = vpop.f32.mrb[220].mxu1 }
 0x7ff   :  { %v18727_v2 = vadd.f32 %v2975_v28, %v18549_v61  ;;  %v15510_v18 = vpop.f32.mrb[221].mxu1 }
 0x800   :  { %v2978_v32 = vpop.f32.mrb[222].mxu1 }
 0x801   :  { %v18736_v1 = vadd.f32 %v2978_v32, %v18558_v9  ;;  %v15511_v37 = vpop.f32.mrb[223].mxu1  ;;  %v12938_v9 = vcombine.low %v12920_v7, %v12920_v7 }
 0x803   :  { %3595 = vmatmul.mubr.bf16.gmra.mrb[20].mxu1 %v12938_v9 }
 0x804   :  { %15556 = vmatprep.mubr.msk.bf16.mxu1 %vm17183_vm0, %v21806_v30 }
 0x806   :  { %v2983_v22 = vpop.f32.mrb[224].mxu1 }
 0x807   :  { %v18739_v61 = vadd.f32 %v2983_v22, %v18561_v27  ;;  %v15514_v10 = vpop.f32.mrb[225].mxu1 }
 0x808   :  { %v2986_v16 = vpop.f32.mrb[226].mxu1 }
 0x809   :  { %v18745_v15 = vadd.f32 %v2986_v16, %v18567_v47  ;;  %v15515_v52 = vpop.f32.mrb[227].mxu1 }
 0x80e   :  { %v2991_v28 = vpop.f32.mrb[228].mxu1 }
 0x80f   :  { %v18750_v27 = vadd.f32 %v2991_v28, %v18572_v42  ;;  %v15518_v18 = vpop.f32.mrb[229].mxu1 }
 0x810   :  { %v2994_v41 = vpop.f32.mrb[230].mxu1 }
 0x811   :  { %v18753_v39 = vadd.f32 %v2994_v41, %v18575_v31  ;;  %v15519_v32 = vpop.f32.mrb[231].mxu1 }
 0x816   :  { %v2999_v47 = vpop.f32.mrb[232].mxu1 }
 0x817   :  { %v18756_v37 = vadd.f32 %v2999_v47, %v18578_v19  ;;  %v15522_v22 = vpop.f32.mrb[233].mxu1 }
 0x818   :  { %v3002_v10 = vpop.f32.mrb[234].mxu1 }
 0x819   :  { %v18759_v16 = vadd.f32 %v3002_v10, %v18581_v25  ;;  %v15523_v7 = vpop.f32.mrb[235].mxu1 }
 0x81e   :  { %v3007_v52 = vpop.f32.mrb[236].mxu1 }
 0x81f   :  { %v18762_v42 = vadd.f32 %v3007_v52, %v18584_v0  ;;  %v15526_v58 = vpop.f32.mrb[237].mxu1 }
 0x820   :  { %v3010_v9 = vpop.f32.mrb[238].mxu1 }
 0x821   :  { %v15527_v28 = vpop.f32.mrb[239].mxu1 }
 0x832   :  { %v3251_v31 = vpop.f32.mrb[240].mxu1 }
 0x833   :  { %v3252_v18 = vadd.f32 %v18690_v12, %v3251_v31  ;;  %v3253_v41 = vpop.f32.mrb[241].mxu1 }
 0x834   :  { %v3254_v32 = vpop.f32.mrb[242].mxu1 }
 0x835   :  { %v3255_v19 = vadd.f32 %v18692_v38, %v3254_v32  ;;  %v3256_v47 = vpop.f32.mrb[243].mxu1 }
 0x837   :  { %v3289_v22 = vpack.c.bf16 %v3255_v19, %v3252_v18 }
 0x839   :  { %15533 = vmatmul.mubr.msk.bf16.vlgmr.msra.gmra.mrb[0].mxu0 %vm1295_vm4, %v3289_v22 }
 0x83a   :  { %3603 = vmatpush1.bf16.msra.mxu0 %v17551_v20  ;;  %v3259_v25 = vpop.f32.mrb[244].mxu1  ;;  %15536 = vmatprep.mubr.msk.bf16.mxu0 %vm17183_vm0, %v21806_v30 }
 0x83b   :  { %v3260_v0 = vadd.f32 %v18694_v55, %v3259_v25  ;;  %v3261_v10 = vpop.f32.mrb[245].mxu1  ;;  %3604 = vmatprep.subr.bf16.mxu0 %v21807_v59 }
 0x83c   :  { %v3262_v12 = vpop.f32.mrb[246].mxu1 }
 0x83d   :  { %v3263_v7 = vadd.f32 %v18696_v40, %v3262_v12  ;;  %v3264_v52 = vpop.f32.mrb[247].mxu1 }
 0x83e   :  { %3605 = vmatpush1.bf16.msra.mxu0 %v17563_v35  ;;  %v16429_v52 = vld [vmem:[%s21787_s3 + $0x41c] ss:$16 sps:$4 sm:$0xff]  }
 0x83f   :  { %v3290_v38 = vpack.c.bf16 %v3263_v7, %v3260_v0  ;;  %3606 = vmatprep.subr.bf16.mxu0 %v21807_v59  ;;  %v16423_v7 = vld [vmem:[%s21787_s3 + $0x3fc] ss:$16 sps:$4 sm:$0xff]  }
 0x841   :  { %15537 = vmatmul.mubr.msk.bf16.gmra.mrb[4].mxu0 %vm1295_vm4, %v3290_v38  ;;  %v16427_v38 = vld [vmem:[%s21787_s3 + $0x418] ss:$16 sps:$4 sm:$0xff]  }
 0x842   :  { %3607 = vmatpush1.bf16.msra.mxu0 %v17575_v50  ;;  %v3267_v58 = vpop.f32.mrb[248].mxu1  ;;  %15540 = vmatprep.mubr.msk.bf16.mxu0 %vm17183_vm0, %v21806_v30 }
 0x843   :  { %v3268_v55 = vadd.f32 %v18698_v24, %v3267_v58  ;;  %v3269_v9 = vpop.f32.mrb[249].mxu1  ;;  %3608 = vmatprep.subr.bf16.mxu0 %v21807_v59  ;;  %v16435_v58 = vld [vmem:[%s21787_s3 + $0x43c] ss:$16 sps:$4 sm:$0xff]  }
 0x844   :  { %v3270_v40 = vpop.f32.mrb[250].mxu1  ;;  %v16441_v9 = vld [vmem:[%s21787_s3 + $0x45c] ss:$16 sps:$4 sm:$0xff]  }
 0x845   :  { %v3271_v28 = vadd.f32 %v18700_v54, %v3270_v40  ;;  %v3272_v31 = vpop.f32.mrb[251].mxu1  ;;  %v12921_v40 = vld [vmem:[%s21787_s3 + $0x478] sm:$0xff] }
 0x846   :  { %3609 = vmatpush1.bf16.msra.mxu0 %v17587_v4  ;;  %v12941_v31 = vcombine.high %v12921_v40, %v12921_v40 }
 0x847   :  { %v3291_v18 = vpack.c.bf16 %v3271_v28, %v3268_v55  ;;  %3610 = vmatprep.subr.bf16.mxu0 %v21807_v59  ;;  %v16433_v55 = vld [vmem:[%s21787_s3 + $0x438] ss:$16 sps:$4 sm:$0xff]  }
 0x848   :  { %v16439_v28 = vld [vmem:[%s21787_s3 + $0x458] ss:$16 sps:$4 sm:$0xff]  }
 0x849   :  { %15541 = vmatmul.mubr.msk.bf16.gmra.mrb[8].mxu0 %vm1295_vm4, %v3291_v18  ;;  %v12940_v18 = vcombine.low %v12921_v40, %v12921_v40 }
 0x84a   :  { %3611 = vmatpush1.bf16.msra.mxu0 %v17597_v21  ;;  %v3275_v41 = vpop.f32.mrb[252].mxu1  ;;  %15544 = vmatprep.mubr.msk.bf16.mxu0 %vm17183_vm0, %v21806_v30 }
 0x84b   :  { %v3276_v24 = vadd.f32 %v18702_v6, %v3275_v41  ;;  %v3277_v32 = vpop.f32.mrb[253].mxu1  ;;  %3612 = vmatprep.subr.bf16.mxu0 %v21807_v59  ;;  %v16446_v41 = vld [vmem:[%s21788_s4 + $0x70] sm:$0xff]  }
 0x84c   :  { %v3278_v54 = vpop.f32.mrb[254].mxu1  ;;  %15553 = vmatpush3.bf16.msra.mxu1 %v16446_v41 }
 0x84d   :  { %v3279_v19 = vadd.f32 %v18704_v56, %v3278_v54  ;;  %v3280_v47 = vpop.f32.mrb[255].mxu1  ;;  %15554 = vmatprep.subr.bf16.mxu1 %v21806_v30 }
 0x84e   :  { %3613 = vmatpush1.bf16.msra.mxu0 %v17603_v33 }
 0x84f   :  { %v3292_v22 = vpack.c.bf16 %v3279_v19, %v3276_v24  ;;  %3614 = vmatprep.subr.bf16.mxu0 %v21807_v59  ;;  %v16447_v24 = vld [vmem:[%s21788_s4 + $0x78] sm:$0xff]  }
 0x850   :  { %15555 = vmatpush3.bf16.msra.mxu1 %v16447_v24 }
 0x851   :  { %15545 = vmatmul.mubr.msk.bf16.gmra.mrb[12].mxu0 %vm1295_vm4, %v3292_v22  ;;  %3987 = vmatprep.subr.bf16.mxu1 %v21807_v59 }
 0x852   :  { %3615 = vmatpush1.bf16.msra.mxu0 %v17612_v49  ;;  %v3283_v25 = vpop.f32.mrb[0].mxu1  ;;  %15548 = vmatprep.mubr.msk.bf16.mxu0 %vm17183_vm0, %v21806_v30 }
 0x853   :  { %v3284_v6 = vadd.f32 %v18706_v51, %v3283_v25  ;;  %3616 = vmatprep.subr.bf16.mxu0 %v21807_v59  ;;  %v3285_v0 = vpop.f32.mrb[1].mxu1  ;;  %v16421_v51 = vld [vmem:[%s21787_s3 + $0x3f8] ss:$16 sps:$4 sm:$0xff]  }
 0x854   :  { %v3286_v56 = vpop.f32.mrb[2].mxu1 }
 0x855   :  { %v3293_v10 = vpack.c.bf16 %v3284_v6, %v3284_v6  ;;  %v3287_v12 = vpop.f32.mrb[3].mxu1 }
 0x856   :  { %3617 = vmatpush1.bf16.msra.mxu0 %v17619_v63 }
 0x857   :  { %3618 = vmatprep.subr.bf16.mxu0 %v21807_v59 }
 0x859   :  { %15549 = vmatmul.mubr.msk.bf16.gmra.mrb[16].mxu0 %vm1295_vm4, %v3293_v10 }
 0x85a   :  { %3619 = vmatpush1.bf16.msra.mxu0 %v17625_v14  ;;  %12942 = vmatprep.mubr.msk.bf16.mxu0 %vm833_vm2, %v16423_v7  ;;  %v14590_v32 = vpop.f32.mrb[4].mxu1 }
 0x85b   :  { %3620 = vmatprep.subr.bf16.mxu0 %v21807_v59  ;;  %v14591_v54 = vpop.f32.mrb[5].mxu1 }
 0x85c   :  { %v18868_v19 = vadd.f32 %v14591_v54, %v14590_v32  ;;  %v14593_v47 = vpop.f32.mrb[6].mxu1 }
 0x85d   :  { %v14594_v22 = vpop.f32.mrb[7].mxu1 }
 0x85e   :  { %3621 = vmatpush1.bf16.msra.mxu0 %v17631_v29  ;;  %v18870_v25 = vadd.f32 %v14594_v22, %v14593_v47 }
 0x85f   :  { %3622 = vmatprep.subr.bf16.mxu0 %v21807_v59 }
 0x862   :  { %3623 = vmatpush1.bf16.msra.mxu0 %v17637_v44  ;;  %v14596_v6 = vpop.f32.mrb[8].mxu1 }
 0x863   :  { %3624 = vmatprep.subr.bf16.mxu0 %v21807_v59  ;;  %v14597_v0 = vpop.f32.mrb[9].mxu1 }
 0x864   :  { %v18872_v56 = vadd.f32 %v14597_v0, %v14596_v6  ;;  %v14599_v10 = vpop.f32.mrb[10].mxu1  ;;  %v16448_v0 = vld [vmem:[%s21787_s3 + $0x480] ss:$16 sps:$4 sm:$0xff]  }
 0x865   :  { %v14600_v12 = vpop.f32.mrb[11].mxu1 }
 0x866   :  { %3625 = vmatpush1.bf16.msra.mxu0 %v17643_v60  ;;  %v18874_v7 = vadd.f32 %v14600_v12, %v14599_v10  ;;  %v16450_v10 = vld [vmem:[%s21787_s3 + $0x484] ss:$16 sps:$4 sm:$0xff]   ;;  %v16454_v12 = vld [vmem:[%s21787_s3 + $0x4a0] ss:$16 sps:$4 sm:$0xff]  }
 0x867   :  { %3626 = vmatprep.subr.bf16.mxu0 %v21807_v59 }
 0x86a   :  { %3627 = vmatpush1.bf16.msra.mxu0 %v17648_v11 }
 0x86b   :  { %14627 = vmatprep.subr.bf16.mxu0 %v21810_v48 }
 0x86d   :  { %3635 = vmatmul.mubr.bf16.vlgmr.msra.gmra.mrb[20].mxu0 %v16421_v51  ;;  %v14602_v51 = vpop.f32.mrb[12].mxu1 }
 0x86e   :  { %14628 = vmatpush3.bf16.msra.mxu0 %v17458_v43  ;;  %12943 = vmatprep.mubr.msk.bf16.mxu0 %vm833_vm2, %v16429_v52  ;;  %v14603_v52 = vpop.f32.mrb[13].mxu1 }
 0x86f   :  { %14629 = vmatprep.subr.bf16.mxu0 %v17502_v3 }
 0x872   :  { %14630 = vmatpush3.bf16.msra.mxu0 %v17468_v53 }
 0x873   :  { %14631 = vmatprep.subr.bf16.mxu0 %v17508_v13 }
 0x875   :  { %3643 = vmatmul.mubr.bf16.gmra.mrb[24].mxu0 %v16427_v38  ;;  %v18876_v38 = vadd.f32 %v14603_v52, %v14602_v51  ;;  %v16456_v51 = vld [vmem:[%s21787_s3 + $0x4a4] ss:$16 sps:$4 sm:$0xff]   ;;  %v16460_v52 = vld [vmem:[%s21787_s3 + $0x4c0] ss:$16 sps:$4 sm:$0xff]  }
 0x876   :  { %14632 = vmatpush3.bf16.msra.mxu0 %v17472_v62  ;;  %12944 = vmatprep.mubr.msk.bf16.mxu0 %vm833_vm2, %v16435_v58  ;;  %v14605_v58 = vpop.f32.mrb[14].mxu1 }
 0x877   :  { %14633 = vmatprep.subr.bf16.mxu0 %v17514_v23 }
 0x87a   :  { %14634 = vmatpush3.bf16.msra.mxu0 %v17476_v8 }
 0x87b   :  { %14635 = vmatprep.subr.bf16.mxu0 %v17520_v34 }
 0x87d   :  { %3651 = vmatmul.mubr.bf16.gmra.mrb[28].mxu0 %v16433_v55  ;;  %v14606_v55 = vpop.f32.mrb[15].mxu1 }
 0x87e   :  { %14636 = vmatpush3.bf16.msra.mxu0 %v17480_v17  ;;  %12945 = vmatprep.mubr.msk.bf16.mxu0 %vm833_vm2, %v16441_v9  ;;  %v18878_v9 = vadd.f32 %v14606_v55, %v14605_v58  ;;  %v14608_v40 = vpop.f32.mrb[16].mxu1  ;;  %v16462_v58 = vld [vmem:[%s21787_s3 + $0x4c4] ss:$16 sps:$4 sm:$0xff]  }
 0x87f   :  { %14637 = vmatprep.subr.bf16.mxu0 %v17526_v45 }
 0x882   :  { %14638 = vmatpush3.bf16.msra.mxu0 %v17484_v26 }
 0x883   :  { %14639 = vmatprep.subr.bf16.mxu0 %v17532_v57 }
 0x885   :  { %3659 = vmatmul.mubr.bf16.gmra.mrb[32].mxu0 %v16439_v28  ;;  %v14609_v28 = vpop.f32.mrb[17].mxu1 }
 0x886   :  { %14640 = vmatpush3.bf16.msra.mxu0 %v17488_v36  ;;  %12946 = vmatprep.mubr.msk.bf16.mxu0 %vm833_vm2, %v12941_v31  ;;  %v18880_v31 = vadd.f32 %v14609_v28, %v14608_v40 }
 0x887   :  { %14641 = vmatprep.subr.bf16.mxu0 %v17538_v5 }
 0x88a   :  { %14642 = vmatpush3.bf16.msra.mxu0 %v17492_v46 }
 0x88b   :  { %15576 = vmatprep.subr.bf16.mxu0 %v21806_v30 }
 0x88d   :  { %3667 = vmatmul.mubr.bf16.gmra.mrb[36].mxu0 %v12940_v18  ;;  %v14611_v18 = vpop.f32.mrb[18].mxu1 }
 0x88e   :  { %v14612_v41 = vpop.f32.mrb[19].mxu1  ;;  %3947 = vmatprep.mubr.bf16.mxu0 %v16450_v10 }
 0x88f   :  { %v18882_v24 = vadd.f32 %v14612_v41, %v14611_v18  ;;  %v16466_v18 = vld [vmem:[%s21787_s3 + $0x4e0] ss:$16 sps:$4 sm:$0xff]   ;;  %v16468_v41 = vld [vmem:[%s21787_s3 + $0x4e4] ss:$16 sps:$4 sm:$0xff]  }
 0x895   :  { %3948 = vmatmul.mubr.bf16.vlgmr.msra.gmra.mrb[40].mxu0 %v16448_v0 }
 0x896   :  { %3955 = vmatprep.mubr.bf16.mxu0 %v16456_v51 }
 0x89d   :  { %3956 = vmatmul.mubr.bf16.gmra.mrb[44].mxu0 %v16454_v12  ;;  %v12974_v12 = vld [vmem:[%s21787_s3 + $0x500] sm:$0xff] }
 0x89e   :  { %3963 = vmatprep.mubr.bf16.mxu0 %v16462_v58  ;;  %v12993_v58 = vcombine.high %v12974_v12, %v12974_v12 }
 0x8a5   :  { %3964 = vmatmul.mubr.bf16.gmra.mrb[48].mxu0 %v16460_v52 }
 0x8a6   :  { %3971 = vmatprep.mubr.bf16.mxu0 %v16468_v41 }
 0x8ad   :  { %3972 = vmatmul.mubr.bf16.gmra.mrb[52].mxu0 %v16466_v18 }
 0x8ae   :  { %3979 = vmatprep.mubr.bf16.mxu0 %v12993_v58 }
 0x8d6   :  { %v14614_v32 = vpop.f32.mrb[20].mxu1 }
 0x8d7   :  { %v14615_v54 = vpop.f32.mrb[21].mxu1 }
 0x8d8   :  { %v18884_v47 = vadd.f32 %v14615_v54, %v14614_v32  ;;  %v14617_v22 = vpop.f32.mrb[22].mxu1 }
 0x8d9   :  { %v14618_v6 = vpop.f32.mrb[23].mxu1 }
 0x90c   :  { %v3360_v55 = vpop.f32.mrb[0].mxu0 }
 0x90d   :  { %v18905_v40 = vadd.f32 %v3360_v55, %v18727_v2  ;;  %v15534_v28 = vpop.f32.mrb[1].mxu0 }
 0x90e   :  { %v3363_v32 = vpop.f32.mrb[2].mxu0 }
 0x90f   :  { %v18914_v54 = vadd.f32 %v3363_v32, %v18736_v1  ;;  %v15535_v22 = vpop.f32.mrb[3].mxu0  ;;  %v12992_v1 = vcombine.low %v12974_v12, %v12974_v12 }
 0x911   :  { %3980 = vmatmul.mubr.bf16.gmra.mrb[56].mxu0 %v12992_v1 }
 0x912   :  { %15580 = vmatprep.mubr.msk.bf16.mxu0 %vm17183_vm0, %v21806_v30 }
 0x914   :  { %v3368_v6 = vpop.f32.mrb[4].mxu0 }
 0x915   :  { %v18917_v2 = vadd.f32 %v3368_v6, %v18739_v61  ;;  %v15538_v0 = vpop.f32.mrb[5].mxu0 }
 0x916   :  { %v3371_v10 = vpop.f32.mrb[6].mxu0 }
 0x917   :  { %v18923_v51 = vadd.f32 %v3371_v10, %v18745_v15  ;;  %v15539_v52 = vpop.f32.mrb[7].mxu0 }
 0x91c   :  { %v3376_v55 = vpop.f32.mrb[8].mxu0 }
 0x91d   :  { %v18928_v61 = vadd.f32 %v3376_v55, %v18750_v27  ;;  %v15542_v28 = vpop.f32.mrb[9].mxu0 }
 0x91e   :  { %v3379_v18 = vpop.f32.mrb[10].mxu0 }
 0x91f   :  { %v18931_v41 = vadd.f32 %v3379_v18, %v18753_v39  ;;  %v15543_v32 = vpop.f32.mrb[11].mxu0 }
 0x924   :  { %v3384_v15 = vpop.f32.mrb[12].mxu0 }
 0x925   :  { %v18934_v22 = vadd.f32 %v3384_v15, %v18756_v37  ;;  %v15546_v6 = vpop.f32.mrb[13].mxu0 }
 0x926   :  { %v3387_v0 = vpop.f32.mrb[14].mxu0 }
 0x927   :  { %v18937_v10 = vadd.f32 %v3387_v0, %v18759_v16  ;;  %v15547_v12 = vpop.f32.mrb[15].mxu0 }
 0x92c   :  { %v3392_v52 = vpop.f32.mrb[16].mxu0 }
 0x92d   :  { %v18940_v27 = vadd.f32 %v3392_v52, %v18762_v42  ;;  %v15550_v58 = vpop.f32.mrb[17].mxu0 }
 0x92e   :  { %v3395_v1 = vpop.f32.mrb[18].mxu0 }
 0x92f   :  { %v15551_v55 = vpop.f32.mrb[19].mxu0 }
 0x940   :  { %v3636_v39 = vpop.f32.mrb[20].mxu0 }
 0x941   :  { %v3637_v28 = vadd.f32 %v18868_v19, %v3636_v39  ;;  %v3638_v18 = vpop.f32.mrb[21].mxu0 }
 0x942   :  { %v3639_v32 = vpop.f32.mrb[22].mxu0 }
 0x943   :  { %v3640_v37 = vadd.f32 %v18870_v25, %v3639_v32  ;;  %v3641_v15 = vpop.f32.mrb[23].mxu0 }
 0x945   :  { %v3674_v6 = vpack.c.bf16 %v3640_v37, %v3637_v28 }
 0x947   :  { %15557 = vmatmul.mubr.msk.bf16.vlgmr.msra.gmra.mrb[24].mxu1 %vm1295_vm4, %v3674_v6 }
 0x948   :  { %3988 = vmatpush1.bf16.msra.mxu1 %v17551_v20  ;;  %v3644_v16 = vpop.f32.mrb[24].mxu0  ;;  %15560 = vmatprep.mubr.msk.bf16.mxu1 %vm17183_vm0, %v21806_v30 }
 0x949   :  { %v3645_v42 = vadd.f32 %v18872_v56, %v3644_v16  ;;  %v3646_v0 = vpop.f32.mrb[25].mxu0  ;;  %3989 = vmatprep.subr.bf16.mxu1 %v21807_v59 }
 0x94a   :  { %v3647_v19 = vpop.f32.mrb[26].mxu0 }
 0x94b   :  { %v3648_v12 = vadd.f32 %v18874_v7, %v3647_v19  ;;  %v3649_v52 = vpop.f32.mrb[27].mxu0 }
 0x94c   :  { %3990 = vmatpush1.bf16.msra.mxu1 %v17563_v35  ;;  %v16459_v52 = vld [vmem:[%s21787_s3 + $0x4ac] ss:$16 sps:$4 sm:$0xff]  }
 0x94d   :  { %v3675_v25 = vpack.c.bf16 %v3648_v12, %v3645_v42  ;;  %3991 = vmatprep.subr.bf16.mxu1 %v21807_v59  ;;  %v16453_v12 = vld [vmem:[%s21787_s3 + $0x48c] ss:$16 sps:$4 sm:$0xff]  }
 0x94f   :  { %15561 = vmatmul.mubr.msk.bf16.gmra.mrb[28].mxu1 %vm1295_vm4, %v3675_v25  ;;  %v16457_v25 = vld [vmem:[%s21787_s3 + $0x4a8] ss:$16 sps:$4 sm:$0xff]  }
 0x950   :  { %3992 = vmatpush1.bf16.msra.mxu1 %v17575_v50  ;;  %v3652_v58 = vpop.f32.mrb[28].mxu0  ;;  %15564 = vmatprep.mubr.msk.bf16.mxu1 %vm17183_vm0, %v21806_v30 }
 0x951   :  { %v3653_v56 = vadd.f32 %v18876_v38, %v3652_v58  ;;  %v3654_v1 = vpop.f32.mrb[29].mxu0  ;;  %3993 = vmatprep.subr.bf16.mxu1 %v21807_v59  ;;  %v16465_v58 = vld [vmem:[%s21787_s3 + $0x4cc] ss:$16 sps:$4 sm:$0xff]  }
 0x952   :  { %v3655_v7 = vpop.f32.mrb[30].mxu0  ;;  %v16471_v1 = vld [vmem:[%s21787_s3 + $0x4ec] ss:$16 sps:$4 sm:$0xff]  }
 0x953   :  { %v3656_v55 = vadd.f32 %v18878_v9, %v3655_v7  ;;  %v3657_v39 = vpop.f32.mrb[31].mxu0  ;;  %v12975_v7 = vld [vmem:[%s21787_s3 + $0x508] sm:$0xff] }
 0x954   :  { %3994 = vmatpush1.bf16.msra.mxu1 %v17587_v4  ;;  %v12995_v39 = vcombine.high %v12975_v7, %v12975_v7 }
 0x955   :  { %v3676_v28 = vpack.c.bf16 %v3656_v55, %v3653_v56  ;;  %3995 = vmatprep.subr.bf16.mxu1 %v21807_v59  ;;  %v16463_v56 = vld [vmem:[%s21787_s3 + $0x4c8] ss:$16 sps:$4 sm:$0xff]  }
 0x956   :  { %v16469_v55 = vld [vmem:[%s21787_s3 + $0x4e8] ss:$16 sps:$4 sm:$0xff]  }
 0x957   :  { %15565 = vmatmul.mubr.msk.bf16.gmra.mrb[32].mxu1 %vm1295_vm4, %v3676_v28  ;;  %v12994_v28 = vcombine.low %v12975_v7, %v12975_v7 }
 0x958   :  { %3996 = vmatpush1.bf16.msra.mxu1 %v17597_v21  ;;  %v3660_v18 = vpop.f32.mrb[32].mxu0  ;;  %15568 = vmatprep.mubr.msk.bf16.mxu1 %vm17183_vm0, %v21806_v30 }
 0x959   :  { %v3661_v38 = vadd.f32 %v18880_v31, %v3660_v18  ;;  %v3662_v32 = vpop.f32.mrb[33].mxu0  ;;  %3997 = vmatprep.subr.bf16.mxu1 %v21807_v59  ;;  %v16476_v18 = vld [vmem:[%s21788_s4 + $0x80] sm:$0xff]  }
 0x95a   :  { %v3663_v9 = vpop.f32.mrb[34].mxu0  ;;  %15577 = vmatpush3.bf16.msra.mxu0 %v16476_v18 }
 0x95b   :  { %v3664_v37 = vadd.f32 %v18882_v24, %v3663_v9  ;;  %v3665_v15 = vpop.f32.mrb[35].mxu0  ;;  %15578 = vmatprep.subr.bf16.mxu0 %v21806_v30 }
 0x95c   :  { %3998 = vmatpush1.bf16.msra.mxu1 %v17603_v33 }
 0x95d   :  { %v3677_v6 = vpack.c.bf16 %v3664_v37, %v3661_v38  ;;  %3999 = vmatprep.subr.bf16.mxu1 %v21807_v59  ;;  %v16477_v38 = vld [vmem:[%s21788_s4 + $0x88] sm:$0xff]  }
 0x95e   :  { %15579 = vmatpush3.bf16.msra.mxu0 %v16477_v38 }
 0x95f   :  { %15569 = vmatmul.mubr.msk.bf16.gmra.mrb[36].mxu1 %vm1295_vm4, %v3677_v6  ;;  %4372 = vmatprep.subr.bf16.mxu0 %v21807_v59 }
 0x960   :  { %4000 = vmatpush1.bf16.msra.mxu1 %v17612_v49  ;;  %v3668_v16 = vpop.f32.mrb[36].mxu0  ;;  %15572 = vmatprep.mubr.msk.bf16.mxu1 %vm17183_vm0, %v21806_v30 }
 0x961   :  { %v3669_v31 = vadd.f32 %v18884_v47, %v3668_v16  ;;  %4001 = vmatprep.subr.bf16.mxu1 %v21807_v59  ;;  %v3670_v42 = vpop.f32.mrb[37].mxu0  ;;  %v16451_v47 = vld [vmem:[%s21787_s3 + $0x488] ss:$16 sps:$4 sm:$0xff]  }
 0x962   :  { %v3671_v24 = vpop.f32.mrb[38].mxu0 }
 0x963   :  { %v3678_v0 = vpack.c.bf16 %v3669_v31, %v3669_v31  ;;  %v3672_v19 = vpop.f32.mrb[39].mxu0 }
 0x964   :  { %4002 = vmatpush1.bf16.msra.mxu1 %v17619_v63 }
 0x965   :  { %4003 = vmatprep.subr.bf16.mxu1 %v21807_v59 }
 0x967   :  { %15573 = vmatmul.mubr.msk.bf16.gmra.mrb[40].mxu1 %vm1295_vm4, %v3678_v0 }
 0x968   :  { %4004 = vmatpush1.bf16.msra.mxu1 %v17625_v14  ;;  %12996 = vmatprep.mubr.msk.bf16.mxu1 %vm833_vm2, %v16453_v12  ;;  %v14643_v32 = vpop.f32.mrb[40].mxu0 }
 0x969   :  { %4005 = vmatprep.subr.bf16.mxu1 %v21807_v59  ;;  %v14644_v9 = vpop.f32.mrb[41].mxu0 }
 0x96a   :  { %v19046_v37 = vadd.f32 %v14644_v9, %v14643_v32  ;;  %v14646_v15 = vpop.f32.mrb[42].mxu0 }
 0x96b   :  { %v14647_v6 = vpop.f32.mrb[43].mxu0 }
 0x96c   :  { %4006 = vmatpush1.bf16.msra.mxu1 %v17631_v29  ;;  %v19048_v16 = vadd.f32 %v14647_v6, %v14646_v15 }
 0x96d   :  { %4007 = vmatprep.subr.bf16.mxu1 %v21807_v59 }
 0x970   :  { %4008 = vmatpush1.bf16.msra.mxu1 %v17637_v44  ;;  %v14649_v31 = vpop.f32.mrb[44].mxu0 }
 0x971   :  { %4009 = vmatprep.subr.bf16.mxu1 %v21807_v59  ;;  %v14650_v42 = vpop.f32.mrb[45].mxu0 }
 0x972   :  { %v19050_v24 = vadd.f32 %v14650_v42, %v14649_v31  ;;  %v14652_v0 = vpop.f32.mrb[46].mxu0  ;;  %v16478_v42 = vld [vmem:[%s21787_s3 + $0x510] ss:$16 sps:$4 sm:$0xff]  }
 0x973   :  { %v14653_v19 = vpop.f32.mrb[47].mxu0 }
 0x974   :  { %4010 = vmatpush1.bf16.msra.mxu1 %v17643_v60  ;;  %v19052_v12 = vadd.f32 %v14653_v19, %v14652_v0  ;;  %v16480_v0 = vld [vmem:[%s21787_s3 + $0x514] ss:$16 sps:$4 sm:$0xff]   ;;  %v16484_v19 = vld [vmem:[%s21787_s3 + $0x530] ss:$16 sps:$4 sm:$0xff]  }
 0x975   :  { %4011 = vmatprep.subr.bf16.mxu1 %v21807_v59 }
 0x978   :  { %4012 = vmatpush1.bf16.msra.mxu1 %v17648_v11 }
 0x979   :  { %14680 = vmatprep.subr.bf16.mxu1 %v21810_v48 }
 0x97b   :  { %4020 = vmatmul.mubr.bf16.vlgmr.msra.gmra.mrb[44].mxu1 %v16451_v47  ;;  %v14655_v47 = vpop.f32.mrb[48].mxu0 }
 0x97c   :  { %14681 = vmatpush3.bf16.msra.mxu1 %v17458_v43  ;;  %12997 = vmatprep.mubr.msk.bf16.mxu1 %vm833_vm2, %v16459_v52  ;;  %v14656_v52 = vpop.f32.mrb[49].mxu0 }
 0x97d   :  { %14682 = vmatprep.subr.bf16.mxu1 %v17502_v3 }
 0x980   :  { %14683 = vmatpush3.bf16.msra.mxu1 %v17468_v53 }
 0x981   :  { %14684 = vmatprep.subr.bf16.mxu1 %v17508_v13 }
 0x983   :  { %4028 = vmatmul.mubr.bf16.gmra.mrb[48].mxu1 %v16457_v25  ;;  %v19054_v25 = vadd.f32 %v14656_v52, %v14655_v47  ;;  %v16486_v47 = vld [vmem:[%s21787_s3 + $0x534] ss:$16 sps:$4 sm:$0xff]   ;;  %v16490_v52 = vld [vmem:[%s21787_s3 + $0x550] ss:$16 sps:$4 sm:$0xff]  }
 0x984   :  { %14685 = vmatpush3.bf16.msra.mxu1 %v17472_v62  ;;  %12998 = vmatprep.mubr.msk.bf16.mxu1 %vm833_vm2, %v16465_v58  ;;  %v14658_v58 = vpop.f32.mrb[50].mxu0 }
 0x985   :  { %14686 = vmatprep.subr.bf16.mxu1 %v17514_v23 }
 0x988   :  { %14687 = vmatpush3.bf16.msra.mxu1 %v17476_v8 }
 0x989   :  { %14688 = vmatprep.subr.bf16.mxu1 %v17520_v34 }
 0x98b   :  { %4036 = vmatmul.mubr.bf16.gmra.mrb[52].mxu1 %v16463_v56  ;;  %v14659_v56 = vpop.f32.mrb[51].mxu0 }
 0x98c   :  { %14689 = vmatpush3.bf16.msra.mxu1 %v17480_v17  ;;  %12999 = vmatprep.mubr.msk.bf16.mxu1 %vm833_vm2, %v16471_v1  ;;  %v19056_v1 = vadd.f32 %v14659_v56, %v14658_v58  ;;  %v14661_v7 = vpop.f32.mrb[52].mxu0  ;;  %v16492_v58 = vld [vmem:[%s21787_s3 + $0x554] ss:$16 sps:$4 sm:$0xff]  }
 0x98d   :  { %14690 = vmatprep.subr.bf16.mxu1 %v17526_v45 }
 0x990   :  { %14691 = vmatpush3.bf16.msra.mxu1 %v17484_v26 }
 0x991   :  { %14692 = vmatprep.subr.bf16.mxu1 %v17532_v57 }
 0x993   :  { %4044 = vmatmul.mubr.bf16.gmra.mrb[56].mxu1 %v16469_v55  ;;  %v14662_v55 = vpop.f32.mrb[53].mxu0 }
 0x994   :  { %14693 = vmatpush3.bf16.msra.mxu1 %v17488_v36  ;;  %13000 = vmatprep.mubr.msk.bf16.mxu1 %vm833_vm2, %v12995_v39  ;;  %v19058_v39 = vadd.f32 %v14662_v55, %v14661_v7 }
 0x995   :  { %14694 = vmatprep.subr.bf16.mxu1 %v17538_v5 }
 0x998   :  { %14695 = vmatpush3.bf16.msra.mxu1 %v17492_v46 }
 0x999   :  { %15600 = vmatprep.subr.bf16.mxu1 %v21806_v30 }
 0x99b   :  { %4052 = vmatmul.mubr.bf16.gmra.mrb[60].mxu1 %v12994_v28  ;;  %v14664_v28 = vpop.f32.mrb[54].mxu0 }
 0x99c   :  { %v14665_v18 = vpop.f32.mrb[55].mxu0  ;;  %4332 = vmatprep.mubr.bf16.mxu1 %v16480_v0 }
 0x99d   :  { %v19060_v38 = vadd.f32 %v14665_v18, %v14664_v28  ;;  %v16496_v28 = vld [vmem:[%s21787_s3 + $0x570] ss:$16 sps:$4 sm:$0xff]   ;;  %v16498_v18 = vld [vmem:[%s21787_s3 + $0x574] ss:$16 sps:$4 sm:$0xff]  }
 0x9a3   :  { %4333 = vmatmul.mubr.bf16.vlgmr.msra.gmra.mrb[64].mxu1 %v16478_v42 }
 0x9a4   :  { %4340 = vmatprep.mubr.bf16.mxu1 %v16486_v47 }
 0x9ab   :  { %4341 = vmatmul.mubr.bf16.gmra.mrb[68].mxu1 %v16484_v19  ;;  %v13028_v19 = vld [vmem:[%s21787_s3 + $0x590] sm:$0xff] }
 0x9ac   :  { %4348 = vmatprep.mubr.bf16.mxu1 %v16492_v58 }
 0x9b3   :  { %4349 = vmatmul.mubr.bf16.gmra.mrb[72].mxu1 %v16490_v52  ;;  %v13047_v52 = vcombine.high %v13028_v19, %v13028_v19 }
 0x9b4   :  { %4356 = vmatprep.mubr.bf16.mxu1 %v16498_v18 }
 0x9bb   :  { %4357 = vmatmul.mubr.bf16.gmra.mrb[76].mxu1 %v16496_v28 }
 0x9bc   :  { %4364 = vmatprep.mubr.bf16.mxu1 %v13047_v52 }
 0x9e4   :  { %v14667_v32 = vpop.f32.mrb[56].mxu0 }
 0x9e5   :  { %v14668_v9 = vpop.f32.mrb[57].mxu0 }
 0x9e6   :  { %v19062_v15 = vadd.f32 %v14668_v9, %v14667_v32  ;;  %v14670_v6 = vpop.f32.mrb[58].mxu0 }
 0x9e7   :  { %v14671_v31 = vpop.f32.mrb[59].mxu0 }
 0xa1a   :  { %v3745_v56 = vpop.f32.mrb[24].mxu1 }
 0xa1b   :  { %v19083_v7 = vadd.f32 %v3745_v56, %v18905_v40  ;;  %v15558_v55 = vpop.f32.mrb[25].mxu1 }
 0xa1c   :  { %v3748_v32 = vpop.f32.mrb[26].mxu1 }
 0xa1d   :  { %v19092_v9 = vadd.f32 %v3748_v32, %v18914_v54  ;;  %v15559_v6 = vpop.f32.mrb[27].mxu1  ;;  %v13046_v54 = vcombine.low %v13028_v19, %v13028_v19 }
 0xa1f   :  { %4365 = vmatmul.mubr.bf16.gmra.mrb[80].mxu1 %v13046_v54 }
 0xa20   :  { %15604 = vmatprep.mubr.msk.bf16.mxu1 %vm17183_vm0, %v21806_v30 }
 0xa22   :  { %v3753_v31 = vpop.f32.mrb[28].mxu1 }
 0xa23   :  { %v15562_v42 = vpop.f32.mrb[29].mxu1  ;;  %v19095_v40 = vadd.f32 %v3753_v31, %v18917_v2 }
 0xa24   :  { %v3756_v0 = vpop.f32.mrb[30].mxu1 }
 0xa25   :  { %v15563_v47 = vpop.f32.mrb[31].mxu1  ;;  %v19101_v58 = vadd.f32 %v3756_v0, %v18923_v51 }
 0xa2a   :  { %v3761_v56 = vpop.f32.mrb[32].mxu1 }
 0xa2b   :  { %v19106_v2 = vadd.f32 %v3761_v56, %v18928_v61  ;;  %v15566_v55 = vpop.f32.mrb[33].mxu1 }
 0xa2c   :  { %v3764_v28 = vpop.f32.mrb[34].mxu1 }
 0xa2d   :  { %v19109_v18 = vadd.f32 %v3764_v28, %v18931_v41  ;;  %v15567_v32 = vpop.f32.mrb[35].mxu1 }
 0xa32   :  { %v3769_v6 = vpop.f32.mrb[36].mxu1 }
 0xa33   :  { %v19112_v51 = vadd.f32 %v3769_v6, %v18934_v22  ;;  %v15570_v31 = vpop.f32.mrb[37].mxu1 }
 0xa34   :  { %v3772_v42 = vpop.f32.mrb[38].mxu1 }
 0xa35   :  { %v19115_v0 = vadd.f32 %v3772_v42, %v18937_v10  ;;  %v15571_v19 = vpop.f32.mrb[39].mxu1 }
 0xa3a   :  { %v3777_v47 = vpop.f32.mrb[40].mxu1 }
 0xa3b   :  { %v19118_v61 = vadd.f32 %v3777_v47, %v18940_v27  ;;  %v15574_v52 = vpop.f32.mrb[41].mxu1 }
 0xa3c   :  { %v3780_v54 = vpop.f32.mrb[42].mxu1 }
 0xa3d   :  { %v15575_v56 = vpop.f32.mrb[43].mxu1 }
 0xa4e   :  { %v4021_v41 = vpop.f32.mrb[44].mxu1 }
 0xa4f   :  { %v4022_v55 = vadd.f32 %v19046_v37, %v4021_v41  ;;  %v4023_v28 = vpop.f32.mrb[45].mxu1 }
 0xa50   :  { %v4024_v32 = vpop.f32.mrb[46].mxu1 }
 0xa51   :  { %v4025_v22 = vadd.f32 %v19048_v16, %v4024_v32  ;;  %v4026_v6 = vpop.f32.mrb[47].mxu1 }
 0xa53   :  { %v4059_v31 = vpack.c.bf16 %v4025_v22, %v4022_v55 }
 0xa55   :  { %15581 = vmatmul.mubr.msk.bf16.vlgmr.msra.gmra.mrb[60].mxu0 %vm1295_vm4, %v4059_v31 }
 0xa56   :  { %4373 = vmatpush1.bf16.msra.mxu0 %v17551_v20  ;;  %v4029_v10 = vpop.f32.mrb[48].mxu1  ;;  %15584 = vmatprep.mubr.msk.bf16.mxu0 %vm17183_vm0, %v21806_v30 }
 0xa57   :  { %v4030_v27 = vadd.f32 %v19050_v24, %v4029_v10  ;;  %v4031_v42 = vpop.f32.mrb[49].mxu1  ;;  %4374 = vmatprep.subr.bf16.mxu0 %v21807_v59 }
 0xa58   :  { %v4032_v37 = vpop.f32.mrb[50].mxu1 }
 0xa59   :  { %v4033_v19 = vadd.f32 %v19052_v12, %v4032_v37  ;;  %v4034_v47 = vpop.f32.mrb[51].mxu1 }
 0xa5a   :  { %4375 = vmatpush1.bf16.msra.mxu0 %v17563_v35  ;;  %v16489_v47 = vld [vmem:[%s21787_s3 + $0x53c] ss:$16 sps:$4 sm:$0xff]  }
 0xa5b   :  { %v4060_v16 = vpack.c.bf16 %v4033_v19, %v4030_v27  ;;  %4376 = vmatprep.subr.bf16.mxu0 %v21807_v59  ;;  %v16483_v19 = vld [vmem:[%s21787_s3 + $0x51c] ss:$16 sps:$4 sm:$0xff]  }
 0xa5d   :  { %15585 = vmatmul.mubr.msk.bf16.gmra.mrb[64].mxu0 %vm1295_vm4, %v4060_v16  ;;  %v16487_v16 = vld [vmem:[%s21787_s3 + $0x538] ss:$16 sps:$4 sm:$0xff]  }
 0xa5e   :  { %4377 = vmatpush1.bf16.msra.mxu0 %v17575_v50  ;;  %v4037_v52 = vpop.f32.mrb[52].mxu1  ;;  %15588 = vmatprep.mubr.msk.bf16.mxu0 %vm17183_vm0, %v21806_v30 }
 0xa5f   :  { %v4038_v24 = vadd.f32 %v19054_v25, %v4037_v52  ;;  %v4039_v54 = vpop.f32.mrb[53].mxu1  ;;  %4378 = vmatprep.subr.bf16.mxu0 %v21807_v59  ;;  %v16495_v52 = vld [vmem:[%s21787_s3 + $0x55c] ss:$16 sps:$4 sm:$0xff]  }
 0xa60   :  { %v4040_v12 = vpop.f32.mrb[54].mxu1  ;;  %v16501_v54 = vld [vmem:[%s21787_s3 + $0x57c] ss:$16 sps:$4 sm:$0xff]  }
 0xa61   :  { %v4041_v56 = vadd.f32 %v19056_v1, %v4040_v12  ;;  %v4042_v41 = vpop.f32.mrb[55].mxu1  ;;  %v13029_v12 = vld [vmem:[%s21787_s3 + $0x598] sm:$0xff] }
 0xa62   :  { %4379 = vmatpush1.bf16.msra.mxu0 %v17587_v4  ;;  %v13049_v41 = vcombine.high %v13029_v12, %v13029_v12 }
 0xa63   :  { %v4061_v55 = vpack.c.bf16 %v4041_v56, %v4038_v24  ;;  %4380 = vmatprep.subr.bf16.mxu0 %v21807_v59  ;;  %v16493_v24 = vld [vmem:[%s21787_s3 + $0x558] ss:$16 sps:$4 sm:$0xff]  }
 0xa64   :  { %v16499_v56 = vld [vmem:[%s21787_s3 + $0x578] ss:$16 sps:$4 sm:$0xff]  }
 0xa65   :  { %15589 = vmatmul.mubr.msk.bf16.gmra.mrb[68].mxu0 %vm1295_vm4, %v4061_v55  ;;  %v13048_v55 = vcombine.low %v13029_v12, %v13029_v12 }
 0xa66   :  { %4381 = vmatpush1.bf16.msra.mxu0 %v17597_v21  ;;  %v4045_v28 = vpop.f32.mrb[56].mxu1  ;;  %15592 = vmatprep.mubr.msk.bf16.mxu0 %vm17183_vm0, %v21806_v30 }
 0xa67   :  { %v4046_v25 = vadd.f32 %v19058_v39, %v4045_v28  ;;  %v4047_v32 = vpop.f32.mrb[57].mxu1  ;;  %4382 = vmatprep.subr.bf16.mxu0 %v21807_v59  ;;  %v16506_v28 = vld [vmem:[%s21788_s4 + $0x90] sm:$0xff]  }
 0xa68   :  { %v4048_v1 = vpop.f32.mrb[58].mxu1  ;;  %15601 = vmatpush3.bf16.msra.mxu1 %v16506_v28 }
 0xa69   :  { %v4049_v22 = vadd.f32 %v19060_v38, %v4048_v1  ;;  %v4050_v6 = vpop.f32.mrb[59].mxu1  ;;  %15602 = vmatprep.subr.bf16.mxu1 %v21806_v30 }
 0xa6a   :  { %4383 = vmatpush1.bf16.msra.mxu0 %v17603_v33 }
 0xa6b   :  { %v4062_v31 = vpack.c.bf16 %v4049_v22, %v4046_v25  ;;  %4384 = vmatprep.subr.bf16.mxu0 %v21807_v59  ;;  %v16507_v25 = vld [vmem:[%s21788_s4 + $0x98] sm:$0xff]  }
 0xa6c   :  { %15603 = vmatpush3.bf16.msra.mxu1 %v16507_v25 }
 0xa6d   :  { %15593 = vmatmul.mubr.msk.bf16.gmra.mrb[72].mxu0 %vm1295_vm4, %v4062_v31  ;;  %4757 = vmatprep.subr.bf16.mxu1 %v21807_v59 }
 0xa6e   :  { %4385 = vmatpush1.bf16.msra.mxu0 %v17612_v49  ;;  %v4053_v10 = vpop.f32.mrb[60].mxu1  ;;  %15596 = vmatprep.mubr.msk.bf16.mxu0 %vm17183_vm0, %v21806_v30 }
 0xa6f   :  { %v4054_v39 = vadd.f32 %v19062_v15, %v4053_v10  ;;  %4386 = vmatprep.subr.bf16.mxu0 %v21807_v59  ;;  %v4055_v27 = vpop.f32.mrb[61].mxu1  ;;  %v16481_v15 = vld [vmem:[%s21787_s3 + $0x518] ss:$16 sps:$4 sm:$0xff]  }
 0xa70   :  { %v4056_v38 = vpop.f32.mrb[62].mxu1 }
 0xa71   :  { %v4063_v42 = vpack.c.bf16 %v4054_v39, %v4054_v39  ;;  %v4057_v37 = vpop.f32.mrb[63].mxu1 }
 0xa72   :  { %4387 = vmatpush1.bf16.msra.mxu0 %v17619_v63 }
 0xa73   :  { %4388 = vmatprep.subr.bf16.mxu0 %v21807_v59 }
 0xa75   :  { %15597 = vmatmul.mubr.msk.bf16.gmra.mrb[76].mxu0 %vm1295_vm4, %v4063_v42 }
 0xa76   :  { %4389 = vmatpush1.bf16.msra.mxu0 %v17625_v14  ;;  %13050 = vmatprep.mubr.msk.bf16.mxu0 %vm833_vm2, %v16483_v19  ;;  %v14696_v32 = vpop.f32.mrb[64].mxu1 }
 0xa77   :  { %4390 = vmatprep.subr.bf16.mxu0 %v21807_v59  ;;  %v14697_v1 = vpop.f32.mrb[65].mxu1 }
 0xa78   :  { %v19224_v22 = vadd.f32 %v14697_v1, %v14696_v32  ;;  %v14699_v6 = vpop.f32.mrb[66].mxu1 }
 0xa79   :  { %v14700_v31 = vpop.f32.mrb[67].mxu1 }
 0xa7a   :  { %4391 = vmatpush1.bf16.msra.mxu0 %v17631_v29  ;;  %v19226_v10 = vadd.f32 %v14700_v31, %v14699_v6 }
 0xa7b   :  { %4392 = vmatprep.subr.bf16.mxu0 %v21807_v59 }
 0xa7e   :  { %4393 = vmatpush1.bf16.msra.mxu0 %v17637_v44  ;;  %v14702_v39 = vpop.f32.mrb[68].mxu1 }
 0xa7f   :  { %4394 = vmatprep.subr.bf16.mxu0 %v21807_v59  ;;  %v14703_v27 = vpop.f32.mrb[69].mxu1 }
 0xa80   :  { %v19228_v38 = vadd.f32 %v14703_v27, %v14702_v39  ;;  %v14705_v42 = vpop.f32.mrb[70].mxu1  ;;  %v16508_v27 = vld [vmem:[%s21787_s3 + $0x5a0] ss:$16 sps:$4 sm:$0xff]  }
 0xa81   :  { %v14706_v37 = vpop.f32.mrb[71].mxu1 }
 0xa82   :  { %4395 = vmatpush1.bf16.msra.mxu0 %v17643_v60  ;;  %v19230_v19 = vadd.f32 %v14706_v37, %v14705_v42  ;;  %v16510_v42 = vld [vmem:[%s21787_s3 + $0x5a4] ss:$16 sps:$4 sm:$0xff]   ;;  %v16514_v37 = vld [vmem:[%s21787_s3 + $0x5c0] ss:$16 sps:$4 sm:$0xff]  }
 0xa83   :  { %4396 = vmatprep.subr.bf16.mxu0 %v21807_v59 }
 0xa86   :  { %4397 = vmatpush1.bf16.msra.mxu0 %v17648_v11 }
 0xa87   :  { %14733 = vmatprep.subr.bf16.mxu0 %v21810_v48 }
 0xa89   :  { %4405 = vmatmul.mubr.bf16.vlgmr.msra.gmra.mrb[80].mxu0 %v16481_v15  ;;  %v14708_v15 = vpop.f32.mrb[72].mxu1 }
 0xa8a   :  { %14734 = vmatpush3.bf16.msra.mxu0 %v17458_v43  ;;  %13051 = vmatprep.mubr.msk.bf16.mxu0 %vm833_vm2, %v16489_v47  ;;  %v14709_v47 = vpop.f32.mrb[73].mxu1 }
 0xa8b   :  { %14735 = vmatprep.subr.bf16.mxu0 %v17502_v3 }
 0xa8e   :  { %14736 = vmatpush3.bf16.msra.mxu0 %v17468_v53 }
 0xa8f   :  { %14737 = vmatprep.subr.bf16.mxu0 %v17508_v13 }
 0xa91   :  { %4413 = vmatmul.mubr.bf16.gmra.mrb[84].mxu0 %v16487_v16  ;;  %v19232_v16 = vadd.f32 %v14709_v47, %v14708_v15  ;;  %v16516_v15 = vld [vmem:[%s21787_s3 + $0x5c4] ss:$16 sps:$4 sm:$0xff]   ;;  %v16520_v47 = vld [vmem:[%s21787_s3 + $0x5e0] ss:$16 sps:$4 sm:$0xff]  }
 0xa92   :  { %14738 = vmatpush3.bf16.msra.mxu0 %v17472_v62  ;;  %13052 = vmatprep.mubr.msk.bf16.mxu0 %vm833_vm2, %v16495_v52  ;;  %v14711_v52 = vpop.f32.mrb[74].mxu1 }
 0xa93   :  { %14739 = vmatprep.subr.bf16.mxu0 %v17514_v23 }
 0xa96   :  { %14740 = vmatpush3.bf16.msra.mxu0 %v17476_v8 }
 0xa97   :  { %14741 = vmatprep.subr.bf16.mxu0 %v17520_v34 }
 0xa99   :  { %4421 = vmatmul.mubr.bf16.gmra.mrb[88].mxu0 %v16493_v24  ;;  %v14712_v24 = vpop.f32.mrb[75].mxu1 }
 0xa9a   :  { %14742 = vmatpush3.bf16.msra.mxu0 %v17480_v17  ;;  %13053 = vmatprep.mubr.msk.bf16.mxu0 %vm833_vm2, %v16501_v54  ;;  %v19234_v54 = vadd.f32 %v14712_v24, %v14711_v52  ;;  %v14714_v12 = vpop.f32.mrb[76].mxu1  ;;  %v16522_v52 = vld [vmem:[%s21787_s3 + $0x5e4] ss:$16 sps:$4 sm:$0xff]  }
 0xa9b   :  { %14743 = vmatprep.subr.bf16.mxu0 %v17526_v45 }
 0xa9e   :  { %14744 = vmatpush3.bf16.msra.mxu0 %v17484_v26 }
 0xa9f   :  { %14745 = vmatprep.subr.bf16.mxu0 %v17532_v57 }
 0xaa1   :  { %4429 = vmatmul.mubr.bf16.gmra.mrb[92].mxu0 %v16499_v56  ;;  %v14715_v56 = vpop.f32.mrb[77].mxu1 }
 0xaa2   :  { %14746 = vmatpush3.bf16.msra.mxu0 %v17488_v36  ;;  %13054 = vmatprep.mubr.msk.bf16.mxu0 %vm833_vm2, %v13049_v41  ;;  %v19236_v41 = vadd.f32 %v14715_v56, %v14714_v12 }
 0xaa3   :  { %14747 = vmatprep.subr.bf16.mxu0 %v17538_v5 }
 0xaa6   :  { %14748 = vmatpush3.bf16.msra.mxu0 %v17492_v46 }
 0xaa7   :  { %15624 = vmatprep.subr.bf16.mxu0 %v21806_v30 }
 0xaa9   :  { %4437 = vmatmul.mubr.bf16.gmra.mrb[96].mxu0 %v13048_v55  ;;  %v14717_v55 = vpop.f32.mrb[78].mxu1 }
 0xaaa   :  { %v14718_v28 = vpop.f32.mrb[79].mxu1  ;;  %4717 = vmatprep.mubr.bf16.mxu0 %v16510_v42 }
 0xaab   :  { %v19238_v25 = vadd.f32 %v14718_v28, %v14717_v55  ;;  %v16526_v55 = vld [vmem:[%s21787_s3 + $0x600] ss:$16 sps:$4 sm:$0xff]   ;;  %v16528_v28 = vld [vmem:[%s21787_s3 + $0x604] ss:$16 sps:$4 sm:$0xff]  }
 0xab1   :  { %4718 = vmatmul.mubr.bf16.vlgmr.msra.gmra.mrb[100].mxu0 %v16508_v27 }
 0xab2   :  { %4725 = vmatprep.mubr.bf16.mxu0 %v16516_v15 }
 0xab9   :  { %4726 = vmatmul.mubr.bf16.gmra.mrb[104].mxu0 %v16514_v37  ;;  %v13082_v37 = vld [vmem:[%s21787_s3 + $0x620] sm:$0xff] }
 0xaba   :  { %4733 = vmatprep.mubr.bf16.mxu0 %v16522_v52  ;;  %v13101_v52 = vcombine.high %v13082_v37, %v13082_v37 }
 0xac1   :  { %4734 = vmatmul.mubr.bf16.gmra.mrb[108].mxu0 %v16520_v47 }
 0xac2   :  { %4741 = vmatprep.mubr.bf16.mxu0 %v16528_v28 }
 0xac9   :  { %4742 = vmatmul.mubr.bf16.gmra.mrb[112].mxu0 %v16526_v55 }
 0xaca   :  { %4749 = vmatprep.mubr.bf16.mxu0 %v13101_v52 }
 0xaf2   :  { %v14720_v32 = vpop.f32.mrb[80].mxu1 }
 0xaf3   :  { %v14721_v1 = vpop.f32.mrb[81].mxu1 }
 0xaf4   :  { %v19240_v6 = vadd.f32 %v14721_v1, %v14720_v32  ;;  %v14723_v31 = vpop.f32.mrb[82].mxu1 }
 0xaf5   :  { %v14724_v39 = vpop.f32.mrb[83].mxu1 }
 0xb28   :  { %v4130_v24 = vpop.f32.mrb[60].mxu0 }
 0xb29   :  { %v19261_v12 = vadd.f32 %v4130_v24, %v19083_v7  ;;  %v15582_v56 = vpop.f32.mrb[61].mxu0 }
 0xb2a   :  { %v4133_v32 = vpop.f32.mrb[62].mxu0 }
 0xb2b   :  { %v19270_v1 = vadd.f32 %v4133_v32, %v19092_v9  ;;  %v15583_v31 = vpop.f32.mrb[63].mxu0  ;;  %v13100_v9 = vcombine.low %v13082_v37, %v13082_v37 }
 0xb2d   :  { %4750 = vmatmul.mubr.bf16.gmra.mrb[116].mxu0 %v13100_v9 }
 0xb2e   :  { %15628 = vmatprep.mubr.msk.bf16.mxu0 %vm17183_vm0, %v21806_v30 }
 0xb30   :  { %v4138_v39 = vpop.f32.mrb[64].mxu0 }
 0xb31   :  { %v19273_v7 = vadd.f32 %v4138_v39, %v19095_v40  ;;  %v15586_v27 = vpop.f32.mrb[65].mxu0 }
 0xb32   :  { %v4141_v42 = vpop.f32.mrb[66].mxu0 }
 0xb33   :  { %v19279_v15 = vadd.f32 %v4141_v42, %v19101_v58  ;;  %v15587_v47 = vpop.f32.mrb[67].mxu0 }
 0xb38   :  { %v4146_v24 = vpop.f32.mrb[68].mxu0 }
 0xb39   :  { %v19284_v40 = vadd.f32 %v4146_v24, %v19106_v2  ;;  %v15590_v56 = vpop.f32.mrb[69].mxu0 }
 0xb3a   :  { %v4149_v55 = vpop.f32.mrb[70].mxu0 }
 0xb3b   :  { %v19287_v28 = vadd.f32 %v4149_v55, %v19109_v18  ;;  %v15591_v32 = vpop.f32.mrb[71].mxu0 }
 0xb40   :  { %v4154_v58 = vpop.f32.mrb[72].mxu0 }
 0xb41   :  { %v19290_v31 = vadd.f32 %v4154_v58, %v19112_v51  ;;  %v15594_v39 = vpop.f32.mrb[73].mxu0 }
 0xb42   :  { %v4157_v27 = vpop.f32.mrb[74].mxu0 }
 0xb43   :  { %v19293_v42 = vadd.f32 %v4157_v27, %v19115_v0  ;;  %v15595_v37 = vpop.f32.mrb[75].mxu0 }
 0xb48   :  { %v4162_v47 = vpop.f32.mrb[76].mxu0 }
 0xb49   :  { %v19296_v2 = vadd.f32 %v4162_v47, %v19118_v61  ;;  %v15598_v52 = vpop.f32.mrb[77].mxu0 }
 0xb4a   :  { %v4165_v9 = vpop.f32.mrb[78].mxu0 }
 0xb4b   :  { %v15599_v24 = vpop.f32.mrb[79].mxu0 }
 0xb5c   :  { %v4406_v18 = vpop.f32.mrb[80].mxu0 }
 0xb5d   :  { %v4407_v56 = vadd.f32 %v19224_v22, %v4406_v18  ;;  %v4408_v55 = vpop.f32.mrb[81].mxu0 }
 0xb5e   :  { %v4409_v32 = vpop.f32.mrb[82].mxu0 }
 0xb5f   :  { %v4410_v51 = vadd.f32 %v19226_v10, %v4409_v32  ;;  %v4411_v58 = vpop.f32.mrb[83].mxu0 }
 0xb61   :  { %v4444_v39 = vpack.c.bf16 %v4410_v51, %v4407_v56 }
 0xb63   :  { %15605 = vmatmul.mubr.msk.bf16.vlgmr.msra.gmra.mrb[84].mxu1 %vm1295_vm4, %v4444_v39 }
 0xb64   :  { %4758 = vmatpush1.bf16.msra.mxu1 %v17551_v20  ;;  %v4414_v0 = vpop.f32.mrb[84].mxu0  ;;  %15608 = vmatprep.mubr.msk.bf16.mxu1 %vm17183_vm0, %v21806_v30 }
 0xb65   :  { %v4415_v61 = vadd.f32 %v19228_v38, %v4414_v0  ;;  %v4416_v27 = vpop.f32.mrb[85].mxu0  ;;  %4759 = vmatprep.subr.bf16.mxu1 %v21807_v59 }
 0xb66   :  { %v4417_v22 = vpop.f32.mrb[86].mxu0 }
 0xb67   :  { %v4418_v37 = vadd.f32 %v19230_v19, %v4417_v22  ;;  %v4419_v47 = vpop.f32.mrb[87].mxu0 }
 0xb68   :  { %4760 = vmatpush1.bf16.msra.mxu1 %v17563_v35  ;;  %v16519_v47 = vld [vmem:[%s21787_s3 + $0x5cc] ss:$16 sps:$4 sm:$0xff]  }
 0xb69   :  { %v4445_v10 = vpack.c.bf16 %v4418_v37, %v4415_v61  ;;  %4761 = vmatprep.subr.bf16.mxu1 %v21807_v59  ;;  %v16513_v37 = vld [vmem:[%s21787_s3 + $0x5ac] ss:$16 sps:$4 sm:$0xff]  }
 0xb6b   :  { %15609 = vmatmul.mubr.msk.bf16.gmra.mrb[88].mxu1 %vm1295_vm4, %v4445_v10  ;;  %v16517_v10 = vld [vmem:[%s21787_s3 + $0x5c8] ss:$16 sps:$4 sm:$0xff]  }
 0xb6c   :  { %4762 = vmatpush1.bf16.msra.mxu1 %v17575_v50  ;;  %v4422_v52 = vpop.f32.mrb[88].mxu0  ;;  %15612 = vmatprep.mubr.msk.bf16.mxu1 %vm17183_vm0, %v21806_v30 }
 0xb6d   :  { %v4423_v38 = vadd.f32 %v19232_v16, %v4422_v52  ;;  %v4424_v9 = vpop.f32.mrb[89].mxu0  ;;  %4763 = vmatprep.subr.bf16.mxu1 %v21807_v59  ;;  %v16525_v52 = vld [vmem:[%s21787_s3 + $0x5ec] ss:$16 sps:$4 sm:$0xff]  }
 0xb6e   :  { %v4425_v19 = vpop.f32.mrb[90].mxu0  ;;  %v16531_v9 = vld [vmem:[%s21787_s3 + $0x60c] ss:$16 sps:$4 sm:$0xff]  }
 0xb6f   :  { %v4426_v24 = vadd.f32 %v19234_v54, %v4425_v19  ;;  %v4427_v18 = vpop.f32.mrb[91].mxu0  ;;  %v13083_v19 = vld [vmem:[%s21787_s3 + $0x628] sm:$0xff] }
 0xb70   :  { %4764 = vmatpush1.bf16.msra.mxu1 %v17587_v4  ;;  %v13103_v18 = vcombine.high %v13083_v19, %v13083_v19 }
 0xb71   :  { %v4446_v56 = vpack.c.bf16 %v4426_v24, %v4423_v38  ;;  %4765 = vmatprep.subr.bf16.mxu1 %v21807_v59  ;;  %v16523_v38 = vld [vmem:[%s21787_s3 + $0x5e8] ss:$16 sps:$4 sm:$0xff]  }
 0xb72   :  { %v16529_v24 = vld [vmem:[%s21787_s3 + $0x608] ss:$16 sps:$4 sm:$0xff]  }
 0xb73   :  { %15613 = vmatmul.mubr.msk.bf16.gmra.mrb[92].mxu1 %vm1295_vm4, %v4446_v56  ;;  %v13102_v56 = vcombine.low %v13083_v19, %v13083_v19 }
 0xb74   :  { %4766 = vmatpush1.bf16.msra.mxu1 %v17597_v21  ;;  %v4430_v55 = vpop.f32.mrb[92].mxu0  ;;  %15616 = vmatprep.mubr.msk.bf16.mxu1 %vm17183_vm0, %v21806_v30 }
 0xb75   :  { %v4431_v16 = vadd.f32 %v19236_v41, %v4430_v55  ;;  %v4432_v32 = vpop.f32.mrb[93].mxu0  ;;  %4767 = vmatprep.subr.bf16.mxu1 %v21807_v59  ;;  %v16536_v55 = vld [vmem:[%s21788_s4 + $0xa0] sm:$0xff]  }
 0xb76   :  { %v4433_v54 = vpop.f32.mrb[94].mxu0  ;;  %15625 = vmatpush3.bf16.msra.mxu0 %v16536_v55 }
 0xb77   :  { %v4434_v51 = vadd.f32 %v19238_v25, %v4433_v54  ;;  %v4435_v58 = vpop.f32.mrb[95].mxu0  ;;  %15626 = vmatprep.subr.bf16.mxu0 %v21806_v30 }
 0xb78   :  { %4768 = vmatpush1.bf16.msra.mxu1 %v17603_v33 }
 0xb79   :  { %v4447_v39 = vpack.c.bf16 %v4434_v51, %v4431_v16  ;;  %4769 = vmatprep.subr.bf16.mxu1 %v21807_v59  ;;  %v16537_v16 = vld [vmem:[%s21788_s4 + $0xa8] sm:$0xff]  }
 0xb7a   :  { %15627 = vmatpush3.bf16.msra.mxu0 %v16537_v16 }
 0xb7b   :  { %15617 = vmatmul.mubr.msk.bf16.gmra.mrb[96].mxu1 %vm1295_vm4, %v4447_v39  ;;  %5142 = vmatprep.subr.bf16.mxu0 %v21807_v59 }
 0xb7c   :  { %4770 = vmatpush1.bf16.msra.mxu1 %v17612_v49  ;;  %v4438_v0 = vpop.f32.mrb[96].mxu0  ;;  %15620 = vmatprep.mubr.msk.bf16.mxu1 %vm17183_vm0, %v21806_v30 }
 0xb7d   :  { %v4439_v41 = vadd.f32 %v19240_v6, %v4438_v0  ;;  %4771 = vmatprep.subr.bf16.mxu1 %v21807_v59  ;;  %v4440_v61 = vpop.f32.mrb[97].mxu0  ;;  %v16511_v6 = vld [vmem:[%s21787_s3 + $0x5a8] ss:$16 sps:$4 sm:$0xff]  }
 0xb7e   :  { %v4441_v25 = vpop.f32.mrb[98].mxu0 }
 0xb7f   :  { %v4448_v27 = vpack.c.bf16 %v4439_v41, %v4439_v41  ;;  %v4442_v22 = vpop.f32.mrb[99].mxu0 }
 0xb80   :  { %4772 = vmatpush1.bf16.msra.mxu1 %v17619_v63 }
 0xb81   :  { %4773 = vmatprep.subr.bf16.mxu1 %v21807_v59 }
 0xb83   :  { %15621 = vmatmul.mubr.msk.bf16.gmra.mrb[100].mxu1 %vm1295_vm4, %v4448_v27 }
 0xb84   :  { %4774 = vmatpush1.bf16.msra.mxu1 %v17625_v14  ;;  %13104 = vmatprep.mubr.msk.bf16.mxu1 %vm833_vm2, %v16513_v37  ;;  %v14749_v32 = vpop.f32.mrb[100].mxu0 }
 0xb85   :  { %4775 = vmatprep.subr.bf16.mxu1 %v21807_v59  ;;  %v14750_v54 = vpop.f32.mrb[101].mxu0 }
 0xb86   :  { %v19402_v51 = vadd.f32 %v14750_v54, %v14749_v32  ;;  %v14752_v58 = vpop.f32.mrb[102].mxu0 }
 0xb87   :  { %v14753_v39 = vpop.f32.mrb[103].mxu0 }
 0xb88   :  { %4776 = vmatpush1.bf16.msra.mxu1 %v17631_v29  ;;  %v19404_v0 = vadd.f32 %v14753_v39, %v14752_v58 }
 0xb89   :  { %4777 = vmatprep.subr.bf16.mxu1 %v21807_v59 }
 0xb8c   :  { %4778 = vmatpush1.bf16.msra.mxu1 %v17637_v44  ;;  %v14755_v41 = vpop.f32.mrb[104].mxu0 }
 0xb8d   :  { %4779 = vmatprep.subr.bf16.mxu1 %v21807_v59  ;;  %v14756_v61 = vpop.f32.mrb[105].mxu0 }
 0xb8e   :  { %v19406_v25 = vadd.f32 %v14756_v61, %v14755_v41  ;;  %v14758_v27 = vpop.f32.mrb[106].mxu0  ;;  %v16538_v61 = vld [vmem:[%s21787_s3 + $0x630] ss:$16 sps:$4 sm:$0xff]  }
 0xb8f   :  { %v14759_v22 = vpop.f32.mrb[107].mxu0 }
 0xb90   :  { %4780 = vmatpush1.bf16.msra.mxu1 %v17643_v60  ;;  %v19408_v37 = vadd.f32 %v14759_v22, %v14758_v27  ;;  %v16540_v27 = vld [vmem:[%s21787_s3 + $0x634] ss:$16 sps:$4 sm:$0xff]   ;;  %v16544_v22 = vld [vmem:[%s21787_s3 + $0x650] ss:$16 sps:$4 sm:$0xff]  }
 0xb91   :  { %4781 = vmatprep.subr.bf16.mxu1 %v21807_v59 }
 0xb94   :  { %4782 = vmatpush1.bf16.msra.mxu1 %v17648_v11 }
 0xb95   :  { %14786 = vmatprep.subr.bf16.mxu1 %v21810_v48 }
 0xb97   :  { %4790 = vmatmul.mubr.bf16.vlgmr.msra.gmra.mrb[104].mxu1 %v16511_v6  ;;  %v14761_v6 = vpop.f32.mrb[108].mxu0 }
 0xb98   :  { %14787 = vmatpush3.bf16.msra.mxu1 %v17458_v43  ;;  %13105 = vmatprep.mubr.msk.bf16.mxu1 %vm833_vm2, %v16519_v47  ;;  %v14762_v47 = vpop.f32.mrb[109].mxu0 }
 0xb99   :  { %14788 = vmatprep.subr.bf16.mxu1 %v17502_v3 }
 0xb9c   :  { %14789 = vmatpush3.bf16.msra.mxu1 %v17468_v53 }
 0xb9d   :  { %14790 = vmatprep.subr.bf16.mxu1 %v17508_v13 }
 0xb9f   :  { %4798 = vmatmul.mubr.bf16.gmra.mrb[108].mxu1 %v16517_v10  ;;  %v19410_v10 = vadd.f32 %v14762_v47, %v14761_v6  ;;  %v16546_v6 = vld [vmem:[%s21787_s3 + $0x654] ss:$16 sps:$4 sm:$0xff]   ;;  %v16550_v47 = vld [vmem:[%s21787_s3 + $0x670] ss:$16 sps:$4 sm:$0xff]  }
 0xba0   :  { %14791 = vmatpush3.bf16.msra.mxu1 %v17472_v62  ;;  %13106 = vmatprep.mubr.msk.bf16.mxu1 %vm833_vm2, %v16525_v52  ;;  %v14764_v52 = vpop.f32.mrb[110].mxu0 }
 0xba1   :  { %14792 = vmatprep.subr.bf16.mxu1 %v17514_v23 }
 0xba4   :  { %14793 = vmatpush3.bf16.msra.mxu1 %v17476_v8 }
 0xba5   :  { %14794 = vmatprep.subr.bf16.mxu1 %v17520_v34 }
 0xba7   :  { %4806 = vmatmul.mubr.bf16.gmra.mrb[112].mxu1 %v16523_v38  ;;  %v14765_v38 = vpop.f32.mrb[111].mxu0 }
 0xba8   :  { %14795 = vmatpush3.bf16.msra.mxu1 %v17480_v17  ;;  %13107 = vmatprep.mubr.msk.bf16.mxu1 %vm833_vm2, %v16531_v9  ;;  %v19412_v9 = vadd.f32 %v14765_v38, %v14764_v52  ;;  %v14767_v19 = vpop.f32.mrb[112].mxu0  ;;  %v16552_v52 = vld [vmem:[%s21787_s3 + $0x674] ss:$16 sps:$4 sm:$0xff]  }
 0xba9   :  { %14796 = vmatprep.subr.bf16.mxu1 %v17526_v45 }
 0xbac   :  { %14797 = vmatpush3.bf16.msra.mxu1 %v17484_v26 }
 0xbad   :  { %14798 = vmatprep.subr.bf16.mxu1 %v17532_v57 }
 0xbaf   :  { %4814 = vmatmul.mubr.bf16.gmra.mrb[116].mxu1 %v16529_v24  ;;  %v14768_v24 = vpop.f32.mrb[113].mxu0 }
 0xbb0   :  { %14799 = vmatpush3.bf16.msra.mxu1 %v17488_v36  ;;  %13108 = vmatprep.mubr.msk.bf16.mxu1 %vm833_vm2, %v13103_v18  ;;  %v19414_v18 = vadd.f32 %v14768_v24, %v14767_v19 }
 0xbb1   :  { %14800 = vmatprep.subr.bf16.mxu1 %v17538_v5 }
 0xbb4   :  { %14801 = vmatpush3.bf16.msra.mxu1 %v17492_v46 }
 0xbb5   :  { %15648 = vmatprep.subr.bf16.mxu1 %v21806_v30 }
 0xbb7   :  { %4822 = vmatmul.mubr.bf16.gmra.mrb[120].mxu1 %v13102_v56  ;;  %v14770_v56 = vpop.f32.mrb[114].mxu0 }
 0xbb8   :  { %v14771_v55 = vpop.f32.mrb[115].mxu0  ;;  %5102 = vmatprep.mubr.bf16.mxu1 %v16540_v27 }
 0xbb9   :  { %v19416_v16 = vadd.f32 %v14771_v55, %v14770_v56  ;;  %v16556_v56 = vld [vmem:[%s21787_s3 + $0x690] ss:$16 sps:$4 sm:$0xff]   ;;  %v16558_v55 = vld [vmem:[%s21787_s3 + $0x694] ss:$16 sps:$4 sm:$0xff]  }
 0xbbf   :  { %5103 = vmatmul.mubr.bf16.vlgmr.msra.gmra.mrb[124].mxu1 %v16538_v61 }
 0xbc0   :  { %5110 = vmatprep.mubr.bf16.mxu1 %v16546_v6 }
 0xbc7   :  { %5111 = vmatmul.mubr.bf16.gmra.mrb[128].mxu1 %v16544_v22  ;;  %v13136_v22 = vld [vmem:[%s21787_s3 + $0x6b0] sm:$0xff] }
 0xbc8   :  { %5118 = vmatprep.mubr.bf16.mxu1 %v16552_v52  ;;  %v13155_v52 = vcombine.high %v13136_v22, %v13136_v22 }
 0xbcf   :  { %5119 = vmatmul.mubr.bf16.gmra.mrb[132].mxu1 %v16550_v47 }
 0xbd0   :  { %5126 = vmatprep.mubr.bf16.mxu1 %v16558_v55 }
 0xbd7   :  { %5127 = vmatmul.mubr.bf16.gmra.mrb[136].mxu1 %v16556_v56 }
 0xbd8   :  { %5134 = vmatprep.mubr.bf16.mxu1 %v13155_v52 }
 0xc00   :  { %v14773_v32 = vpop.f32.mrb[116].mxu0 }
 0xc01   :  { %v14774_v54 = vpop.f32.mrb[117].mxu0 }
 0xc02   :  { %v19418_v58 = vadd.f32 %v14774_v54, %v14773_v32  ;;  %v14776_v39 = vpop.f32.mrb[118].mxu0 }
 0xc03   :  { %v14777_v41 = vpop.f32.mrb[119].mxu0 }
 0xc36   :  { %v4515_v38 = vpop.f32.mrb[84].mxu1 }
 0xc37   :  { %v19439_v19 = vadd.f32 %v4515_v38, %v19261_v12  ;;  %v15606_v24 = vpop.f32.mrb[85].mxu1 }
 0xc38   :  { %v4518_v32 = vpop.f32.mrb[86].mxu1 }
 0xc39   :  { %v19448_v54 = vadd.f32 %v4518_v32, %v19270_v1  ;;  %v15607_v39 = vpop.f32.mrb[87].mxu1  ;;  %v13154_v1 = vcombine.low %v13136_v22, %v13136_v22 }
 0xc3b   :  { %5135 = vmatmul.mubr.bf16.gmra.mrb[140].mxu1 %v13154_v1 }
 0xc3c   :  { %15652 = vmatprep.mubr.msk.bf16.mxu1 %vm17183_vm0, %v21806_v30 }
 0xc3e   :  { %v4523_v41 = vpop.f32.mrb[88].mxu1 }
 0xc3f   :  { %v19451_v12 = vadd.f32 %v4523_v41, %v19273_v7  ;;  %v15610_v61 = vpop.f32.mrb[89].mxu1 }
 0xc40   :  { %v4526_v27 = vpop.f32.mrb[90].mxu1 }
 0xc41   :  { %v19457_v6 = vadd.f32 %v4526_v27, %v19279_v15  ;;  %v15611_v47 = vpop.f32.mrb[91].mxu1 }
 0xc46   :  { %v4531_v38 = vpop.f32.mrb[92].mxu1 }
 0xc47   :  { %v19462_v7 = vadd.f32 %v4531_v38, %v19284_v40  ;;  %v15614_v24 = vpop.f32.mrb[93].mxu1 }
 0xc48   :  { %v4534_v56 = vpop.f32.mrb[94].mxu1 }
 0xc49   :  { %v19465_v55 = vadd.f32 %v4534_v56, %v19287_v28  ;;  %v15615_v32 = vpop.f32.mrb[95].mxu1 }
 0xc4e   :  { %v4539_v15 = vpop.f32.mrb[96].mxu1 }
 0xc4f   :  { %v19468_v39 = vadd.f32 %v4539_v15, %v19290_v31  ;;  %v15618_v41 = vpop.f32.mrb[97].mxu1 }
 0xc50   :  { %v4542_v61 = vpop.f32.mrb[98].mxu1 }
 0xc51   :  { %v19471_v27 = vadd.f32 %v4542_v61, %v19293_v42  ;;  %v15619_v22 = vpop.f32.mrb[99].mxu1 }
 0xc56   :  { %v4547_v47 = vpop.f32.mrb[100].mxu1 }
 0xc57   :  { %v19474_v40 = vadd.f32 %v4547_v47, %v19296_v2  ;;  %v15622_v52 = vpop.f32.mrb[101].mxu1 }
 0xc58   :  { %v4550_v1 = vpop.f32.mrb[102].mxu1 }
 0xc59   :  { %v15623_v38 = vpop.f32.mrb[103].mxu1 }
 0xc6a   :  { %v4791_v28 = vpop.f32.mrb[104].mxu1 }
 0xc6b   :  { %v4792_v24 = vadd.f32 %v19402_v51, %v4791_v28  ;;  %v4793_v56 = vpop.f32.mrb[105].mxu1 }
 0xc6c   :  { %v4794_v32 = vpop.f32.mrb[106].mxu1 }
 0xc6d   :  { %v4795_v31 = vadd.f32 %v19404_v0, %v4794_v32  ;;  %v4796_v15 = vpop.f32.mrb[107].mxu1 }
 0xc6f   :  { %v4829_v41 = vpack.c.bf16 %v4795_v31, %v4792_v24 }
 0xc71   :  { %15629 = vmatmul.mubr.msk.bf16.vlgmr.msra.gmra.mrb[120].mxu0 %vm1295_vm4, %v4829_v41 }
 0xc72   :  { %5143 = vmatpush1.bf16.msra.mxu0 %v17551_v20  ;;  %v4799_v42 = vpop.f32.mrb[108].mxu1  ;;  %15632 = vmatprep.mubr.msk.bf16.mxu0 %vm17183_vm0, %v21806_v30 }
 0xc73   :  { %v4800_v2 = vadd.f32 %v19406_v25, %v4799_v42  ;;  %v4801_v61 = vpop.f32.mrb[109].mxu1  ;;  %5144 = vmatprep.subr.bf16.mxu0 %v21807_v59 }
 0xc74   :  { %v4802_v51 = vpop.f32.mrb[110].mxu1 }
 0xc75   :  { %v4803_v22 = vadd.f32 %v19408_v37, %v4802_v51  ;;  %v4804_v47 = vpop.f32.mrb[111].mxu1 }
 0xc76   :  { %5145 = vmatpush1.bf16.msra.mxu0 %v17563_v35  ;;  %v16549_v47 = vld [vmem:[%s21787_s3 + $0x65c] ss:$16 sps:$4 sm:$0xff]  }
 0xc77   :  { %v4830_v0 = vpack.c.bf16 %v4803_v22, %v4800_v2  ;;  %5146 = vmatprep.subr.bf16.mxu0 %v21807_v59  ;;  %v16543_v22 = vld [vmem:[%s21787_s3 + $0x63c] ss:$16 sps:$4 sm:$0xff]  }
 0xc79   :  { %15633 = vmatmul.mubr.msk.bf16.gmra.mrb[124].mxu0 %vm1295_vm4, %v4830_v0  ;;  %v16547_v0 = vld [vmem:[%s21787_s3 + $0x658] ss:$16 sps:$4 sm:$0xff]  }
 0xc7a   :  { %5147 = vmatpush1.bf16.msra.mxu0 %v17575_v50  ;;  %v4807_v52 = vpop.f32.mrb[112].mxu1  ;;  %15636 = vmatprep.mubr.msk.bf16.mxu0 %vm17183_vm0, %v21806_v30 }
 0xc7b   :  { %v4808_v25 = vadd.f32 %v19410_v10, %v4807_v52  ;;  %v4809_v1 = vpop.f32.mrb[113].mxu1  ;;  %5148 = vmatprep.subr.bf16.mxu0 %v21807_v59  ;;  %v16555_v52 = vld [vmem:[%s21787_s3 + $0x67c] ss:$16 sps:$4 sm:$0xff]  }
 0xc7c   :  { %v4810_v37 = vpop.f32.mrb[114].mxu1  ;;  %v16561_v1 = vld [vmem:[%s21787_s3 + $0x69c] ss:$16 sps:$4 sm:$0xff]  }
 0xc7d   :  { %v4811_v38 = vadd.f32 %v19412_v9, %v4810_v37  ;;  %v4812_v28 = vpop.f32.mrb[115].mxu1  ;;  %v13137_v37 = vld [vmem:[%s21787_s3 + $0x6b8] sm:$0xff] }
 0xc7e   :  { %5149 = vmatpush1.bf16.msra.mxu0 %v17587_v4  ;;  %v13157_v28 = vcombine.high %v13137_v37, %v13137_v37 }
 0xc7f   :  { %v4831_v24 = vpack.c.bf16 %v4811_v38, %v4808_v25  ;;  %5150 = vmatprep.subr.bf16.mxu0 %v21807_v59  ;;  %v16553_v25 = vld [vmem:[%s21787_s3 + $0x678] ss:$16 sps:$4 sm:$0xff]  }
 0xc80   :  { %v16559_v38 = vld [vmem:[%s21787_s3 + $0x698] ss:$16 sps:$4 sm:$0xff]  }
 0xc81   :  { %15637 = vmatmul.mubr.msk.bf16.gmra.mrb[128].mxu0 %vm1295_vm4, %v4831_v24  ;;  %v13156_v24 = vcombine.low %v13137_v37, %v13137_v37 }
 0xc82   :  { %5151 = vmatpush1.bf16.msra.mxu0 %v17597_v21  ;;  %v4815_v56 = vpop.f32.mrb[116].mxu1  ;;  %15640 = vmatprep.mubr.msk.bf16.mxu0 %vm17183_vm0, %v21806_v30 }
 0xc83   :  { %v4816_v10 = vadd.f32 %v19414_v18, %v4815_v56  ;;  %v4817_v32 = vpop.f32.mrb[117].mxu1  ;;  %5152 = vmatprep.subr.bf16.mxu0 %v21807_v59  ;;  %v16566_v56 = vld [vmem:[%s21788_s4 + $0xb0] sm:$0xff]  }
 0xc84   :  { %v4818_v9 = vpop.f32.mrb[118].mxu1  ;;  %15649 = vmatpush3.bf16.msra.mxu1 %v16566_v56 }
 0xc85   :  { %v4819_v31 = vadd.f32 %v19416_v16, %v4818_v9  ;;  %v4820_v15 = vpop.f32.mrb[119].mxu1  ;;  %15650 = vmatprep.subr.bf16.mxu1 %v21806_v30 }
 0xc86   :  { %5153 = vmatpush1.bf16.msra.mxu0 %v17603_v33 }
 0xc87   :  { %v4832_v41 = vpack.c.bf16 %v4819_v31, %v4816_v10  ;;  %5154 = vmatprep.subr.bf16.mxu0 %v21807_v59  ;;  %v16567_v10 = vld [vmem:[%s21788_s4 + $0xb8] sm:$0xff]  }
 0xc88   :  { %15651 = vmatpush3.bf16.msra.mxu1 %v16567_v10 }
 0xc89   :  { %15641 = vmatmul.mubr.msk.bf16.gmra.mrb[132].mxu0 %vm1295_vm4, %v4832_v41  ;;  %5527 = vmatprep.subr.bf16.mxu1 %v21807_v59 }
 0xc8a   :  { %5155 = vmatpush1.bf16.msra.mxu0 %v17612_v49  ;;  %v4823_v42 = vpop.f32.mrb[120].mxu1  ;;  %15644 = vmatprep.mubr.msk.bf16.mxu0 %vm17183_vm0, %v21806_v30 }
 0xc8b   :  { %v4824_v18 = vadd.f32 %v19418_v58, %v4823_v42  ;;  %5156 = vmatprep.subr.bf16.mxu0 %v21807_v59  ;;  %v4825_v2 = vpop.f32.mrb[121].mxu1  ;;  %v16541_v58 = vld [vmem:[%s21787_s3 + $0x638] ss:$16 sps:$4 sm:$0xff]  }
 0xc8c   :  { %v4826_v16 = vpop.f32.mrb[122].mxu1 }
 0xc8d   :  { %v4833_v61 = vpack.c.bf16 %v4824_v18, %v4824_v18  ;;  %v4827_v51 = vpop.f32.mrb[123].mxu1 }
 0xc8e   :  { %5157 = vmatpush1.bf16.msra.mxu0 %v17619_v63 }
 0xc8f   :  { %5158 = vmatprep.subr.bf16.mxu0 %v21807_v59 }
 0xc91   :  { %15645 = vmatmul.mubr.msk.bf16.gmra.mrb[136].mxu0 %vm1295_vm4, %v4833_v61 }
 0xc92   :  { %5159 = vmatpush1.bf16.msra.mxu0 %v17625_v14  ;;  %13158 = vmatprep.mubr.msk.bf16.mxu0 %vm833_vm2, %v16543_v22  ;;  %v14802_v32 = vpop.f32.mrb[124].mxu1 }
 0xc93   :  { %5160 = vmatprep.subr.bf16.mxu0 %v21807_v59  ;;  %v14803_v9 = vpop.f32.mrb[125].mxu1 }
 0xc94   :  { %v19580_v31 = vadd.f32 %v14803_v9, %v14802_v32  ;;  %v14805_v15 = vpop.f32.mrb[126].mxu1 }
 0xc95   :  { %v14806_v41 = vpop.f32.mrb[127].mxu1 }
 0xc96   :  { %5161 = vmatpush1.bf16.msra.mxu0 %v17631_v29  ;;  %v19582_v42 = vadd.f32 %v14806_v41, %v14805_v15 }
 0xc97   :  { %5162 = vmatprep.subr.bf16.mxu0 %v21807_v59 }
 0xc9a   :  { %5163 = vmatpush1.bf16.msra.mxu0 %v17637_v44  ;;  %v14808_v18 = vpop.f32.mrb[128].mxu1 }
 0xc9b   :  { %5164 = vmatprep.subr.bf16.mxu0 %v21807_v59  ;;  %v14809_v2 = vpop.f32.mrb[129].mxu1 }
 0xc9c   :  { %v19584_v16 = vadd.f32 %v14809_v2, %v14808_v18  ;;  %v14811_v61 = vpop.f32.mrb[130].mxu1  ;;  %v16568_v2 = vld [vmem:[%s21787_s3 + $0x6c0] ss:$16 sps:$4 sm:$0xff]  }
 0xc9d   :  { %v14812_v51 = vpop.f32.mrb[131].mxu1 }
 0xc9e   :  { %5165 = vmatpush1.bf16.msra.mxu0 %v17643_v60  ;;  %v19586_v22 = vadd.f32 %v14812_v51, %v14811_v61  ;;  %v16570_v61 = vld [vmem:[%s21787_s3 + $0x6c4] ss:$16 sps:$4 sm:$0xff]   ;;  %v16574_v51 = vld [vmem:[%s21787_s3 + $0x6e0] ss:$16 sps:$4 sm:$0xff]  }
 0xc9f   :  { %5166 = vmatprep.subr.bf16.mxu0 %v21807_v59 }
 0xca2   :  { %5167 = vmatpush1.bf16.msra.mxu0 %v17648_v11 }
 0xca3   :  { %14839 = vmatprep.subr.bf16.mxu0 %v21810_v48 }
 0xca5   :  { %5175 = vmatmul.mubr.bf16.vlgmr.msra.gmra.mrb[140].mxu0 %v16541_v58  ;;  %v14814_v58 = vpop.f32.mrb[132].mxu1 }
 0xca6   :  { %14840 = vmatpush3.bf16.msra.mxu0 %v17458_v43  ;;  %13159 = vmatprep.mubr.msk.bf16.mxu0 %vm833_vm2, %v16549_v47  ;;  %v14815_v47 = vpop.f32.mrb[133].mxu1 }
 0xca7   :  { %14841 = vmatprep.subr.bf16.mxu0 %v17502_v3 }
 0xcaa   :  { %14842 = vmatpush3.bf16.msra.mxu0 %v17468_v53 }
 0xcab   :  { %14843 = vmatprep.subr.bf16.mxu0 %v17508_v13 }
 0xcad   :  { %5183 = vmatmul.mubr.bf16.gmra.mrb[144].mxu0 %v16547_v0  ;;  %v19588_v0 = vadd.f32 %v14815_v47, %v14814_v58  ;;  %v16576_v58 = vld [vmem:[%s21787_s3 + $0x6e4] ss:$16 sps:$4 sm:$0xff]   ;;  %v16580_v47 = vld [vmem:[%s21787_s3 + $0x700] ss:$16 sps:$4 sm:$0xff]  }
 0xcae   :  { %14844 = vmatpush3.bf16.msra.mxu0 %v17472_v62  ;;  %13160 = vmatprep.mubr.msk.bf16.mxu0 %vm833_vm2, %v16555_v52  ;;  %v14817_v52 = vpop.f32.mrb[134].mxu1 }
 0xcaf   :  { %14845 = vmatprep.subr.bf16.mxu0 %v17514_v23 }
 0xcb2   :  { %14846 = vmatpush3.bf16.msra.mxu0 %v17476_v8 }
 0xcb3   :  { %14847 = vmatprep.subr.bf16.mxu0 %v17520_v34 }
 0xcb5   :  { %5191 = vmatmul.mubr.bf16.gmra.mrb[148].mxu0 %v16553_v25  ;;  %v14818_v25 = vpop.f32.mrb[135].mxu1 }
 0xcb6   :  { %14848 = vmatpush3.bf16.msra.mxu0 %v17480_v17  ;;  %13161 = vmatprep.mubr.msk.bf16.mxu0 %vm833_vm2, %v16561_v1  ;;  %v19590_v1 = vadd.f32 %v14818_v25, %v14817_v52  ;;  %v14820_v37 = vpop.f32.mrb[136].mxu1  ;;  %v16582_v52 = vld [vmem:[%s21787_s3 + $0x704] ss:$16 sps:$4 sm:$0xff]  }
 0xcb7   :  { %14849 = vmatprep.subr.bf16.mxu0 %v17526_v45 }
 0xcba   :  { %14850 = vmatpush3.bf16.msra.mxu0 %v17484_v26 }
 0xcbb   :  { %14851 = vmatprep.subr.bf16.mxu0 %v17532_v57 }
 0xcbd   :  { %5199 = vmatmul.mubr.bf16.gmra.mrb[152].mxu0 %v16559_v38  ;;  %v14821_v38 = vpop.f32.mrb[137].mxu1 }
 0xcbe   :  { %14852 = vmatpush3.bf16.msra.mxu0 %v17488_v36  ;;  %13162 = vmatprep.mubr.msk.bf16.mxu0 %vm833_vm2, %v13157_v28  ;;  %v19592_v28 = vadd.f32 %v14821_v38, %v14820_v37  ;;  %v16586_v38 = vld [vmem:[%s21787_s3 + $0x720] ss:$16 sps:$4 sm:$0xff]  }
 0xcbf   :  { %14853 = vmatprep.subr.bf16.mxu0 %v17538_v5 }
 0xcc2   :  { %14854 = vmatpush3.bf16.msra.mxu0 %v17492_v46 }
 0xcc3   :  { %15672 = vmatprep.subr.bf16.mxu0 %v21806_v30 }
 0xcc5   :  { %5207 = vmatmul.mubr.bf16.gmra.mrb[156].mxu0 %v13156_v24  ;;  %v14823_v24 = vpop.f32.mrb[138].mxu1 }
 0xcc6   :  { %v14824_v56 = vpop.f32.mrb[139].mxu1  ;;  %5487 = vmatprep.mubr.bf16.mxu0 %v16570_v61 }
 0xcc7   :  { %v19594_v10 = vadd.f32 %v14824_v56, %v14823_v24  ;;  %v16588_v24 = vld [vmem:[%s21787_s3 + $0x724] ss:$16 sps:$4 sm:$0xff]  }
 0xccd   :  { %5488 = vmatmul.mubr.bf16.vlgmr.msra.gmra.mrb[160].mxu0 %v16568_v2 }
 0xcce   :  { %5495 = vmatprep.mubr.bf16.mxu0 %v16576_v58  ;;  %v13190_v58 = vld [vmem:[%s21787_s3 + $0x740] sm:$0xff] }
 0xcd5   :  { %5496 = vmatmul.mubr.bf16.gmra.mrb[164].mxu0 %v16574_v51 }
 0xcd6   :  { %5503 = vmatprep.mubr.bf16.mxu0 %v16582_v52 }
 0xcdd   :  { %5504 = vmatmul.mubr.bf16.gmra.mrb[168].mxu0 %v16580_v47 }
 0xcde   :  { %5511 = vmatprep.mubr.bf16.mxu0 %v16588_v24 }
 0xce5   :  { %5512 = vmatmul.mubr.bf16.gmra.mrb[172].mxu0 %v16586_v38 }
 0xd0e   :  { %v14826_v32 = vpop.f32.mrb[140].mxu1 }
 0xd0f   :  { %v14827_v9 = vpop.f32.mrb[141].mxu1 }
 0xd10   :  { %v19596_v15 = vadd.f32 %v14827_v9, %v14826_v32  ;;  %v14829_v41 = vpop.f32.mrb[142].mxu1 }
 0xd11   :  { %v14830_v18 = vpop.f32.mrb[143].mxu1 }
 0xd44   :  { %v4900_v25 = vpop.f32.mrb[120].mxu0 }
 0xd45   :  { %v15630_v37 = vpop.f32.mrb[121].mxu0  ;;  %v19623_v56 = vadd.f32 %v4900_v25, %v19439_v19  ;;  %v13209_v19 = vcombine.high %v13190_v58, %v13190_v58  ;;  %v13208_v25 = vcombine.low %v13190_v58, %v13190_v58 }
 0xd46   :  { %v4903_v32 = vpop.f32.mrb[122].mxu0 }
 0xd47   :  { %v15631_v9 = vpop.f32.mrb[123].mxu0  ;;  %v19626_v41 = vadd.f32 %v4903_v32, %v19448_v54  ;;  %5519 = vmatprep.mubr.bf16.mxu0 %v13209_v19 }
 0xd48   :  { %5520 = vmatmul.mubr.bf16.gmra.mrb[176].mxu0 %v13208_v25 }
 0xd49   :  { %15676 = vmatprep.mubr.msk.bf16.mxu0 %vm17183_vm0, %v21806_v30 }
 0xd4c   :  { %v4908_v18 = vpop.f32.mrb[124].mxu0 }
 0xd4d   :  { %v15634_v2 = vpop.f32.mrb[125].mxu0  ;;  %v19629_v61 = vadd.f32 %v4908_v18, %v19451_v12 }
 0xd4e   :  { %v4911_v51 = vpop.f32.mrb[126].mxu0 }
 0xd4f   :  { %v15635_v47 = vpop.f32.mrb[127].mxu0  ;;  %v19635_v52 = vadd.f32 %v4911_v51, %v19457_v6 }
 0xd54   :  { %v4916_v54 = vpop.f32.mrb[128].mxu0 }
 0xd55   :  { %v15638_v37 = vpop.f32.mrb[129].mxu0  ;;  %v19640_v12 = vadd.f32 %v4916_v54, %v19462_v7 }
 0xd56   :  { %v4919_v38 = vpop.f32.mrb[130].mxu0 }
 0xd57   :  { %v15639_v24 = vpop.f32.mrb[131].mxu0  ;;  %v19643_v32 = vadd.f32 %v4919_v38, %v19465_v55 }
 0xd5c   :  { %v4924_v9 = vpop.f32.mrb[132].mxu0 }
 0xd5d   :  { %v15642_v18 = vpop.f32.mrb[133].mxu0  ;;  %v19646_v6 = vadd.f32 %v4924_v9, %v19468_v39 }
 0xd5e   :  { %v4927_v2 = vpop.f32.mrb[134].mxu0 }
 0xd5f   :  { %v15643_v51 = vpop.f32.mrb[135].mxu0  ;;  %v19649_v58 = vadd.f32 %v4927_v2, %v19471_v27 }
 0xd64   :  { %v4932_v47 = vpop.f32.mrb[136].mxu0 }
 0xd65   :  { %v15646_v19 = vpop.f32.mrb[137].mxu0  ;;  %v19652_v7 = vadd.f32 %v4932_v47, %v19474_v40 }
 0xd66   :  { %v4935_v25 = vpop.f32.mrb[138].mxu0 }
 0xd67   :  { %v15647_v54 = vpop.f32.mrb[139].mxu0 }
 0xd78   :  { %v5176_v37 = vpop.f32.mrb[140].mxu0 }
 0xd79   :  { %v5177_v55 = vadd.f32 %v19580_v31, %v5176_v37  ;;  %v5178_v38 = vpop.f32.mrb[141].mxu0 }
 0xd7a   :  { %v5179_v24 = vpop.f32.mrb[142].mxu0 }
 0xd7b   :  { %v5180_v39 = vadd.f32 %v19582_v42, %v5179_v24  ;;  %v5181_v9 = vpop.f32.mrb[143].mxu0 }
 0xd7d   :  { %v5214_v18 = vpack.c.bf16 %v5180_v39, %v5177_v55 }
 0xd7f   :  { %15653 = vmatmul.mubr.msk.bf16.vlgmr.msra.gmra.mrb[144].mxu1 %vm1295_vm4, %v5214_v18 }
 0xd80   :  { %5528 = vmatpush1.bf16.msra.mxu1 %v17551_v20  ;;  %v5184_v27 = vpop.f32.mrb[144].mxu0  ;;  %15656 = vmatprep.mubr.msk.bf16.mxu1 %vm17183_vm0, %v21806_v30 }
 0xd81   :  { %v5185_v40 = vadd.f32 %v19584_v16, %v5184_v27  ;;  %v5186_v2 = vpop.f32.mrb[145].mxu0  ;;  %5529 = vmatprep.subr.bf16.mxu1 %v21807_v59 }
 0xd82   :  { %v5187_v31 = vpop.f32.mrb[146].mxu0 }
 0xd83   :  { %v5188_v51 = vadd.f32 %v19586_v22, %v5187_v31  ;;  %v5189_v47 = vpop.f32.mrb[147].mxu0 }
 0xd84   :  { %5530 = vmatpush1.bf16.msra.mxu1 %v17563_v35  ;;  %v16579_v47 = vld [vmem:[%s21787_s3 + $0x6ec] ss:$16 sps:$4 sm:$0xff]  }
 0xd85   :  { %v5215_v42 = vpack.c.bf16 %v5188_v51, %v5185_v40  ;;  %5531 = vmatprep.subr.bf16.mxu1 %v21807_v59  ;;  %v16573_v51 = vld [vmem:[%s21787_s3 + $0x6cc] ss:$16 sps:$4 sm:$0xff]  }
 0xd87   :  { %15657 = vmatmul.mubr.msk.bf16.gmra.mrb[148].mxu1 %vm1295_vm4, %v5215_v42  ;;  %v16577_v42 = vld [vmem:[%s21787_s3 + $0x6e8] ss:$16 sps:$4 sm:$0xff]  }
 0xd88   :  { %5532 = vmatpush1.bf16.msra.mxu1 %v17575_v50  ;;  %v5192_v19 = vpop.f32.mrb[148].mxu0  ;;  %15660 = vmatprep.mubr.msk.bf16.mxu1 %vm17183_vm0, %v21806_v30 }
 0xd89   :  { %v5193_v16 = vadd.f32 %v19588_v0, %v5192_v19  ;;  %v5194_v25 = vpop.f32.mrb[149].mxu0  ;;  %5533 = vmatprep.subr.bf16.mxu1 %v21807_v59  ;;  %v16585_v19 = vld [vmem:[%s21787_s3 + $0x70c] ss:$16 sps:$4 sm:$0xff]  }
 0xd8a   :  { %v5195_v22 = vpop.f32.mrb[150].mxu0  ;;  %v16591_v25 = vld [vmem:[%s21787_s3 + $0x72c] ss:$16 sps:$4 sm:$0xff]  }
 0xd8b   :  { %v5196_v54 = vadd.f32 %v19590_v1, %v5195_v22  ;;  %v5197_v37 = vpop.f32.mrb[151].mxu0  ;;  %v13191_v22 = vld [vmem:[%s21787_s3 + $0x748] sm:$0xff] }
 0xd8c   :  { %5534 = vmatpush1.bf16.msra.mxu1 %v17587_v4  ;;  %v13211_v37 = vcombine.high %v13191_v22, %v13191_v22 }
 0xd8d   :  { %v5216_v55 = vpack.c.bf16 %v5196_v54, %v5193_v16  ;;  %5535 = vmatprep.subr.bf16.mxu1 %v21807_v59  ;;  %v16583_v16 = vld [vmem:[%s21787_s3 + $0x708] ss:$16 sps:$4 sm:$0xff]  }
 0xd8e   :  { %v16589_v54 = vld [vmem:[%s21787_s3 + $0x728] ss:$16 sps:$4 sm:$0xff]  }
 0xd8f   :  { %15661 = vmatmul.mubr.msk.bf16.gmra.mrb[152].mxu1 %vm1295_vm4, %v5216_v55  ;;  %v13210_v55 = vcombine.low %v13191_v22, %v13191_v22 }
 0xd90   :  { %5536 = vmatpush1.bf16.msra.mxu1 %v17597_v21  ;;  %v5200_v38 = vpop.f32.mrb[152].mxu0  ;;  %15664 = vmatprep.mubr.msk.bf16.mxu1 %vm17183_vm0, %v21806_v30 }
 0xd91   :  { %v5201_v0 = vadd.f32 %v19592_v28, %v5200_v38  ;;  %v5202_v24 = vpop.f32.mrb[153].mxu0  ;;  %5537 = vmatprep.subr.bf16.mxu1 %v21807_v59  ;;  %v16596_v38 = vld [vmem:[%s21788_s4 + $0xc0] sm:$0xff]  }
 0xd92   :  { %v5203_v1 = vpop.f32.mrb[154].mxu0  ;;  %15673 = vmatpush3.bf16.msra.mxu0 %v16596_v38 }
 0xd93   :  { %v5204_v39 = vadd.f32 %v19594_v10, %v5203_v1  ;;  %v5205_v9 = vpop.f32.mrb[155].mxu0  ;;  %15674 = vmatprep.subr.bf16.mxu0 %v21806_v30 }
 0xd94   :  { %5538 = vmatpush1.bf16.msra.mxu1 %v17603_v33 }
 0xd95   :  { %v5217_v18 = vpack.c.bf16 %v5204_v39, %v5201_v0  ;;  %5539 = vmatprep.subr.bf16.mxu1 %v21807_v59  ;;  %v16597_v0 = vld [vmem:[%s21788_s4 + $0xc8] sm:$0xff]  }
 0xd96   :  { %15675 = vmatpush3.bf16.msra.mxu0 %v16597_v0 }
 0xd97   :  { %15665 = vmatmul.mubr.msk.bf16.gmra.mrb[156].mxu1 %vm1295_vm4, %v5217_v18  ;;  %5912 = vmatprep.subr.bf16.mxu0 %v21807_v59 }
 0xd98   :  { %5540 = vmatpush1.bf16.msra.mxu1 %v17612_v49  ;;  %v5208_v27 = vpop.f32.mrb[156].mxu0  ;;  %15668 = vmatprep.mubr.msk.bf16.mxu1 %vm17183_vm0, %v21806_v30 }
 0xd99   :  { %v5209_v28 = vadd.f32 %v19596_v15, %v5208_v27  ;;  %5541 = vmatprep.subr.bf16.mxu1 %v21807_v59  ;;  %v5210_v40 = vpop.f32.mrb[157].mxu0  ;;  %v16571_v15 = vld [vmem:[%s21787_s3 + $0x6c8] ss:$16 sps:$4 sm:$0xff]  }
 0xd9a   :  { %v5211_v10 = vpop.f32.mrb[158].mxu0 }
 0xd9b   :  { %v5218_v2 = vpack.c.bf16 %v5209_v28, %v5209_v28  ;;  %v5212_v31 = vpop.f32.mrb[159].mxu0 }
 0xd9c   :  { %5542 = vmatpush1.bf16.msra.mxu1 %v17619_v63 }
 0xd9d   :  { %5543 = vmatprep.subr.bf16.mxu1 %v21807_v59 }
 0xd9f   :  { %15669 = vmatmul.mubr.msk.bf16.gmra.mrb[160].mxu1 %vm1295_vm4, %v5218_v2 }
 0xda0   :  { %5544 = vmatpush1.bf16.msra.mxu1 %v17625_v14  ;;  %13212 = vmatprep.mubr.msk.bf16.mxu1 %vm833_vm2, %v16573_v51  ;;  %v14855_v24 = vpop.f32.mrb[160].mxu0 }
 0xda1   :  { %5545 = vmatprep.subr.bf16.mxu1 %v21807_v59  ;;  %v14856_v1 = vpop.f32.mrb[161].mxu0 }
 0xda2   :  { %v19758_v39 = vadd.f32 %v14856_v1, %v14855_v24  ;;  %v14858_v9 = vpop.f32.mrb[162].mxu0 }
 0xda3   :  { %v14859_v18 = vpop.f32.mrb[163].mxu0 }
 0xda4   :  { %5546 = vmatpush1.bf16.msra.mxu1 %v17631_v29  ;;  %v19760_v27 = vadd.f32 %v14859_v18, %v14858_v9 }
 0xda5   :  { %5547 = vmatprep.subr.bf16.mxu1 %v21807_v59 }
 0xda8   :  { %5548 = vmatpush1.bf16.msra.mxu1 %v17637_v44  ;;  %v14861_v28 = vpop.f32.mrb[164].mxu0 }
 0xda9   :  { %5549 = vmatprep.subr.bf16.mxu1 %v21807_v59  ;;  %v14862_v40 = vpop.f32.mrb[165].mxu0 }
 0xdaa   :  { %v19762_v10 = vadd.f32 %v14862_v40, %v14861_v28  ;;  %v14864_v2 = vpop.f32.mrb[166].mxu0  ;;  %v16598_v40 = vld [vmem:[%s21787_s3 + $0x750] ss:$16 sps:$4 sm:$0xff]  }
 0xdab   :  { %v14865_v31 = vpop.f32.mrb[167].mxu0 }
 0xdac   :  { %5550 = vmatpush1.bf16.msra.mxu1 %v17643_v60  ;;  %v19764_v51 = vadd.f32 %v14865_v31, %v14864_v2  ;;  %v16600_v2 = vld [vmem:[%s21787_s3 + $0x754] ss:$16 sps:$4 sm:$0xff]   ;;  %v16604_v31 = vld [vmem:[%s21787_s3 + $0x770] ss:$16 sps:$4 sm:$0xff]  }
 0xdad   :  { %5551 = vmatprep.subr.bf16.mxu1 %v21807_v59 }
 0xdb0   :  { %5552 = vmatpush1.bf16.msra.mxu1 %v17648_v11 }
 0xdb1   :  { %14892 = vmatprep.subr.bf16.mxu1 %v21810_v48 }
 0xdb3   :  { %5560 = vmatmul.mubr.bf16.vlgmr.msra.gmra.mrb[164].mxu1 %v16571_v15  ;;  %v14867_v15 = vpop.f32.mrb[168].mxu0 }
 0xdb4   :  { %14893 = vmatpush3.bf16.msra.mxu1 %v17458_v43  ;;  %13213 = vmatprep.mubr.msk.bf16.mxu1 %vm833_vm2, %v16579_v47  ;;  %v14868_v47 = vpop.f32.mrb[169].mxu0 }
 0xdb5   :  { %14894 = vmatprep.subr.bf16.mxu1 %v17502_v3 }
 0xdb8   :  { %14895 = vmatpush3.bf16.msra.mxu1 %v17468_v53 }
 0xdb9   :  { %14896 = vmatprep.subr.bf16.mxu1 %v17508_v13 }
 0xdbb   :  { %5568 = vmatmul.mubr.bf16.gmra.mrb[168].mxu1 %v16577_v42  ;;  %v19766_v42 = vadd.f32 %v14868_v47, %v14867_v15  ;;  %v16606_v15 = vld [vmem:[%s21787_s3 + $0x774] ss:$16 sps:$4 sm:$0xff]   ;;  %v16610_v47 = vld [vmem:[%s21787_s3 + $0x790] ss:$16 sps:$4 sm:$0xff]  }
 0xdbc   :  { %14897 = vmatpush3.bf16.msra.mxu1 %v17472_v62  ;;  %13214 = vmatprep.mubr.msk.bf16.mxu1 %vm833_vm2, %v16585_v19  ;;  %v14870_v19 = vpop.f32.mrb[170].mxu0 }
 0xdbd   :  { %14898 = vmatprep.subr.bf16.mxu1 %v17514_v23 }
 0xdc0   :  { %14899 = vmatpush3.bf16.msra.mxu1 %v17476_v8 }
 0xdc1   :  { %14900 = vmatprep.subr.bf16.mxu1 %v17520_v34 }
 0xdc3   :  { %5576 = vmatmul.mubr.bf16.gmra.mrb[172].mxu1 %v16583_v16  ;;  %v14871_v16 = vpop.f32.mrb[171].mxu0 }
 0xdc4   :  { %14901 = vmatpush3.bf16.msra.mxu1 %v17480_v17  ;;  %13215 = vmatprep.mubr.msk.bf16.mxu1 %vm833_vm2, %v16591_v25  ;;  %v19768_v25 = vadd.f32 %v14871_v16, %v14870_v19  ;;  %v14873_v22 = vpop.f32.mrb[172].mxu0  ;;  %v16612_v19 = vld [vmem:[%s21787_s3 + $0x794] ss:$16 sps:$4 sm:$0xff]  }
 0xdc5   :  { %14902 = vmatprep.subr.bf16.mxu1 %v17526_v45 }
 0xdc8   :  { %14903 = vmatpush3.bf16.msra.mxu1 %v17484_v26 }
 0xdc9   :  { %14904 = vmatprep.subr.bf16.mxu1 %v17532_v57 }
 0xdcb   :  { %5584 = vmatmul.mubr.bf16.gmra.mrb[176].mxu1 %v16589_v54  ;;  %v14874_v54 = vpop.f32.mrb[173].mxu0 }
 0xdcc   :  { %14905 = vmatpush3.bf16.msra.mxu1 %v17488_v36  ;;  %13216 = vmatprep.mubr.msk.bf16.mxu1 %vm833_vm2, %v13211_v37  ;;  %v19770_v37 = vadd.f32 %v14874_v54, %v14873_v22 }
 0xdcd   :  { %14906 = vmatprep.subr.bf16.mxu1 %v17538_v5 }
 0xdd0   :  { %14907 = vmatpush3.bf16.msra.mxu1 %v17492_v46 }
 0xdd1   :  { %15696 = vmatprep.subr.bf16.mxu1 %v21806_v30 }
 0xdd3   :  { %5592 = vmatmul.mubr.bf16.gmra.mrb[180].mxu1 %v13210_v55  ;;  %v14876_v55 = vpop.f32.mrb[174].mxu0 }
 0xdd4   :  { %v14877_v38 = vpop.f32.mrb[175].mxu0  ;;  %5872 = vmatprep.mubr.bf16.mxu1 %v16600_v2 }
 0xdd5   :  { %v19772_v0 = vadd.f32 %v14877_v38, %v14876_v55  ;;  %v16616_v55 = vld [vmem:[%s21787_s3 + $0x7b0] ss:$16 sps:$4 sm:$0xff]   ;;  %v16618_v38 = vld [vmem:[%s21787_s3 + $0x7b4] ss:$16 sps:$4 sm:$0xff]  }
 0xddb   :  { %5873 = vmatmul.mubr.bf16.vlgmr.msra.gmra.mrb[184].mxu1 %v16598_v40 }
 0xddc   :  { %5880 = vmatprep.mubr.bf16.mxu1 %v16606_v15 }
 0xde3   :  { %5881 = vmatmul.mubr.bf16.gmra.mrb[188].mxu1 %v16604_v31  ;;  %v13244_v31 = vld [vmem:[%s21787_s3 + $0x7d0] sm:$0xff] }
 0xde4   :  { %5888 = vmatprep.mubr.bf16.mxu1 %v16612_v19  ;;  %v13263_v19 = vcombine.high %v13244_v31, %v13244_v31 }
 0xdeb   :  { %5889 = vmatmul.mubr.bf16.gmra.mrb[192].mxu1 %v16610_v47 }
 0xdec   :  { %5896 = vmatprep.mubr.bf16.mxu1 %v16618_v38 }
 0xdf3   :  { %5897 = vmatmul.mubr.bf16.gmra.mrb[196].mxu1 %v16616_v55 }
 0xdf4   :  { %5904 = vmatprep.mubr.bf16.mxu1 %v13263_v19 }
 0xe1b   :  { %v14879_v24 = vpop.f32.mrb[176].mxu0 }
 0xe1c   :  { %v14880_v1 = vpop.f32.mrb[177].mxu0 }
 0xe1d   :  { %v19774_v9 = vadd.f32 %v14880_v1, %v14879_v24  ;;  %v14882_v18 = vpop.f32.mrb[178].mxu0 }
 0xe1e   :  { %v14883_v28 = vpop.f32.mrb[179].mxu0 }
 0xe52   :  { %v5285_v16 = vpop.f32.mrb[144].mxu1 }
 0xe53   :  { %v19795_v22 = vadd.f32 %v5285_v16, %v19623_v56  ;;  %v15654_v54 = vpop.f32.mrb[145].mxu1 }
 0xe54   :  { %v5288_v24 = vpop.f32.mrb[146].mxu1 }
 0xe55   :  { %v19804_v1 = vadd.f32 %v5288_v24, %v19626_v41  ;;  %v15655_v18 = vpop.f32.mrb[147].mxu1  ;;  %v13262_v41 = vcombine.low %v13244_v31, %v13244_v31 }
 0xe57   :  { %5905 = vmatmul.mubr.bf16.gmra.mrb[200].mxu1 %v13262_v41 }
 0xe58   :  { %15700 = vmatprep.mubr.msk.bf16.mxu1 %vm17183_vm0, %v21806_v30 }
 0xe5a   :  { %v5293_v28 = vpop.f32.mrb[148].mxu1 }
 0xe5b   :  { %v19807_v56 = vadd.f32 %v5293_v28, %v19629_v61  ;;  %v15658_v40 = vpop.f32.mrb[149].mxu1 }
 0xe5c   :  { %v5296_v2 = vpop.f32.mrb[150].mxu1 }
 0xe5d   :  { %v19813_v15 = vadd.f32 %v5296_v2, %v19635_v52  ;;  %v15659_v47 = vpop.f32.mrb[151].mxu1 }
 0xe62   :  { %v5301_v16 = vpop.f32.mrb[152].mxu1 }
 0xe63   :  { %v19818_v61 = vadd.f32 %v5301_v16, %v19640_v12  ;;  %v15662_v54 = vpop.f32.mrb[153].mxu1 }
 0xe64   :  { %v5304_v55 = vpop.f32.mrb[154].mxu1 }
 0xe65   :  { %v19821_v38 = vadd.f32 %v5304_v55, %v19643_v32  ;;  %v15663_v24 = vpop.f32.mrb[155].mxu1 }
 0xe6a   :  { %v5309_v52 = vpop.f32.mrb[156].mxu1 }
 0xe6b   :  { %v19824_v18 = vadd.f32 %v5309_v52, %v19646_v6  ;;  %v15666_v28 = vpop.f32.mrb[157].mxu1 }
 0xe6c   :  { %v5312_v40 = vpop.f32.mrb[158].mxu1 }
 0xe6d   :  { %v19827_v2 = vadd.f32 %v5312_v40, %v19649_v58  ;;  %v15667_v31 = vpop.f32.mrb[159].mxu1 }
 0xe72   :  { %v5317_v47 = vpop.f32.mrb[160].mxu1 }
 0xe73   :  { %v19830_v12 = vadd.f32 %v5317_v47, %v19652_v7  ;;  %v15670_v19 = vpop.f32.mrb[161].mxu1 }
 0xe74   :  { %v5320_v41 = vpop.f32.mrb[162].mxu1 }
 0xe75   :  { %v15671_v16 = vpop.f32.mrb[163].mxu1 }
 0xe86   :  { %v5561_v32 = vpop.f32.mrb[164].mxu1 }
 0xe87   :  { %v5562_v54 = vadd.f32 %v19758_v39, %v5561_v32  ;;  %v5563_v55 = vpop.f32.mrb[165].mxu1 }
 0xe88   :  { %v5564_v24 = vpop.f32.mrb[166].mxu1 }
 0xe89   :  { %v5565_v6 = vadd.f32 %v19760_v27, %v5564_v24  ;;  %v5566_v52 = vpop.f32.mrb[167].mxu1 }
 0xe8b   :  { %v5599_v28 = vpack.c.bf16 %v5565_v6, %v5562_v54 }
 0xe8d   :  { %15677 = vmatmul.mubr.msk.bf16.vlgmr.msra.gmra.mrb[180].mxu0 %vm1295_vm4, %v5599_v28 }
 0xe8e   :  { %5913 = vmatpush1.bf16.msra.mxu0 %v17551_v20  ;;  %v5569_v58 = vpop.f32.mrb[168].mxu1  ;;  %15680 = vmatprep.mubr.msk.bf16.mxu0 %vm17183_vm0, %v21806_v30 }
 0xe8f   :  { %v5570_v7 = vadd.f32 %v19762_v10, %v5569_v58  ;;  %v5571_v40 = vpop.f32.mrb[169].mxu1  ;;  %5914 = vmatprep.subr.bf16.mxu0 %v21807_v59 }
 0xe90   :  { %v5572_v39 = vpop.f32.mrb[170].mxu1 }
 0xe91   :  { %v5573_v31 = vadd.f32 %v19764_v51, %v5572_v39  ;;  %v5574_v47 = vpop.f32.mrb[171].mxu1 }
 0xe92   :  { %5915 = vmatpush1.bf16.msra.mxu0 %v17563_v35  ;;  %v16609_v47 = vld [vmem:[%s21787_s3 + $0x77c] ss:$16 sps:$4 sm:$0xff]  }
 0xe93   :  { %v5600_v27 = vpack.c.bf16 %v5573_v31, %v5570_v7  ;;  %5916 = vmatprep.subr.bf16.mxu0 %v21807_v59  ;;  %v16603_v31 = vld [vmem:[%s21787_s3 + $0x75c] ss:$16 sps:$4 sm:$0xff]  }
 0xe95   :  { %15681 = vmatmul.mubr.msk.bf16.gmra.mrb[184].mxu0 %vm1295_vm4, %v5600_v27  ;;  %v16607_v27 = vld [vmem:[%s21787_s3 + $0x778] ss:$16 sps:$4 sm:$0xff]  }
 0xe96   :  { %5917 = vmatpush1.bf16.msra.mxu0 %v17575_v50  ;;  %v5577_v19 = vpop.f32.mrb[172].mxu1  ;;  %15684 = vmatprep.mubr.msk.bf16.mxu0 %vm17183_vm0, %v21806_v30 }
 0xe97   :  { %v5578_v10 = vadd.f32 %v19766_v42, %v5577_v19  ;;  %v5579_v41 = vpop.f32.mrb[173].mxu1  ;;  %5918 = vmatprep.subr.bf16.mxu0 %v21807_v59  ;;  %v16615_v19 = vld [vmem:[%s21787_s3 + $0x79c] ss:$16 sps:$4 sm:$0xff]  }
 0xe98   :  { %v5580_v51 = vpop.f32.mrb[174].mxu1  ;;  %v16621_v41 = vld [vmem:[%s21787_s3 + $0x7bc] ss:$16 sps:$4 sm:$0xff]  }
 0xe99   :  { %v5581_v16 = vadd.f32 %v19768_v25, %v5580_v51  ;;  %v5582_v32 = vpop.f32.mrb[175].mxu1  ;;  %v13245_v51 = vld [vmem:[%s21787_s3 + $0x7d8] sm:$0xff] }
 0xe9a   :  { %5919 = vmatpush1.bf16.msra.mxu0 %v17587_v4  ;;  %v13265_v32 = vcombine.high %v13245_v51, %v13245_v51 }
 0xe9b   :  { %v5601_v54 = vpack.c.bf16 %v5581_v16, %v5578_v10  ;;  %5920 = vmatprep.subr.bf16.mxu0 %v21807_v59  ;;  %v16613_v10 = vld [vmem:[%s21787_s3 + $0x798] ss:$16 sps:$4 sm:$0xff]  }
 0xe9c   :  { %v16619_v16 = vld [vmem:[%s21787_s3 + $0x7b8] ss:$16 sps:$4 sm:$0xff]  }
 0xe9d   :  { %15685 = vmatmul.mubr.msk.bf16.gmra.mrb[188].mxu0 %vm1295_vm4, %v5601_v54  ;;  %v13264_v54 = vcombine.low %v13245_v51, %v13245_v51 }
 0xe9e   :  { %5921 = vmatpush1.bf16.msra.mxu0 %v17597_v21  ;;  %v5585_v55 = vpop.f32.mrb[176].mxu1  ;;  %15688 = vmatprep.mubr.msk.bf16.mxu0 %vm17183_vm0, %v21806_v30 }
 0xe9f   :  { %v5586_v42 = vadd.f32 %v19770_v37, %v5585_v55  ;;  %v5587_v24 = vpop.f32.mrb[177].mxu1  ;;  %5922 = vmatprep.subr.bf16.mxu0 %v21807_v59  ;;  %v16626_v55 = vld [vmem:[%s21788_s4 + $0xd0] sm:$0xff]  }
 0xea0   :  { %v5588_v25 = vpop.f32.mrb[178].mxu1  ;;  %15697 = vmatpush3.bf16.msra.mxu1 %v16626_v55 }
 0xea1   :  { %v5589_v6 = vadd.f32 %v19772_v0, %v5588_v25  ;;  %v5590_v52 = vpop.f32.mrb[179].mxu1  ;;  %15698 = vmatprep.subr.bf16.mxu1 %v21806_v30 }
 0xea2   :  { %5923 = vmatpush1.bf16.msra.mxu0 %v17603_v33 }
 0xea3   :  { %v5602_v28 = vpack.c.bf16 %v5589_v6, %v5586_v42  ;;  %5924 = vmatprep.subr.bf16.mxu0 %v21807_v59  ;;  %v16627_v42 = vld [vmem:[%s21788_s4 + $0xd8] sm:$0xff]  }
 0xea4   :  { %15699 = vmatpush3.bf16.msra.mxu1 %v16627_v42 }
 0xea5   :  { %15689 = vmatmul.mubr.msk.bf16.gmra.mrb[192].mxu0 %vm1295_vm4, %v5602_v28  ;;  %6297 = vmatprep.subr.bf16.mxu1 %v21807_v59 }
 0xea6   :  { %5925 = vmatpush1.bf16.msra.mxu0 %v17612_v49  ;;  %v5593_v58 = vpop.f32.mrb[180].mxu1  ;;  %15692 = vmatprep.mubr.msk.bf16.mxu0 %vm17183_vm0, %v21806_v30 }
 0xea7   :  { %v5594_v37 = vadd.f32 %v19774_v9, %v5593_v58  ;;  %5926 = vmatprep.subr.bf16.mxu0 %v21807_v59  ;;  %v5595_v7 = vpop.f32.mrb[181].mxu1  ;;  %v16601_v9 = vld [vmem:[%s21787_s3 + $0x758] ss:$16 sps:$4 sm:$0xff]  }
 0xea8   :  { %v5596_v0 = vpop.f32.mrb[182].mxu1 }
 0xea9   :  { %v5603_v40 = vpack.c.bf16 %v5594_v37, %v5594_v37  ;;  %v5597_v39 = vpop.f32.mrb[183].mxu1 }
 0xeaa   :  { %5927 = vmatpush1.bf16.msra.mxu0 %v17619_v63 }
 0xeab   :  { %5928 = vmatprep.subr.bf16.mxu0 %v21807_v59 }
 0xead   :  { %15693 = vmatmul.mubr.msk.bf16.gmra.mrb[196].mxu0 %vm1295_vm4, %v5603_v40 }
 0xeae   :  { %5929 = vmatpush1.bf16.msra.mxu0 %v17625_v14  ;;  %13266 = vmatprep.mubr.msk.bf16.mxu0 %vm833_vm2, %v16603_v31  ;;  %v14908_v24 = vpop.f32.mrb[184].mxu1 }
 0xeaf   :  { %5930 = vmatprep.subr.bf16.mxu0 %v21807_v59  ;;  %v14909_v25 = vpop.f32.mrb[185].mxu1 }
 0xeb0   :  { %v19936_v6 = vadd.f32 %v14909_v25, %v14908_v24  ;;  %v14911_v52 = vpop.f32.mrb[186].mxu1 }
 0xeb1   :  { %v14912_v28 = vpop.f32.mrb[187].mxu1 }
 0xeb2   :  { %5931 = vmatpush1.bf16.msra.mxu0 %v17631_v29  ;;  %v19938_v58 = vadd.f32 %v14912_v28, %v14911_v52 }
 0xeb3   :  { %5932 = vmatprep.subr.bf16.mxu0 %v21807_v59 }
 0xeb6   :  { %5933 = vmatpush1.bf16.msra.mxu0 %v17637_v44  ;;  %v14914_v37 = vpop.f32.mrb[188].mxu1 }
 0xeb7   :  { %5934 = vmatprep.subr.bf16.mxu0 %v21807_v59  ;;  %v14915_v7 = vpop.f32.mrb[189].mxu1 }
 0xeb8   :  { %v19940_v0 = vadd.f32 %v14915_v7, %v14914_v37  ;;  %v14917_v40 = vpop.f32.mrb[190].mxu1  ;;  %v16628_v7 = vld [vmem:[%s21787_s3 + $0x7e0] ss:$16 sps:$4 sm:$0xff]  }
 0xeb9   :  { %v14918_v39 = vpop.f32.mrb[191].mxu1 }
 0xeba   :  { %5935 = vmatpush1.bf16.msra.mxu0 %v17643_v60  ;;  %v19942_v31 = vadd.f32 %v14918_v39, %v14917_v40  ;;  %v16630_v40 = vld [vmem:[%s21787_s3 + $0x7e4] ss:$16 sps:$4 sm:$0xff]   ;;  %v16634_v39 = vld [vmem:[%s21787_s3 + $0x800] ss:$16 sps:$4 sm:$0xff]  }
 0xebb   :  { %5936 = vmatprep.subr.bf16.mxu0 %v21807_v59 }
 0xebe   :  { %5937 = vmatpush1.bf16.msra.mxu0 %v17648_v11 }
 0xebf   :  { %14945 = vmatprep.subr.bf16.mxu0 %v21810_v48 }
 0xec1   :  { %5945 = vmatmul.mubr.bf16.vlgmr.msra.gmra.mrb[200].mxu0 %v16601_v9  ;;  %v14920_v9 = vpop.f32.mrb[192].mxu1 }
 0xec2   :  { %14946 = vmatpush3.bf16.msra.mxu0 %v17458_v43  ;;  %13267 = vmatprep.mubr.msk.bf16.mxu0 %vm833_vm2, %v16609_v47  ;;  %v14921_v47 = vpop.f32.mrb[193].mxu1 }
 0xec3   :  { %14947 = vmatprep.subr.bf16.mxu0 %v17502_v3 }
 0xec6   :  { %14948 = vmatpush3.bf16.msra.mxu0 %v17468_v53 }
 0xec7   :  { %14949 = vmatprep.subr.bf16.mxu0 %v17508_v13 }
 0xec9   :  { %5953 = vmatmul.mubr.bf16.gmra.mrb[204].mxu0 %v16607_v27  ;;  %v19944_v27 = vadd.f32 %v14921_v47, %v14920_v9  ;;  %v16636_v9 = vld [vmem:[%s21787_s3 + $0x804] ss:$16 sps:$4 sm:$0xff]   ;;  %v16640_v47 = vld [vmem:[%s21787_s3 + $0x820] ss:$16 sps:$4 sm:$0xff]  }
 0xeca   :  { %14950 = vmatpush3.bf16.msra.mxu0 %v17472_v62  ;;  %13268 = vmatprep.mubr.msk.bf16.mxu0 %vm833_vm2, %v16615_v19  ;;  %v14923_v19 = vpop.f32.mrb[194].mxu1 }
 0xecb   :  { %14951 = vmatprep.subr.bf16.mxu0 %v17514_v23 }
 0xece   :  { %14952 = vmatpush3.bf16.msra.mxu0 %v17476_v8 }
 0xecf   :  { %14953 = vmatprep.subr.bf16.mxu0 %v17520_v34 }
 0xed1   :  { %5961 = vmatmul.mubr.bf16.gmra.mrb[208].mxu0 %v16613_v10  ;;  %v14924_v10 = vpop.f32.mrb[195].mxu1 }
 0xed2   :  { %14954 = vmatpush3.bf16.msra.mxu0 %v17480_v17  ;;  %13269 = vmatprep.mubr.msk.bf16.mxu0 %vm833_vm2, %v16621_v41  ;;  %v19946_v41 = vadd.f32 %v14924_v10, %v14923_v19  ;;  %v14926_v51 = vpop.f32.mrb[196].mxu1  ;;  %v16642_v19 = vld [vmem:[%s21787_s3 + $0x824] ss:$16 sps:$4 sm:$0xff]  }
 0xed3   :  { %14955 = vmatprep.subr.bf16.mxu0 %v17526_v45 }
 0xed6   :  { %14956 = vmatpush3.bf16.msra.mxu0 %v17484_v26 }
 0xed7   :  { %14957 = vmatprep.subr.bf16.mxu0 %v17532_v57 }
 0xed9   :  { %5969 = vmatmul.mubr.bf16.gmra.mrb[212].mxu0 %v16619_v16  ;;  %v14927_v16 = vpop.f32.mrb[197].mxu1 }
 0xeda   :  { %14958 = vmatpush3.bf16.msra.mxu0 %v17488_v36  ;;  %13270 = vmatprep.mubr.msk.bf16.mxu0 %vm833_vm2, %v13265_v32  ;;  %v19948_v32 = vadd.f32 %v14927_v16, %v14926_v51 }
 0xedb   :  { %14959 = vmatprep.subr.bf16.mxu0 %v17538_v5 }
 0xede   :  { %14960 = vmatpush3.bf16.msra.mxu0 %v17492_v46 }
 0xedf   :  { %15720 = vmatprep.subr.bf16.mxu0 %v21806_v30 }
 0xee1   :  { %5977 = vmatmul.mubr.bf16.gmra.mrb[216].mxu0 %v13264_v54  ;;  %v14929_v54 = vpop.f32.mrb[198].mxu1 }
 0xee2   :  { %v14930_v55 = vpop.f32.mrb[199].mxu1  ;;  %6257 = vmatprep.mubr.bf16.mxu0 %v16630_v40 }
 0xee3   :  { %v19950_v42 = vadd.f32 %v14930_v55, %v14929_v54  ;;  %v16646_v54 = vld [vmem:[%s21787_s3 + $0x840] ss:$16 sps:$4 sm:$0xff]   ;;  %v16648_v55 = vld [vmem:[%s21787_s3 + $0x844] ss:$16 sps:$4 sm:$0xff]  }
 0xee9   :  { %6258 = vmatmul.mubr.bf16.vlgmr.msra.gmra.mrb[220].mxu0 %v16628_v7 }
 0xeea   :  { %6265 = vmatprep.mubr.bf16.mxu0 %v16636_v9 }
 0xef1   :  { %6266 = vmatmul.mubr.bf16.gmra.mrb[224].mxu0 %v16634_v39  ;;  %v13298_v39 = vld [vmem:[%s21787_s3 + $0x860] sm:$0xff] }
 0xef2   :  { %6273 = vmatprep.mubr.bf16.mxu0 %v16642_v19  ;;  %v13317_v19 = vcombine.high %v13298_v39, %v13298_v39 }
 0xef9   :  { %6274 = vmatmul.mubr.bf16.gmra.mrb[228].mxu0 %v16640_v47 }
 0xefa   :  { %6281 = vmatprep.mubr.bf16.mxu0 %v16648_v55 }
 0xf01   :  { %6282 = vmatmul.mubr.bf16.gmra.mrb[232].mxu0 %v16646_v54 }
 0xf02   :  { %6289 = vmatprep.mubr.bf16.mxu0 %v13317_v19 }
 0xf2a   :  { %v14932_v24 = vpop.f32.mrb[200].mxu1 }
 0xf2b   :  { %v14933_v25 = vpop.f32.mrb[201].mxu1 }
 0xf2c   :  { %v19952_v52 = vadd.f32 %v14933_v25, %v14932_v24  ;;  %v14935_v28 = vpop.f32.mrb[202].mxu1 }
 0xf2d   :  { %v14936_v37 = vpop.f32.mrb[203].mxu1 }
 0xf60   :  { %v5670_v10 = vpop.f32.mrb[180].mxu0 }
 0xf61   :  { %v19973_v51 = vadd.f32 %v5670_v10, %v19795_v22  ;;  %v15678_v16 = vpop.f32.mrb[181].mxu0 }
 0xf62   :  { %v5673_v24 = vpop.f32.mrb[182].mxu0 }
 0xf63   :  { %v19982_v25 = vadd.f32 %v5673_v24, %v19804_v1  ;;  %v15679_v28 = vpop.f32.mrb[183].mxu0  ;;  %v13316_v1 = vcombine.low %v13298_v39, %v13298_v39 }
 0xf65   :  { %6290 = vmatmul.mubr.bf16.gmra.mrb[236].mxu0 %v13316_v1 }
 0xf66   :  { %15724 = vmatprep.mubr.msk.bf16.mxu0 %vm17183_vm0, %v21806_v30 }
 0xf68   :  { %v5678_v37 = vpop.f32.mrb[184].mxu0 }
 0xf69   :  { %v19985_v22 = vadd.f32 %v5678_v37, %v19807_v56  ;;  %v15682_v7 = vpop.f32.mrb[185].mxu0 }
 0xf6a   :  { %v5681_v40 = vpop.f32.mrb[186].mxu0 }
 0xf6b   :  { %v19991_v9 = vadd.f32 %v5681_v40, %v19813_v15  ;;  %v15683_v47 = vpop.f32.mrb[187].mxu0 }
 0xf70   :  { %v5686_v10 = vpop.f32.mrb[188].mxu0 }
 0xf71   :  { %v19996_v56 = vadd.f32 %v5686_v10, %v19818_v61  ;;  %v15686_v16 = vpop.f32.mrb[189].mxu0 }
 0xf72   :  { %v5689_v54 = vpop.f32.mrb[190].mxu0 }
 0xf73   :  { %v19999_v55 = vadd.f32 %v5689_v54, %v19821_v38  ;;  %v15687_v24 = vpop.f32.mrb[191].mxu0 }
 0xf78   :  { %v5694_v15 = vpop.f32.mrb[192].mxu0 }
 0xf79   :  { %v20002_v28 = vadd.f32 %v5694_v15, %v19824_v18  ;;  %v15690_v37 = vpop.f32.mrb[193].mxu0 }
 0xf7a   :  { %v5697_v7 = vpop.f32.mrb[194].mxu0 }
 0xf7b   :  { %v20005_v40 = vadd.f32 %v5697_v7, %v19827_v2  ;;  %v15691_v39 = vpop.f32.mrb[195].mxu0 }
 0xf80   :  { %v5702_v47 = vpop.f32.mrb[196].mxu0 }
 0xf81   :  { %v20008_v61 = vadd.f32 %v5702_v47, %v19830_v12  ;;  %v15694_v19 = vpop.f32.mrb[197].mxu0 }
 0xf82   :  { %v5705_v1 = vpop.f32.mrb[198].mxu0 }
 0xf83   :  { %v15695_v10 = vpop.f32.mrb[199].mxu0 }
 0xf94   :  { %v5946_v38 = vpop.f32.mrb[200].mxu0 }
 0xf95   :  { %v5947_v16 = vadd.f32 %v19936_v6, %v5946_v38  ;;  %v5948_v54 = vpop.f32.mrb[201].mxu0 }
 0xf96   :  { %v5949_v24 = vpop.f32.mrb[202].mxu0 }
 0xf97   :  { %v5950_v18 = vadd.f32 %v19938_v58, %v5949_v24  ;;  %v5951_v15 = vpop.f32.mrb[203].mxu0 }
 0xf99   :  { %v5984_v37 = vpack.c.bf16 %v5950_v18, %v5947_v16 }
 0xf9b   :  { %15701 = vmatmul.mubr.msk.bf16.vlgmr.msra.gmra.mrb[204].mxu1 %vm1295_vm4, %v5984_v37 }
 0xf9c   :  { %6298 = vmatpush1.bf16.msra.mxu1 %v17551_v20  ;;  %v5954_v2 = vpop.f32.mrb[204].mxu0  ;;  %15704 = vmatprep.mubr.msk.bf16.mxu1 %vm17183_vm0, %v21806_v30 }
 0xf9d   :  { %v5955_v12 = vadd.f32 %v19940_v0, %v5954_v2  ;;  %v5956_v7 = vpop.f32.mrb[205].mxu0  ;;  %6299 = vmatprep.subr.bf16.mxu1 %v21807_v59 }
 0xf9e   :  { %v5957_v6 = vpop.f32.mrb[206].mxu0 }
 0xf9f   :  { %v5958_v39 = vadd.f32 %v19942_v31, %v5957_v6  ;;  %v5959_v47 = vpop.f32.mrb[207].mxu0 }
 0xfa0   :  { %6300 = vmatpush1.bf16.msra.mxu1 %v17563_v35  ;;  %v16639_v47 = vld [vmem:[%s21787_s3 + $0x80c] ss:$16 sps:$4 sm:$0xff]  }
 0xfa1   :  { %v5985_v58 = vpack.c.bf16 %v5958_v39, %v5955_v12  ;;  %6301 = vmatprep.subr.bf16.mxu1 %v21807_v59  ;;  %v16633_v39 = vld [vmem:[%s21787_s3 + $0x7ec] ss:$16 sps:$4 sm:$0xff]  }
 0xfa3   :  { %15705 = vmatmul.mubr.msk.bf16.gmra.mrb[208].mxu1 %vm1295_vm4, %v5985_v58  ;;  %v16637_v58 = vld [vmem:[%s21787_s3 + $0x808] ss:$16 sps:$4 sm:$0xff]  }
 0xfa4   :  { %6302 = vmatpush1.bf16.msra.mxu1 %v17575_v50  ;;  %v5962_v19 = vpop.f32.mrb[208].mxu0  ;;  %15708 = vmatprep.mubr.msk.bf16.mxu1 %vm17183_vm0, %v21806_v30 }
 0xfa5   :  { %v5963_v0 = vadd.f32 %v19944_v27, %v5962_v19  ;;  %v5964_v1 = vpop.f32.mrb[209].mxu0  ;;  %6303 = vmatprep.subr.bf16.mxu1 %v21807_v59  ;;  %v16645_v19 = vld [vmem:[%s21787_s3 + $0x82c] ss:$16 sps:$4 sm:$0xff]  }
 0xfa6   :  { %v5965_v31 = vpop.f32.mrb[210].mxu0 }
 0xfa7   :  { %v5966_v10 = vadd.f32 %v19946_v41, %v5965_v31  ;;  %v5967_v38 = vpop.f32.mrb[211].mxu0 }
 0xfa8   :  { %6304 = vmatpush1.bf16.msra.mxu1 %v17587_v4 }
 0xfa9   :  { %v5986_v16 = vpack.c.bf16 %v5966_v10, %v5963_v0  ;;  %6305 = vmatprep.subr.bf16.mxu1 %v21807_v59 }
 0xfab   :  { %15709 = vmatmul.mubr.msk.bf16.gmra.mrb[212].mxu1 %vm1295_vm4, %v5986_v16 }
 0xfac   :  { %6306 = vmatpush1.bf16.msra.mxu1 %v17597_v21  ;;  %v5970_v54 = vpop.f32.mrb[212].mxu0  ;;  %15712 = vmatprep.mubr.msk.bf16.mxu1 %vm17183_vm0, %v21806_v30 }
 0xfad   :  { %v5971_v27 = vadd.f32 %v19948_v32, %v5970_v54  ;;  %v5972_v24 = vpop.f32.mrb[213].mxu0  ;;  %6307 = vmatprep.subr.bf16.mxu1 %v21807_v59 }
 0xfae   :  { %v5973_v41 = vpop.f32.mrb[214].mxu0 }
 0xfaf   :  { %v5974_v18 = vadd.f32 %v19950_v42, %v5973_v41  ;;  %v5975_v15 = vpop.f32.mrb[215].mxu0 }
 0xfb0   :  { %6308 = vmatpush1.bf16.msra.mxu1 %v17603_v33 }
 0xfb1   :  { %v5987_v37 = vpack.c.bf16 %v5974_v18, %v5971_v27  ;;  %6309 = vmatprep.subr.bf16.mxu1 %v21807_v59 }
 0xfb3   :  { %15713 = vmatmul.mubr.msk.bf16.gmra.mrb[216].mxu1 %vm1295_vm4, %v5987_v37 }
 0xfb4   :  { %6310 = vmatpush1.bf16.msra.mxu1 %v17612_v49  ;;  %v5978_v2 = vpop.f32.mrb[216].mxu0  ;;  %15716 = vmatprep.mubr.msk.bf16.mxu1 %vm17183_vm0, %v21806_v30 }
 0xfb5   :  { %v5979_v32 = vadd.f32 %v19952_v52, %v5978_v2  ;;  %6311 = vmatprep.subr.bf16.mxu1 %v21807_v59  ;;  %v5980_v12 = vpop.f32.mrb[217].mxu0  ;;  %v16631_v52 = vld [vmem:[%s21787_s3 + $0x7e8] ss:$16 sps:$4 sm:$0xff]  }
 0xfb6   :  { %v5981_v42 = vpop.f32.mrb[218].mxu0 }
 0xfb7   :  { %v5988_v7 = vpack.c.bf16 %v5979_v32, %v5979_v32  ;;  %v5982_v6 = vpop.f32.mrb[219].mxu0 }
 0xfb8   :  { %6312 = vmatpush1.bf16.msra.mxu1 %v17619_v63 }
 0xfb9   :  { %6313 = vmatprep.subr.bf16.mxu1 %v21807_v59 }
 0xfbb   :  { %15717 = vmatmul.mubr.msk.bf16.gmra.mrb[220].mxu1 %vm1295_vm4, %v5988_v7 }
 0xfbc   :  { %6314 = vmatpush1.bf16.msra.mxu1 %v17625_v14  ;;  %13320 = vmatprep.mubr.msk.bf16.mxu1 %vm833_vm2, %v16633_v39 }
 0xfbd   :  { %6315 = vmatprep.subr.bf16.mxu1 %v21807_v59 }
 0xfc0   :  { %6316 = vmatpush1.bf16.msra.mxu1 %v17631_v29 }
 0xfc1   :  { %6317 = vmatprep.subr.bf16.mxu1 %v21807_v59 }
 0xfc4   :  { %6318 = vmatpush1.bf16.msra.mxu1 %v17637_v44 }
 0xfc5   :  { %6319 = vmatprep.subr.bf16.mxu1 %v21807_v59 }
 0xfc8   :  { %6320 = vmatpush1.bf16.msra.mxu1 %v17643_v60 }
 0xfc9   :  { %6321 = vmatprep.subr.bf16.mxu1 %v21807_v59 }
 0xfcc   :  { %6322 = vmatpush1.bf16.msra.mxu1 %v17648_v11 }
 0xfcd   :  { %14998 = vmatprep.subr.bf16.mxu1 %v21810_v48 }
 0xfcf   :  { %6330 = vmatmul.mubr.bf16.vlgmr.msra.gmra.mrb[224].mxu1 %v16631_v52 }
 0xfd0   :  { %14999 = vmatpush3.bf16.msra.mxu1 %v17458_v43  ;;  %13321 = vmatprep.mubr.msk.bf16.mxu1 %vm833_vm2, %v16639_v47  ;;  %v16643_v43 = vld [vmem:[%s21787_s3 + $0x828] ss:$16 sps:$4 sm:$0xff]   ;;  %v16658_v47 = vld [vmem:[%s21787_s3 + $0x870] ss:$16 sps:$4 sm:$0xff]  }
 0xfd1   :  { %15000 = vmatprep.subr.bf16.mxu1 %v17502_v3 }
 0xfd4   :  { %15001 = vmatpush3.bf16.msra.mxu1 %v17468_v53  ;;  %v16651_v53 = vld [vmem:[%s21787_s3 + $0x84c] ss:$16 sps:$4 sm:$0xff]  }
 0xfd5   :  { %15002 = vmatprep.subr.bf16.mxu1 %v17508_v13  ;;  %v14961_v13 = vpop.f32.mrb[220].mxu0 }
 0xfd7   :  { %6338 = vmatmul.mubr.bf16.gmra.mrb[228].mxu1 %v16637_v58  ;;  %v16660_v58 = vld [vmem:[%s21787_s3 + $0x874] ss:$16 sps:$4 sm:$0xff]  }
 0xfd8   :  { %15003 = vmatpush3.bf16.msra.mxu1 %v17472_v62  ;;  %13322 = vmatprep.mubr.msk.bf16.mxu1 %vm833_vm2, %v16645_v19  ;;  %v13299_v62 = vld [vmem:[%s21787_s3 + $0x868] sm:$0xff]  ;;  %v16666_v19 = vld [vmem:[%s21787_s3 + $0x894] ss:$16 sps:$4 sm:$0xff]  }
 0xfd9   :  { %15004 = vmatprep.subr.bf16.mxu1 %v17514_v23  ;;  %v13319_v3 = vcombine.high %v13299_v62, %v13299_v62  ;;  %v14962_v23 = vpop.f32.mrb[221].mxu0 }
 0xfdc   :  { %15005 = vmatpush3.bf16.msra.mxu1 %v17476_v8  ;;  %v16649_v8 = vld [vmem:[%s21787_s3 + $0x848] ss:$16 sps:$4 sm:$0xff]  }
 0xfdd   :  { %15006 = vmatprep.subr.bf16.mxu1 %v17520_v34  ;;  %v14964_v34 = vpop.f32.mrb[222].mxu0 }
 0xfdf   :  { %6346 = vmatmul.mubr.bf16.gmra.mrb[232].mxu1 %v16643_v43  ;;  %v16664_v43 = vld [vmem:[%s21787_s3 + $0x890] ss:$16 sps:$4 sm:$0xff]  }
 0xfe0   :  { %15007 = vmatpush3.bf16.msra.mxu1 %v17480_v17  ;;  %13323 = vmatprep.mubr.msk.bf16.mxu1 %vm833_vm2, %v16651_v53  ;;  %v13318_v17 = vcombine.low %v13299_v62, %v13299_v62  ;;  %v16672_v53 = vld [vmem:[%s21787_s3 + $0x8b4] ss:$16 sps:$4 sm:$0xff]   ;;  %v16670_v62 = vld [vmem:[%s21787_s3 + $0x8b0] ss:$16 sps:$4 sm:$0xff]  }
 0xfe1   :  { %15008 = vmatprep.subr.bf16.mxu1 %v17526_v45  ;;  %v14965_v45 = vpop.f32.mrb[223].mxu0 }
 0xfe4   :  { %15009 = vmatpush3.bf16.msra.mxu1 %v17484_v26  ;;  %v16656_v26 = vld [vmem:[%s21788_s4 + $0xe0] sm:$0xff]  }
 0xfe5   :  { %15010 = vmatprep.subr.bf16.mxu1 %v17532_v57  ;;  %15721 = vmatpush3.bf16.msra.mxu0 %v16656_v26  ;;  %v20116_v57 = vadd.f32 %v14965_v45, %v14964_v34  ;;  %v13352_v45 = vld [vmem:[%s21787_s3 + $0x8f0] sm:$0xff] }
 0xfe6   :  { %15722 = vmatprep.subr.bf16.mxu0 %v21806_v30 }
 0xfe7   :  { %6354 = vmatmul.mubr.bf16.gmra.mrb[236].mxu1 %v16649_v8  ;;  %v16678_v8 = vld [vmem:[%s21787_s3 + $0x8d4] ss:$16 sps:$4 sm:$0xff]  }
 0xfe8   :  { %15011 = vmatpush3.bf16.msra.mxu1 %v17488_v36  ;;  %13324 = vmatprep.mubr.msk.bf16.mxu1 %vm833_vm2, %v13319_v3  ;;  %v16657_v36 = vld [vmem:[%s21788_s4 + $0xe8] sm:$0xff]   ;;  %v16676_v3 = vld [vmem:[%s21787_s3 + $0x8d0] ss:$16 sps:$4 sm:$0xff]  }
 0xfe9   :  { %15012 = vmatprep.subr.bf16.mxu1 %v17538_v5  ;;  %15723 = vmatpush3.bf16.msra.mxu0 %v16657_v36  ;;  %v14967_v5 = vpop.f32.mrb[224].mxu0 }
 0xfea   :  { %6682 = vmatprep.subr.bf16.mxu0 %v21807_v59  ;;  %v14968_v48 = vpop.f32.mrb[225].mxu0 }
 0xfeb   :  { %v20118_v0 = vadd.f32 %v14968_v48, %v14967_v5  ;;  %v14970_v1 = vpop.f32.mrb[226].mxu0  ;;  %v13370_v48 = vcombine.low %v13352_v45, %v13352_v45 }
 0xfec   :  { %15013 = vmatpush3.bf16.msra.mxu1 %v17492_v46  ;;  %v20114_v46 = vadd.f32 %v14962_v23, %v14961_v13  ;;  %v14971_v31 = vpop.f32.mrb[227].mxu0 }
 0xfed   :  { %15744 = vmatprep.subr.bf16.mxu1 %v21806_v30  ;;  %v20120_v10 = vadd.f32 %v14971_v31, %v14970_v1  ;;  %v14973_v38 = vpop.f32.mrb[228].mxu0  ;;  %v13371_v1 = vcombine.high %v13352_v45, %v13352_v45 }
 0xfee   :  { %v14974_v16 = vpop.f32.mrb[229].mxu0 }
 0xfef   :  { %6362 = vmatmul.mubr.bf16.gmra.mrb[240].mxu1 %v13318_v17  ;;  %v20122_v54 = vadd.f32 %v14974_v16, %v14973_v38  ;;  %v14976_v27 = vpop.f32.mrb[230].mxu0 }
 0xff0   :  { %v14977_v24 = vpop.f32.mrb[231].mxu0  ;;  %6642 = vmatprep.mubr.bf16.mxu1 %v16660_v58 }
 0xff1   :  { %v20124_v41 = vadd.f32 %v14977_v24, %v14976_v27  ;;  %v14979_v18 = vpop.f32.mrb[232].mxu0 }
 0xff2   :  { %v14980_v15 = vpop.f32.mrb[233].mxu0 }
 0xff3   :  { %v20126_v37 = vadd.f32 %v14980_v15, %v14979_v18  ;;  %v14982_v2 = vpop.f32.mrb[234].mxu0 }
 0xff4   :  { %v14983_v32 = vpop.f32.mrb[235].mxu0 }
 0xff5   :  { %v20128_v12 = vadd.f32 %v14983_v32, %v14982_v2 }
 0xff7   :  { %6643 = vmatmul.mubr.bf16.vlgmr.msra.gmra.mrb[244].mxu1 %v16658_v47 }
 0xff8   :  { %6650 = vmatprep.mubr.bf16.mxu1 %v16666_v19 }
 0xfff   :  { %6651 = vmatmul.mubr.bf16.gmra.mrb[248].mxu1 %v16664_v43 }
0x1000   :  { %6658 = vmatprep.mubr.bf16.mxu1 %v16672_v53 }
0x1007   :  { %6659 = vmatmul.mubr.bf16.gmra.mrb[252].mxu1 %v16670_v62 }
0x1008   :  { %6666 = vmatprep.mubr.bf16.mxu1 %v16678_v8 }
0x100f   :  { %6667 = vmatmul.mubr.bf16.gmra.mrb[0].mxu1 %v16676_v3 }
0x1010   :  { %6674 = vmatprep.mubr.bf16.mxu1 %v13371_v1 }
0x1017   :  { %6675 = vmatmul.mubr.bf16.gmra.mrb[4].mxu1 %v13370_v48 }
0x1018   :  { %15748 = vmatprep.mubr.msk.bf16.mxu1 %vm17183_vm0, %v21806_v30 }
0x1038   :  { %v14985_v42 = vpop.f32.mrb[236].mxu0 }
0x1039   :  { %v14986_v7 = vpop.f32.mrb[237].mxu0 }
0x103a   :  { %v20130_v6 = vadd.f32 %v14986_v7, %v14985_v42  ;;  %v14988_v39 = vpop.f32.mrb[238].mxu0 }
0x103b   :  { %v14989_v52 = vpop.f32.mrb[239].mxu0 }
0x106e   :  { %v6055_v17 = vpop.f32.mrb[204].mxu1 }
0x106f   :  { %v20157_v26 = vadd.f32 %v6055_v17, %v19973_v51  ;;  %v15702_v36 = vpop.f32.mrb[205].mxu1 }
0x1070   :  { %v6058_v13 = vpop.f32.mrb[206].mxu1 }
0x1071   :  { %v20160_v23 = vadd.f32 %v6058_v13, %v19982_v25  ;;  %v15703_v34 = vpop.f32.mrb[207].mxu1 }
0x1076   :  { %v6063_v5 = vpop.f32.mrb[208].mxu1 }
0x1077   :  { %v20166_v31 = vadd.f32 %v6063_v5, %v19985_v22  ;;  %v15706_v38 = vpop.f32.mrb[209].mxu1 }
0x1078   :  { %v6066_v51 = vpop.f32.mrb[210].mxu1 }
0x1079   :  { %v20169_v16 = vadd.f32 %v6066_v51, %v19991_v9  ;;  %v15707_v27 = vpop.f32.mrb[211].mxu1 }
0x107e   :  { %v6071_v25 = vpop.f32.mrb[212].mxu1 }
0x107f   :  { %v20174_v24 = vadd.f32 %v6071_v25, %v19996_v56  ;;  %v15710_v18 = vpop.f32.mrb[213].mxu1 }
0x1080   :  { %v6074_v15 = vpop.f32.mrb[214].mxu1 }
0x1081   :  { %v20177_v22 = vadd.f32 %v6074_v15, %v19999_v55  ;;  %v15711_v2 = vpop.f32.mrb[215].mxu1 }
0x1086   :  { %v6079_v32 = vpop.f32.mrb[216].mxu1 }
0x1087   :  { %v20180_v42 = vadd.f32 %v6079_v32, %v20002_v28  ;;  %v15714_v9 = vpop.f32.mrb[217].mxu1  ;;  %v16686_v32 = vld [vmem:[%s21788_s4 + $0xf0] sm:$0xff]  }
0x1088   :  { %v6082_v7 = vpop.f32.mrb[218].mxu1  ;;  %15745 = vmatpush3.bf16.msra.mxu1 %v16686_v32  ;;  %v16687_v9 = vld [vmem:[%s21788_s4 + $0xf8] sm:$0xff]  }
0x1089   :  { %v20183_v39 = vadd.f32 %v6082_v7, %v20005_v40  ;;  %v15715_v52 = vpop.f32.mrb[219].mxu1  ;;  %15746 = vmatprep.subr.bf16.mxu1 %v21806_v30 }
0x108c   :  { %15747 = vmatpush3.bf16.msra.mxu1 %v16687_v9 }
0x108e   :  { %v6087_v47 = vpop.f32.mrb[220].mxu1 }
0x108f   :  { %v20186_v56 = vadd.f32 %v6087_v47, %v20008_v61  ;;  %v15718_v58 = vpop.f32.mrb[221].mxu1 }
0x1090   :  { %v6090_v19 = vpop.f32.mrb[222].mxu1 }
0x1091   :  { %v15719_v43 = vpop.f32.mrb[223].mxu1 }
0x10a2   :  { %v6331_v55 = vpop.f32.mrb[224].mxu1 }
0x10a3   :  { %v6332_v53 = vadd.f32 %v20114_v46, %v6331_v55  ;;  %v6333_v62 = vpop.f32.mrb[225].mxu1 }
0x10a4   :  { %v6334_v8 = vpop.f32.mrb[226].mxu1 }
0x10a5   :  { %v6335_v28 = vadd.f32 %v20116_v57, %v6334_v8  ;;  %v6336_v3 = vpop.f32.mrb[227].mxu1 }
0x10a7   :  { %v6369_v17 = vpack.c.bf16 %v6335_v28, %v6332_v53 }
0x10a9   :  { %15725 = vmatmul.mubr.msk.bf16.vlgmr.msra.gmra.mrb[240].mxu0 %vm1295_vm4, %v6369_v17 }
0x10aa   :  { %6683 = vmatpush1.bf16.msra.mxu0 %v17551_v20  ;;  %v6339_v40 = vpop.f32.mrb[228].mxu1  ;;  %15728 = vmatprep.mubr.msk.bf16.mxu0 %vm17183_vm0, %v21806_v30 }
0x10ab   :  { %v6340_v61 = vadd.f32 %v20118_v0, %v6339_v40  ;;  %v6341_v36 = vpop.f32.mrb[229].mxu1  ;;  %6684 = vmatprep.subr.bf16.mxu0 %v21807_v59 }
0x10ac   :  { %v6342_v46 = vpop.f32.mrb[230].mxu1 }
0x10ad   :  { %v6343_v13 = vadd.f32 %v20120_v10, %v6342_v46  ;;  %v6344_v34 = vpop.f32.mrb[231].mxu1 }
0x10ae   :  { %6685 = vmatpush1.bf16.msra.mxu0 %v17563_v35 }
0x10af   :  { %v6370_v57 = vpack.c.bf16 %v6343_v13, %v6340_v61  ;;  %6686 = vmatprep.subr.bf16.mxu0 %v21807_v59 }
0x10b1   :  { %15729 = vmatmul.mubr.msk.bf16.gmra.mrb[244].mxu0 %vm1295_vm4, %v6370_v57 }
0x10b2   :  { %6687 = vmatpush1.bf16.msra.mxu0 %v17575_v50  ;;  %v6347_v20 = vpop.f32.mrb[232].mxu1  ;;  %15732 = vmatprep.mubr.msk.bf16.mxu0 %vm17183_vm0, %v21806_v30 }
0x10b3   :  { %v6348_v0 = vadd.f32 %v20122_v54, %v6347_v20  ;;  %v6349_v45 = vpop.f32.mrb[233].mxu1  ;;  %6688 = vmatprep.subr.bf16.mxu0 %v21807_v59 }
0x10b4   :  { %v6350_v10 = vpop.f32.mrb[234].mxu1 }
0x10b5   :  { %v6351_v5 = vadd.f32 %v20124_v41, %v6350_v10  ;;  %v6352_v35 = vpop.f32.mrb[235].mxu1 }
0x10b6   :  { %6689 = vmatpush1.bf16.msra.mxu0 %v17587_v4 }
0x10b7   :  { %v6371_v48 = vpack.c.bf16 %v6351_v5, %v6348_v0  ;;  %6690 = vmatprep.subr.bf16.mxu0 %v21807_v59 }
0x10b9   :  { %15733 = vmatmul.mubr.msk.bf16.gmra.mrb[248].mxu0 %vm1295_vm4, %v6371_v48 }
0x10ba   :  { %6691 = vmatpush1.bf16.msra.mxu0 %v17597_v21  ;;  %v6355_v50 = vpop.f32.mrb[236].mxu1  ;;  %15736 = vmatprep.mubr.msk.bf16.mxu0 %vm17183_vm0, %v21806_v30 }
0x10bb   :  { %v6356_v54 = vadd.f32 %v20126_v37, %v6355_v50  ;;  %v6357_v1 = vpop.f32.mrb[237].mxu1  ;;  %6692 = vmatprep.subr.bf16.mxu0 %v21807_v59 }
0x10bc   :  { %v6358_v41 = vpop.f32.mrb[238].mxu1 }
0x10bd   :  { %v6359_v38 = vadd.f32 %v20128_v12, %v6358_v41  ;;  %v6360_v4 = vpop.f32.mrb[239].mxu1 }
0x10be   :  { %6693 = vmatpush1.bf16.msra.mxu0 %v17603_v33  ;;  %v16663_v33 = vld [vmem:[%s21787_s3 + $0x87c] ss:$16 sps:$4 sm:$0xff]  }
0x10bf   :  { %v6372_v51 = vpack.c.bf16 %v6359_v38, %v6356_v54  ;;  %6694 = vmatprep.subr.bf16.mxu0 %v21807_v59 }
0x10c1   :  { %15737 = vmatmul.mubr.msk.bf16.gmra.mrb[252].mxu0 %vm1295_vm4, %v6372_v51 }
0x10c2   :  { %6695 = vmatpush1.bf16.msra.mxu0 %v17612_v49  ;;  %v6363_v21 = vpop.f32.mrb[240].mxu1  ;;  %15740 = vmatprep.mubr.msk.bf16.mxu0 %vm17183_vm0, %v21806_v30  ;;  %v16661_v49 = vld [vmem:[%s21787_s3 + $0x878] ss:$16 sps:$4 sm:$0xff]  }
0x10c3   :  { %v6364_v37 = vadd.f32 %v20130_v6, %v6363_v21  ;;  %6696 = vmatprep.subr.bf16.mxu0 %v21807_v59  ;;  %v6365_v27 = vpop.f32.mrb[241].mxu1  ;;  %v16679_v6 = vld [vmem:[%s21787_s3 + $0x8d8] ss:$16 sps:$4 sm:$0xff]  }
0x10c4   :  { %v6366_v12 = vpop.f32.mrb[242].mxu1 }
0x10c5   :  { %v6373_v25 = vpack.c.bf16 %v6364_v37, %v6364_v37  ;;  %v6367_v18 = vpop.f32.mrb[243].mxu1 }
0x10c6   :  { %6697 = vmatpush1.bf16.msra.mxu0 %v17619_v63  ;;  %v16669_v63 = vld [vmem:[%s21787_s3 + $0x89c] ss:$16 sps:$4 sm:$0xff]  }
0x10c7   :  { %6698 = vmatprep.subr.bf16.mxu0 %v21807_v59 }
0x10c9   :  { %15741 = vmatmul.mubr.msk.bf16.gmra.mrb[0].mxu0 %vm1295_vm4, %v6373_v25 }
0x10ca   :  { %6699 = vmatpush1.bf16.msra.mxu0 %v17625_v14  ;;  %13374 = vmatprep.mubr.msk.bf16.mxu0 %vm833_vm2, %v16663_v33  ;;  %v16667_v14 = vld [vmem:[%s21787_s3 + $0x898] ss:$16 sps:$4 sm:$0xff]   ;;  %v15014_v7 = vpop.f32.mrb[244].mxu1 }
0x10cb   :  { %6700 = vmatprep.subr.bf16.mxu0 %v21807_v59  ;;  %v15015_v52 = vpop.f32.mrb[245].mxu1 }
0x10cc   :  { %v15016_v47 = vadd.f32 %v15015_v52, %v15014_v7  ;;  %v15017_v58 = vpop.f32.mrb[246].mxu1 }
0x10cd   :  { %v15018_v19 = vpop.f32.mrb[247].mxu1 }
0x10ce   :  { %6701 = vmatpush1.bf16.msra.mxu0 %v17631_v29  ;;  %v16675_v29 = vld [vmem:[%s21787_s3 + $0x8bc] ss:$16 sps:$4 sm:$0xff]   ;;  %v15019_v43 = vadd.f32 %v15018_v19, %v15017_v58 }
0x10cf   :  { %6702 = vmatprep.subr.bf16.mxu0 %v21807_v59 }
0x10d2   :  { %6703 = vmatpush1.bf16.msra.mxu0 %v17637_v44  ;;  %v16673_v44 = vld [vmem:[%s21787_s3 + $0x8b8] ss:$16 sps:$4 sm:$0xff]   ;;  %v15020_v55 = vpop.f32.mrb[248].mxu1 }
0x10d3   :  { %6704 = vmatprep.subr.bf16.mxu0 %v21807_v59  ;;  %v15021_v53 = vpop.f32.mrb[249].mxu1 }
0x10d4   :  { %v15023_v62 = vpop.f32.mrb[250].mxu1  ;;  %v15022_v8 = vadd.f32 %v15021_v53, %v15020_v55 }
0x10d5   :  { %v15024_v28 = vpop.f32.mrb[251].mxu1 }
0x10d6   :  { %6705 = vmatpush1.bf16.msra.mxu0 %v17643_v60  ;;  %v16681_v60 = vld [vmem:[%s21787_s3 + $0x8dc] ss:$16 sps:$4 sm:$0xff]   ;;  %v15025_v3 = vadd.f32 %v15024_v28, %v15023_v62 }
0x10d7   :  { %6706 = vmatprep.subr.bf16.mxu0 %v21807_v59 }
0x10da   :  { %6707 = vmatpush1.bf16.msra.mxu0 %v17648_v11  ;;  %v13353_v11 = vld [vmem:[%s21787_s3 + $0x8f8] sm:$0xff]  ;;  %v15026_v17 = vpop.f32.mrb[252].mxu1 }
0x10db   :  { %v13373_v15 = vcombine.high %v13353_v11, %v13353_v11  ;;  %v13372_v2 = vcombine.low %v13353_v11, %v13353_v11  ;;  %v15027_v40 = vpop.f32.mrb[253].mxu1 }
0x10dc   :  { %v15029_v61 = vpop.f32.mrb[254].mxu1  ;;  %v15028_v36 = vadd.f32 %v15027_v40, %v15026_v17 }
0x10dd   :  { %6715 = vmatmul.mubr.bf16.vlgmr.msra.gmra.mrb[4].mxu0 %v16661_v49  ;;  %v15030_v46 = vpop.f32.mrb[255].mxu1 }
0x10de   :  { %13375 = vmatprep.mubr.msk.bf16.mxu0 %vm833_vm2, %v16669_v63  ;;  %v20274_v13 = vadd.f32 %v15030_v46, %v15029_v61 }
0x10e2   :  { %v15032_v34 = vpop.f32.mrb[0].mxu1 }
0x10e3   :  { %v15033_v57 = vpop.f32.mrb[1].mxu1 }
0x10e4   :  { %v15035_v20 = vpop.f32.mrb[2].mxu1  ;;  %v20276_v0 = vadd.f32 %v15033_v57, %v15032_v34 }
0x10e5   :  { %6723 = vmatmul.mubr.bf16.gmra.mrb[8].mxu0 %v16667_v14  ;;  %v15036_v45 = vpop.f32.mrb[3].mxu1 }
0x10e6   :  { %13376 = vmatprep.mubr.msk.bf16.mxu0 %vm833_vm2, %v16675_v29  ;;  %v20278_v10 = vadd.f32 %v15036_v45, %v15035_v20 }
0x10ea   :  { %v15038_v5 = vpop.f32.mrb[4].mxu1 }
0x10eb   :  { %v15039_v35 = vpop.f32.mrb[5].mxu1 }
0x10ec   :  { %v20280_v48 = vadd.f32 %v15039_v35, %v15038_v5  ;;  %v15041_v50 = vpop.f32.mrb[6].mxu1 }
0x10ed   :  { %6731 = vmatmul.mubr.bf16.gmra.mrb[12].mxu0 %v16673_v44  ;;  %v15042_v54 = vpop.f32.mrb[7].mxu1 }
0x10ee   :  { %13377 = vmatprep.mubr.msk.bf16.mxu0 %vm833_vm2, %v16681_v60 }
0x10f5   :  { %6739 = vmatmul.mubr.bf16.gmra.mrb[16].mxu0 %v16679_v6 }
0x10f6   :  { %13378 = vmatprep.mubr.msk.bf16.mxu0 %vm833_vm2, %v13373_v15 }
0x10fd   :  { %6747 = vmatmul.mubr.bf16.gmra.mrb[20].mxu0 %v13372_v2 }
0x117c   :  { %v6440_v1 = vpop.f32.mrb[240].mxu0 }
0x117d   :  { %v20283_v41 = vadd.f32 %v6440_v1, %v20157_v26  ;;  %v15726_v38 = vpop.f32.mrb[241].mxu0 }
0x117e   :  { %v6443_v4 = vpop.f32.mrb[242].mxu0 }
0x117f   :  { %v20286_v51 = vadd.f32 %v6443_v4, %v20160_v23  ;;  %v15727_v21 = vpop.f32.mrb[243].mxu0 }
0x1184   :  { %v6448_v37 = vpop.f32.mrb[244].mxu0 }
0x1185   :  { %v20289_v27 = vadd.f32 %v6448_v37, %v20166_v31  ;;  %v15730_v12 = vpop.f32.mrb[245].mxu0  ;;  %v13390_v37 = vld [vmem:[%s21789_s5] ss:$0 sm:$0xff]  ;;  %s12477_s5 = sshll.u32 %s17185_s1, 4  ;;  %s12478_s5 = int_to_ptr.vmem [resolvable:$true] %s12477_s5 }
0x1186   :  { %v6451_v25 = vpop.f32.mrb[246].mxu0  ;;  %s17158_s25 = scalar_lea.vmem %s12478_s5, 32  ;;  %p17163_p1 = scmp.lt.s32.totalorder %s12478_s5, %s12478_s5 }
0x1187   :  { %v20292_v18 = vadd.f32 %v6451_v25, %v20169_v16  ;;  %v15731_v33 = vpop.f32.mrb[247].mxu0  ;;  %p17159_p0 = scmp.ne.s32.totalorder %s12478_s5, %s17158_s25  ;;  %p17164_p2 = scmp.lt.s32.totalorder %s17158_s25, %s17158_s25 }
0x1189   :  { %p17165_p3 = por %p17164_p2, %p17163_p1 }
0x118b   :  { %p17166_p4 = pnand %p17165_p3, %p17159_p0 }
0x118c   :  { %v6456_v49 = vpop.f32.mrb[248].mxu0 }
0x118d   :  { %v20295_v26 = vadd.f32 %v6456_v49, %v20174_v24  ;;  %v15734_v63 = vpop.f32.mrb[249].mxu0 }
0x118e   :  { %v6459_v14 = vpop.f32.mrb[250].mxu0 }
0x118f   :  { %v20298_v23 = vadd.f32 %v6459_v14, %v20177_v22  ;;  %v15735_v29 = vpop.f32.mrb[251].mxu0 }
0x1194   :  { %v6464_v44 = vpop.f32.mrb[252].mxu0 }
0x1195   :  { %v20301_v31 = vadd.f32 %v6464_v44, %v20180_v42  ;;  %v15738_v60 = vpop.f32.mrb[253].mxu0 }
0x1196   :  { %v6467_v11 = vpop.f32.mrb[254].mxu0 }
0x1197   :  { %v20304_v16 = vadd.f32 %v6467_v11, %v20183_v39  ;;  %v15739_v6 = vpop.f32.mrb[255].mxu0 }
0x119c   :  { %v6472_v15 = vpop.f32.mrb[0].mxu0 }
0x119d   :  { %v20307_v24 = vadd.f32 %v6472_v15, %v20186_v56  ;;  %v15742_v2 = vpop.f32.mrb[1].mxu0 }
0x119e   :  { %v6475_v32 = vpop.f32.mrb[2].mxu0 }
0x119f   :  { %v15743_v9 = vpop.f32.mrb[3].mxu0 }
0x11b0   :  { %v6716_v22 = vpop.f32.mrb[4].mxu0 }
0x11b1   :  { %v6717_v7 = vadd.f32 %v15016_v47, %v6716_v22  ;;  %v6718_v52 = vpop.f32.mrb[5].mxu0 }
0x11b2   :  { %v6719_v58 = vpop.f32.mrb[6].mxu0 }
0x11b3   :  { %v6720_v19 = vadd.f32 %v15019_v43, %v6719_v58  ;;  %v6721_v42 = vpop.f32.mrb[7].mxu0 }
0x11b5   :  { %v6754_v55 = vpack.c.bf16 %v6720_v19, %v6717_v7 }
0x11b7   :  { %15749 = vmatmul.mubr.msk.bf16.vlgmr.msra.gmra.mrb[8].mxu1 %vm1295_vm4, %v6754_v55 }
0x11b8   :  { %v6724_v53 = vpop.f32.mrb[8].mxu0  ;;  %15752 = vmatprep.mubr.msk.bf16.mxu1 %vm17183_vm0, %v21806_v30 }
0x11b9   :  { %v6725_v39 = vadd.f32 %v15022_v8, %v6724_v53  ;;  %v6726_v62 = vpop.f32.mrb[9].mxu0 }
0x11ba   :  { %v6727_v56 = vpop.f32.mrb[10].mxu0 }
0x11bb   :  { %v6728_v28 = vadd.f32 %v15025_v3, %v6727_v56  ;;  %v6729_v17 = vpop.f32.mrb[11].mxu0 }
0x11bd   :  { %v6755_v40 = vpack.c.bf16 %v6728_v28, %v6725_v39 }
0x11bf   :  { %15753 = vmatmul.mubr.msk.bf16.gmra.mrb[12].mxu1 %vm1295_vm4, %v6755_v40 }
0x11c0   :  { %v6732_v47 = vpop.f32.mrb[12].mxu0  ;;  %15756 = vmatprep.mubr.msk.bf16.mxu1 %vm17183_vm0, %v21806_v30 }
0x11c1   :  { %v6733_v43 = vadd.f32 %v15028_v36, %v6732_v47  ;;  %v6734_v61 = vpop.f32.mrb[13].mxu0 }
0x11c2   :  { %v6735_v46 = vpop.f32.mrb[14].mxu0 }
0x11c3   :  { %v6736_v34 = vadd.f32 %v20274_v13, %v6735_v46  ;;  %v6737_v57 = vpop.f32.mrb[15].mxu0 }
0x11c5   :  { %v6756_v20 = vpack.c.bf16 %v6736_v34, %v6733_v43 }
0x11c7   :  { %15757 = vmatmul.mubr.msk.bf16.gmra.mrb[16].mxu1 %vm1295_vm4, %v6756_v20 }
0x11c8   :  { %v6740_v8 = vpop.f32.mrb[16].mxu0  ;;  %15760 = vmatprep.mubr.msk.bf16.mxu1 %vm17183_vm0, %v21806_v30 }
0x11c9   :  { %v6741_v3 = vadd.f32 %v20276_v0, %v6740_v8  ;;  %v6742_v45 = vpop.f32.mrb[17].mxu0  ;;  %v16688_v0 = vld [vmem:[%s21790_s6] sm:$0xff]  }
0x11ca   :  { %v6743_v5 = vpop.f32.mrb[18].mxu0  ;;  %15778 = vmatprep.mubr.msk.bf16.mxu0 %vm6916_vm5, %v16688_v0  ;;  %v16695_v0 = vld [vmem:[%s21790_s6 + $0x38] sm:$0xff]  }
0x11cb   :  { %v6744_v35 = vadd.f32 %v20278_v10, %v6743_v5  ;;  %v6745_v50 = vpop.f32.mrb[19].mxu0 }
0x11cd   :  { %v6757_v36 = vpack.c.bf16 %v6744_v35, %v6741_v3 }
0x11cf   :  { %15761 = vmatmul.mubr.msk.bf16.gmra.mrb[20].mxu1 %vm1295_vm4, %v6757_v36 }
0x11d0   :  { %v6748_v54 = vpop.f32.mrb[20].mxu0  ;;  %15764 = vmatprep.mubr.msk.bf16.mxu1 %vm17183_vm0, %v21806_v30 }
0x11d1   :  { %v6749_v13 = vadd.f32 %v20280_v48, %v6748_v54  ;;  %v6750_v1 = vpop.f32.mrb[21].mxu0  ;;  %v16690_v54 = vld [vmem:[%s21790_s6 + $0x10] sm:$0xff]  }
0x11d2   :  { %v6751_v38 = vpop.f32.mrb[22].mxu0  ;;  %v16691_v1 = vld [vmem:[%s21790_s6 + $0x18] sm:$0xff]  }
0x11d3   :  { %v6758_v4 = vpack.c.bf16 %v6749_v13, %v6749_v13  ;;  %v6752_v21 = vpop.f32.mrb[23].mxu0  ;;  %v16704_v13 = vld [vmem:[%s21791_s7 + $0x20] sm:$0xff]  }
0x11d4   :  { %15796 = vmatprep.subr.bf16.mxu1 %v16704_v13  ;;  %v16692_v38 = vld [vmem:[%s21790_s6 + $0x20] sm:$0xff]   ;;  %v16694_v21 = vld [vmem:[%s21790_s6 + $0x30] sm:$0xff]  }
0x11d5   :  { %15797 = vmatpush3.bf16.msra.mxu1 %v16704_v13 }
0x11d7   :  { %15765 = vmatmul.mubr.msk.bf16.gmra.mrb[24].mxu1 %vm1295_vm4, %v6758_v4  ;;  %v16693_v4 = vld [vmem:[%s21790_s6 + $0x28] sm:$0xff]  }
0x128a   :  { %v6825_v10 = vpop.f32.mrb[8].mxu1 }
0x128b   :  { %v6863_v48 = vadd.f32 %v6825_v10, %v20283_v41  ;;  %v15750_v12 = vpop.f32.mrb[9].mxu1  ;;  %v16696_v10 = vld [vmem:[%s21790_s6 + $0x40] sm:$0xff]  }
0x128c   :  { %v6828_v25 = vpop.f32.mrb[10].mxu1  ;;  %v16705_v12 = vld [vmem:[%s21791_s7 + $0x28] sm:$0xff]  }
0x128d   :  { %v6879_v33 = vadd.f32 %v13390_v37, %v6863_v48  ;;  %v6864_v49 = vadd.f32 %v6828_v25, %v20286_v51  ;;  %v15751_v63 = vpop.f32.mrb[11].mxu1  ;;  %v16698_v48 = vld [vmem:[%s21790_s6 + $0x50] sm:$0xff]   ;;  %15798 = vmatprep.subr.bf16.mxu1 %v16705_v12 }
0x128e   :  { %v16706_v25 = vld [vmem:[%s21791_s7 + $0x30] sm:$0xff]   ;;  %15799 = vmatpush3.bf16.msra.mxu1 %v16705_v12  ;;  %v16707_v63 = vld [vmem:[%s21791_s7 + $0x38] sm:$0xff]  }
0x128f   :  { %v6880_v14 = vadd.f32 %v13390_v37, %v6864_v49  ;;  %v6888_v29 = vmax.f32 %v6879_v33, 0.0  ;;  %15800 = vmatprep.subr.bf16.mxu1 %v16706_v25  ;;  %v16699_v33 = vld [vmem:[%s21790_s6 + $0x58] sm:$0xff]   ;;  %v16700_v49 = vld [vmem:[%s21790_s6 + $0x60] sm:$0xff]   ;;  %v16726_v12 = vld [vmem:[%s21791_s7 + $0xb0] sm:$0xff]  }
0x1291   :  { %v6889_v44 = vmax.f32 %v6880_v14, 0.0  ;;  %v16708_v14 = vld [vmem:[%s21791_s7] sm:$0xff]  }
0x1292   :  { %v6833_v60 = vpop.f32.mrb[12].mxu1  ;;  %15801 = vmatpush3.bf16.msra.mxu1 %v16706_v25  ;;  %v16727_v25 = vld [vmem:[%s21791_s7 + $0xb8] sm:$0xff]  }
0x1293   :  { %v20335_v11 = vpack.c.bf16 %v6889_v44, %v6888_v29  ;;  %v6865_v6 = vadd.f32 %v6833_v60, %v20289_v27  ;;  %v15754_v15 = vpop.f32.mrb[13].mxu1  ;;  %15802 = vmatprep.subr.bf16.mxu1 %v16707_v63  ;;  %v16701_v29 = vld [vmem:[%s21790_s6 + $0x68] sm:$0xff]   ;;  %v16702_v44 = vld [vmem:[%s21790_s6 + $0x70] sm:$0xff]   ;;  %v16703_v60 = vld [vmem:[%s21790_s6 + $0x78] sm:$0xff]  }
0x1294   :  { %v6836_v2 = vpop.f32.mrb[14].mxu1 }
0x1295   :  { %v6881_v32 = vadd.f32 %v13390_v37, %v6865_v6  ;;  %v6866_v9 = vadd.f32 %v6836_v2, %v20292_v18  ;;  %v15755_v41 = vpop.f32.mrb[15].mxu1  ;;  %15768 = vmatprep.subr.bf16.mxu0 %v20335_v11 }
0x1296   :  { %15769 = vmatpush3.bf16.msra.mxu0 %v20335_v11  ;;  %15803 = vmatpush3.bf16.msra.mxu1 %v16707_v63  ;;  %v16728_v63 = vld [vmem:[%s21791_s7 + $0xc0] sm:$0xff]  }
0x1297   :  { %v6882_v51 = vadd.f32 %v13390_v37, %v6866_v9  ;;  %v6890_v22 = vmax.f32 %v6881_v32, 0.0  ;;  %15808 = vmatprep.subr.bf16.mxu1 %v16708_v14 }
0x1299   :  { %v6891_v7 = vmax.f32 %v6882_v51, 0.0 }
0x129a   :  { %v6841_v52 = vpop.f32.mrb[16].mxu1 }
0x129b   :  { %v20341_v58 = vpack.c.bf16 %v6891_v7, %v6890_v22  ;;  %v6867_v19 = vadd.f32 %v6841_v52, %v20295_v26  ;;  %v15758_v42 = vpop.f32.mrb[17].mxu1 }
0x129c   :  { %v6844_v27 = vpop.f32.mrb[18].mxu1 }
0x129d   :  { %v6883_v55 = vadd.f32 %v13390_v37, %v6867_v19  ;;  %v6868_v53 = vadd.f32 %v6844_v27, %v20298_v23  ;;  %v15759_v39 = vpop.f32.mrb[19].mxu1  ;;  %15770 = vmatprep.subr.bf16.mxu0 %v20341_v58  ;;  %v16709_v27 = vld [vmem:[%s21791_s7 + $0x8] sm:$0xff]  }
0x129e   :  { %15771 = vmatpush3.bf16.msra.mxu0 %v20341_v58  ;;  %v16712_v39 = vld [vmem:[%s21791_s7 + $0x40] sm:$0xff]  }
0x129f   :  { %v6884_v18 = vadd.f32 %v13390_v37, %v6868_v53  ;;  %v6892_v62 = vmax.f32 %v6883_v55, 0.0  ;;  %v16710_v55 = vld [vmem:[%s21791_s7 + $0x10] sm:$0xff]   ;;  %v16711_v53 = vld [vmem:[%s21791_s7 + $0x18] sm:$0xff]  }
0x12a1   :  { %v6893_v56 = vmax.f32 %v6884_v18, 0.0 }
0x12a2   :  { %v6849_v28 = vpop.f32.mrb[20].mxu1 }
0x12a3   :  { %v20347_v17 = vpack.c.bf16 %v6893_v56, %v6892_v62  ;;  %v6869_v40 = vadd.f32 %v6849_v28, %v20301_v31  ;;  %v15762_v47 = vpop.f32.mrb[21].mxu1  ;;  %v16713_v56 = vld [vmem:[%s21791_s7 + $0x48] sm:$0xff]  }
0x12a4   :  { %v6852_v26 = vpop.f32.mrb[22].mxu1 }
0x12a5   :  { %v6885_v43 = vadd.f32 %v13390_v37, %v6869_v40  ;;  %v6870_v61 = vadd.f32 %v6852_v26, %v20304_v16  ;;  %v15763_v46 = vpop.f32.mrb[23].mxu1  ;;  %15772 = vmatprep.subr.bf16.mxu0 %v20347_v17 }
0x12a6   :  { %15773 = vmatpush3.bf16.msra.mxu0 %v20347_v17  ;;  %v16716_v46 = vld [vmem:[%s21791_s7 + $0x60] sm:$0xff]  }
0x12a7   :  { %v6886_v23 = vadd.f32 %v13390_v37, %v6870_v61  ;;  %v6894_v34 = vmax.f32 %v6885_v43, 0.0  ;;  %v16714_v43 = vld [vmem:[%s21791_s7 + $0x50] sm:$0xff]   ;;  %v16715_v61 = vld [vmem:[%s21791_s7 + $0x58] sm:$0xff]  }
0x12a9   :  { %v6895_v57 = vmax.f32 %v6886_v23, 0.0  ;;  %v16717_v23 = vld [vmem:[%s21791_s7 + $0x68] sm:$0xff]  }
0x12aa   :  { %v6857_v20 = vpop.f32.mrb[24].mxu1 }
0x12ab   :  { %v20353_v8 = vpack.c.bf16 %v6895_v57, %v6894_v34  ;;  %v6871_v3 = vadd.f32 %v6857_v20, %v20307_v24  ;;  %v15766_v45 = vpop.f32.mrb[25].mxu1  ;;  %v16689_v24 = vld [vmem:[%s21790_s6 + $0x8] sm:$0xff]   ;;  %v16718_v20 = vld [vmem:[%s21791_s7 + $0x70] sm:$0xff]  }
0x12ac   :  { %v6860_v31 = vpop.f32.mrb[26].mxu1 }
0x12ad   :  { %v6887_v5 = vadd.f32 %v13390_v37, %v6871_v3  ;;  %v15767_v35 = vpop.f32.mrb[27].mxu1  ;;  %15774 = vmatprep.subr.bf16.mxu0 %v20353_v8  ;;  %v16697_v37 = vld [vmem:[%s21790_s6 + $0x48] sm:$0xff]  }
0x12ae   :  { %15775 = vmatpush3.bf16.msra.mxu0 %v20353_v8  ;;  %v16719_v35 = vld [vmem:[%s21791_s7 + $0x78] sm:$0xff]  }
0x12af   :  { %v6896_v16 = vmax.f32 %v6887_v5, 0.0 }
0x12b1   :  { %v20358_v50 = vpack.c.bf16 %v6896_v16, %v6896_v16  ;;  %v16720_v16 = vld [vmem:[%s21791_s7 + $0x80] sm:$0xff]  }
0x12b3   :  { %16162 = vmatprep.subr.msk.bf16.mxu0 %vm6923_vm6, %v20358_v50  ;;  %v20364_v36 = vsel %vm6923_vm6, %v20358_v50, 0 }
0x12b4   :  { %15777 = vmatpush3.bf16.msra.mxu0 %v20364_v36 }
0x12b5   :  { %15782 = vmatprep.subr.bf16.mxu0 %v20335_v11 }
0x12b7   :  { %15779 = vmatmul.mubr.msk.bf16.vlgmr.msra.gmra.mrb[24].mxu0 %vm6916_vm5, %v16689_v24  ;;  %v16721_v24 = vld [vmem:[%s21791_s7 + $0x88] sm:$0xff]  }
0x12b8   :  { %15783 = vmatpush3.bf16.msra.mxu0 %v20335_v11  ;;  %15792 = vmatprep.mubr.msk.bf16.mxu0 %vm6916_vm5, %v16690_v54  ;;  %v16722_v54 = vld [vmem:[%s21791_s7 + $0x90] sm:$0xff]  }
0x12b9   :  { %15784 = vmatprep.subr.bf16.mxu0 %v20341_v58 }
0x12bc   :  { %15785 = vmatpush3.bf16.msra.mxu0 %v20341_v58 }
0x12bd   :  { %15786 = vmatprep.subr.bf16.mxu0 %v20347_v17 }
0x12c0   :  { %15787 = vmatpush3.bf16.msra.mxu0 %v20347_v17 }
0x12c1   :  { %15788 = vmatprep.subr.bf16.mxu0 %v20353_v8 }
0x12c4   :  { %15789 = vmatpush3.bf16.msra.mxu0 %v20353_v8 }
0x12c5   :  { %16163 = vmatprep.subr.msk.bf16.mxu0 %vm6923_vm6, %v20358_v50 }
0x12c8   :  { %15791 = vmatpush3.bf16.msra.mxu0 %v20364_v36 }
0x12c9   :  { %15820 = vmatprep.subr.bf16.mxu0 %v20335_v11 }
0x12cb   :  { %15793 = vmatmul.mubr.msk.bf16.vlgmr.msra.gmra.mrb[28].mxu0 %vm6916_vm5, %v16691_v1 }
0x12cc   :  { %15821 = vmatpush3.bf16.msra.mxu0 %v20335_v11  ;;  %15830 = vmatprep.mubr.msk.bf16.mxu0 %vm6916_vm5, %v16692_v38  ;;  %v16723_v38 = vld [vmem:[%s21791_s7 + $0x98] sm:$0xff]  }
0x12cd   :  { %15822 = vmatprep.subr.bf16.mxu0 %v20341_v58 }
0x12d0   :  { %15823 = vmatpush3.bf16.msra.mxu0 %v20341_v58 }
0x12d1   :  { %15824 = vmatprep.subr.bf16.mxu0 %v20347_v17 }
0x12d4   :  { %15825 = vmatpush3.bf16.msra.mxu0 %v20347_v17 }
0x12d5   :  { %15826 = vmatprep.subr.bf16.mxu0 %v20353_v8 }
0x12d8   :  { %15827 = vmatpush3.bf16.msra.mxu0 %v20353_v8 }
0x12d9   :  { %16164 = vmatprep.subr.msk.bf16.mxu0 %vm6923_vm6, %v20358_v50 }
0x12dc   :  { %15829 = vmatpush3.bf16.msra.mxu0 %v20364_v36 }
0x12dd   :  { %15846 = vmatprep.subr.bf16.mxu0 %v20335_v11 }
0x12df   :  { %15831 = vmatmul.mubr.msk.bf16.vlgmr.msra.gmra.mrb[32].mxu0 %vm6916_vm5, %v16693_v4 }
0x12e0   :  { %15847 = vmatpush3.bf16.msra.mxu0 %v20335_v11  ;;  %15856 = vmatprep.mubr.msk.bf16.mxu0 %vm6916_vm5, %v16694_v21 }
0x12e1   :  { %15848 = vmatprep.subr.bf16.mxu0 %v20341_v58 }
0x12e4   :  { %15849 = vmatpush3.bf16.msra.mxu0 %v20341_v58 }
0x12e5   :  { %15850 = vmatprep.subr.bf16.mxu0 %v20347_v17 }
0x12e8   :  { %15851 = vmatpush3.bf16.msra.mxu0 %v20347_v17 }
0x12e9   :  { %15852 = vmatprep.subr.bf16.mxu0 %v20353_v8 }
0x12ec   :  { %15853 = vmatpush3.bf16.msra.mxu0 %v20353_v8 }
0x12ed   :  { %16165 = vmatprep.subr.msk.bf16.mxu0 %vm6923_vm6, %v20358_v50 }
0x12f0   :  { %15855 = vmatpush3.bf16.msra.mxu0 %v20364_v36 }
0x12f1   :  { %15872 = vmatprep.subr.bf16.mxu0 %v20335_v11 }
0x12f3   :  { %15857 = vmatmul.mubr.msk.bf16.vlgmr.msra.gmra.mrb[36].mxu0 %vm6916_vm5, %v16695_v0 }
0x12f4   :  { %15873 = vmatpush3.bf16.msra.mxu0 %v20335_v11  ;;  %15882 = vmatprep.mubr.msk.bf16.mxu0 %vm6916_vm5, %v16696_v10 }
0x12f5   :  { %15874 = vmatprep.subr.bf16.mxu0 %v20341_v58 }
0x12f8   :  { %15875 = vmatpush3.bf16.msra.mxu0 %v20341_v58 }
0x12f9   :  { %15876 = vmatprep.subr.bf16.mxu0 %v20347_v17 }
0x12fc   :  { %15877 = vmatpush3.bf16.msra.mxu0 %v20347_v17 }
0x12fd   :  { %15878 = vmatprep.subr.bf16.mxu0 %v20353_v8 }
0x1300   :  { %15879 = vmatpush3.bf16.msra.mxu0 %v20353_v8 }
0x1301   :  { %16166 = vmatprep.subr.msk.bf16.mxu0 %vm6923_vm6, %v20358_v50 }
0x1304   :  { %15881 = vmatpush3.bf16.msra.mxu0 %v20364_v36 }
0x1305   :  { %15898 = vmatprep.subr.bf16.mxu0 %v20335_v11 }
0x1307   :  { %15883 = vmatmul.mubr.msk.bf16.vlgmr.msra.gmra.mrb[40].mxu0 %vm6916_vm5, %v16697_v37  ;;  %v16724_v37 = vld [vmem:[%s21791_s7 + $0xa0] sm:$0xff]  }
0x1308   :  { %15899 = vmatpush3.bf16.msra.mxu0 %v20335_v11  ;;  %15908 = vmatprep.mubr.msk.bf16.mxu0 %vm6916_vm5, %v16698_v48  ;;  %v16725_v48 = vld [vmem:[%s21791_s7 + $0xa8] sm:$0xff]  }
0x1309   :  { %15900 = vmatprep.subr.bf16.mxu0 %v20341_v58 }
0x130c   :  { %15901 = vmatpush3.bf16.msra.mxu0 %v20341_v58 }
0x130d   :  { %15902 = vmatprep.subr.bf16.mxu0 %v20347_v17 }
0x1310   :  { %15903 = vmatpush3.bf16.msra.mxu0 %v20347_v17 }
0x1311   :  { %15904 = vmatprep.subr.bf16.mxu0 %v20353_v8 }
0x1314   :  { %15905 = vmatpush3.bf16.msra.mxu0 %v20353_v8 }
0x1315   :  { %16167 = vmatprep.subr.msk.bf16.mxu0 %vm6923_vm6, %v20358_v50 }
0x1318   :  { %15907 = vmatpush3.bf16.msra.mxu0 %v20364_v36 }
0x1319   :  { %15924 = vmatprep.subr.bf16.mxu0 %v20335_v11 }
0x131b   :  { %15909 = vmatmul.mubr.msk.bf16.vlgmr.msra.gmra.mrb[44].mxu0 %vm6916_vm5, %v16699_v33 }
0x131c   :  { %15925 = vmatpush3.bf16.msra.mxu0 %v20335_v11  ;;  %15934 = vmatprep.mubr.msk.bf16.mxu0 %vm6916_vm5, %v16700_v49 }
0x131d   :  { %15926 = vmatprep.subr.bf16.mxu0 %v20341_v58 }
0x1320   :  { %15927 = vmatpush3.bf16.msra.mxu0 %v20341_v58 }
0x1321   :  { %15928 = vmatprep.subr.bf16.mxu0 %v20347_v17 }
0x1324   :  { %15929 = vmatpush3.bf16.msra.mxu0 %v20347_v17 }
0x1325   :  { %15930 = vmatprep.subr.bf16.mxu0 %v20353_v8 }
0x1328   :  { %15931 = vmatpush3.bf16.msra.mxu0 %v20353_v8 }
0x1329   :  { %16168 = vmatprep.subr.msk.bf16.mxu0 %vm6923_vm6, %v20358_v50 }
0x132c   :  { %15933 = vmatpush3.bf16.msra.mxu0 %v20364_v36 }
0x132d   :  { %15950 = vmatprep.subr.bf16.mxu0 %v20335_v11 }
0x132f   :  { %15935 = vmatmul.mubr.msk.bf16.vlgmr.msra.gmra.mrb[48].mxu0 %vm6916_vm5, %v16701_v29 }
0x1330   :  { %15951 = vmatpush3.bf16.msra.mxu0 %v20335_v11  ;;  %15960 = vmatprep.mubr.msk.bf16.mxu0 %vm6916_vm5, %v16702_v44 }
0x1331   :  { %15952 = vmatprep.subr.bf16.mxu0 %v20341_v58 }
0x1334   :  { %15953 = vmatpush3.bf16.msra.mxu0 %v20341_v58 }
0x1335   :  { %15954 = vmatprep.subr.bf16.mxu0 %v20347_v17 }
0x1338   :  { %15955 = vmatpush3.bf16.msra.mxu0 %v20347_v17 }
0x1339   :  { %15956 = vmatprep.subr.bf16.mxu0 %v20353_v8 }
0x133c   :  { %15957 = vmatpush3.bf16.msra.mxu0 %v20353_v8 }
0x133d   :  { %16169 = vmatprep.subr.msk.bf16.mxu0 %vm6923_vm6, %v20358_v50 }
0x1340   :  { %15959 = vmatpush3.bf16.msra.mxu0 %v20364_v36 }
0x1341   :  { %16002 = vmatprep.subr.bf16.mxu0 %v21806_v30 }
0x1343   :  { %15961 = vmatmul.mubr.msk.bf16.vlgmr.msra.gmra.mrb[52].mxu0 %vm6916_vm5, %v16703_v60 }
0x1344   :  { %16006 = vmatprep.mubr.msk.bf16.mxu0 %vm17183_vm0, %v21806_v30 }
0x138a   :  { %v15780_v6 = vpop.f32.mrb[24].mxu0 }
0x138b   :  { %v6961_v15 = vpop.f32.mrb[25].mxu0 }
0x138c   :  { %v15781_v2 = vpop.f32.mrb[26].mxu0 }
0x138d   :  { %v6977_v32 = vpack.c.bf16 %v15781_v2, %v15780_v6  ;;  %v6964_v9 = vpop.f32.mrb[27].mxu0  ;;  %v16729_v6 = vld [vmem:[%s21791_s7 + $0xc8] sm:$0xff]   ;;  %v16731_v2 = vld [vmem:[%s21791_s7 + $0xd8] sm:$0xff]  }
0x138e   :  { %v6976_v41 = vpack.c.bf16 %v6964_v9, %v6961_v15  ;;  %v16730_v15 = vld [vmem:[%s21791_s7 + $0xd0] sm:$0xff]  }
0x139e   :  { %v15794_v51 = vpop.f32.mrb[28].mxu0 }
0x139f   :  { %v7041_v22 = vpop.f32.mrb[29].mxu0 }
0x13a0   :  { %v15795_v7 = vpop.f32.mrb[30].mxu0 }
0x13a1   :  { %v7057_v52 = vpack.c.bf16 %v15795_v7, %v15794_v51  ;;  %v7044_v19 = vpop.f32.mrb[31].mxu0 }
0x13a2   :  { %v7056_v42 = vpack.c.bf16 %v7044_v19, %v7041_v22  ;;  %v16733_v19 = vld [vmem:[%s21791_s7 + $0xe8] sm:$0xff]  }
0x13a4   :  { %15804 = vmatprep.mubr.msk.bf16.mxu1 %vm288_vm1, %v7056_v42  ;;  %v16734_v42 = vld [vmem:[%s21791_s7 + $0xf0] sm:$0xff]  }
0x13a5   :  { %15805 = vmatmul.mubr.msk.bf16.vlgmr.msra.gmra.mrb[28].mxu1 %vm288_vm1, %v7057_v52 }
0x13a6   :  { %15809 = vmatpush3.bf16.msra.mxu1 %v16708_v14  ;;  %15816 = vmatprep.mubr.msk.bf16.mxu1 %vm288_vm1, %v6976_v41 }
0x13a7   :  { %15810 = vmatprep.subr.bf16.mxu1 %v16709_v27 }
0x13aa   :  { %15811 = vmatpush3.bf16.msra.mxu1 %v16709_v27  ;;  %v16735_v27 = vld [vmem:[%s21791_s7 + $0xf8] sm:$0xff]  }
0x13ab   :  { %15812 = vmatprep.subr.bf16.mxu1 %v16710_v55 }
0x13ae   :  { %15813 = vmatpush3.bf16.msra.mxu1 %v16710_v55 }
0x13af   :  { %15814 = vmatprep.subr.bf16.mxu1 %v16711_v53 }
0x13b2   :  { %15815 = vmatpush3.bf16.msra.mxu1 %v16711_v53  ;;  %v15832_v18 = vpop.f32.mrb[32].mxu0 }
0x13b3   :  { %15834 = vmatprep.subr.bf16.mxu1 %v16712_v39  ;;  %v7280_v62 = vpop.f32.mrb[33].mxu0 }
0x13b4   :  { %v15833_v28 = vpop.f32.mrb[34].mxu0 }
0x13b5   :  { %15817 = vmatmul.mubr.msk.bf16.vlgmr.msra.gmra.mrb[28].mxu1 %vm288_vm1, %v6977_v32  ;;  %v7296_v40 = vpack.c.bf16 %v15833_v28, %v15832_v18  ;;  %v7283_v47 = vpop.f32.mrb[35].mxu0  ;;  %v16732_v32 = vld [vmem:[%s21791_s7 + $0xe0] sm:$0xff]  }
0x13b6   :  { %15835 = vmatpush3.bf16.msra.mxu1 %v16712_v39  ;;  %v7295_v26 = vpack.c.bf16 %v7283_v47, %v7280_v62  ;;  %v16736_v28 = vld [vmem:[%s21790_s6 + $0x80] sm:$0xff]  }
0x13b7   :  { %15836 = vmatprep.subr.bf16.mxu1 %v16713_v56 }
0x13b8   :  { %15842 = vmatprep.mubr.msk.bf16.mxu1 %vm288_vm1, %v7295_v26 }
0x13ba   :  { %15837 = vmatpush3.bf16.msra.mxu1 %v16713_v56 }
0x13bb   :  { %15838 = vmatprep.subr.bf16.mxu1 %v16714_v43 }
0x13be   :  { %15839 = vmatpush3.bf16.msra.mxu1 %v16714_v43 }
0x13bf   :  { %15840 = vmatprep.subr.bf16.mxu1 %v16715_v61 }
0x13c2   :  { %15841 = vmatpush3.bf16.msra.mxu1 %v16715_v61 }
0x13c3   :  { %15860 = vmatprep.subr.bf16.mxu1 %v16716_v46 }
0x13c5   :  { %15843 = vmatmul.mubr.msk.bf16.vlgmr.msra.gmra.mrb[28].mxu1 %vm288_vm1, %v7296_v40  ;;  %v16737_v40 = vld [vmem:[%s21790_s6 + $0x88] sm:$0xff]  }
0x13c6   :  { %15861 = vmatpush3.bf16.msra.mxu1 %v16716_v46  ;;  %v15858_v34 = vpop.f32.mrb[36].mxu0  ;;  %v16742_v46 = vld [vmem:[%s21794_s10] ss:$16 sps:$4 sm:$0xff]  }
0x13c7   :  { %15862 = vmatprep.subr.bf16.mxu1 %v16717_v23  ;;  %v7444_v57 = vpop.f32.mrb[37].mxu0 }
0x13c8   :  { %v15859_v3 = vpop.f32.mrb[38].mxu0 }
0x13c9   :  { %v7460_v45 = vpack.c.bf16 %v15859_v3, %v15858_v34  ;;  %v7447_v31 = vpop.f32.mrb[39].mxu0  ;;  %v16747_v34 = vld [vmem:[%s21794_s10 + $0x24] ss:$16 sps:$4 sm:$0xff]   ;;  %v16751_v3 = vld [vmem:[%s21794_s10 + $0x40] ss:$16 sps:$4 sm:$0xff]  }
0x13ca   :  { %15863 = vmatpush3.bf16.msra.mxu1 %v16717_v23  ;;  %v7459_v5 = vpack.c.bf16 %v7447_v31, %v7444_v57  ;;  %v16744_v23 = vld [vmem:[%s21794_s10 + $0x4] ss:$16 sps:$4 sm:$0xff]   ;;  %v16745_v57 = vld [vmem:[%s21794_s10 + $0x20] ss:$16 sps:$4 sm:$0xff]  }
0x13cb   :  { %15864 = vmatprep.subr.bf16.mxu1 %v16718_v20  ;;  %v16757_v31 = vld [vmem:[%s21794_s10 + $0x60] ss:$16 sps:$4 sm:$0xff]  }
0x13cc   :  { %15868 = vmatprep.mubr.msk.bf16.mxu1 %vm288_vm1, %v7459_v5  ;;  %v13577_v5 = vld [vmem:[%s21792_s8] ss:$0 sm:$0xff] }
0x13ce   :  { %15865 = vmatpush3.bf16.msra.mxu1 %v16718_v20  ;;  %v16753_v20 = vld [vmem:[%s21794_s10 + $0x44] ss:$16 sps:$4 sm:$0xff]  }
0x13cf   :  { %15866 = vmatprep.subr.bf16.mxu1 %v16719_v35 }
0x13d2   :  { %15867 = vmatpush3.bf16.msra.mxu1 %v16719_v35 }
0x13d3   :  { %15886 = vmatprep.subr.bf16.mxu1 %v16720_v16 }
0x13d5   :  { %15869 = vmatmul.mubr.msk.bf16.vlgmr.msra.gmra.mrb[28].mxu1 %vm288_vm1, %v7460_v45  ;;  %v16759_v45 = vld [vmem:[%s21794_s10 + $0x64] ss:$16 sps:$4 sm:$0xff]  }
0x13d6   :  { %15887 = vmatpush3.bf16.msra.mxu1 %v16720_v16 }
0x13d7   :  { %15888 = vmatprep.subr.bf16.mxu1 %v16721_v24 }
0x13da   :  { %15889 = vmatpush3.bf16.msra.mxu1 %v16721_v24  ;;  %v15884_v13 = vpop.f32.mrb[40].mxu0 }
0x13db   :  { %15890 = vmatprep.subr.bf16.mxu1 %v16722_v54  ;;  %v7608_v1 = vpop.f32.mrb[41].mxu0 }
0x13dc   :  { %v15885_v4 = vpop.f32.mrb[42].mxu0 }
0x13dd   :  { %v7624_v21 = vpack.c.bf16 %v15885_v4, %v15884_v13  ;;  %v7611_v0 = vpop.f32.mrb[43].mxu0 }
0x13de   :  { %15891 = vmatpush3.bf16.msra.mxu1 %v16722_v54  ;;  %v7623_v10 = vpack.c.bf16 %v7611_v0, %v7608_v1 }
0x13df   :  { %15892 = vmatprep.subr.bf16.mxu1 %v16723_v38 }
0x13e0   :  { %15894 = vmatprep.mubr.msk.bf16.mxu1 %vm288_vm1, %v7623_v10 }
0x13e2   :  { %15893 = vmatpush3.bf16.msra.mxu1 %v16723_v38 }
0x13e3   :  { %15912 = vmatprep.subr.bf16.mxu1 %v16724_v37 }
0x13e5   :  { %15895 = vmatmul.mubr.msk.bf16.vlgmr.msra.gmra.mrb[28].mxu1 %vm288_vm1, %v7624_v21 }
0x13e6   :  { %15913 = vmatpush3.bf16.msra.mxu1 %v16724_v37 }
0x13e7   :  { %15914 = vmatprep.subr.bf16.mxu1 %v16725_v48 }
0x13ea   :  { %15915 = vmatpush3.bf16.msra.mxu1 %v16725_v48 }
0x13eb   :  { %15916 = vmatprep.subr.bf16.mxu1 %v16726_v12 }
0x13ee   :  { %v15910_v33 = vpop.f32.mrb[44].mxu0  ;;  %15917 = vmatpush3.bf16.msra.mxu1 %v16726_v12 }
0x13ef   :  { %v7772_v49 = vpop.f32.mrb[45].mxu0  ;;  %15918 = vmatprep.subr.bf16.mxu1 %v16727_v25 }
0x13f0   :  { %v15911_v14 = vpop.f32.mrb[46].mxu0 }
0x13f1   :  { %v7788_v29 = vpack.c.bf16 %v15911_v14, %v15910_v33  ;;  %v7775_v44 = vpop.f32.mrb[47].mxu0  ;;  %v16750_v33 = vld [vmem:[%s21794_s10 + $0x84] ss:$16 sps:$4 sm:$0xff]  }
0x13f2   :  { %v7787_v60 = vpack.c.bf16 %v7775_v44, %v7772_v49  ;;  %15919 = vmatpush3.bf16.msra.mxu1 %v16727_v25  ;;  %v8390_v25 = vld [vmem:[%s21793_s9] sm:$0x1]  ;;  %v13579_v49 = vld [vmem:[%s21793_s9 + $0x1] sm:$0x1]  ;;  %v16756_v14 = vld [vmem:[%s21794_s10 + $0xa4] ss:$16 sps:$4 sm:$0xff]  }
0x13f3   :  { %15938 = vmatprep.subr.bf16.mxu1 %v16728_v63  ;;  %v16762_v44 = vld [vmem:[%s21794_s10 + $0xc4] ss:$16 sps:$4 sm:$0xff]  }
0x13f4   :  { %15920 = vmatprep.mubr.msk.bf16.mxu1 %vm288_vm1, %v7787_v60  ;;  %v16760_v60 = vld [vmem:[%s21794_s10 + $0xc0] ss:$16 sps:$4 sm:$0xff]  }
0x13f5   :  { %15921 = vmatmul.mubr.msk.bf16.vlgmr.msra.gmra.mrb[28].mxu1 %vm288_vm1, %v7788_v29  ;;  %v16754_v29 = vld [vmem:[%s21794_s10 + $0xa0] ss:$16 sps:$4 sm:$0xff]  }
0x13f6   :  { %15939 = vmatpush3.bf16.msra.mxu1 %v16728_v63  ;;  %v16748_v63 = vld [vmem:[%s21794_s10 + $0x80] ss:$16 sps:$4 sm:$0xff]  }
0x13f7   :  { %15940 = vmatprep.subr.bf16.mxu1 %v16729_v6 }
0x13fa   :  { %15941 = vmatpush3.bf16.msra.mxu1 %v16729_v6  ;;  %v16763_v6 = vld [vmem:[%s21794_s10 + $0xe0] ss:$16 sps:$4 sm:$0xff]  }
0x13fb   :  { %15942 = vmatprep.subr.bf16.mxu1 %v16730_v15 }
0x13fe   :  { %15943 = vmatpush3.bf16.msra.mxu1 %v16730_v15  ;;  %v16765_v15 = vld [vmem:[%s21794_s10 + $0xe4] ss:$16 sps:$4 sm:$0xff]  }
0x13ff   :  { %15944 = vmatprep.subr.bf16.mxu1 %v16731_v2 }
0x1402   :  { %v15936_v9 = vpop.f32.mrb[48].mxu0  ;;  %15945 = vmatpush3.bf16.msra.mxu1 %v16731_v2  ;;  %v16768_v2 = vld [vmem:[%s21794_s10 + $0x8c] ss:$16 sps:$4 sm:$0xff]  }
0x1403   :  { %v7936_v41 = vpop.f32.mrb[49].mxu0  ;;  %15964 = vmatprep.subr.bf16.mxu1 %v16732_v32 }
0x1404   :  { %v15937_v51 = vpop.f32.mrb[50].mxu0 }
0x1405   :  { %v7952_v22 = vpack.c.bf16 %v15937_v51, %v15936_v9  ;;  %v7939_v7 = vpop.f32.mrb[51].mxu0 }
0x1406   :  { %v7951_v52 = vpack.c.bf16 %v7939_v7, %v7936_v41  ;;  %v16792_v7 = vld [vmem:[%s21794_s10 + $0x104] ss:$16 sps:$4 sm:$0xff]  }
0x1408   :  { %15946 = vmatprep.mubr.msk.bf16.mxu1 %vm288_vm1, %v7951_v52 }
0x1409   :  { %15947 = vmatmul.mubr.msk.bf16.vlgmr.msra.gmra.mrb[28].mxu1 %vm288_vm1, %v7952_v22 }
0x140a   :  { %15965 = vmatpush3.bf16.msra.mxu1 %v16732_v32 }
0x140b   :  { %15966 = vmatprep.subr.bf16.mxu1 %v16733_v19 }
0x140e   :  { %15967 = vmatpush3.bf16.msra.mxu1 %v16733_v19  ;;  %v16766_v19 = vld [vmem:[%s21794_s10 + $0x88] ss:$16 sps:$4 sm:$0xff]  }
0x140f   :  { %15968 = vmatprep.subr.bf16.mxu1 %v16734_v42 }
0x1412   :  { %15969 = vmatpush3.bf16.msra.mxu1 %v16734_v42  ;;  %v13633_v42 = vld [vmem:[%s21793_s9 + $0x2] sm:$0x1] }
0x1413   :  { %15970 = vmatprep.subr.bf16.mxu1 %v16735_v27 }
0x1416   :  { %15971 = vmatpush3.bf16.msra.mxu1 %v16735_v27  ;;  %v15962_v55 = vpop.f32.mrb[52].mxu0 }
0x1417   :  { %15976 = vmatprep.subr.bf16.mxu1 %v20335_v11  ;;  %v8100_v53 = vpop.f32.mrb[53].mxu0 }
0x1418   :  { %v15963_v39 = vpop.f32.mrb[54].mxu0 }
0x1419   :  { %v8116_v18 = vpack.c.bf16 %v15963_v39, %v15962_v55  ;;  %v8103_v62 = vpop.f32.mrb[55].mxu0  ;;  %v16771_v55 = vld [vmem:[%s21794_s10 + $0xac] ss:$16 sps:$4 sm:$0xff]  }
0x141a   :  { %v8115_v56 = vpack.c.bf16 %v8103_v62, %v8100_v53  ;;  %v16790_v53 = vld [vmem:[%s21794_s10 + $0x100] ss:$16 sps:$4 sm:$0xff]  }
0x141c   :  { %15972 = vmatprep.mubr.msk.bf16.mxu1 %vm288_vm1, %v8115_v56 }
0x141d   :  { %15973 = vmatmul.mubr.msk.bf16.vlgmr.msra.gmra.mrb[28].mxu1 %vm288_vm1, %v8116_v18  ;;  %v16798_v18 = vld [vmem:[%s21794_s10 + $0x124] ss:$16 sps:$4 sm:$0xff]  }
0x141e   :  { %15977 = vmatpush3.bf16.msra.mxu1 %v20335_v11  ;;  %15986 = vmatprep.mubr.msk.bf16.mxu1 %vm6916_vm5, %v16736_v28  ;;  %v16738_v11 = vld [vmem:[%s21791_s7 + $0x100] sm:$0xff]   ;;  %v16769_v28 = vld [vmem:[%s21794_s10 + $0xa8] ss:$16 sps:$4 sm:$0xff]  }
0x141f   :  { %15978 = vmatprep.subr.bf16.mxu1 %v20341_v58 }
0x1422   :  { %15979 = vmatpush3.bf16.msra.mxu1 %v20341_v58  ;;  %v16739_v58 = vld [vmem:[%s21791_s7 + $0x108] sm:$0xff]  }
0x1423   :  { %15980 = vmatprep.subr.bf16.mxu1 %v20347_v17 }
0x1426   :  { %15981 = vmatpush3.bf16.msra.mxu1 %v20347_v17  ;;  %v16740_v17 = vld [vmem:[%s21791_s7 + $0x110] sm:$0xff]  }
0x1427   :  { %15982 = vmatprep.subr.bf16.mxu1 %v20353_v8 }
0x142a   :  { %15983 = vmatpush3.bf16.msra.mxu1 %v20353_v8  ;;  %v16741_v8 = vld [vmem:[%s21791_s7 + $0x118] sm:$0xff]  }
0x142b   :  { %16170 = vmatprep.subr.msk.bf16.mxu1 %vm6923_vm6, %v20358_v50 }
0x142e   :  { %15985 = vmatpush3.bf16.msra.mxu1 %v20364_v36 }
0x142f   :  { %15990 = vmatprep.subr.bf16.mxu1 %v16738_v11 }
0x1431   :  { %15987 = vmatmul.mubr.msk.bf16.vlgmr.msra.gmra.mrb[32].mxu1 %vm6916_vm5, %v16737_v40  ;;  %v16796_v40 = vld [vmem:[%s21794_s10 + $0x120] ss:$16 sps:$4 sm:$0xff]  }
0x1432   :  { %15991 = vmatpush3.bf16.msra.mxu1 %v16738_v11  ;;  %v16774_v11 = vld [vmem:[%s21794_s10 + $0xcc] ss:$16 sps:$4 sm:$0xff]  }
0x1433   :  { %15992 = vmatprep.subr.bf16.mxu1 %v16739_v58 }
0x1436   :  { %15993 = vmatpush3.bf16.msra.mxu1 %v16739_v58  ;;  %v16804_v58 = vld [vmem:[%s21794_s10 + $0x144] ss:$16 sps:$4 sm:$0xff]  }
0x1437   :  { %15994 = vmatprep.subr.bf16.mxu1 %v16740_v17 }
0x143a   :  { %15995 = vmatpush3.bf16.msra.mxu1 %v16740_v17  ;;  %v16772_v17 = vld [vmem:[%s21794_s10 + $0xc8] ss:$16 sps:$4 sm:$0xff]  }
0x143b   :  { %15996 = vmatprep.subr.bf16.mxu1 %v16741_v8 }
0x143e   :  { %15997 = vmatpush3.bf16.msra.mxu1 %v16741_v8  ;;  %v16777_v8 = vld [vmem:[%s21794_s10 + $0xec] ss:$16 sps:$4 sm:$0xff]  }
0x143f   :  { %8762 = vmatprep.subr.bf16.mxu1 %v16744_v23  ;;  %v16784_v23 = vld [vmem:[%s21794_s10 + $0x48] ss:$16 sps:$4 sm:$0xff]  }
0x1504   :  { %v15988_v50 = vpop.f32.mrb[32].mxu1 }
0x1505   :  { %v8264_v36 = vpop.f32.mrb[33].mxu1 }
0x1506   :  { %v15989_v47 = vpop.f32.mrb[34].mxu1 }
0x1507   :  { %v8280_v26 = vpack.c.bf16 %v15989_v47, %v15988_v50  ;;  %v8267_v43 = vpop.f32.mrb[35].mxu1  ;;  %v16802_v50 = vld [vmem:[%s21794_s10 + $0x140] ss:$16 sps:$4 sm:$0xff]   ;;  %v16780_v47 = vld [vmem:[%s21794_s10 + $0xc] ss:$16 sps:$4 sm:$0xff]  }
0x1508   :  { %v8279_v61 = vpack.c.bf16 %v8267_v43, %v8264_v36  ;;  %v16775_v36 = vld [vmem:[%s21794_s10 + $0xe8] ss:$16 sps:$4 sm:$0xff]   ;;  %v16783_v43 = vld [vmem:[%s21794_s10 + $0x2c] ss:$16 sps:$4 sm:$0xff]  }
0x150a   :  { %15998 = vmatprep.mubr.msk.bf16.mxu1 %vm288_vm1, %v8279_v61  ;;  %v16781_v61 = vld [vmem:[%s21794_s10 + $0x28] ss:$16 sps:$4 sm:$0xff]  }
0x150b   :  { %15999 = vmatmul.mubr.msk.bf16.vlgmr.msra.gmra.mrb[28].mxu1 %vm288_vm1, %v8280_v26  ;;  %v16778_v26 = vld [vmem:[%s21794_s10 + $0x8] ss:$16 sps:$4 sm:$0xff]  }
0x150c   :  { %8794 = vmatprep.mubr.bf16.mxu1 %v21807_v59  ;;  %8763 = vmatpush1.bf16.msra.mxu1 %v16742_v46  ;;  %v16786_v46 = vld [vmem:[%s21794_s10 + $0x4c] ss:$16 sps:$4 sm:$0xff]  }
0x150d   :  { %8764 = vmatprep.subr.bf16.mxu1 %v16747_v34  ;;  %v16789_v34 = vld [vmem:[%s21794_s10 + $0x6c] ss:$16 sps:$4 sm:$0xff]  }
0x1510   :  { %8765 = vmatpush1.bf16.msra.mxu1 %v16745_v57  ;;  %v16787_v57 = vld [vmem:[%s21794_s10 + $0x68] ss:$16 sps:$4 sm:$0xff]  }
0x1511   :  { %8766 = vmatprep.subr.bf16.mxu1 %v16753_v20  ;;  %v16795_v20 = vld [vmem:[%s21794_s10 + $0x10c] ss:$16 sps:$4 sm:$0xff]  }
0x1514   :  { %8767 = vmatpush1.bf16.msra.mxu1 %v16751_v3  ;;  %v16793_v3 = vld [vmem:[%s21794_s10 + $0x108] ss:$16 sps:$4 sm:$0xff]  }
0x1515   :  { %8768 = vmatprep.subr.bf16.mxu1 %v16759_v45  ;;  %v16801_v45 = vld [vmem:[%s21794_s10 + $0x12c] ss:$16 sps:$4 sm:$0xff]  }
0x1518   :  { %8769 = vmatpush1.bf16.msra.mxu1 %v16757_v31  ;;  %v16799_v31 = vld [vmem:[%s21794_s10 + $0x128] ss:$16 sps:$4 sm:$0xff]  }
0x1519   :  { %16018 = vmatprep.subr.bf16.mxu1 %v21806_v30 }
0x15de   :  { %v16000_v35 = vpop.f32.mrb[28].mxu1 }
0x15df   :  { %v8382_v16 = vadd.f32 %v16000_v35, %v13577_v5  ;;  %v8354_v24 = vpop.f32.mrb[29].mxu1  ;;  %v16807_v35 = vld [vmem:[%s21794_s10 + $0x14c] ss:$16 sps:$4 sm:$0xff]  }
0x15e0   :  { %v8380_v54 = vadd.f32 %v13577_v5, %v8354_v24  ;;  %v16001_v13 = vpop.f32.mrb[30].mxu1  ;;  %v16810_v24 = vld [vmem:[%s21794_s10 + $0x164] ss:$16 sps:$4 sm:$0xff]  }
0x15e1   :  { %v8383_v1 = vadd.f32 %v16001_v13, %v13577_v5  ;;  %v8357_v38 = vpop.f32.mrb[31].mxu1  ;;  %v8386_v21 = vmax.f32 %v8382_v16, 0.0  ;;  %v16808_v16 = vld [vmem:[%s21794_s10 + $0x160] ss:$16 sps:$4 sm:$0xff]   ;;  %v16813_v13 = vld [vmem:[%s21794_s10 + $0x16c] ss:$16 sps:$4 sm:$0xff]  }
0x15e2   :  { %v8381_v4 = vadd.f32 %v13577_v5, %v8357_v38  ;;  %v8384_v10 = vmax.f32 %v8380_v54, 0.0  ;;  %v16805_v5 = vld [vmem:[%s21794_s10 + $0x148] ss:$16 sps:$4 sm:$0xff]  }
0x15e3   :  { %v8387_v0 = vmax.f32 %v8383_v1, 0.0  ;;  %v16811_v54 = vld [vmem:[%s21794_s10 + $0x168] ss:$16 sps:$4 sm:$0xff]   ;;  %v16816_v1 = vld [vmem:[%s21794_s10 + $0x184] ss:$16 sps:$4 sm:$0xff]  }
0x15e4   :  { %v8385_v37 = vmax.f32 %v8381_v4, 0.0 }
0x15e5   :  { %v20681_v48 = vpack.c.bf16 %v8387_v0, %v8386_v21 }
0x15e6   :  { %v20683_v12 = vpack.c.bf16 %v8385_v37, %v8384_v10 }
0x15e8   :  { %16003 = vmatpush3.bf16.msra.mxu0 %v20683_v12 }
0x15e9   :  { %16004 = vmatprep.subr.bf16.mxu0 %v21806_v30 }
0x15ec   :  { %16005 = vmatpush3.bf16.msra.mxu0 %v20681_v48 }
0x15ed   :  { %16010 = vmatprep.subr.bf16.mxu0 %v21806_v30 }
0x15ef   :  { %16007 = vmatmul.mubr.msk.bf16.vlgmr.msra.gmra.mrb[56].mxu0 %vm1295_vm4, %v8390_v25 }
0x15f0   :  { %16011 = vmatpush3.bf16.msra.mxu0 %v20683_v12  ;;  %16014 = vmatprep.mubr.msk.bf16.mxu0 %vm17183_vm0, %v21806_v30 }
0x15f1   :  { %16012 = vmatprep.subr.bf16.mxu0 %v21806_v30 }
0x15f4   :  { %16013 = vmatpush3.bf16.msra.mxu0 %v20681_v48 }
0x15f5   :  { %8597 = vmatprep.subr.bf16.mxu0 %v16750_v33 }
0x15f7   :  { %16015 = vmatmul.mubr.msk.bf16.vlgmr.msra.gmra.mrb[60].mxu0 %vm1295_vm4, %v13579_v49 }
0x15f8   :  { %8598 = vmatpush1.bf16.msra.mxu0 %v16748_v63  ;;  %8629 = vmatprep.mubr.bf16.mxu0 %v21807_v59 }
0x15f9   :  { %8599 = vmatprep.subr.bf16.mxu0 %v16756_v14  ;;  %v16814_v14 = vld [vmem:[%s21794_s10 + $0x180] ss:$16 sps:$4 sm:$0xff]  }
0x15fc   :  { %8600 = vmatpush1.bf16.msra.mxu0 %v16754_v29 }
0x15fd   :  { %8601 = vmatprep.subr.bf16.mxu0 %v16762_v44 }
0x1600   :  { %8602 = vmatpush1.bf16.msra.mxu0 %v16760_v60 }
0x1601   :  { %8603 = vmatprep.subr.bf16.mxu0 %v16765_v15 }
0x1604   :  { %8604 = vmatpush1.bf16.msra.mxu0 %v16763_v6  ;;  %v16822_v6 = vld [vmem:[%s21794_s10 + $0x1a4] ss:$16 sps:$4 sm:$0xff]  }
0x1605   :  { %8638 = vmatprep.subr.bf16.mxu0 %v16768_v2 }
0x16c2   :  { %v8428_v32 = vpop.f32.mrb[56].mxu0 }
0x16c3   :  { %v20730_v9 = vpack.c.bf16 %v8428_v32, %v8428_v32  ;;  %v16008_v41 = vpop.f32.mrb[57].mxu0  ;;  %v16819_v32 = vld [vmem:[%s21794_s10 + $0x18c] ss:$16 sps:$4 sm:$0xff]  }
0x16c4   :  { %v8431_v51 = vpop.f32.mrb[58].mxu0  ;;  %v13669_v41 = vld [vmem:[%s21793_s9 + $0x3] sm:$0x1] }
0x16c5   :  { %13631 = vmatmul.mubr.msk.bf16.vlgmr.msra.gmra.mrb[36].mxu1 %vm288_vm1, %v20730_v9  ;;  %v16009_v22 = vpop.f32.mrb[59].mxu0  ;;  %v16817_v51 = vld [vmem:[%s21794_s10 + $0x188] ss:$16 sps:$4 sm:$0xff]  }
0x16c6   :  { %16019 = vmatpush3.bf16.msra.mxu1 %v20683_v12  ;;  %16022 = vmatprep.mubr.msk.bf16.mxu1 %vm17183_vm0, %v21806_v30  ;;  %v16825_v22 = vld [vmem:[%s21794_s10 + $0x1ac] ss:$16 sps:$4 sm:$0xff]  }
0x16c7   :  { %16020 = vmatprep.subr.bf16.mxu1 %v21806_v30 }
0x16ca   :  { %16021 = vmatpush3.bf16.msra.mxu1 %v20681_v48  ;;  %v8490_v52 = vpop.f32.mrb[60].mxu0 }
0x16cb   :  { %v8496_v27 = vpack.c.bf16 %v8490_v52, %v8490_v52  ;;  %8990 = vmatprep.subr.bf16.mxu1 %v16792_v7  ;;  %v16016_v39 = vpop.f32.mrb[61].mxu0  ;;  %v16823_v7 = vld [vmem:[%s21794_s10 + $0x1a8] ss:$16 sps:$4 sm:$0xff]  }
0x16cc   :  { %v8493_v62 = vpop.f32.mrb[62].mxu0 }
0x16cd   :  { %13613 = vmatmul.mubr.msk.bf16.vlgmr.msra.gmra.mrb[64].mxu0 %vm288_vm1, %v8496_v27  ;;  %16023 = vmatmul.mubr.msk.bf16.vlgmr.msra.gmra.mrb[40].mxu1 %vm1295_vm4, %v13633_v42  ;;  %v16017_v56 = vpop.f32.mrb[63].mxu0 }
0x16ce   :  { %8639 = vmatpush1.bf16.msra.mxu0 %v16766_v19  ;;  %8670 = vmatprep.mubr.bf16.mxu0 %v21807_v59 }
0x16cf   :  { %8640 = vmatprep.subr.bf16.mxu0 %v16771_v55  ;;  %8991 = vmatpush1.bf16.msra.mxu1 %v16790_v53 }
0x16d0   :  { %8992 = vmatprep.subr.bf16.mxu1 %v16798_v18  ;;  %9022 = vmatprep.mubr.bf16.mxu1 %v21807_v59 }
0x16d2   :  { %8641 = vmatpush1.bf16.msra.mxu0 %v16769_v28  ;;  %v16828_v28 = vld [vmem:[%s21794_s10 + $0x1c4] ss:$16 sps:$4 sm:$0xff]  }
0x16d3   :  { %8642 = vmatprep.subr.bf16.mxu0 %v16774_v11  ;;  %8993 = vmatpush1.bf16.msra.mxu1 %v16796_v40  ;;  %v16826_v11 = vld [vmem:[%s21794_s10 + $0x1c0] ss:$16 sps:$4 sm:$0xff]   ;;  %v16829_v40 = vld [vmem:[%s21794_s10 + $0x1c8] ss:$16 sps:$4 sm:$0xff]  }
0x16d4   :  { %8994 = vmatprep.subr.bf16.mxu1 %v16804_v58  ;;  %v16831_v58 = vld [vmem:[%s21794_s10 + $0x1cc] ss:$16 sps:$4 sm:$0xff]  }
0x16d6   :  { %8643 = vmatpush1.bf16.msra.mxu0 %v16772_v17  ;;  %v16834_v17 = vld [vmem:[%s21794_s10 + $0x1e4] ss:$16 sps:$4 sm:$0xff]  }
0x16d7   :  { %8644 = vmatprep.subr.bf16.mxu0 %v16777_v8  ;;  %8995 = vmatpush1.bf16.msra.mxu1 %v16802_v50  ;;  %v16832_v8 = vld [vmem:[%s21794_s10 + $0x1e0] ss:$16 sps:$4 sm:$0xff]   ;;  %v16837_v50 = vld [vmem:[%s21794_s10 + $0x1ec] ss:$16 sps:$4 sm:$0xff]  }
0x16d8   :  { %8996 = vmatprep.subr.bf16.mxu1 %v16810_v24 }
0x16da   :  { %8645 = vmatpush1.bf16.msra.mxu0 %v16775_v36  ;;  %v16835_v36 = vld [vmem:[%s21794_s10 + $0x1e8] ss:$16 sps:$4 sm:$0xff]  }
0x16db   :  { %8803 = vmatprep.subr.bf16.mxu0 %v16780_v47  ;;  %8997 = vmatpush1.bf16.msra.mxu1 %v16808_v16  ;;  %v16840_v47 = vld [vmem:[%s21794_s10 + $0x204] ss:$16 sps:$4 sm:$0xff]  }
0x16dc   :  { %16026 = vmatprep.subr.bf16.mxu1 %v21806_v30 }
0x16dd   :  { %13614 = vmatmul.mubr.msk.bf16.vlgmr.msra.gmra.mrb[68].mxu0 %vm288_vm1, %v8496_v27 }
0x16de   :  { %8804 = vmatpush1.bf16.msra.mxu0 %v16778_v26  ;;  %8835 = vmatprep.mubr.bf16.mxu0 %v21807_v59 }
0x16df   :  { %8805 = vmatprep.subr.bf16.mxu0 %v16783_v43 }
0x16e2   :  { %8806 = vmatpush1.bf16.msra.mxu0 %v16781_v61 }
0x16e3   :  { %8807 = vmatprep.subr.bf16.mxu0 %v16786_v46 }
0x16e6   :  { %8808 = vmatpush1.bf16.msra.mxu0 %v16784_v23 }
0x16e7   :  { %8809 = vmatprep.subr.bf16.mxu0 %v16789_v34 }
0x16ea   :  { %8810 = vmatpush1.bf16.msra.mxu0 %v16787_v57 }
0x16eb   :  { %9031 = vmatprep.subr.bf16.mxu0 %v16795_v20 }
0x16ed   :  { %13632 = vmatmul.mubr.msk.bf16.vlgmr.msra.gmra.mrb[72].mxu0 %vm288_vm1, %v20730_v9  ;;  %v16820_v9 = vld [vmem:[%s21794_s10 + $0x1a0] ss:$16 sps:$4 sm:$0xff]  }
0x16ee   :  { %9032 = vmatpush1.bf16.msra.mxu0 %v16793_v3  ;;  %9063 = vmatprep.mubr.bf16.mxu0 %v21807_v59 }
0x16ef   :  { %9033 = vmatprep.subr.bf16.mxu0 %v16801_v45 }
0x16f2   :  { %9034 = vmatpush1.bf16.msra.mxu0 %v16799_v31 }
0x16f3   :  { %9035 = vmatprep.subr.bf16.mxu0 %v16807_v35 }
0x16f6   :  { %9036 = vmatpush1.bf16.msra.mxu0 %v16805_v5 }
0x16f7   :  { %9037 = vmatprep.subr.bf16.mxu0 %v16813_v13 }
0x16fa   :  { %9038 = vmatpush1.bf16.msra.mxu0 %v16811_v54  ;;  %v16838_v54 = vld [vmem:[%s21794_s10 + $0x200] ss:$16 sps:$4 sm:$0xff]  }
0x16fb   :  { %9222 = vmatprep.subr.bf16.mxu0 %v16816_v1  ;;  %v16846_v1 = vld [vmem:[%s21794_s10 + $0x224] ss:$16 sps:$4 sm:$0xff]  }
0x1798   :  { %v8796_v38 = vpop.f32.mrb[36].mxu1 }
0x1799   :  { %v8798_v4 = vpop.f32.mrb[37].mxu1 }
0x179a   :  { %v8800_v21 = vpop.f32.mrb[38].mxu1 }
0x179b   :  { %v8801_v0 = vpop.f32.mrb[39].mxu1  ;;  %v16844_v21 = vld [vmem:[%s21794_s10 + $0x220] ss:$16 sps:$4 sm:$0xff]  }
0x179c   :  { %v13705_v0 = vld [vmem:[%s21793_s9 + $0x4] sm:$0x1] }
0x17a0   :  { %v8631_v10 = vpop.f32.mrb[64].mxu0  ;;  %v8883_v37 = vpop.f32.mrb[40].mxu1 }
0x17a1   :  { %v20848_v25 = vadd.f32 %v8796_v38, %v8631_v10  ;;  %v8889_v33 = vpack.c.bf16 %v8883_v37, %v8883_v37  ;;  %v8633_v49 = vpop.f32.mrb[65].mxu0  ;;  %v16024_v63 = vpop.f32.mrb[41].mxu1  ;;  %v16841_v10 = vld [vmem:[%s21794_s10 + $0x208] ss:$16 sps:$4 sm:$0xff]   ;;  %v16849_v37 = vld [vmem:[%s21794_s10 + $0x22c] ss:$16 sps:$4 sm:$0xff]  }
0x17a2   :  { %v20853_v29 = vadd.f32 %v8798_v4, %v8633_v49  ;;  %v8886_v44 = vpop.f32.mrb[42].mxu1  ;;  %v8635_v60 = vpop.f32.mrb[66].mxu0  ;;  %v16843_v4 = vld [vmem:[%s21794_s10 + $0x20c] ss:$16 sps:$4 sm:$0xff]   ;;  %v16850_v49 = vld [vmem:[%s21794_s10 + $0x240] ss:$16 sps:$4 sm:$0xff]  }
0x17a3   :  { %13667 = vmatmul.mubr.msk.bf16.vlgmr.msra.gmra.mrb[44].mxu1 %vm288_vm1, %v8889_v33  ;;  %13668 = vmatmul.mubr.msk.bf16.vlgmr.msra.gmra.mrb[76].mxu0 %vm288_vm1, %v8889_v33  ;;  %v16025_v15 = vpop.f32.mrb[43].mxu1  ;;  %v8636_v2 = vpop.f32.mrb[67].mxu0  ;;  %v16852_v33 = vld [vmem:[%s21794_s10 + $0x244] ss:$16 sps:$4 sm:$0xff]   ;;  %v16853_v63 = vld [vmem:[%s21794_s10 + $0x248] ss:$16 sps:$4 sm:$0xff]  }
0x17a4   :  { %16027 = vmatpush3.bf16.msra.mxu1 %v20683_v12  ;;  %16030 = vmatprep.mubr.msk.bf16.mxu1 %vm17183_vm0, %v21806_v30  ;;  %v16856_v44 = vld [vmem:[%s21794_s10 + $0x260] ss:$16 sps:$4 sm:$0xff]   ;;  %v16861_v60 = vld [vmem:[%s21794_s10 + $0x26c] ss:$16 sps:$4 sm:$0xff]   ;;  %v16864_v15 = vld [vmem:[%s21794_s10 + $0x284] ss:$16 sps:$4 sm:$0xff]  }
0x17a5   :  { %16028 = vmatprep.subr.bf16.mxu1 %v21806_v30  ;;  %9223 = vmatpush1.bf16.msra.mxu0 %v16814_v14  ;;  %v16855_v14 = vld [vmem:[%s21794_s10 + $0x24c] ss:$16 sps:$4 sm:$0xff]  }
0x17a6   :  { %9224 = vmatprep.subr.bf16.mxu0 %v16822_v6  ;;  %9254 = vmatprep.mubr.bf16.mxu0 %v21807_v59  ;;  %v16859_v6 = vld [vmem:[%s21794_s10 + $0x268] ss:$16 sps:$4 sm:$0xff]  }
0x17a8   :  { %16029 = vmatpush3.bf16.msra.mxu1 %v20681_v48 }
0x17a9   :  { %9263 = vmatprep.subr.bf16.mxu1 %v16819_v32  ;;  %9225 = vmatpush1.bf16.msra.mxu0 %v16820_v9 }
0x17aa   :  { %9226 = vmatprep.subr.bf16.mxu0 %v16828_v28  ;;  %v16870_v28 = vld [vmem:[%s21794_s10 + $0x2a4] ss:$16 sps:$4 sm:$0xff]  }
0x17ab   :  { %16031 = vmatmul.mubr.msk.bf16.vlgmr.msra.gmra.mrb[48].mxu1 %vm1295_vm4, %v13669_v41 }
0x17ac   :  { %9264 = vmatpush1.bf16.msra.mxu1 %v16817_v51  ;;  %9295 = vmatprep.mubr.bf16.mxu1 %v21807_v59 }
0x17ad   :  { %9265 = vmatprep.subr.bf16.mxu1 %v16825_v22  ;;  %9227 = vmatpush1.bf16.msra.mxu0 %v16826_v11 }
0x17ae   :  { %9228 = vmatprep.subr.bf16.mxu0 %v16834_v17  ;;  %v13741_v17 = vld [vmem:[%s21793_s9 + $0x5] sm:$0x1] }
0x17b0   :  { %v8672_v52 = vpop.f32.mrb[68].mxu0  ;;  %9266 = vmatpush1.bf16.msra.mxu1 %v16823_v7 }
0x17b1   :  { %v8674_v19 = vpop.f32.mrb[69].mxu0  ;;  %9267 = vmatprep.subr.bf16.mxu1 %v16831_v58  ;;  %9229 = vmatpush1.bf16.msra.mxu0 %v16832_v8  ;;  %v16868_v58 = vld [vmem:[%s21794_s10 + $0x2a0] ss:$16 sps:$4 sm:$0xff]   ;;  %v16865_v8 = vld [vmem:[%s21794_s10 + $0x288] ss:$16 sps:$4 sm:$0xff]  }
0x17b2   :  { %v8676_v42 = vpop.f32.mrb[70].mxu0  ;;  %16034 = vmatprep.subr.bf16.mxu0 %v21806_v30 }
0x17b3   :  { %v8677_v27 = vpop.f32.mrb[71].mxu0 }
0x17b4   :  { %9268 = vmatpush1.bf16.msra.mxu1 %v16829_v40  ;;  %v16867_v40 = vld [vmem:[%s21794_s10 + $0x28c] ss:$16 sps:$4 sm:$0xff]  }
0x17b5   :  { %9269 = vmatprep.subr.bf16.mxu1 %v16837_v50  ;;  %v16873_v50 = vld [vmem:[%s21794_s10 + $0x2ac] ss:$16 sps:$4 sm:$0xff]  }
0x17b8   :  { %9270 = vmatpush1.bf16.msra.mxu1 %v16835_v36  ;;  %v16871_v36 = vld [vmem:[%s21794_s10 + $0x2a8] ss:$16 sps:$4 sm:$0xff]  }
0x17b9   :  { %9454 = vmatprep.subr.bf16.mxu1 %v16840_v47  ;;  %v16876_v47 = vld [vmem:[%s21794_s10 + $0x2c4] ss:$16 sps:$4 sm:$0xff]  }
0x17c0   :  { %v8837_v55 = vpop.f32.mrb[72].mxu0 }
0x17c1   :  { %v8838_v53 = vadd.f32 %v8837_v55, %v8672_v52  ;;  %v8839_v39 = vpop.f32.mrb[73].mxu0 }
0x17c2   :  { %v8840_v18 = vadd.f32 %v8839_v39, %v8674_v19  ;;  %v8841_v62 = vpop.f32.mrb[74].mxu0 }
0x17c3   :  { %v8842_v56 = vpop.f32.mrb[75].mxu0  ;;  %v16862_v62 = vld [vmem:[%s21794_s10 + $0x280] ss:$16 sps:$4 sm:$0xff]  }
0x1876   :  { %v9024_v26 = vpop.f32.mrb[44].mxu1  ;;  %v9065_v43 = vpop.f32.mrb[76].mxu0 }
0x1877   :  { %v9072_v61 = vadd.f32 %v9024_v26, %v20848_v25  ;;  %v9074_v46 = vadd.f32 %v9065_v43, %v8838_v53  ;;  %v9026_v23 = vpop.f32.mrb[45].mxu1  ;;  %v9067_v34 = vpop.f32.mrb[77].mxu0  ;;  %v16847_v25 = vld [vmem:[%s21794_s10 + $0x228] ss:$16 sps:$4 sm:$0xff]   ;;  %v16874_v26 = vld [vmem:[%s21794_s10 + $0x2c0] ss:$16 sps:$4 sm:$0xff]  }
0x1878   :  { %v9073_v57 = vadd.f32 %v9026_v23, %v20853_v29  ;;  %v9075_v20 = vadd.f32 %v9067_v34, %v8840_v18  ;;  %v9028_v3 = vpop.f32.mrb[46].mxu1  ;;  %v9069_v45 = vpop.f32.mrb[78].mxu0  ;;  %v16858_v29 = vld [vmem:[%s21794_s10 + $0x264] ss:$16 sps:$4 sm:$0xff]   ;;  %v16877_v43 = vld [vmem:[%s21794_s10 + $0x2c8] ss:$16 sps:$4 sm:$0xff]  }
0x1879   :  { %v9029_v31 = vpop.f32.mrb[47].mxu1  ;;  %v9070_v5 = vpop.f32.mrb[79].mxu0  ;;  %v16880_v23 = vld [vmem:[%s21794_s10 + $0x2e0] ss:$16 sps:$4 sm:$0xff]   ;;  %v16885_v34 = vld [vmem:[%s21794_s10 + $0x2ec] ss:$16 sps:$4 sm:$0xff]  }
0x187e   :  { %v9115_v35 = vpop.f32.mrb[48].mxu1 }
0x187f   :  { %v9121_v16 = vpack.c.bf16 %v9115_v35, %v9115_v35  ;;  %v16032_v24 = vpop.f32.mrb[49].mxu1 }
0x1880   :  { %v9118_v13 = vpop.f32.mrb[50].mxu1 }
0x1881   :  { %13703 = vmatmul.mubr.msk.bf16.vlgmr.msra.gmra.mrb[80].mxu0 %vm288_vm1, %v9121_v16  ;;  %13704 = vmatmul.mubr.msk.bf16.vlgmr.msra.gmra.mrb[52].mxu1 %vm288_vm1, %v9121_v16  ;;  %v16033_v38 = vpop.f32.mrb[51].mxu1 }
0x1882   :  { %16035 = vmatpush3.bf16.msra.mxu0 %v20683_v12  ;;  %16038 = vmatprep.mubr.msk.bf16.mxu0 %vm17183_vm0, %v21806_v30 }
0x1883   :  { %16036 = vmatprep.subr.bf16.mxu0 %v21806_v30  ;;  %9455 = vmatpush1.bf16.msra.mxu1 %v16838_v54 }
0x1884   :  { %9456 = vmatprep.subr.bf16.mxu1 %v16846_v1  ;;  %9486 = vmatprep.mubr.bf16.mxu1 %v21807_v59 }
0x1886   :  { %16037 = vmatpush3.bf16.msra.mxu0 %v20681_v48 }
0x1887   :  { %9495 = vmatprep.subr.bf16.mxu0 %v16843_v4  ;;  %9457 = vmatpush1.bf16.msra.mxu1 %v16844_v21 }
0x1888   :  { %9458 = vmatprep.subr.bf16.mxu1 %v16852_v33  ;;  %v16894_v33 = vld [vmem:[%s21794_s10 + $0x324] ss:$16 sps:$4 sm:$0xff]  }
0x1889   :  { %16039 = vmatmul.mubr.msk.bf16.vlgmr.msra.gmra.mrb[84].mxu0 %vm1295_vm4, %v13705_v0 }
0x188a   :  { %9496 = vmatpush1.bf16.msra.mxu0 %v16841_v10  ;;  %9527 = vmatprep.mubr.bf16.mxu0 %v21807_v59 }
0x188b   :  { %9497 = vmatprep.subr.bf16.mxu0 %v16849_v37  ;;  %9459 = vmatpush1.bf16.msra.mxu1 %v16850_v49  ;;  %v16886_v37 = vld [vmem:[%s21794_s10 + $0x300] ss:$16 sps:$4 sm:$0xff]  }
0x188c   :  { %9460 = vmatprep.subr.bf16.mxu1 %v16858_v29  ;;  %v13777_v29 = vld [vmem:[%s21793_s9 + $0x6] sm:$0x1] }
0x188e   :  { %9498 = vmatpush1.bf16.msra.mxu0 %v16847_v25 }
0x188f   :  { %9499 = vmatprep.subr.bf16.mxu0 %v16855_v14  ;;  %9461 = vmatpush1.bf16.msra.mxu1 %v16856_v44  ;;  %v16892_v14 = vld [vmem:[%s21794_s10 + $0x320] ss:$16 sps:$4 sm:$0xff]   ;;  %v16889_v44 = vld [vmem:[%s21794_s10 + $0x308] ss:$16 sps:$4 sm:$0xff]  }
0x1890   :  { %16042 = vmatprep.subr.bf16.mxu1 %v21806_v30 }
0x1892   :  { %9500 = vmatpush1.bf16.msra.mxu0 %v16853_v63  ;;  %v16891_v63 = vld [vmem:[%s21794_s10 + $0x30c] ss:$16 sps:$4 sm:$0xff]  }
0x1893   :  { %9501 = vmatprep.subr.bf16.mxu0 %v16861_v60  ;;  %v16897_v60 = vld [vmem:[%s21794_s10 + $0x32c] ss:$16 sps:$4 sm:$0xff]  }
0x1896   :  { %9502 = vmatpush1.bf16.msra.mxu0 %v16859_v6  ;;  %v16895_v6 = vld [vmem:[%s21794_s10 + $0x328] ss:$16 sps:$4 sm:$0xff]  }
0x1897   :  { %9686 = vmatprep.subr.bf16.mxu0 %v16864_v15  ;;  %v16900_v15 = vld [vmem:[%s21794_s10 + $0x344] ss:$16 sps:$4 sm:$0xff]  }
0x1954   :  { %v9256_v2 = vpop.f32.mrb[80].mxu0  ;;  %v9297_v32 = vpop.f32.mrb[52].mxu1 }
0x1955   :  { %v9304_v9 = vadd.f32 %v9256_v2, %v9072_v61  ;;  %v9306_v41 = vadd.f32 %v9297_v32, %v9074_v46  ;;  %v9258_v51 = vpop.f32.mrb[81].mxu0  ;;  %v9299_v22 = vpop.f32.mrb[53].mxu1  ;;  %v16879_v61 = vld [vmem:[%s21794_s10 + $0x2cc] ss:$16 sps:$4 sm:$0xff]   ;;  %v16882_v46 = vld [vmem:[%s21794_s10 + $0x2e4] ss:$16 sps:$4 sm:$0xff]  }
0x1956   :  { %v9305_v7 = vadd.f32 %v9258_v51, %v9073_v57  ;;  %v9307_v52 = vadd.f32 %v9299_v22, %v9075_v20  ;;  %v9260_v19 = vpop.f32.mrb[82].mxu0  ;;  %v9301_v42 = vpop.f32.mrb[54].mxu1  ;;  %v16883_v57 = vld [vmem:[%s21794_s10 + $0x2e8] ss:$16 sps:$4 sm:$0xff]   ;;  %v16888_v20 = vld [vmem:[%s21794_s10 + $0x304] ss:$16 sps:$4 sm:$0xff]  }
0x1957   :  { %v9261_v27 = vpop.f32.mrb[83].mxu0  ;;  %v9302_v55 = vpop.f32.mrb[55].mxu1  ;;  %v16898_v2 = vld [vmem:[%s21794_s10 + $0x340] ss:$16 sps:$4 sm:$0xff]   ;;  %v16901_v32 = vld [vmem:[%s21794_s10 + $0x348] ss:$16 sps:$4 sm:$0xff]  }
0x1958   :  { %v16904_v51 = vld [vmem:[%s21794_s10 + $0x360] ss:$16 sps:$4 sm:$0xff]   ;;  %v16909_v22 = vld [vmem:[%s21794_s10 + $0x36c] ss:$16 sps:$4 sm:$0xff]  }
0x195c   :  { %v9347_v53 = vpop.f32.mrb[84].mxu0 }
0x195d   :  { %v9353_v39 = vpack.c.bf16 %v9347_v53, %v9347_v53  ;;  %v16040_v18 = vpop.f32.mrb[85].mxu0 }
0x195e   :  { %v9350_v56 = vpop.f32.mrb[86].mxu0 }
0x195f   :  { %13739 = vmatmul.mubr.msk.bf16.vlgmr.msra.gmra.mrb[56].mxu1 %vm288_vm1, %v9353_v39  ;;  %13740 = vmatmul.mubr.msk.bf16.vlgmr.msra.gmra.mrb[88].mxu0 %vm288_vm1, %v9353_v39  ;;  %v16041_v11 = vpop.f32.mrb[87].mxu0 }
0x1960   :  { %16043 = vmatpush3.bf16.msra.mxu1 %v20683_v12  ;;  %16046 = vmatprep.mubr.msk.bf16.mxu1 %vm17183_vm0, %v21806_v30 }
0x1961   :  { %16044 = vmatprep.subr.bf16.mxu1 %v21806_v30  ;;  %9687 = vmatpush1.bf16.msra.mxu0 %v16862_v62 }
0x1962   :  { %9688 = vmatprep.subr.bf16.mxu0 %v16870_v28  ;;  %9718 = vmatprep.mubr.bf16.mxu0 %v21807_v59 }
0x1964   :  { %16045 = vmatpush3.bf16.msra.mxu1 %v20681_v48 }
0x1965   :  { %9727 = vmatprep.subr.bf16.mxu1 %v16867_v40  ;;  %9689 = vmatpush1.bf16.msra.mxu0 %v16868_v58 }
0x1966   :  { %9690 = vmatprep.subr.bf16.mxu0 %v16876_v47  ;;  %v16918_v47 = vld [vmem:[%s21794_s10 + $0x3a4] ss:$16 sps:$4 sm:$0xff]  }
0x1967   :  { %16047 = vmatmul.mubr.msk.bf16.vlgmr.msra.gmra.mrb[60].mxu1 %vm1295_vm4, %v13741_v17 }
0x1968   :  { %9728 = vmatpush1.bf16.msra.mxu1 %v16865_v8  ;;  %9759 = vmatprep.mubr.bf16.mxu1 %v21807_v59 }
0x1969   :  { %9729 = vmatprep.subr.bf16.mxu1 %v16873_v50  ;;  %9691 = vmatpush1.bf16.msra.mxu0 %v16874_v26  ;;  %v16910_v50 = vld [vmem:[%s21794_s10 + $0x380] ss:$16 sps:$4 sm:$0xff]  }
0x196a   :  { %9692 = vmatprep.subr.bf16.mxu0 %v16882_v46  ;;  %v13813_v46 = vld [vmem:[%s21793_s9 + $0x7] sm:$0x1] }
0x196c   :  { %9730 = vmatpush1.bf16.msra.mxu1 %v16871_v36 }
0x196d   :  { %9731 = vmatprep.subr.bf16.mxu1 %v16879_v61  ;;  %9693 = vmatpush1.bf16.msra.mxu0 %v16880_v23  ;;  %v16916_v61 = vld [vmem:[%s21794_s10 + $0x3a0] ss:$16 sps:$4 sm:$0xff]   ;;  %v16913_v23 = vld [vmem:[%s21794_s10 + $0x388] ss:$16 sps:$4 sm:$0xff]  }
0x196e   :  { %16050 = vmatprep.subr.bf16.mxu0 %v21806_v30 }
0x1970   :  { %9732 = vmatpush1.bf16.msra.mxu1 %v16877_v43  ;;  %v16915_v43 = vld [vmem:[%s21794_s10 + $0x38c] ss:$16 sps:$4 sm:$0xff]  }
0x1971   :  { %9733 = vmatprep.subr.bf16.mxu1 %v16885_v34  ;;  %v16921_v34 = vld [vmem:[%s21794_s10 + $0x3ac] ss:$16 sps:$4 sm:$0xff]  }
0x1974   :  { %9734 = vmatpush1.bf16.msra.mxu1 %v16883_v57  ;;  %v16919_v57 = vld [vmem:[%s21794_s10 + $0x3a8] ss:$16 sps:$4 sm:$0xff]  }
0x1975   :  { %9918 = vmatprep.subr.bf16.mxu1 %v16888_v20  ;;  %v16924_v20 = vld [vmem:[%s21794_s10 + $0x3c4] ss:$16 sps:$4 sm:$0xff]  }
0x1a32   :  { %v9488_v3 = vpop.f32.mrb[56].mxu1  ;;  %v9529_v45 = vpop.f32.mrb[88].mxu0 }
0x1a33   :  { %v9536_v31 = vadd.f32 %v9488_v3, %v9304_v9  ;;  %v9538_v5 = vadd.f32 %v9529_v45, %v9306_v41  ;;  %v9490_v35 = vpop.f32.mrb[57].mxu1  ;;  %v9531_v16 = vpop.f32.mrb[89].mxu0  ;;  %v16903_v9 = vld [vmem:[%s21794_s10 + $0x34c] ss:$16 sps:$4 sm:$0xff]   ;;  %v16906_v41 = vld [vmem:[%s21794_s10 + $0x364] ss:$16 sps:$4 sm:$0xff]  }
0x1a34   :  { %v9537_v24 = vadd.f32 %v9490_v35, %v9305_v7  ;;  %v9539_v54 = vadd.f32 %v9531_v16, %v9307_v52  ;;  %v9492_v13 = vpop.f32.mrb[58].mxu1  ;;  %v9533_v1 = vpop.f32.mrb[90].mxu0  ;;  %v16907_v7 = vld [vmem:[%s21794_s10 + $0x368] ss:$16 sps:$4 sm:$0xff]   ;;  %v16912_v52 = vld [vmem:[%s21794_s10 + $0x384] ss:$16 sps:$4 sm:$0xff]  }
0x1a35   :  { %v9493_v38 = vpop.f32.mrb[59].mxu1  ;;  %v9534_v4 = vpop.f32.mrb[91].mxu0  ;;  %v16922_v3 = vld [vmem:[%s21794_s10 + $0x3c0] ss:$16 sps:$4 sm:$0xff]   ;;  %v16925_v45 = vld [vmem:[%s21794_s10 + $0x3c8] ss:$16 sps:$4 sm:$0xff]  }
0x1a36   :  { %v16928_v35 = vld [vmem:[%s21794_s10 + $0x3e0] ss:$16 sps:$4 sm:$0xff]   ;;  %v16933_v16 = vld [vmem:[%s21794_s10 + $0x3ec] ss:$16 sps:$4 sm:$0xff]  }
0x1a3a   :  { %v9579_v21 = vpop.f32.mrb[60].mxu1 }
0x1a3b   :  { %v9585_v0 = vpack.c.bf16 %v9579_v21, %v9579_v21  ;;  %v16048_v10 = vpop.f32.mrb[61].mxu1 }
0x1a3c   :  { %v9582_v25 = vpop.f32.mrb[62].mxu1 }
0x1a3d   :  { %13775 = vmatmul.mubr.msk.bf16.vlgmr.msra.gmra.mrb[92].mxu0 %vm288_vm1, %v9585_v0  ;;  %13776 = vmatmul.mubr.msk.bf16.vlgmr.msra.gmra.mrb[64].mxu1 %vm288_vm1, %v9585_v0  ;;  %v16049_v49 = vpop.f32.mrb[63].mxu1 }
0x1a3e   :  { %16051 = vmatpush3.bf16.msra.mxu0 %v20683_v12  ;;  %16054 = vmatprep.mubr.msk.bf16.mxu0 %vm17183_vm0, %v21806_v30 }
0x1a3f   :  { %16052 = vmatprep.subr.bf16.mxu0 %v21806_v30  ;;  %9919 = vmatpush1.bf16.msra.mxu1 %v16886_v37 }
0x1a40   :  { %9920 = vmatprep.subr.bf16.mxu1 %v16894_v33  ;;  %9950 = vmatprep.mubr.bf16.mxu1 %v21807_v59 }
0x1a42   :  { %16053 = vmatpush3.bf16.msra.mxu0 %v20681_v48 }
0x1a43   :  { %9959 = vmatprep.subr.bf16.mxu0 %v16891_v63  ;;  %9921 = vmatpush1.bf16.msra.mxu1 %v16892_v14 }
0x1a44   :  { %9922 = vmatprep.subr.bf16.mxu1 %v16900_v15  ;;  %v16942_v15 = vld [vmem:[%s21794_s10 + $0x424] ss:$16 sps:$4 sm:$0xff]  }
0x1a45   :  { %16055 = vmatmul.mubr.msk.bf16.vlgmr.msra.gmra.mrb[96].mxu0 %vm1295_vm4, %v13777_v29 }
0x1a46   :  { %9960 = vmatpush1.bf16.msra.mxu0 %v16889_v44  ;;  %9991 = vmatprep.mubr.bf16.mxu0 %v21807_v59 }
0x1a47   :  { %9961 = vmatprep.subr.bf16.mxu0 %v16897_v60  ;;  %9923 = vmatpush1.bf16.msra.mxu1 %v16898_v2  ;;  %v16934_v60 = vld [vmem:[%s21794_s10 + $0x400] ss:$16 sps:$4 sm:$0xff]  }
0x1a48   :  { %9924 = vmatprep.subr.bf16.mxu1 %v16906_v41  ;;  %v13849_v41 = vld [vmem:[%s21793_s9 + $0x8] sm:$0x1] }
0x1a4a   :  { %9962 = vmatpush1.bf16.msra.mxu0 %v16895_v6 }
0x1a4b   :  { %9963 = vmatprep.subr.bf16.mxu0 %v16903_v9  ;;  %9925 = vmatpush1.bf16.msra.mxu1 %v16904_v51  ;;  %v16940_v9 = vld [vmem:[%s21794_s10 + $0x420] ss:$16 sps:$4 sm:$0xff]   ;;  %v16937_v51 = vld [vmem:[%s21794_s10 + $0x408] ss:$16 sps:$4 sm:$0xff]  }
0x1a4c   :  { %16058 = vmatprep.subr.bf16.mxu1 %v21806_v30 }
0x1a4e   :  { %9964 = vmatpush1.bf16.msra.mxu0 %v16901_v32  ;;  %v16939_v32 = vld [vmem:[%s21794_s10 + $0x40c] ss:$16 sps:$4 sm:$0xff]  }
0x1a4f   :  { %9965 = vmatprep.subr.bf16.mxu0 %v16909_v22  ;;  %v16945_v22 = vld [vmem:[%s21794_s10 + $0x42c] ss:$16 sps:$4 sm:$0xff]  }
0x1a52   :  { %9966 = vmatpush1.bf16.msra.mxu0 %v16907_v7  ;;  %v16943_v7 = vld [vmem:[%s21794_s10 + $0x428] ss:$16 sps:$4 sm:$0xff]  }
0x1a53   :  { %10150 = vmatprep.subr.bf16.mxu0 %v16912_v52  ;;  %v16948_v52 = vld [vmem:[%s21794_s10 + $0x444] ss:$16 sps:$4 sm:$0xff]  }
0x1b10   :  { %v9720_v19 = vpop.f32.mrb[92].mxu0  ;;  %v9761_v42 = vpop.f32.mrb[64].mxu1 }
0x1b11   :  { %v9768_v27 = vadd.f32 %v9720_v19, %v9536_v31  ;;  %v9770_v55 = vadd.f32 %v9761_v42, %v9538_v5  ;;  %v9722_v53 = vpop.f32.mrb[93].mxu0  ;;  %v9763_v39 = vpop.f32.mrb[65].mxu1  ;;  %v16927_v31 = vld [vmem:[%s21794_s10 + $0x3cc] ss:$16 sps:$4 sm:$0xff]   ;;  %v16930_v5 = vld [vmem:[%s21794_s10 + $0x3e4] ss:$16 sps:$4 sm:$0xff]  }
0x1b12   :  { %v9769_v18 = vadd.f32 %v9722_v53, %v9537_v24  ;;  %v9771_v62 = vadd.f32 %v9763_v39, %v9539_v54  ;;  %v9724_v56 = vpop.f32.mrb[94].mxu0  ;;  %v9765_v28 = vpop.f32.mrb[66].mxu1  ;;  %v16931_v24 = vld [vmem:[%s21794_s10 + $0x3e8] ss:$16 sps:$4 sm:$0xff]   ;;  %v16936_v54 = vld [vmem:[%s21794_s10 + $0x404] ss:$16 sps:$4 sm:$0xff]  }
0x1b13   :  { %v9725_v11 = vpop.f32.mrb[95].mxu0  ;;  %v9766_v40 = vpop.f32.mrb[67].mxu1  ;;  %v16946_v19 = vld [vmem:[%s21794_s10 + $0x440] ss:$16 sps:$4 sm:$0xff]   ;;  %v16949_v42 = vld [vmem:[%s21794_s10 + $0x448] ss:$16 sps:$4 sm:$0xff]  }
0x1b14   :  { %v16952_v53 = vld [vmem:[%s21794_s10 + $0x460] ss:$16 sps:$4 sm:$0xff]   ;;  %v16957_v39 = vld [vmem:[%s21794_s10 + $0x46c] ss:$16 sps:$4 sm:$0xff]  }
0x1b18   :  { %v9811_v58 = vpop.f32.mrb[96].mxu0 }
0x1b19   :  { %v9817_v17 = vpack.c.bf16 %v9811_v58, %v9811_v58  ;;  %v16056_v8 = vpop.f32.mrb[97].mxu0 }
0x1b1a   :  { %v9814_v36 = vpop.f32.mrb[98].mxu0 }
0x1b1b   :  { %13811 = vmatmul.mubr.msk.bf16.vlgmr.msra.gmra.mrb[68].mxu1 %vm288_vm1, %v9817_v17  ;;  %13812 = vmatmul.mubr.msk.bf16.vlgmr.msra.gmra.mrb[100].mxu0 %vm288_vm1, %v9817_v17  ;;  %v16057_v26 = vpop.f32.mrb[99].mxu0 }
0x1b1c   :  { %16059 = vmatpush3.bf16.msra.mxu1 %v20683_v12  ;;  %16062 = vmatprep.mubr.msk.bf16.mxu1 %vm17183_vm0, %v21806_v30 }
0x1b1d   :  { %16060 = vmatprep.subr.bf16.mxu1 %v21806_v30  ;;  %10151 = vmatpush1.bf16.msra.mxu0 %v16910_v50 }
0x1b1e   :  { %10152 = vmatprep.subr.bf16.mxu0 %v16918_v47  ;;  %10182 = vmatprep.mubr.bf16.mxu0 %v21807_v59 }
0x1b20   :  { %16061 = vmatpush3.bf16.msra.mxu1 %v20681_v48 }
0x1b21   :  { %10191 = vmatprep.subr.bf16.mxu1 %v16915_v43  ;;  %10153 = vmatpush1.bf16.msra.mxu0 %v16916_v61 }
0x1b22   :  { %10154 = vmatprep.subr.bf16.mxu0 %v16924_v20  ;;  %v16966_v20 = vld [vmem:[%s21794_s10 + $0x4a4] ss:$16 sps:$4 sm:$0xff]  }
0x1b23   :  { %16063 = vmatmul.mubr.msk.bf16.vlgmr.msra.gmra.mrb[72].mxu1 %vm1295_vm4, %v13813_v46 }
0x1b24   :  { %10192 = vmatpush1.bf16.msra.mxu1 %v16913_v23  ;;  %10223 = vmatprep.mubr.bf16.mxu1 %v21807_v59 }
0x1b25   :  { %10193 = vmatprep.subr.bf16.mxu1 %v16921_v34  ;;  %10155 = vmatpush1.bf16.msra.mxu0 %v16922_v3  ;;  %v16958_v34 = vld [vmem:[%s21794_s10 + $0x480] ss:$16 sps:$4 sm:$0xff]  }
0x1b26   :  { %10156 = vmatprep.subr.bf16.mxu0 %v16930_v5  ;;  %v13885_v5 = vld [vmem:[%s21793_s9 + $0x9] sm:$0x1] }
0x1b28   :  { %10194 = vmatpush1.bf16.msra.mxu1 %v16919_v57 }
0x1b29   :  { %10195 = vmatprep.subr.bf16.mxu1 %v16927_v31  ;;  %10157 = vmatpush1.bf16.msra.mxu0 %v16928_v35  ;;  %v16964_v31 = vld [vmem:[%s21794_s10 + $0x4a0] ss:$16 sps:$4 sm:$0xff]   ;;  %v16961_v35 = vld [vmem:[%s21794_s10 + $0x488] ss:$16 sps:$4 sm:$0xff]  }
0x1b2a   :  { %16066 = vmatprep.subr.bf16.mxu0 %v21806_v30 }
0x1b2c   :  { %10196 = vmatpush1.bf16.msra.mxu1 %v16925_v45  ;;  %v16963_v45 = vld [vmem:[%s21794_s10 + $0x48c] ss:$16 sps:$4 sm:$0xff]  }
0x1b2d   :  { %10197 = vmatprep.subr.bf16.mxu1 %v16933_v16  ;;  %v16969_v16 = vld [vmem:[%s21794_s10 + $0x4ac] ss:$16 sps:$4 sm:$0xff]  }
0x1b30   :  { %10198 = vmatpush1.bf16.msra.mxu1 %v16931_v24  ;;  %v16967_v24 = vld [vmem:[%s21794_s10 + $0x4a8] ss:$16 sps:$4 sm:$0xff]  }
0x1b31   :  { %10382 = vmatprep.subr.bf16.mxu1 %v16936_v54  ;;  %v16972_v54 = vld [vmem:[%s21794_s10 + $0x4c4] ss:$16 sps:$4 sm:$0xff]  }
0x1bee   :  { %v9952_v13 = vpop.f32.mrb[68].mxu1  ;;  %v9993_v1 = vpop.f32.mrb[100].mxu0 }
0x1bef   :  { %v10000_v38 = vadd.f32 %v9952_v13, %v9768_v27  ;;  %v10002_v4 = vadd.f32 %v9993_v1, %v9770_v55  ;;  %v9954_v21 = vpop.f32.mrb[69].mxu1  ;;  %v9995_v0 = vpop.f32.mrb[101].mxu0  ;;  %v16951_v27 = vld [vmem:[%s21794_s10 + $0x44c] ss:$16 sps:$4 sm:$0xff]   ;;  %v16954_v55 = vld [vmem:[%s21794_s10 + $0x464] ss:$16 sps:$4 sm:$0xff]  }
0x1bf0   :  { %v10001_v10 = vadd.f32 %v9954_v21, %v9769_v18  ;;  %v10003_v37 = vadd.f32 %v9995_v0, %v9771_v62  ;;  %v9956_v25 = vpop.f32.mrb[70].mxu1  ;;  %v9997_v33 = vpop.f32.mrb[102].mxu0  ;;  %v16955_v18 = vld [vmem:[%s21794_s10 + $0x468] ss:$16 sps:$4 sm:$0xff]   ;;  %v16960_v62 = vld [vmem:[%s21794_s10 + $0x484] ss:$16 sps:$4 sm:$0xff]  }
0x1bf1   :  { %v9957_v49 = vpop.f32.mrb[71].mxu1  ;;  %v9998_v63 = vpop.f32.mrb[103].mxu0  ;;  %v16970_v13 = vld [vmem:[%s21794_s10 + $0x4c0] ss:$16 sps:$4 sm:$0xff]   ;;  %v16973_v1 = vld [vmem:[%s21794_s10 + $0x4c8] ss:$16 sps:$4 sm:$0xff]  }
0x1bf2   :  { %v16976_v21 = vld [vmem:[%s21794_s10 + $0x4e0] ss:$16 sps:$4 sm:$0xff]   ;;  %v16981_v0 = vld [vmem:[%s21794_s10 + $0x4ec] ss:$16 sps:$4 sm:$0xff]  }
0x1bf6   :  { %v10043_v14 = vpop.f32.mrb[72].mxu1 }
0x1bf7   :  { %v10049_v29 = vpack.c.bf16 %v10043_v14, %v10043_v14  ;;  %v16064_v44 = vpop.f32.mrb[73].mxu1 }
0x1bf8   :  { %v10046_v6 = vpop.f32.mrb[74].mxu1 }
0x1bf9   :  { %13847 = vmatmul.mubr.msk.bf16.vlgmr.msra.gmra.mrb[104].mxu0 %vm288_vm1, %v10049_v29  ;;  %13848 = vmatmul.mubr.msk.bf16.vlgmr.msra.gmra.mrb[76].mxu1 %vm288_vm1, %v10049_v29  ;;  %v16065_v2 = vpop.f32.mrb[75].mxu1 }
0x1bfa   :  { %16067 = vmatpush3.bf16.msra.mxu0 %v20683_v12  ;;  %16070 = vmatprep.mubr.msk.bf16.mxu0 %vm17183_vm0, %v21806_v30 }
0x1bfb   :  { %16068 = vmatprep.subr.bf16.mxu0 %v21806_v30  ;;  %10383 = vmatpush1.bf16.msra.mxu1 %v16934_v60 }
0x1bfc   :  { %10384 = vmatprep.subr.bf16.mxu1 %v16942_v15  ;;  %10414 = vmatprep.mubr.bf16.mxu1 %v21807_v59 }
0x1bfe   :  { %16069 = vmatpush3.bf16.msra.mxu0 %v20681_v48 }
0x1bff   :  { %10423 = vmatprep.subr.bf16.mxu0 %v16939_v32  ;;  %10385 = vmatpush1.bf16.msra.mxu1 %v16940_v9 }
0x1c00   :  { %10386 = vmatprep.subr.bf16.mxu1 %v16948_v52  ;;  %v16990_v52 = vld [vmem:[%s21794_s10 + $0x524] ss:$16 sps:$4 sm:$0xff]  }
0x1c01   :  { %16071 = vmatmul.mubr.msk.bf16.vlgmr.msra.gmra.mrb[108].mxu0 %vm1295_vm4, %v13849_v41 }
0x1c02   :  { %10424 = vmatpush1.bf16.msra.mxu0 %v16937_v51  ;;  %10455 = vmatprep.mubr.bf16.mxu0 %v21807_v59 }
0x1c03   :  { %10425 = vmatprep.subr.bf16.mxu0 %v16945_v22  ;;  %10387 = vmatpush1.bf16.msra.mxu1 %v16946_v19  ;;  %v16982_v22 = vld [vmem:[%s21794_s10 + $0x500] ss:$16 sps:$4 sm:$0xff]  }
0x1c04   :  { %10388 = vmatprep.subr.bf16.mxu1 %v16954_v55  ;;  %v13921_v55 = vld [vmem:[%s21793_s9 + $0xa] sm:$0x1] }
0x1c06   :  { %10426 = vmatpush1.bf16.msra.mxu0 %v16943_v7 }
0x1c07   :  { %10427 = vmatprep.subr.bf16.mxu0 %v16951_v27  ;;  %10389 = vmatpush1.bf16.msra.mxu1 %v16952_v53  ;;  %v16988_v27 = vld [vmem:[%s21794_s10 + $0x520] ss:$16 sps:$4 sm:$0xff]   ;;  %v16985_v53 = vld [vmem:[%s21794_s10 + $0x508] ss:$16 sps:$4 sm:$0xff]  }
0x1c08   :  { %16074 = vmatprep.subr.bf16.mxu1 %v21806_v30 }
0x1c0a   :  { %10428 = vmatpush1.bf16.msra.mxu0 %v16949_v42  ;;  %v16987_v42 = vld [vmem:[%s21794_s10 + $0x50c] ss:$16 sps:$4 sm:$0xff]  }
0x1c0b   :  { %10429 = vmatprep.subr.bf16.mxu0 %v16957_v39  ;;  %v16993_v39 = vld [vmem:[%s21794_s10 + $0x52c] ss:$16 sps:$4 sm:$0xff]  }
0x1c0e   :  { %10430 = vmatpush1.bf16.msra.mxu0 %v16955_v18  ;;  %v16991_v18 = vld [vmem:[%s21794_s10 + $0x528] ss:$16 sps:$4 sm:$0xff]  }
0x1c0f   :  { %10614 = vmatprep.subr.bf16.mxu0 %v16960_v62  ;;  %v16996_v62 = vld [vmem:[%s21794_s10 + $0x544] ss:$16 sps:$4 sm:$0xff]  }
0x1ccc   :  { %v10184_v56 = vpop.f32.mrb[104].mxu0  ;;  %v10225_v28 = vpop.f32.mrb[76].mxu1 }
0x1ccd   :  { %v10232_v11 = vadd.f32 %v10184_v56, %v10000_v38  ;;  %v10234_v40 = vadd.f32 %v10225_v28, %v10002_v4  ;;  %v10186_v58 = vpop.f32.mrb[105].mxu0  ;;  %v10227_v17 = vpop.f32.mrb[77].mxu1  ;;  %v16975_v38 = vld [vmem:[%s21794_s10 + $0x4cc] ss:$16 sps:$4 sm:$0xff]   ;;  %v16978_v4 = vld [vmem:[%s21794_s10 + $0x4e4] ss:$16 sps:$4 sm:$0xff]  }
0x1cce   :  { %v10233_v8 = vadd.f32 %v10186_v58, %v10001_v10  ;;  %v10235_v50 = vadd.f32 %v10227_v17, %v10003_v37  ;;  %v10188_v36 = vpop.f32.mrb[106].mxu0  ;;  %v10229_v47 = vpop.f32.mrb[78].mxu1  ;;  %v16979_v10 = vld [vmem:[%s21794_s10 + $0x4e8] ss:$16 sps:$4 sm:$0xff]   ;;  %v16984_v37 = vld [vmem:[%s21794_s10 + $0x504] ss:$16 sps:$4 sm:$0xff]  }
0x1ccf   :  { %v10189_v26 = vpop.f32.mrb[107].mxu0  ;;  %v10230_v43 = vpop.f32.mrb[79].mxu1  ;;  %v16994_v56 = vld [vmem:[%s21794_s10 + $0x540] ss:$16 sps:$4 sm:$0xff]   ;;  %v16997_v28 = vld [vmem:[%s21794_s10 + $0x548] ss:$16 sps:$4 sm:$0xff]  }
0x1cd0   :  { %v17000_v58 = vld [vmem:[%s21794_s10 + $0x560] ss:$16 sps:$4 sm:$0xff]   ;;  %v17005_v17 = vld [vmem:[%s21794_s10 + $0x56c] ss:$16 sps:$4 sm:$0xff]  }
0x1cd4   :  { %v10275_v61 = vpop.f32.mrb[108].mxu0 }
0x1cd5   :  { %v10281_v46 = vpack.c.bf16 %v10275_v61, %v10275_v61  ;;  %v16072_v23 = vpop.f32.mrb[109].mxu0 }
0x1cd6   :  { %v10278_v57 = vpop.f32.mrb[110].mxu0 }
0x1cd7   :  { %13883 = vmatmul.mubr.msk.bf16.vlgmr.msra.gmra.mrb[80].mxu1 %vm288_vm1, %v10281_v46  ;;  %13884 = vmatmul.mubr.msk.bf16.vlgmr.msra.gmra.mrb[112].mxu0 %vm288_vm1, %v10281_v46  ;;  %v16073_v3 = vpop.f32.mrb[111].mxu0 }
0x1cd8   :  { %16075 = vmatpush3.bf16.msra.mxu1 %v20683_v12  ;;  %16078 = vmatprep.mubr.msk.bf16.mxu1 %vm17183_vm0, %v21806_v30 }
0x1cd9   :  { %16076 = vmatprep.subr.bf16.mxu1 %v21806_v30  ;;  %10615 = vmatpush1.bf16.msra.mxu0 %v16958_v34 }
0x1cda   :  { %10616 = vmatprep.subr.bf16.mxu0 %v16966_v20  ;;  %10646 = vmatprep.mubr.bf16.mxu0 %v21807_v59 }
0x1cdc   :  { %16077 = vmatpush3.bf16.msra.mxu1 %v20681_v48 }
0x1cdd   :  { %10655 = vmatprep.subr.bf16.mxu1 %v16963_v45  ;;  %10617 = vmatpush1.bf16.msra.mxu0 %v16964_v31 }
0x1cde   :  { %10618 = vmatprep.subr.bf16.mxu0 %v16972_v54  ;;  %v17014_v54 = vld [vmem:[%s21794_s10 + $0x5a4] ss:$16 sps:$4 sm:$0xff]  }
0x1cdf   :  { %16079 = vmatmul.mubr.msk.bf16.vlgmr.msra.gmra.mrb[84].mxu1 %vm1295_vm4, %v13885_v5 }
0x1ce0   :  { %10656 = vmatpush1.bf16.msra.mxu1 %v16961_v35  ;;  %10687 = vmatprep.mubr.bf16.mxu1 %v21807_v59 }
0x1ce1   :  { %10657 = vmatprep.subr.bf16.mxu1 %v16969_v16  ;;  %10619 = vmatpush1.bf16.msra.mxu0 %v16970_v13  ;;  %v17006_v16 = vld [vmem:[%s21794_s10 + $0x580] ss:$16 sps:$4 sm:$0xff]  }
0x1ce2   :  { %10620 = vmatprep.subr.bf16.mxu0 %v16978_v4  ;;  %v13957_v4 = vld [vmem:[%s21793_s9 + $0xb] sm:$0x1] }
0x1ce4   :  { %10658 = vmatpush1.bf16.msra.mxu1 %v16967_v24 }
0x1ce5   :  { %10659 = vmatprep.subr.bf16.mxu1 %v16975_v38  ;;  %10621 = vmatpush1.bf16.msra.mxu0 %v16976_v21  ;;  %v17012_v38 = vld [vmem:[%s21794_s10 + $0x5a0] ss:$16 sps:$4 sm:$0xff]   ;;  %v17009_v21 = vld [vmem:[%s21794_s10 + $0x588] ss:$16 sps:$4 sm:$0xff]  }
0x1ce6   :  { %16082 = vmatprep.subr.bf16.mxu0 %v21806_v30 }
0x1ce8   :  { %10660 = vmatpush1.bf16.msra.mxu1 %v16973_v1  ;;  %v17011_v1 = vld [vmem:[%s21794_s10 + $0x58c] ss:$16 sps:$4 sm:$0xff]  }
0x1ce9   :  { %10661 = vmatprep.subr.bf16.mxu1 %v16981_v0  ;;  %v17017_v0 = vld [vmem:[%s21794_s10 + $0x5ac] ss:$16 sps:$4 sm:$0xff]  }
0x1cec   :  { %10662 = vmatpush1.bf16.msra.mxu1 %v16979_v10  ;;  %v17015_v10 = vld [vmem:[%s21794_s10 + $0x5a8] ss:$16 sps:$4 sm:$0xff]  }
0x1ced   :  { %10846 = vmatprep.subr.bf16.mxu1 %v16984_v37  ;;  %v17020_v37 = vld [vmem:[%s21794_s10 + $0x5c4] ss:$16 sps:$4 sm:$0xff]  }
0x1daa   :  { %v10416_v25 = vpop.f32.mrb[80].mxu1  ;;  %v10457_v33 = vpop.f32.mrb[112].mxu0 }
0x1dab   :  { %v10464_v49 = vadd.f32 %v10416_v25, %v10232_v11  ;;  %v10466_v63 = vadd.f32 %v10457_v33, %v10234_v40  ;;  %v10418_v14 = vpop.f32.mrb[81].mxu1  ;;  %v10459_v29 = vpop.f32.mrb[113].mxu0  ;;  %v16999_v11 = vld [vmem:[%s21794_s10 + $0x54c] ss:$16 sps:$4 sm:$0xff]   ;;  %v17002_v40 = vld [vmem:[%s21794_s10 + $0x564] ss:$16 sps:$4 sm:$0xff]  }
0x1dac   :  { %v10465_v44 = vadd.f32 %v10418_v14, %v10233_v8  ;;  %v10467_v60 = vadd.f32 %v10459_v29, %v10235_v50  ;;  %v10420_v6 = vpop.f32.mrb[82].mxu1  ;;  %v10461_v15 = vpop.f32.mrb[114].mxu0  ;;  %v17003_v8 = vld [vmem:[%s21794_s10 + $0x568] ss:$16 sps:$4 sm:$0xff]   ;;  %v17008_v50 = vld [vmem:[%s21794_s10 + $0x584] ss:$16 sps:$4 sm:$0xff]  }
0x1dad   :  { %v10421_v2 = vpop.f32.mrb[83].mxu1  ;;  %v10462_v32 = vpop.f32.mrb[115].mxu0  ;;  %v17018_v25 = vld [vmem:[%s21794_s10 + $0x5c0] ss:$16 sps:$4 sm:$0xff]   ;;  %v17021_v33 = vld [vmem:[%s21794_s10 + $0x5c8] ss:$16 sps:$4 sm:$0xff]  }
0x1dae   :  { %v17024_v14 = vld [vmem:[%s21794_s10 + $0x5e0] ss:$16 sps:$4 sm:$0xff]   ;;  %v17029_v29 = vld [vmem:[%s21794_s10 + $0x5ec] ss:$16 sps:$4 sm:$0xff]  }
0x1db2   :  { %v10507_v9 = vpop.f32.mrb[84].mxu1 }
0x1db3   :  { %v10513_v41 = vpack.c.bf16 %v10507_v9, %v10507_v9  ;;  %v16080_v51 = vpop.f32.mrb[85].mxu1 }
0x1db4   :  { %v10510_v7 = vpop.f32.mrb[86].mxu1 }
0x1db5   :  { %13919 = vmatmul.mubr.msk.bf16.vlgmr.msra.gmra.mrb[116].mxu0 %vm288_vm1, %v10513_v41  ;;  %13920 = vmatmul.mubr.msk.bf16.vlgmr.msra.gmra.mrb[88].mxu1 %vm288_vm1, %v10513_v41  ;;  %v16081_v19 = vpop.f32.mrb[87].mxu1 }
0x1db6   :  { %16083 = vmatpush3.bf16.msra.mxu0 %v20683_v12  ;;  %16086 = vmatprep.mubr.msk.bf16.mxu0 %vm17183_vm0, %v21806_v30 }
0x1db7   :  { %16084 = vmatprep.subr.bf16.mxu0 %v21806_v30  ;;  %10847 = vmatpush1.bf16.msra.mxu1 %v16982_v22 }
0x1db8   :  { %10848 = vmatprep.subr.bf16.mxu1 %v16990_v52  ;;  %10878 = vmatprep.mubr.bf16.mxu1 %v21807_v59 }
0x1dba   :  { %16085 = vmatpush3.bf16.msra.mxu0 %v20681_v48 }
0x1dbb   :  { %10887 = vmatprep.subr.bf16.mxu0 %v16987_v42  ;;  %10849 = vmatpush1.bf16.msra.mxu1 %v16988_v27 }
0x1dbc   :  { %10850 = vmatprep.subr.bf16.mxu1 %v16996_v62  ;;  %v17038_v62 = vld [vmem:[%s21794_s10 + $0x624] ss:$16 sps:$4 sm:$0xff]  }
0x1dbd   :  { %16087 = vmatmul.mubr.msk.bf16.vlgmr.msra.gmra.mrb[120].mxu0 %vm1295_vm4, %v13921_v55 }
0x1dbe   :  { %10888 = vmatpush1.bf16.msra.mxu0 %v16985_v53  ;;  %10919 = vmatprep.mubr.bf16.mxu0 %v21807_v59 }
0x1dbf   :  { %10889 = vmatprep.subr.bf16.mxu0 %v16993_v39  ;;  %10851 = vmatpush1.bf16.msra.mxu1 %v16994_v56  ;;  %v17030_v39 = vld [vmem:[%s21794_s10 + $0x600] ss:$16 sps:$4 sm:$0xff]  }
0x1dc0   :  { %10852 = vmatprep.subr.bf16.mxu1 %v17002_v40  ;;  %v13993_v40 = vld [vmem:[%s21793_s9 + $0xc] sm:$0x1] }
0x1dc2   :  { %10890 = vmatpush1.bf16.msra.mxu0 %v16991_v18 }
0x1dc3   :  { %10891 = vmatprep.subr.bf16.mxu0 %v16999_v11  ;;  %10853 = vmatpush1.bf16.msra.mxu1 %v17000_v58  ;;  %v17036_v11 = vld [vmem:[%s21794_s10 + $0x620] ss:$16 sps:$4 sm:$0xff]   ;;  %v17033_v58 = vld [vmem:[%s21794_s10 + $0x608] ss:$16 sps:$4 sm:$0xff]  }
0x1dc4   :  { %16090 = vmatprep.subr.bf16.mxu1 %v21806_v30 }
0x1dc6   :  { %10892 = vmatpush1.bf16.msra.mxu0 %v16997_v28  ;;  %v17035_v28 = vld [vmem:[%s21794_s10 + $0x60c] ss:$16 sps:$4 sm:$0xff]  }
0x1dc7   :  { %10893 = vmatprep.subr.bf16.mxu0 %v17005_v17  ;;  %v17041_v17 = vld [vmem:[%s21794_s10 + $0x62c] ss:$16 sps:$4 sm:$0xff]  }
0x1dca   :  { %10894 = vmatpush1.bf16.msra.mxu0 %v17003_v8  ;;  %v17039_v8 = vld [vmem:[%s21794_s10 + $0x628] ss:$16 sps:$4 sm:$0xff]  }
0x1dcb   :  { %11078 = vmatprep.subr.bf16.mxu0 %v17008_v50  ;;  %v17044_v50 = vld [vmem:[%s21794_s10 + $0x644] ss:$16 sps:$4 sm:$0xff]  }
0x1e88   :  { %v10648_v36 = vpop.f32.mrb[116].mxu0  ;;  %v10689_v47 = vpop.f32.mrb[88].mxu1 }
0x1e89   :  { %v10696_v26 = vadd.f32 %v10648_v36, %v10464_v49  ;;  %v10698_v43 = vadd.f32 %v10689_v47, %v10466_v63  ;;  %v10650_v61 = vpop.f32.mrb[117].mxu0  ;;  %v10691_v46 = vpop.f32.mrb[89].mxu1  ;;  %v17023_v49 = vld [vmem:[%s21794_s10 + $0x5cc] ss:$16 sps:$4 sm:$0xff]   ;;  %v17026_v63 = vld [vmem:[%s21794_s10 + $0x5e4] ss:$16 sps:$4 sm:$0xff]  }
0x1e8a   :  { %v10697_v23 = vadd.f32 %v10650_v61, %v10465_v44  ;;  %v10699_v34 = vadd.f32 %v10691_v46, %v10467_v60  ;;  %v10652_v57 = vpop.f32.mrb[118].mxu0  ;;  %v10693_v20 = vpop.f32.mrb[90].mxu1  ;;  %v17027_v44 = vld [vmem:[%s21794_s10 + $0x5e8] ss:$16 sps:$4 sm:$0xff]   ;;  %v17032_v60 = vld [vmem:[%s21794_s10 + $0x604] ss:$16 sps:$4 sm:$0xff]  }
0x1e8b   :  { %v10653_v3 = vpop.f32.mrb[119].mxu0  ;;  %v10694_v45 = vpop.f32.mrb[91].mxu1  ;;  %v17042_v36 = vld [vmem:[%s21794_s10 + $0x640] ss:$16 sps:$4 sm:$0xff]   ;;  %v17045_v47 = vld [vmem:[%s21794_s10 + $0x648] ss:$16 sps:$4 sm:$0xff]  }
0x1e8c   :  { %v17048_v61 = vld [vmem:[%s21794_s10 + $0x660] ss:$16 sps:$4 sm:$0xff]   ;;  %v17053_v46 = vld [vmem:[%s21794_s10 + $0x66c] ss:$16 sps:$4 sm:$0xff]  }
0x1e90   :  { %v10739_v31 = vpop.f32.mrb[120].mxu0 }
0x1e91   :  { %v10745_v5 = vpack.c.bf16 %v10739_v31, %v10739_v31  ;;  %v16088_v35 = vpop.f32.mrb[121].mxu0 }
0x1e92   :  { %v10742_v24 = vpop.f32.mrb[122].mxu0 }
0x1e93   :  { %13955 = vmatmul.mubr.msk.bf16.vlgmr.msra.gmra.mrb[92].mxu1 %vm288_vm1, %v10745_v5  ;;  %13956 = vmatmul.mubr.msk.bf16.vlgmr.msra.gmra.mrb[124].mxu0 %vm288_vm1, %v10745_v5  ;;  %v16089_v13 = vpop.f32.mrb[123].mxu0 }
0x1e94   :  { %16091 = vmatpush3.bf16.msra.mxu1 %v20683_v12  ;;  %16094 = vmatprep.mubr.msk.bf16.mxu1 %vm17183_vm0, %v21806_v30 }
0x1e95   :  { %16092 = vmatprep.subr.bf16.mxu1 %v21806_v30  ;;  %11079 = vmatpush1.bf16.msra.mxu0 %v17006_v16 }
0x1e96   :  { %11080 = vmatprep.subr.bf16.mxu0 %v17014_v54  ;;  %11110 = vmatprep.mubr.bf16.mxu0 %v21807_v59 }
0x1e98   :  { %16093 = vmatpush3.bf16.msra.mxu1 %v20681_v48 }
0x1e99   :  { %11119 = vmatprep.subr.bf16.mxu1 %v17011_v1  ;;  %11081 = vmatpush1.bf16.msra.mxu0 %v17012_v38 }
0x1e9a   :  { %11082 = vmatprep.subr.bf16.mxu0 %v17020_v37  ;;  %v17062_v37 = vld [vmem:[%s21794_s10 + $0x6a4] ss:$16 sps:$4 sm:$0xff]  }
0x1e9b   :  { %16095 = vmatmul.mubr.msk.bf16.vlgmr.msra.gmra.mrb[96].mxu1 %vm1295_vm4, %v13957_v4 }
0x1e9c   :  { %11120 = vmatpush1.bf16.msra.mxu1 %v17009_v21  ;;  %11151 = vmatprep.mubr.bf16.mxu1 %v21807_v59 }
0x1e9d   :  { %11121 = vmatprep.subr.bf16.mxu1 %v17017_v0  ;;  %11083 = vmatpush1.bf16.msra.mxu0 %v17018_v25  ;;  %v17054_v0 = vld [vmem:[%s21794_s10 + $0x680] ss:$16 sps:$4 sm:$0xff]  }
0x1e9e   :  { %11084 = vmatprep.subr.bf16.mxu0 %v17026_v63  ;;  %v14029_v63 = vld [vmem:[%s21793_s9 + $0xd] sm:$0x1] }
0x1ea0   :  { %11122 = vmatpush1.bf16.msra.mxu1 %v17015_v10 }
0x1ea1   :  { %11123 = vmatprep.subr.bf16.mxu1 %v17023_v49  ;;  %11085 = vmatpush1.bf16.msra.mxu0 %v17024_v14  ;;  %v17060_v49 = vld [vmem:[%s21794_s10 + $0x6a0] ss:$16 sps:$4 sm:$0xff]   ;;  %v17057_v14 = vld [vmem:[%s21794_s10 + $0x688] ss:$16 sps:$4 sm:$0xff]  }
0x1ea2   :  { %16098 = vmatprep.subr.bf16.mxu0 %v21806_v30 }
0x1ea4   :  { %11124 = vmatpush1.bf16.msra.mxu1 %v17021_v33  ;;  %v17059_v33 = vld [vmem:[%s21794_s10 + $0x68c] ss:$16 sps:$4 sm:$0xff]  }
0x1ea5   :  { %11125 = vmatprep.subr.bf16.mxu1 %v17029_v29  ;;  %v17065_v29 = vld [vmem:[%s21794_s10 + $0x6ac] ss:$16 sps:$4 sm:$0xff]  }
0x1ea8   :  { %11126 = vmatpush1.bf16.msra.mxu1 %v17027_v44  ;;  %v17063_v44 = vld [vmem:[%s21794_s10 + $0x6a8] ss:$16 sps:$4 sm:$0xff]  }
0x1ea9   :  { %11310 = vmatprep.subr.bf16.mxu1 %v17032_v60  ;;  %v17068_v60 = vld [vmem:[%s21794_s10 + $0x6c4] ss:$16 sps:$4 sm:$0xff]  }
0x1f66   :  { %v10880_v6 = vpop.f32.mrb[92].mxu1  ;;  %v10921_v15 = vpop.f32.mrb[124].mxu0 }
0x1f67   :  { %v10928_v2 = vadd.f32 %v10880_v6, %v10696_v26  ;;  %v10930_v32 = vadd.f32 %v10921_v15, %v10698_v43  ;;  %v10882_v9 = vpop.f32.mrb[93].mxu1  ;;  %v10923_v41 = vpop.f32.mrb[125].mxu0  ;;  %v17047_v26 = vld [vmem:[%s21794_s10 + $0x64c] ss:$16 sps:$4 sm:$0xff]   ;;  %v17050_v43 = vld [vmem:[%s21794_s10 + $0x664] ss:$16 sps:$4 sm:$0xff]  }
0x1f68   :  { %v10929_v51 = vadd.f32 %v10882_v9, %v10697_v23  ;;  %v10931_v22 = vadd.f32 %v10923_v41, %v10699_v34  ;;  %v10884_v7 = vpop.f32.mrb[94].mxu1  ;;  %v10925_v52 = vpop.f32.mrb[126].mxu0  ;;  %v17051_v23 = vld [vmem:[%s21794_s10 + $0x668] ss:$16 sps:$4 sm:$0xff]   ;;  %v17056_v34 = vld [vmem:[%s21794_s10 + $0x684] ss:$16 sps:$4 sm:$0xff]  }
0x1f69   :  { %v10885_v19 = vpop.f32.mrb[95].mxu1  ;;  %v10926_v42 = vpop.f32.mrb[127].mxu0  ;;  %v17066_v6 = vld [vmem:[%s21794_s10 + $0x6c0] ss:$16 sps:$4 sm:$0xff]   ;;  %v17069_v15 = vld [vmem:[%s21794_s10 + $0x6c8] ss:$16 sps:$4 sm:$0xff]  }
0x1f6a   :  { %v17072_v9 = vld [vmem:[%s21794_s10 + $0x6e0] ss:$16 sps:$4 sm:$0xff]   ;;  %v17077_v41 = vld [vmem:[%s21794_s10 + $0x6ec] ss:$16 sps:$4 sm:$0xff]  }
0x1f6e   :  { %v10971_v27 = vpop.f32.mrb[96].mxu1 }
0x1f6f   :  { %v10977_v55 = vpack.c.bf16 %v10971_v27, %v10971_v27  ;;  %v16096_v53 = vpop.f32.mrb[97].mxu1 }
0x1f70   :  { %v10974_v18 = vpop.f32.mrb[98].mxu1 }
0x1f71   :  { %13991 = vmatmul.mubr.msk.bf16.vlgmr.msra.gmra.mrb[128].mxu0 %vm288_vm1, %v10977_v55  ;;  %13992 = vmatmul.mubr.msk.bf16.vlgmr.msra.gmra.mrb[100].mxu1 %vm288_vm1, %v10977_v55  ;;  %v16097_v56 = vpop.f32.mrb[99].mxu1 }
0x1f72   :  { %16099 = vmatpush3.bf16.msra.mxu0 %v20683_v12  ;;  %16102 = vmatprep.mubr.msk.bf16.mxu0 %vm17183_vm0, %v21806_v30 }
0x1f73   :  { %16100 = vmatprep.subr.bf16.mxu0 %v21806_v30  ;;  %11311 = vmatpush1.bf16.msra.mxu1 %v17030_v39 }
0x1f74   :  { %11312 = vmatprep.subr.bf16.mxu1 %v17038_v62  ;;  %11342 = vmatprep.mubr.bf16.mxu1 %v21807_v59 }
0x1f76   :  { %16101 = vmatpush3.bf16.msra.mxu0 %v20681_v48 }
0x1f77   :  { %11351 = vmatprep.subr.bf16.mxu0 %v17035_v28  ;;  %11313 = vmatpush1.bf16.msra.mxu1 %v17036_v11 }
0x1f78   :  { %11314 = vmatprep.subr.bf16.mxu1 %v17044_v50  ;;  %v17086_v50 = vld [vmem:[%s21794_s10 + $0x724] ss:$16 sps:$4 sm:$0xff]  }
0x1f79   :  { %16103 = vmatmul.mubr.msk.bf16.vlgmr.msra.gmra.mrb[132].mxu0 %vm1295_vm4, %v13993_v40 }
0x1f7a   :  { %11352 = vmatpush1.bf16.msra.mxu0 %v17033_v58  ;;  %11383 = vmatprep.mubr.bf16.mxu0 %v21807_v59 }
0x1f7b   :  { %11353 = vmatprep.subr.bf16.mxu0 %v17041_v17  ;;  %11315 = vmatpush1.bf16.msra.mxu1 %v17042_v36  ;;  %v17078_v17 = vld [vmem:[%s21794_s10 + $0x700] ss:$16 sps:$4 sm:$0xff]  }
0x1f7c   :  { %11316 = vmatprep.subr.bf16.mxu1 %v17050_v43  ;;  %v14065_v43 = vld [vmem:[%s21793_s9 + $0xe] sm:$0x1] }
0x1f7e   :  { %11354 = vmatpush1.bf16.msra.mxu0 %v17039_v8 }
0x1f7f   :  { %11355 = vmatprep.subr.bf16.mxu0 %v17047_v26  ;;  %11317 = vmatpush1.bf16.msra.mxu1 %v17048_v61  ;;  %v17084_v26 = vld [vmem:[%s21794_s10 + $0x720] ss:$16 sps:$4 sm:$0xff]   ;;  %v17081_v61 = vld [vmem:[%s21794_s10 + $0x708] ss:$16 sps:$4 sm:$0xff]  }
0x1f80   :  { %16106 = vmatprep.subr.bf16.mxu1 %v21806_v30 }
0x1f82   :  { %11356 = vmatpush1.bf16.msra.mxu0 %v17045_v47  ;;  %v17083_v47 = vld [vmem:[%s21794_s10 + $0x70c] ss:$16 sps:$4 sm:$0xff]  }
0x1f83   :  { %11357 = vmatprep.subr.bf16.mxu0 %v17053_v46  ;;  %v17089_v46 = vld [vmem:[%s21794_s10 + $0x72c] ss:$16 sps:$4 sm:$0xff]  }
0x1f86   :  { %11358 = vmatpush1.bf16.msra.mxu0 %v17051_v23  ;;  %v17087_v23 = vld [vmem:[%s21794_s10 + $0x728] ss:$16 sps:$4 sm:$0xff]  }
0x1f87   :  { %11542 = vmatprep.subr.bf16.mxu0 %v17056_v34  ;;  %v17092_v34 = vld [vmem:[%s21794_s10 + $0x744] ss:$16 sps:$4 sm:$0xff]  }
0x2044   :  { %v11112_v57 = vpop.f32.mrb[128].mxu0  ;;  %v11153_v20 = vpop.f32.mrb[100].mxu1 }
0x2045   :  { %v11160_v3 = vadd.f32 %v11112_v57, %v10928_v2  ;;  %v11162_v45 = vadd.f32 %v11153_v20, %v10930_v32  ;;  %v11114_v31 = vpop.f32.mrb[129].mxu0  ;;  %v11155_v5 = vpop.f32.mrb[101].mxu1  ;;  %v17071_v2 = vld [vmem:[%s21794_s10 + $0x6cc] ss:$16 sps:$4 sm:$0xff]   ;;  %v17074_v32 = vld [vmem:[%s21794_s10 + $0x6e4] ss:$16 sps:$4 sm:$0xff]  }
0x2046   :  { %v11161_v35 = vadd.f32 %v11114_v31, %v10929_v51  ;;  %v11163_v16 = vadd.f32 %v11155_v5, %v10931_v22  ;;  %v11116_v24 = vpop.f32.mrb[130].mxu0  ;;  %v11157_v54 = vpop.f32.mrb[102].mxu1  ;;  %v17075_v51 = vld [vmem:[%s21794_s10 + $0x6e8] ss:$16 sps:$4 sm:$0xff]   ;;  %v17080_v22 = vld [vmem:[%s21794_s10 + $0x704] ss:$16 sps:$4 sm:$0xff]  }
0x2047   :  { %v11117_v13 = vpop.f32.mrb[131].mxu0  ;;  %v11158_v1 = vpop.f32.mrb[103].mxu1  ;;  %v17090_v57 = vld [vmem:[%s21794_s10 + $0x740] ss:$16 sps:$4 sm:$0xff]   ;;  %v17093_v20 = vld [vmem:[%s21794_s10 + $0x748] ss:$16 sps:$4 sm:$0xff]  }
0x2048   :  { %v17096_v31 = vld [vmem:[%s21794_s10 + $0x760] ss:$16 sps:$4 sm:$0xff]   ;;  %v17101_v5 = vld [vmem:[%s21794_s10 + $0x76c] ss:$16 sps:$4 sm:$0xff]  }
0x204c   :  { %v11203_v38 = vpop.f32.mrb[132].mxu0 }
0x204d   :  { %v11209_v4 = vpack.c.bf16 %v11203_v38, %v11203_v38  ;;  %v16104_v21 = vpop.f32.mrb[133].mxu0 }
0x204e   :  { %v11206_v10 = vpop.f32.mrb[134].mxu0 }
0x204f   :  { %14027 = vmatmul.mubr.msk.bf16.vlgmr.msra.gmra.mrb[104].mxu1 %vm288_vm1, %v11209_v4  ;;  %14028 = vmatmul.mubr.msk.bf16.vlgmr.msra.gmra.mrb[136].mxu0 %vm288_vm1, %v11209_v4  ;;  %v16105_v25 = vpop.f32.mrb[135].mxu0 }
0x2050   :  { %16107 = vmatpush3.bf16.msra.mxu1 %v20683_v12  ;;  %16110 = vmatprep.mubr.msk.bf16.mxu1 %vm17183_vm0, %v21806_v30 }
0x2051   :  { %16108 = vmatprep.subr.bf16.mxu1 %v21806_v30  ;;  %11543 = vmatpush1.bf16.msra.mxu0 %v17054_v0 }
0x2052   :  { %11544 = vmatprep.subr.bf16.mxu0 %v17062_v37  ;;  %11574 = vmatprep.mubr.bf16.mxu0 %v21807_v59 }
0x2054   :  { %16109 = vmatpush3.bf16.msra.mxu1 %v20681_v48 }
0x2055   :  { %11583 = vmatprep.subr.bf16.mxu1 %v17059_v33  ;;  %11545 = vmatpush1.bf16.msra.mxu0 %v17060_v49 }
0x2056   :  { %11546 = vmatprep.subr.bf16.mxu0 %v17068_v60  ;;  %v17110_v60 = vld [vmem:[%s21794_s10 + $0x7a4] ss:$16 sps:$4 sm:$0xff]  }
0x2057   :  { %16111 = vmatmul.mubr.msk.bf16.vlgmr.msra.gmra.mrb[108].mxu1 %vm1295_vm4, %v14029_v63 }
0x2058   :  { %11584 = vmatpush1.bf16.msra.mxu1 %v17057_v14  ;;  %11615 = vmatprep.mubr.bf16.mxu1 %v21807_v59 }
0x2059   :  { %11585 = vmatprep.subr.bf16.mxu1 %v17065_v29  ;;  %11547 = vmatpush1.bf16.msra.mxu0 %v17066_v6  ;;  %v17102_v29 = vld [vmem:[%s21794_s10 + $0x780] ss:$16 sps:$4 sm:$0xff]  }
0x205a   :  { %11548 = vmatprep.subr.bf16.mxu0 %v17074_v32  ;;  %v17113_v32 = vld [vmem:[%s21794_s10 + $0x7ac] ss:$16 sps:$4 sm:$0xff]  }
0x205c   :  { %11586 = vmatpush1.bf16.msra.mxu1 %v17063_v44 }
0x205d   :  { %11587 = vmatprep.subr.bf16.mxu1 %v17071_v2  ;;  %11549 = vmatpush1.bf16.msra.mxu0 %v17072_v9  ;;  %v17108_v2 = vld [vmem:[%s21794_s10 + $0x7a0] ss:$16 sps:$4 sm:$0xff]  }
0x205e   :  { %16114 = vmatprep.subr.bf16.mxu0 %v21806_v30  ;;  %v17114_v9 = vld [vmem:[%s21794_s10 + $0x7c0] ss:$16 sps:$4 sm:$0xff]  }
0x2060   :  { %11588 = vmatpush1.bf16.msra.mxu1 %v17069_v15  ;;  %v17107_v15 = vld [vmem:[%s21794_s10 + $0x78c] ss:$16 sps:$4 sm:$0xff]  }
0x2061   :  { %11589 = vmatprep.subr.bf16.mxu1 %v17077_v41  ;;  %v17116_v41 = vld [vmem:[%s21794_s10 + $0x7c4] ss:$16 sps:$4 sm:$0xff]  }
0x2064   :  { %11590 = vmatpush1.bf16.msra.mxu1 %v17075_v51  ;;  %v17117_v51 = vld [vmem:[%s21794_s10 + $0x7c8] ss:$16 sps:$4 sm:$0xff]  }
0x2065   :  { %11774 = vmatprep.subr.bf16.mxu1 %v17080_v22  ;;  %v17119_v22 = vld [vmem:[%s21794_s10 + $0x7cc] ss:$16 sps:$4 sm:$0xff]  }
0x2122   :  { %v11344_v7 = vpop.f32.mrb[104].mxu1  ;;  %v11385_v52 = vpop.f32.mrb[136].mxu0 }
0x2123   :  { %v11392_v19 = vadd.f32 %v11344_v7, %v11160_v3  ;;  %v11394_v42 = vadd.f32 %v11385_v52, %v11162_v45  ;;  %v11346_v27 = vpop.f32.mrb[105].mxu1  ;;  %v11387_v55 = vpop.f32.mrb[137].mxu0  ;;  %v17095_v3 = vld [vmem:[%s21794_s10 + $0x74c] ss:$16 sps:$4 sm:$0xff]   ;;  %v17098_v45 = vld [vmem:[%s21794_s10 + $0x764] ss:$16 sps:$4 sm:$0xff]  }
0x2124   :  { %v11393_v53 = vadd.f32 %v11346_v27, %v11161_v35  ;;  %v11395_v39 = vadd.f32 %v11387_v55, %v11163_v16  ;;  %v11348_v18 = vpop.f32.mrb[106].mxu1  ;;  %v11389_v62 = vpop.f32.mrb[138].mxu0  ;;  %v17099_v35 = vld [vmem:[%s21794_s10 + $0x768] ss:$16 sps:$4 sm:$0xff]   ;;  %v17104_v16 = vld [vmem:[%s21794_s10 + $0x784] ss:$16 sps:$4 sm:$0xff]  }
0x2125   :  { %v11349_v56 = vpop.f32.mrb[107].mxu1  ;;  %v11390_v28 = vpop.f32.mrb[139].mxu0  ;;  %v17125_v7 = vld [vmem:[%s21794_s10 + $0x7ec] ss:$16 sps:$4 sm:$0xff]   ;;  %v17120_v52 = vld [vmem:[%s21794_s10 + $0x7e0] ss:$16 sps:$4 sm:$0xff]  }
0x2126   :  { %v17127_v27 = vld [vmem:[%s21796_s12 + $0xc0] sm:$0xff]  }
0x212a   :  { %v11435_v11 = vpop.f32.mrb[108].mxu1 }
0x212b   :  { %v11441_v40 = vpack.c.bf16 %v11435_v11, %v11435_v11  ;;  %v16112_v58 = vpop.f32.mrb[109].mxu1 }
0x212c   :  { %v11438_v8 = vpop.f32.mrb[110].mxu1 }
0x212d   :  { %14063 = vmatmul.mubr.msk.bf16.vlgmr.msra.gmra.mrb[140].mxu0 %vm288_vm1, %v11441_v40  ;;  %14064 = vmatmul.mubr.msk.bf16.vlgmr.msra.gmra.mrb[112].mxu1 %vm288_vm1, %v11441_v40  ;;  %v16113_v36 = vpop.f32.mrb[111].mxu1 }
0x212e   :  { %16115 = vmatpush3.bf16.msra.mxu0 %v20683_v12  ;;  %16118 = vmatprep.mubr.msk.bf16.mxu0 %vm17183_vm0, %v21806_v30  ;;  %v17128_v36 = vld [vmem:[%s21796_s12] sm:$0xff]  }
0x212f   :  { %16116 = vmatprep.subr.bf16.mxu0 %v21806_v30  ;;  %11775 = vmatpush1.bf16.msra.mxu1 %v17078_v17 }
0x2130   :  { %11776 = vmatprep.subr.bf16.mxu1 %v17086_v50  ;;  %11806 = vmatprep.mubr.bf16.mxu1 %v21807_v59 }
0x2132   :  { %16117 = vmatpush3.bf16.msra.mxu0 %v20681_v48 }
0x2133   :  { %11815 = vmatprep.subr.bf16.mxu0 %v17083_v47  ;;  %11777 = vmatpush1.bf16.msra.mxu1 %v17084_v26  ;;  %v17129_v47 = vld [vmem:[%s21796_s12 + $0x80] sm:$0xff]  }
0x2134   :  { %11778 = vmatprep.subr.bf16.mxu1 %v17092_v34 }
0x2135   :  { %16119 = vmatmul.mubr.msk.bf16.vlgmr.msra.gmra.mrb[144].mxu0 %vm1295_vm4, %v14065_v43 }
0x2136   :  { %11816 = vmatpush1.bf16.msra.mxu0 %v17081_v61  ;;  %11847 = vmatprep.mubr.bf16.mxu0 %v21807_v59  ;;  %v17130_v61 = vld [vmem:[%s21796_s12 + $0x48] sm:$0xff]  }
0x2137   :  { %11817 = vmatprep.subr.bf16.mxu0 %v17089_v46  ;;  %11779 = vmatpush1.bf16.msra.mxu1 %v17090_v57  ;;  %v17131_v46 = vld [vmem:[%s21796_s12 + $0xc8] sm:$0xff]  }
0x2138   :  { %11780 = vmatprep.subr.bf16.mxu1 %v17098_v45  ;;  %v17132_v57 = vld [vmem:[%s21796_s12 + $0x8] sm:$0xff]   ;;  %v17135_v45 = vld [vmem:[%s21796_s12 + $0xd0] sm:$0xff]  }
0x213a   :  { %11818 = vmatpush1.bf16.msra.mxu0 %v17087_v23 }
0x213b   :  { %11819 = vmatprep.subr.bf16.mxu0 %v17095_v3  ;;  %11781 = vmatpush1.bf16.msra.mxu1 %v17096_v31  ;;  %v17134_v3 = vld [vmem:[%s21796_s12 + $0x50] sm:$0xff]  }
0x213c   :  { %16122 = vmatprep.subr.bf16.mxu1 %v21806_v30  ;;  %v17136_v31 = vld [vmem:[%s21796_s12 + $0x10] sm:$0xff]  }
0x213e   :  { %11820 = vmatpush1.bf16.msra.mxu0 %v17093_v20  ;;  %v17133_v20 = vld [vmem:[%s21796_s12 + $0x88] sm:$0xff]  }
0x213f   :  { %11821 = vmatprep.subr.bf16.mxu0 %v17101_v5  ;;  %v17137_v5 = vld [vmem:[%s21796_s12 + $0x90] sm:$0xff]  }
0x2142   :  { %11822 = vmatpush1.bf16.msra.mxu0 %v17099_v35  ;;  %v17138_v35 = vld [vmem:[%s21796_s12 + $0x58] sm:$0xff]  }
0x2143   :  { %12006 = vmatprep.subr.bf16.mxu0 %v17104_v16  ;;  %v17139_v16 = vld [vmem:[%s21796_s12 + $0xd8] sm:$0xff]  }
0x2200   :  { %v11576_v24 = vpop.f32.mrb[140].mxu0  ;;  %v11617_v54 = vpop.f32.mrb[112].mxu1 }
0x2201   :  { %v11624_v13 = vadd.f32 %v11576_v24, %v11392_v19  ;;  %v11626_v1 = vadd.f32 %v11617_v54, %v11394_v42  ;;  %v11578_v38 = vpop.f32.mrb[141].mxu0  ;;  %v11619_v4 = vpop.f32.mrb[113].mxu1  ;;  %v17123_v19 = vld [vmem:[%s21794_s10 + $0x7e8] ss:$16 sps:$4 sm:$0xff]   ;;  %v17126_v42 = vld [vmem:[%s21796_s12 + $0x40] sm:$0xff]  }
0x2202   :  { %v11625_v21 = vadd.f32 %v11578_v38, %v11393_v53  ;;  %v11627_v0 = vadd.f32 %v11619_v4, %v11395_v39  ;;  %v11580_v10 = vpop.f32.mrb[142].mxu0  ;;  %v11621_v37 = vpop.f32.mrb[114].mxu1  ;;  %v17140_v24 = vld [vmem:[%s21796_s12 + $0x18] sm:$0xff]   ;;  %v17144_v38 = vld [vmem:[%s21796_s12 + $0x20] sm:$0xff]  }
0x2203   :  { %v11581_v25 = vpop.f32.mrb[143].mxu0  ;;  %v11622_v33 = vpop.f32.mrb[115].mxu1  ;;  %v17141_v54 = vld [vmem:[%s21796_s12 + $0x98] sm:$0xff]   ;;  %v17145_v4 = vld [vmem:[%s21796_s12 + $0xa0] sm:$0xff]   ;;  %v17148_v10 = vld [vmem:[%s21796_s12 + $0x28] sm:$0xff]  }
0x2204   :  { %v17149_v37 = vld [vmem:[%s21796_s12 + $0xa8] sm:$0xff]   ;;  %v17150_v25 = vld [vmem:[%s21796_s12 + $0x70] sm:$0xff]  }
0x2205   :  { %v17151_v33 = vld [vmem:[%s21796_s12 + $0xf0] sm:$0xff]  }
0x2208   :  { %v11667_v49 = vpop.f32.mrb[144].mxu0 }
0x2209   :  { %v11673_v63 = vpack.c.bf16 %v11667_v49, %v11667_v49  ;;  %v16120_v14 = vpop.f32.mrb[145].mxu0  ;;  %v17152_v49 = vld [vmem:[%s21796_s12 + $0x30] sm:$0xff]  }
0x220a   :  { %v11670_v44 = vpop.f32.mrb[146].mxu0  ;;  %v17154_v14 = vld [vmem:[%s21796_s12 + $0x78] sm:$0xff]  }
0x220b   :  { %14099 = vmatmul.mubr.msk.bf16.vlgmr.msra.gmra.mrb[116].mxu1 %vm288_vm1, %v11673_v63  ;;  %14100 = vmatmul.mubr.msk.bf16.vlgmr.msra.gmra.mrb[148].mxu0 %vm288_vm1, %v11673_v63  ;;  %v16121_v6 = vpop.f32.mrb[147].mxu0  ;;  %v17153_v63 = vld [vmem:[%s21796_s12 + $0xb0] sm:$0xff]   ;;  %v17156_v44 = vld [vmem:[%s21796_s12 + $0x38] sm:$0xff]  }
0x220c   :  { %16123 = vmatpush3.bf16.msra.mxu1 %v20683_v12  ;;  %16126 = vmatprep.mubr.msk.bf16.mxu1 %vm17183_vm0, %v21806_v30  ;;  %v14101_v12 = vld [vmem:[%s21793_s9 + $0xf] sm:$0x1]  ;;  %v12094_v6 = vlaneseq }
0x220d   :  { %16124 = vmatprep.subr.bf16.mxu1 %v21806_v30  ;;  %12007 = vmatpush1.bf16.msra.mxu0 %v17102_v29  ;;  %v17105_v30 = vld [vmem:[%s21794_s10 + $0x788] ss:$16 sps:$4 sm:$0xff]  }
0x220e   :  { %12008 = vmatprep.subr.bf16.mxu0 %v17110_v60  ;;  %12038 = vmatprep.mubr.bf16.mxu0 %v21807_v59  ;;  %v17155_v29 = vld [vmem:[%s21796_s12 + $0xf8] sm:$0xff]  }
0x220f   :  { %v17157_v60 = vld [vmem:[%s21796_s12 + $0xb8] sm:$0xff]  }
0x2210   :  { %16125 = vmatpush3.bf16.msra.mxu1 %v20681_v48  ;;  %v17111_v48 = vld [vmem:[%s21794_s10 + $0x7a8] ss:$16 sps:$4 sm:$0xff]  }
0x2211   :  { %12047 = vmatprep.subr.bf16.mxu1 %v17107_v15  ;;  %12009 = vmatpush1.bf16.msra.mxu0 %v17108_v2  ;;  %v12095_v15 = vshrl.u32 %v12094_v6, 7 }
0x2212   :  { %12010 = vmatprep.subr.bf16.mxu0 %v17116_v41 }
0x2213   :  { %16127 = vmatmul.mubr.msk.bf16.vlgmr.msra.gmra.mrb[120].mxu1 %vm1295_vm4, %v14101_v12  ;;  %v12096_v2 = vsub.s32 0, %v12095_v15  ;;  %v12104_v12 = vsub.s32 2, %v12095_v15 }
0x2214   :  { %12048 = vmatpush1.bf16.msra.mxu1 %v17105_v30  ;;  %12079 = vmatprep.mubr.bf16.mxu1 %v21807_v59  ;;  %v17122_v59 = vld [vmem:[%s21794_s10 + $0x7e4] ss:$16 sps:$4 sm:$0xff]   ;;  %v12092_v30 = vld [vmem:[%s21795_s11] sm:$0xf] }
0x2215   :  { %12049 = vmatprep.subr.bf16.mxu1 %v17113_v32  ;;  %12011 = vmatpush1.bf16.msra.mxu0 %v17114_v9  ;;  %v12100_v32 = vsub.s32 1, %v12095_v15  ;;  %v12097_v9 = vrot.slane %v12092_v30, %v12096_v2  ;;  %v12105_v41 = vrot.slane %v12092_v30, %v12104_v12 }
0x2216   :  { %12012 = vmatprep.subr.bf16.mxu0 %v17122_v59 }
0x2217   :  { %v12101_v59 = vrot.slane %v12092_v30, %v12100_v32 }
0x2218   :  { %12050 = vmatpush1.bf16.msra.mxu1 %v17111_v48  ;;  %v12108_v48 = vsub.s32 3, %v12095_v15 }
0x2219   :  { %12051 = vmatprep.subr.bf16.mxu1 %v17119_v22  ;;  %12013 = vmatpush1.bf16.msra.mxu0 %v17120_v52 }
0x221a   :  { %15216 = vmatprep.subr.bf16.mxu0 %v17126_v42 }
0x221c   :  { %12052 = vmatpush1.bf16.msra.mxu1 %v17117_v51 }
0x221d   :  { %12053 = vmatprep.subr.bf16.mxu1 %v17125_v7  ;;  %v12109_v7 = vrot.slane %v12092_v30, %v12108_v48 }
0x2220   :  { %12054 = vmatpush1.bf16.msra.mxu1 %v17123_v19 }
0x2221   :  { %15238 = vmatprep.subr.bf16.mxu1 %v17127_v27 }
0x22de   :  { %v11808_v55 = vpop.f32.mrb[116].mxu1  ;;  %v11849_v53 = vpop.f32.mrb[148].mxu0 }
0x22df   :  { %v21662_v39 = vadd.f32 %v11808_v55, %v11624_v13  ;;  %v21664_v18 = vadd.f32 %v11849_v53, %v11626_v1  ;;  %v11810_v62 = vpop.f32.mrb[117].mxu1  ;;  %v11851_v56 = vpop.f32.mrb[149].mxu0  ;;  %v17142_v13 = vld [vmem:[%s21796_s12 + $0x60] sm:$0xff]  }
0x22e0   :  { %v21666_v28 = vadd.f32 %v11810_v62, %v11625_v21  ;;  %v21668_v11 = vadd.f32 %v11851_v56, %v11627_v0  ;;  %v11812_v40 = vpop.f32.mrb[118].mxu1  ;;  %v11853_v58 = vpop.f32.mrb[150].mxu0  ;;  %v17143_v1 = vld [vmem:[%s21796_s12 + $0xe0] sm:$0xff]   ;;  %v17146_v21 = vld [vmem:[%s21796_s12 + $0x68] sm:$0xff]  }
0x22e1   :  { %v11813_v17 = vpop.f32.mrb[119].mxu1  ;;  %v11854_v8 = vpop.f32.mrb[151].mxu0  ;;  %v17147_v0 = vld [vmem:[%s21796_s12 + $0xe8] sm:$0xff]  }
0x22e6   :  { %v11899_v50 = vpop.f32.mrb[120].mxu1 }
0x22e7   :  { %v11905_v26 = vpack.c.bf16 %v11899_v50, %v11899_v50  ;;  %v16128_v43 = vpop.f32.mrb[121].mxu1 }
0x22e8   :  { %v11902_v23 = vpop.f32.mrb[122].mxu1 }
0x22e9   :  { %14135 = vmatmul.mubr.msk.bf16.vlgmr.msra.gmra.mrb[152].mxu0 %vm288_vm1, %v11905_v26  ;;  %14136 = vmatmul.mubr.msk.bf16.vlgmr.msra.gmra.mrb[124].mxu1 %vm288_vm1, %v11905_v26  ;;  %v16129_v34 = vpop.f32.mrb[123].mxu1 }
0x22ea   :  { %15217 = vmatpush3.bf16.msra.mxu0 %v17128_v36  ;;  %15239 = vmatpush3.bf16.msra.mxu1 %v17129_v47  ;;  %v14137_v34 = vld [vmem:[%s21797_s13] ss:$0 sm:$0xff] }
0x22eb   :  { %15218 = vmatprep.subr.bf16.mxu0 %v17130_v61  ;;  %15240 = vmatprep.subr.bf16.mxu1 %v17131_v46 }
0x22ee   :  { %15219 = vmatpush3.bf16.msra.mxu0 %v17132_v57  ;;  %15241 = vmatpush3.bf16.msra.mxu1 %v17133_v20 }
0x22ef   :  { %15220 = vmatprep.subr.bf16.mxu0 %v17134_v3  ;;  %15242 = vmatprep.subr.bf16.mxu1 %v17135_v45 }
0x22f2   :  { %15221 = vmatpush3.bf16.msra.mxu0 %v17136_v31  ;;  %15243 = vmatpush3.bf16.msra.mxu1 %v17137_v5 }
0x22f3   :  { %15222 = vmatprep.subr.bf16.mxu0 %v17138_v35  ;;  %15244 = vmatprep.subr.bf16.mxu1 %v17139_v16 }
0x22f6   :  { %15223 = vmatpush3.bf16.msra.mxu0 %v17140_v24  ;;  %15245 = vmatpush3.bf16.msra.mxu1 %v17141_v54 }
0x22f7   :  { %15224 = vmatprep.subr.bf16.mxu0 %v17142_v13  ;;  %15246 = vmatprep.subr.bf16.mxu1 %v17143_v1 }
0x22fa   :  { %15225 = vmatpush3.bf16.msra.mxu0 %v17144_v38  ;;  %15247 = vmatpush3.bf16.msra.mxu1 %v17145_v4 }
0x22fb   :  { %15226 = vmatprep.subr.bf16.mxu0 %v17146_v21  ;;  %15248 = vmatprep.subr.bf16.mxu1 %v17147_v0 }
0x22fe   :  { %15227 = vmatpush3.bf16.msra.mxu0 %v17148_v10  ;;  %15249 = vmatpush3.bf16.msra.mxu1 %v17149_v37 }
0x22ff   :  { %15228 = vmatprep.subr.bf16.mxu0 %v17150_v25  ;;  %15250 = vmatprep.subr.bf16.mxu1 %v17151_v33 }
0x2302   :  { %15229 = vmatpush3.bf16.msra.mxu0 %v17152_v49  ;;  %15251 = vmatpush3.bf16.msra.mxu1 %v17153_v63 }
0x2303   :  { %15230 = vmatprep.subr.bf16.mxu0 %v17154_v14  ;;  %15252 = vmatprep.subr.bf16.mxu1 %v17155_v29 }
0x2306   :  { %15231 = vmatpush3.bf16.msra.mxu0 %v17156_v44  ;;  %15253 = vmatpush3.bf16.msra.mxu1 %v17157_v60 }
0x23bc   :  { %v12040_v51 = vpop.f32.mrb[152].mxu0  ;;  %v12081_v22 = vpop.f32.mrb[124].mxu1 }
0x23bd   :  { %v12088_v52 = vadd.f32 %v12040_v51, %v21662_v39  ;;  %v12090_v19 = vadd.f32 %v12081_v22, %v21664_v18  ;;  %v12042_v42 = vpop.f32.mrb[153].mxu0  ;;  %v12083_v27 = vpop.f32.mrb[125].mxu1 }
0x23be   :  { %v12089_v55 = vadd.f32 %v12042_v42, %v21666_v28  ;;  %v12091_v53 = vadd.f32 %v12083_v27, %v21668_v11  ;;  %v12044_v62 = vpop.f32.mrb[154].mxu0  ;;  %v12085_v56 = vpop.f32.mrb[126].mxu1 }
0x23bf   :  { %v12114_v40 = vadd.f32 %v12097_v9, %v12088_v52  ;;  %v12116_v58 = vadd.f32 %v12105_v41, %v12090_v19  ;;  %v12045_v17 = vpop.f32.mrb[155].mxu0  ;;  %v12086_v8 = vpop.f32.mrb[127].mxu1 }
0x23c0   :  { %v12115_v50 = vadd.f32 %v12101_v59, %v12089_v55  ;;  %v12117_v36 = vadd.f32 %v12109_v7, %v12091_v53 }
0x23c1   :  { %v12118_v47 = vmax.f32 %v12114_v40, 0.0  ;;  %v12120_v26 = vmax.f32 %v12116_v58, 0.0 }
0x23c2   :  { %v12119_v43 = vmax.f32 %v12115_v50, 0.0  ;;  %v12121_v39 = vmax.f32 %v12117_v36, 0.0 }
0x23c3   :  { %v12122_v46 = vpack.c.bf16 %v12118_v47, %v12118_v47  ;;  %v12124_v23 = vpack.c.bf16 %v12120_v26, %v12120_v26 }
0x23c4   :  { %v12123_v61 = vpack.c.bf16 %v12119_v43, %v12119_v43  ;;  %v12125_v18 = vpack.c.bf16 %v12121_v39, %v12121_v39 }
0x23c6   :  { %12421 = vmatprep.mubr.bf16.mxu0 %v12123_v61  ;;  %12461 = vmatprep.mubr.bf16.mxu1 %v12125_v18 }
0x23c7   :  { %12422 = vmatmul.mubr.bf16.vlgmr.msra.gmra.mrb[156].mxu0 %v12122_v46  ;;  %12462 = vmatmul.mubr.bf16.vlgmr.msra.gmra.mrb[128].mxu1 %v12124_v23 }
0x249a   :  { %v15232_v28 = vpop.f32.mrb[156].mxu0  ;;  %v15254_v11 = vpop.f32.mrb[128].mxu1 }
0x249b   :  { %v15233_v57 = vpop.f32.mrb[157].mxu0  ;;  %v15255_v20 = vpop.f32.mrb[129].mxu1 }
0x249c   :  { %v15234_v3 = vadd.f32 %v15233_v57, %v15232_v28  ;;  %v15256_v45 = vadd.f32 %v15255_v20, %v15254_v11  ;;  %v15235_v31 = vpop.f32.mrb[158].mxu0  ;;  %v15257_v5 = vpop.f32.mrb[130].mxu1 }
0x249d   :  { %v15236_v35 = vpop.f32.mrb[159].mxu0  ;;  %v15258_v16 = vpop.f32.mrb[131].mxu1 }
0x249e   :  { %v12424_v24 = vadd.f32 %v15234_v3, %v14137_v34 }
0x24a0   :  { %v12464_v54 = vadd.f32 %v15256_v45, %v12424_v24 }
0x24a2   :  { %12470 = vst.msk [vmem:[#allocation2] sm:$0x3] %vm12469_vm7, %v12464_v54 }
0x24a3   :  { %17169 = shalt.err (!%p17166_p4)
}
0x24a4   :  { %s17170_s2 = scalar_lea.hbm %s21798_s14, 32 }
0x24a5   :  { %p17171_p5 = scmp.ne.s32.totalorder %s21798_s14, %s17170_s2  ;;  %p17174_p6 = scmp.lt.u32.totalorder %s17170_s2, %s21798_s14 }
0x24a7   :  { %p17176_p7 = pnand %p17174_p6, %p17171_p5 }
0x24a9   :  { %17179 = shalt.err (!%p17176_p7)
}
0x24aa   :  { %12480 = dma.vmem_to_hbm [thread:$0]  %s12478_s5, 32, %s21798_s14, [#allocation3]  }
0x24ab   :  { %17180 = dma.done.wait [#allocation3], 32  }
0x24ac   :  { %17181 = vsyncadd [#allocation3], 4294967264 }
0x24ad   :  { %12484 = vsyncpa [#allocation3], 1 }

</bundles_post_ra>
